<compile_context>
chip_gen: v7x
topology: tpu7x:2x2x1
jax: 0.10.0
libtpu: 0.0.40
codegen_flags: <defaults>
</compile_context>

<pallas_src>
import functools
import math

import numpy as np
import jax
import jax.numpy as jnp
from jax.experimental import pallas as pl
from jax.experimental.pallas import tpu as pltpu

BN_EPS = 1e-5
BN_SCALE = 1.0 / math.sqrt(1.0 + BN_EPS)   # eval-mode BN with default params
CM = 16                                    # channel_mult
EMB = 2000                                 # embedding_size / output_size
FC_DEC = 512                               # decoder fc_output_dim
FLAT_FTS = 16 * CM * 2 * 2                 # 1024 (encoder conv output, 28x28 in)

# (cin, cout, k, stride, pad, use_bn)
ENC_CONVS = [
    (1, CM, 4, 1, 1, False),
    (CM, 2 * CM, 4, 2, 1, True),
    (2 * CM, 4 * CM, 4, 2, 1, True),
    (4 * CM, 8 * CM, 4, 2, 1, True),
    (8 * CM, 16 * CM, 3, 2, 1, True),
]
# (cin, cout, k, stride, pad, use_bn, act)
DEC_DECONVS = [
    (FC_DEC, 4 * CM, 4, 1, 0, True, "relu"),
    (4 * CM, 2 * CM, 3, 2, 1, True, "relu"),
    (2 * CM, CM, 4, 2, 1, True, "relu"),
    (CM, 1, 4, 2, 1, False, "sigmoid"),
]


def _round_up(x, m):
    return (x + m - 1) // m * m


def _cdiv(a, b):
    return -(-a // b)


def _choose_tm(m, cap=256):
    """Pick an M tile: multiple of 16, minimal padding, even tile count when >1."""
    nt = _cdiv(m, cap)
    if nt > 1 and nt % 2:
        nt += 1                       # balance across v7x's two TensorCores
    tm = _round_up(_cdiv(m, nt), 16)
    nt = _cdiv(m, tm)
    return tm, nt * tm


def _choose_tn(np_, cap=1024):
    """Split wide N so weights stay small in VMEM and both v7x cores get work."""
    if np_ <= cap:
        return np_
    nt = _cdiv(np_, cap)
    tn = _round_up(_cdiv(np_, nt), 128)
    while np_ % tn:
        tn += 128
    return tn


# ----------------------------------------------------------------------------
# Pallas kernels
# ----------------------------------------------------------------------------
def _apply_act(y, act, slope):
    if act == "leaky_relu":
        return jnp.maximum(y, slope * y)
    if act == "relu":
        return jnp.maximum(y, 0.0)
    if act == "sigmoid":
        return 1.0 / (1.0 + jnp.exp(-y))     # exp runs on the EUP slot
    return y


def _fused_matmul_kernel(a_ref, w_ref, b_ref, o_ref, *, act, slope):
    acc = jnp.dot(a_ref[...], w_ref[...], preferred_element_type=jnp.float32)
    y = _apply_act(acc + b_ref[...], act, slope)
    o_ref[...] = y.astype(o_ref.dtype)


def _double_matmul_kernel(a_ref, w1_ref, b1_ref, w2_ref, b2_ref, o_ref):
    h = jnp.dot(a_ref[...], w1_ref[...], preferred_element_type=jnp.float32)
    h = jnp.maximum(h + b1_ref[...], 0.0)                       # Linear+BN+ReLU
    y = jnp.dot(h.astype(jnp.bfloat16), w2_ref[...],
                preferred_element_type=jnp.float32)
    o_ref[...] = jnp.maximum(y + b2_ref[...], 0.0).astype(o_ref.dtype)  # ConvT+BN+ReLU


# ----------------------------------------------------------------------------
# Pallas wrappers
# ----------------------------------------------------------------------------
def fused_matmul(a, w_p, b_p, act="none", slope=0.2, out_dtype=jnp.bfloat16):
    """act(a @ W + bias).  W: pre-padded (Kp, Np) bf16, bias: (1, Np) f32.

    Returns the padded (Mp, Np) result; callers slice [:M, :N_real].
    """
    M, K = a.shape
    Kp, Np = w_p.shape
    tm, Mp = _choose_tm(M)
    tn = _choose_tn(Np)
    a_p = a.astype(jnp.bfloat16)
    if (Mp, Kp) != (M, K):
        a_p = jnp.pad(a_p, ((0, Mp - M), (0, Kp - K)))

    out_bytes = jnp.dtype(out_dtype).itemsize
    cost = pl.CostEstimate(
        flops=2 * Mp * Kp * Np,
        transcendentals=Mp * Np if act == "sigmoid" else 0,
        bytes_accessed=Mp * Kp * 2 + Kp * Np * 2 + Np * 4 + Mp * Np * out_bytes,
    )
    kernel = functools.partial(_fused_matmul_kernel, act=act, slope=slope)
    return pl.pallas_call(
        kernel,
        out_shape=jax.ShapeDtypeStruct((Mp, Np), out_dtype),
        grid=(Mp // tm, Np // tn),
        in_specs=[
            pl.BlockSpec((tm, Kp), lambda i, j: (i, 0)),
            pl.BlockSpec((Kp, tn), lambda i, j: (0, j)),
            pl.BlockSpec((1, tn), lambda i, j: (0, j)),
        ],
        out_specs=pl.BlockSpec((tm, tn), lambda i, j: (i, j)),
        compiler_params=pltpu.CompilerParams(
            dimension_semantics=("parallel", "parallel")),
        cost_estimate=cost,
    )(a_p, w_p, b_p)


def double_matmul(a, w1_p, b1_p, w2_p, b2_p, out_dtype=jnp.bfloat16):
    """relu(relu(a @ W1 + b1) @ W2 + b2), all constants pre-padded/folded."""
    M, K = a.shape
    Kp1, Np1 = w1_p.shape
    Kp2, Np2 = w2_p.shape
    assert Np1 == Kp2
    tm, Mp = _choose_tm(M, cap=128)   # keep the f32 intermediate vreg-friendly
    a_p = a.astype(jnp.bfloat16)
    if (Mp, Kp1) != (M, K):
        a_p = jnp.pad(a_p, ((0, Mp - M), (0, Kp1 - K)))

    cost = pl.CostEstimate(
        flops=2 * Mp * (Kp1 * Np1 + Kp2 * Np2),
        transcendentals=0,
        bytes_accessed=(Mp * Kp1 * 2 + (Kp1 * Np1 + Kp2 * Np2) * 2
                        + (Np1 + Np2) * 4 + Mp * Np2 * 2),
    )
    return pl.pallas_call(
        _double_matmul_kernel,
        out_shape=jax.ShapeDtypeStruct((Mp, Np2), out_dtype),
        grid=(Mp // tm,),
        in_specs=[
            pl.BlockSpec((tm, Kp1), lambda i: (i, 0)),
            pl.BlockSpec((Kp1, Np1), lambda i: (0, 0)),
            pl.BlockSpec((1, Np1), lambda i: (0, 0)),
            pl.BlockSpec((Kp2, Np2), lambda i: (0, 0)),
            pl.BlockSpec((1, Np2), lambda i: (0, 0)),
        ],
        out_specs=pl.BlockSpec((tm, Np2), lambda i: (i, 0)),
        compiler_params=pltpu.CompilerParams(
            dimension_semantics=("parallel",)),
        cost_estimate=cost,
    )(a_p, w1_p, b1_p, w2_p, b2_p)


# ----------------------------------------------------------------------------
# Layer glue (NHWC im2col / phase interleave in JAX; matmul+BN+act in Pallas)
# ----------------------------------------------------------------------------
def conv2d(x, w_p, b_p, cout, k, stride, pad, act, slope=0.2,
           out_dtype=jnp.bfloat16):
    """x: (N, H, W, Cin) NHWC -> (N, Ho, Wo, Cout) NHWC.  No transposes."""
    n, H, W, C = x.shape
    x = x.astype(jnp.bfloat16)
    xp = jnp.pad(x, ((0, 0), (pad, pad), (pad, pad), (0, 0))) if pad else x
    Ho = (H + 2 * pad - k) // stride + 1
    Wo = (W + 2 * pad - k) // stride + 1
    cols = []
    for i in range(k):
        for j in range(k):
            cols.append(xp[:, i:i + stride * Ho:stride, j:j + stride * Wo:stride, :])
    col = jnp.concatenate(cols, axis=-1).reshape(n * Ho * Wo, k * k * C)
    out = fused_matmul(col, w_p, b_p, act=act, slope=slope, out_dtype=out_dtype)
    return out[:n * Ho * Wo, :cout].reshape(n, Ho, Wo, cout)


def _phase_tap_range(k, s, p):
    """Range of input offsets dy used by any output phase of a transposed conv."""
    dys = [(py + p - ky) // s
           for py in range(s) for ky in range(k) if (py + p - ky) % s == 0]
    return min(dys), max(dys)


def conv_transpose2d(x, w_p, b_p, cout, k, stride, pad, act,
                     out_dtype=jnp.bfloat16):
    """ConvTranspose2d via sub-pixel (phase) decomposition, NHWC in/out.

    One matmul on the un-dilated input; output columns are (py, px, Cout),
    interleaved afterwards.  No zero-dilation scatter, no wasted MXU work on
    structurally-zero im2col columns.
    """
    n, H, W, cin = x.shape
    s = stride
    Ho = (H - 1) * s - 2 * pad + k
    Wo = (W - 1) * s - 2 * pad + k
    dmin, dmax = _phase_tap_range(k, s, pad)
    D = dmax - dmin + 1
    Hm, Wm = _cdiv(Ho, s), _cdiv(Wo, s)
    pad_l = max(0, -dmin)
    pad_rh = max(0, (Hm - 1) + dmax - (H - 1))
    pad_rw = max(0, (Wm - 1) + dmax - (W - 1))
    base = dmin + pad_l
    xq = x.astype(jnp.bfloat16)
    if pad_l or pad_rh or pad_rw:
        xq = jnp.pad(xq, ((0, 0), (pad_l, pad_rh), (pad_l, pad_rw), (0, 0)))
    cols = []
    for i in range(D):
        for j in range(D):
            cols.append(xq[:, base + i:base + i + Hm, base + j:base + j + Wm, :])
    col = jnp.concatenate(cols, axis=-1).reshape(n * Hm * Wm, D * D * cin)
    out = fused_matmul(col, w_p, b_p, act=act, out_dtype=out_dtype)
    out = out[:n * Hm * Wm, :s * s * cout].reshape(n, Hm, Wm, s, s, cout)
    out = out.transpose(0, 1, 3, 2, 4, 5).reshape(n, Hm * s, Wm * s, cout)
    return out[:, :Ho, :Wo, :]


# ----------------------------------------------------------------------------
# Parameters: raw PyTorch-style init, then one-time folding/padding
# ----------------------------------------------------------------------------
def _uniform(key, shape, fan_in):
    bound = 1.0 / float(fan_in) ** 0.5
    return jax.random.uniform(key, shape, jnp.float32, -bound, bound)


def init_raw_params(key):
    p = {"enc_conv": [], "dec_deconv": []}
    for (cin, cout, k, _s, _p, _bn) in ENC_CONVS:
        key, k1, k2 = jax.random.split(key, 3)
        fan = cin * k * k
        p["enc_conv"].append((_uniform(k1, (cout, cin, k, k), fan),
                              _uniform(k2, (cout,), fan)))
    key, k1, k2 = jax.random.split(key, 3)
    p["enc_fc"] = (_uniform(k1, (EMB, FLAT_FTS), FLAT_FTS),
                   _uniform(k2, (EMB,), FLAT_FTS))
    key, k1, k2 = jax.random.split(key, 3)
    p["dec_fc"] = (_uniform(k1, (FC_DEC, EMB), EMB),
                   _uniform(k2, (FC_DEC,), EMB))
    for (cin, cout, k, _s, _p, _bn, _a) in DEC_DECONVS:
        key, k1 = jax.random.split(key)
        p["dec_deconv"].append(_uniform(k1, (cin, cout, k, k), cin * k * k))
    return p


def _pad_wb(w_mat, bias, k_pad=None):
    """(K, N) f32 weight, (N,) f32 bias -> bf16 (Kp, Np) weight, f32 (1, Np) bias.

    K is padded only to a multiple of 16 (bf16 sublane packing), so e.g. the
    first conv's K=16 activation is not inflated to 128.
    """
    K, N = w_mat.shape
    Kp = k_pad if k_pad is not None else _round_up(K, 16)
    Np = _round_up(N, 128)
    w_p = jnp.zeros((Kp, Np), jnp.bfloat16).at[:K, :N].set(
        w_mat.astype(jnp.bfloat16))
    b_p = jnp.zeros((1, Np), jnp.float32).at[0, :N].set(bias.astype(jnp.float32))
    return w_p, b_p


def _deconv_phase_weight(w_t, k, s, p, scale):
    """Build the sub-pixel weight matrix (D*D*Cin, s*s*Cout) for a ConvTranspose.

    out[n, s*m+py, s*l+px, co] = sum_{dy,dx,ci} x[n, m+dy, l+dx, ci]
                                  * w_t[ci, co, py+p-s*dy, px+p-s*dx]
    Rows ordered (dy_off, dx_off, ci); columns ordered (py, px, co).
    """
    w_np = np.asarray(w_t, dtype=np.float32)
    cin, cout = w_np.shape[0], w_np.shape[1]
    dmin, dmax = _phase_tap_range(k, s, p)
    D = dmax - dmin + 1
    wm = np.zeros((D, D, cin, s, s, cout), np.float32)
    for py in range(s):
        for px in range(s):
            for oy in range(D):
                ky = py + p - s * (dmin + oy)
                if not 0 <= ky < k:
                    continue
                for ox in range(D):
                    kx = px + p - s * (dmin + ox)
                    if not 0 <= kx < k:
                        continue
                    wm[oy, ox, :, py, px, :] = w_np[:, :, ky, kx] * scale
    return jnp.asarray(wm.reshape(D * D * cin, s * s * cout))


def prepare_params(raw):
    """One-time weight folding: NHWC reordering, phase decomposition, BN fold, pad."""
    prep = {"enc_conv": [], "dec_deconv": []}
    for (w, b), (cin, cout, k, _s, _p, use_bn) in zip(raw["enc_conv"], ENC_CONVS):
        scale = BN_SCALE if use_bn else 1.0
        # NHWC im2col ordering: rows are (ky, kx, cin)
        w_mat = w.transpose(0, 2, 3, 1).reshape(cout, k * k * cin).T * scale
        prep["enc_conv"].append(_pad_wb(w_mat, b * scale))

    # enc_fc: PyTorch flattens NCHW (C,H,W); activations here are NHWC (H,W,C).
    w, b = raw["enc_fc"]
    c5, h5, w5 = 16 * CM, 2, 2
    w_perm = w.reshape(EMB, c5, h5, w5).transpose(0, 2, 3, 1).reshape(EMB, FLAT_FTS)
    prep["enc_fc"] = _pad_wb(w_perm.T * BN_SCALE, b * BN_SCALE)

    # dec_fc: K padded to the enc_fc lane width (2048) so the padded embedding
    # feeds it directly (padded columns are exactly zero).
    w, b = raw["dec_fc"]
    prep["dec_fc"] = _pad_wb(w.T * BN_SCALE, b * BN_SCALE,
                             k_pad=_round_up(EMB, 128))

    for idx, (w, (cin, cout, k, s, p, use_bn, _a)) in enumerate(
            zip(raw["dec_deconv"], DEC_DECONVS)):
        scale = BN_SCALE if use_bn else 1.0
        if idx == 0:
            # 1x1 spatial input, stride=1, pad=0 -> pure matmul.
            # Columns ordered (ky, kx, co) so the output is directly NHWC.
            w_mat = w.transpose(0, 2, 3, 1).reshape(cin, k * k * cout) * scale
            ncols = k * k * cout
        else:
            w_mat = _deconv_phase_weight(w, k, s, p, scale)
            ncols = s * s * cout
        bias = jnp.zeros((ncols,), jnp.float32)
        prep["dec_deconv"].append(_pad_wb(w_mat, bias))
    return prep


# ----------------------------------------------------------------------------
# Network forward  (z = encode(x.view(-1, 784)); return decode(z))
# ----------------------------------------------------------------------------
def _encode_padded(p, x_flat):
    n = x_flat.shape[0]
    h = x_flat.reshape(n, 28, 28, 1)                 # NHWC (C=1: same data layout)
    for (w_p, b_p), (_ci, cout, k, s, pad, _bn) in zip(p["enc_conv"], ENC_CONVS):
        h = conv2d(h, w_p, b_p, cout, k, stride=s, pad=pad,
                   act="leaky_relu", slope=0.2)
    h = h.reshape(n, FLAT_FTS)
    w_p, b_p = p["enc_fc"]
    z = fused_matmul(h, w_p, b_p, act="leaky_relu", slope=0.2)
    return z[:n]         # (n, 2048); columns EMB..2048 are exactly zero


def encode(p, x_flat):
    return _encode_padded(p, x_flat)[:, :EMB]


def decode(p, z):
    n = z.shape[0]
    w1_p, b1_p = p["dec_fc"]
    w2_p, b2_p = p["dec_deconv"][0]
    kp1 = w1_p.shape[0]
    if z.shape[1] < kp1:
        z = jnp.pad(z, ((0, 0), (0, kp1 - z.shape[1])))
    _ci0, cout0, k0 = DEC_DECONVS[0][:3]
    # dec_fc (Linear+BN+ReLU) fused with the first ConvTranspose (pure matmul).
    h = double_matmul(z, w1_p, b1_p, w2_p, b2_p)
    h = h[:n, :k0 * k0 * cout0].reshape(n, k0, k0, cout0)        # NHWC
    n_layers = len(DEC_DECONVS)
    for idx in range(1, n_layers):
        w_p, b_p = p["dec_deconv"][idx]
        _ci, cout, k, s, pad, _bn, act = DEC_DECONVS[idx]
        out_dtype = jnp.float32 if idx == n_layers - 1 else jnp.bfloat16
        h = conv_transpose2d(h, w_p, b_p, cout, k, stride=s, pad=pad,
                             act=act, out_dtype=out_dtype)
    return h.reshape(n, 28 * 28)


@jax.jit
def network_forward(p, x):
    z = _encode_padded(p, x.reshape(-1, 784))
    return decode(p, z)


if __name__ == "__main__":
    key = jax.random.PRNGKey(0)
    pkey, xkey = jax.random.split(key)
    params = prepare_params(init_raw_params(pkey))   # weight folding done once
    x = jax.random.uniform(xkey, (2, 1, 28, 28), jnp.float32)  # NCHW, MNIST-like
    out = network_forward(params, x)
    out = jax.block_until_ready(out)
    assert out.shape == (2, 784)
    assert bool(jnp.all(jnp.isfinite(out)))
    assert bool(jnp.all((out >= 0.0) & (out <= 1.0)))  # sigmoid output
    print("KERNEL_OK")
</pallas_src>

<mosaic_0001>
module attributes {stable_mosaic.version = 11 : i64} {
  func.func @_fused_matmul_kernel(%arg0: i32, %arg1: i32, %arg2: memref<256x16xbf16, #tpu.memory_space<vmem>>, %arg3: memref<16x128xbf16, #tpu.memory_space<vmem>>, %arg4: memref<1x128xf32, #tpu.memory_space<vmem>>, %arg5: memref<256x128xbf16, #tpu.memory_space<vmem>>) attributes {dimension_semantics = [#tpu.dimension_semantics<parallel>, #tpu.dimension_semantics<parallel>], iteration_bounds = array<i64: 6, 1>, scalar_prefetch = 0 : i64, scratch_operands = 0 : i64, tpu.core_type = #tpu.core_type<tc>, window_params = [{transform_indices = @transform_0, window_bounds = array<i64: 256, 16>}, {transform_indices = @transform_1, window_bounds = array<i64: 16, 128>}, {transform_indices = @transform_2, window_bounds = array<i64: 1, 128>}, {transform_indices = @transform_3, window_bounds = array<i64: 256, 128>}]} {
    %c0 = arith.constant 0 : index
    %c0_0 = arith.constant 0 : index
    %0 = vector.load %arg2[%c0, %c0_0] : memref<256x16xbf16, #tpu.memory_space<vmem>>, vector<256x16xbf16>
    %c0_1 = arith.constant 0 : index
    %c0_2 = arith.constant 0 : index
    %1 = vector.load %arg3[%c0_1, %c0_2] : memref<16x128xbf16, #tpu.memory_space<vmem>>, vector<16x128xbf16>
    %cst = arith.constant dense<0.000000e+00> : vector<256x128xf32>
    %2 = tpu.matmul %0, %1, %cst {dimension_numbers = #tpu.dot_dimension_numbers<[1], [0], [0], [1], [0, 0, 1, 1], [], []>} : vector<256x16xbf16>, vector<16x128xbf16>, vector<256x128xf32> -> vector<256x128xf32>
    %c0_3 = arith.constant 0 : index
    %c0_4 = arith.constant 0 : index
    %3 = vector.load %arg4[%c0_3, %c0_4] : memref<1x128xf32, #tpu.memory_space<vmem>>, vector<1x128xf32>
    %4 = vector.broadcast %3 : vector<1x128xf32> to vector<256x128xf32>
    %5 = arith.addf %2, %4 : vector<256x128xf32>
    %cst_5 = arith.constant 2.000000e-01 : f32
    %6 = vector.broadcast %cst_5 : f32 to vector<256x128xf32>
    %7 = arith.mulf %6, %5 : vector<256x128xf32>
    %8 = arith.maximumf %5, %7 : vector<256x128xf32>
    %9 = arith.truncf %8 : vector<256x128xf32> to vector<256x128xbf16>
    %c0_6 = arith.constant 0 : index
    %c0_7 = arith.constant 0 : index
    %10 = vector.load %arg5[%c0_6, %c0_7] : memref<256x128xbf16, #tpu.memory_space<vmem>>, vector<256x128xbf16>
    tpu.vector_store %arg5[%c0_6, %c0_7], %9 {strides = array<i32>} : memref<256x128xbf16, #tpu.memory_space<vmem>>, vector<256x128xbf16>,
    return
  }
  func.func @transform_0(%arg0: i32, %arg1: i32) -> (i32, i32) {
    %c0_i32 = arith.constant 0 : i32
    %c0_i32_0 = arith.constant 0 : i32
    return %arg0, %c0_i32 : i32, i32
  }
  func.func @transform_1(%arg0: i32, %arg1: i32) -> (i32, i32) {
    %c0_i32 = arith.constant 0 : i32
    %c0_i32_0 = arith.constant 0 : i32
    return %c0_i32, %arg1 : i32, i32
  }
  func.func @transform_2(%arg0: i32, %arg1: i32) -> (i32, i32) {
    %c0_i32 = arith.constant 0 : i32
    %c0_i32_0 = arith.constant 0 : i32
    return %c0_i32, %arg1 : i32, i32
  }
  func.func @transform_3(%arg0: i32, %arg1: i32) -> (i32, i32) {
    %c0_i32 = arith.constant 0 : i32
    return %arg0, %arg1 : i32, i32
  }
}

module attributes {stable_mosaic.version = 11 : i64} {
  func.func @_fused_matmul_kernel(%arg0: i32, %arg1: i32, %arg2: memref<176x256xbf16, #tpu.memory_space<vmem>>, %arg3: memref<256x128xbf16, #tpu.memory_space<vmem>>, %arg4: memref<1x128xf32, #tpu.memory_space<vmem>>, %arg5: memref<176x128xbf16, #tpu.memory_space<vmem>>) attributes {dimension_semantics = [#tpu.dimension_semantics<parallel>, #tpu.dimension_semantics<parallel>], iteration_bounds = array<i64: 2, 1>, scalar_prefetch = 0 : i64, scratch_operands = 0 : i64, tpu.core_type = #tpu.core_type<tc>, window_params = [{transform_indices = @transform_0, window_bounds = array<i64: 176, 256>}, {transform_indices = @transform_1, window_bounds = array<i64: 256, 128>}, {transform_indices = @transform_2, window_bounds = array<i64: 1, 128>}, {transform_indices = @transform_3, window_bounds = array<i64: 176, 128>}]} {
    %c0 = arith.constant 0 : index
    %c0_0 = arith.constant 0 : index
    %0 = vector.load %arg2[%c0, %c0_0] : memref<176x256xbf16, #tpu.memory_space<vmem>>, vector<176x256xbf16>
    %c0_1 = arith.constant 0 : index
    %c0_2 = arith.constant 0 : index
    %1 = vector.load %arg3[%c0_1, %c0_2] : memref<256x128xbf16, #tpu.memory_space<vmem>>, vector<256x128xbf16>
    %cst = arith.constant dense<0.000000e+00> : vector<176x128xf32>
    %2 = tpu.matmul %0, %1, %cst {dimension_numbers = #tpu.dot_dimension_numbers<[1], [0], [0], [1], [0, 0, 1, 1], [], []>} : vector<176x256xbf16>, vector<256x128xbf16>, vector<176x128xf32> -> vector<176x128xf32>
    %c0_3 = arith.constant 0 : index
    %c0_4 = arith.constant 0 : index
    %3 = vector.load %arg4[%c0_3, %c0_4] : memref<1x128xf32, #tpu.memory_space<vmem>>, vector<1x128xf32>
    %4 = vector.broadcast %3 : vector<1x128xf32> to vector<176x128xf32>
    %5 = arith.addf %2, %4 : vector<176x128xf32>
    %cst_5 = arith.constant 2.000000e-01 : f32
    %6 = vector.broadcast %cst_5 : f32 to vector<176x128xf32>
    %7 = arith.mulf %6, %5 : vector<176x128xf32>
    %8 = arith.maximumf %5, %7 : vector<176x128xf32>
    %9 = arith.truncf %8 : vector<176x128xf32> to vector<176x128xbf16>
    %c0_6 = arith.constant 0 : index
    %c0_7 = arith.constant 0 : index
    %10 = vector.load %arg5[%c0_6, %c0_7] : memref<176x128xbf16, #tpu.memory_space<vmem>>, vector<176x128xbf16>
    tpu.vector_store %arg5[%c0_6, %c0_7], %9 {strides = array<i32>} : memref<176x128xbf16, #tpu.memory_space<vmem>>, vector<176x128xbf16>,
    return
  }
  func.func @transform_0(%arg0: i32, %arg1: i32) -> (i32, i32) {
    %c0_i32 = arith.constant 0 : i32
    %c0_i32_0 = arith.constant 0 : i32
    return %arg0, %c0_i32 : i32, i32
  }
  func.func @transform_1(%arg0: i32, %arg1: i32) -> (i32, i32) {
    %c0_i32 = arith.constant 0 : i32
    %c0_i32_0 = arith.constant 0 : i32
    return %c0_i32, %arg1 : i32, i32
  }
  func.func @transform_2(%arg0: i32, %arg1: i32) -> (i32, i32) {
    %c0_i32 = arith.constant 0 : i32
    %c0_i32_0 = arith.constant 0 : i32
    return %c0_i32, %arg1 : i32, i32
  }
  func.func @transform_3(%arg0: i32, %arg1: i32) -> (i32, i32) {
    %c0_i32 = arith.constant 0 : i32
    return %arg0, %arg1 : i32, i32
  }
}

module attributes {stable_mosaic.version = 11 : i64} {
  func.func @_fused_matmul_kernel(%arg0: i32, %arg1: i32, %arg2: memref<80x512xbf16, #tpu.memory_space<vmem>>, %arg3: memref<512x128xbf16, #tpu.memory_space<vmem>>, %arg4: memref<1x128xf32, #tpu.memory_space<vmem>>, %arg5: memref<80x128xbf16, #tpu.memory_space<vmem>>) attributes {dimension_semantics = [#tpu.dimension_semantics<parallel>, #tpu.dimension_semantics<parallel>], iteration_bounds = array<i64: 1, 1>, scalar_prefetch = 0 : i64, scratch_operands = 0 : i64, tpu.core_type = #tpu.core_type<tc>, window_params = [{transform_indices = @transform_0, window_bounds = array<i64: 80, 512>}, {transform_indices = @transform_1, window_bounds = array<i64: 512, 128>}, {transform_indices = @transform_2, window_bounds = array<i64: 1, 128>}, {transform_indices = @transform_3, window_bounds = array<i64: 80, 128>}]} {
    %c0 = arith.constant 0 : index
    %c0_0 = arith.constant 0 : index
    %0 = vector.load %arg2[%c0, %c0_0] : memref<80x512xbf16, #tpu.memory_space<vmem>>, vector<80x512xbf16>
    %c0_1 = arith.constant 0 : index
    %c0_2 = arith.constant 0 : index
    %1 = vector.load %arg3[%c0_1, %c0_2] : memref<512x128xbf16, #tpu.memory_space<vmem>>, vector<512x128xbf16>
    %cst = arith.constant dense<0.000000e+00> : vector<80x128xf32>
    %2 = tpu.matmul %0, %1, %cst {dimension_numbers = #tpu.dot_dimension_numbers<[1], [0], [0], [1], [0, 0, 1, 1], [], []>} : vector<80x512xbf16>, vector<512x128xbf16>, vector<80x128xf32> -> vector<80x128xf32>
    %c0_3 = arith.constant 0 : index
    %c0_4 = arith.constant 0 : index
    %3 = vector.load %arg4[%c0_3, %c0_4] : memref<1x128xf32, #tpu.memory_space<vmem>>, vector<1x128xf32>
    %4 = vector.broadcast %3 : vector<1x128xf32> to vector<80x128xf32>
    %5 = arith.addf %2, %4 : vector<80x128xf32>
    %cst_5 = arith.constant 2.000000e-01 : f32
    %6 = vector.broadcast %cst_5 : f32 to vector<80x128xf32>
    %7 = arith.mulf %6, %5 : vector<80x128xf32>
    %8 = arith.maximumf %5, %7 : vector<80x128xf32>
    %9 = arith.truncf %8 : vector<80x128xf32> to vector<80x128xbf16>
    %c0_6 = arith.constant 0 : index
    %c0_7 = arith.constant 0 : index
    %10 = vector.load %arg5[%c0_6, %c0_7] : memref<80x128xbf16, #tpu.memory_space<vmem>>, vector<80x128xbf16>
    tpu.vector_store %arg5[%c0_6, %c0_7], %9 {strides = array<i32>} : memref<80x128xbf16, #tpu.memory_space<vmem>>, vector<80x128xbf16>,
    return
  }
  func.func @transform_0(%arg0: i32, %arg1: i32) -> (i32, i32) {
    %c0_i32 = arith.constant 0 : i32
    %c0_i32_0 = arith.constant 0 : i32
    return %arg0, %c0_i32 : i32, i32
  }
  func.func @transform_1(%arg0: i32, %arg1: i32) -> (i32, i32) {
    %c0_i32 = arith.constant 0 : i32
    %c0_i32_0 = arith.constant 0 : i32
    return %c0_i32, %arg1 : i32, i32
  }
  func.func @transform_2(%arg0: i32, %arg1: i32) -> (i32, i32) {
    %c0_i32 = arith.constant 0 : i32
    %c0_i32_0 = arith.constant 0 : i32
    return %c0_i32, %arg1 : i32, i32
  }
  func.func @transform_3(%arg0: i32, %arg1: i32) -> (i32, i32) {
    %c0_i32 = arith.constant 0 : i32
    return %arg0, %arg1 : i32, i32
  }
}

module attributes {stable_mosaic.version = 11 : i64} {
  func.func @_fused_matmul_kernel(%arg0: i32, %arg1: i32, %arg2: memref<32x1024xbf16, #tpu.memory_space<vmem>>, %arg3: memref<1024x128xbf16, #tpu.memory_space<vmem>>, %arg4: memref<1x128xf32, #tpu.memory_space<vmem>>, %arg5: memref<32x128xbf16, #tpu.memory_space<vmem>>) attributes {dimension_semantics = [#tpu.dimension_semantics<parallel>, #tpu.dimension_semantics<parallel>], iteration_bounds = array<i64: 1, 1>, scalar_prefetch = 0 : i64, scratch_operands = 0 : i64, tpu.core_type = #tpu.core_type<tc>, window_params = [{transform_indices = @transform_0, window_bounds = array<i64: 32, 1024>}, {transform_indices = @transform_1, window_bounds = array<i64: 1024, 128>}, {transform_indices = @transform_2, window_bounds = array<i64: 1, 128>}, {transform_indices = @transform_3, window_bounds = array<i64: 32, 128>}]} {
    %c0 = arith.constant 0 : index
    %c0_0 = arith.constant 0 : index
    %0 = vector.load %arg2[%c0, %c0_0] : memref<32x1024xbf16, #tpu.memory_space<vmem>>, vector<32x1024xbf16>
    %c0_1 = arith.constant 0 : index
    %c0_2 = arith.constant 0 : index
    %1 = vector.load %arg3[%c0_1, %c0_2] : memref<1024x128xbf16, #tpu.memory_space<vmem>>, vector<1024x128xbf16>
    %cst = arith.constant dense<0.000000e+00> : vector<32x128xf32>
    %2 = tpu.matmul %0, %1, %cst {dimension_numbers = #tpu.dot_dimension_numbers<[1], [0], [0], [1], [0, 0, 1, 1], [], []>} : vector<32x1024xbf16>, vector<1024x128xbf16>, vector<32x128xf32> -> vector<32x128xf32>
    %c0_3 = arith.constant 0 : index
    %c0_4 = arith.constant 0 : index
    %3 = vector.load %arg4[%c0_3, %c0_4] : memref<1x128xf32, #tpu.memory_space<vmem>>, vector<1x128xf32>
    %4 = vector.broadcast %3 : vector<1x128xf32> to vector<32x128xf32>
    %5 = arith.addf %2, %4 : vector<32x128xf32>
    %cst_5 = arith.constant 2.000000e-01 : f32
    %6 = vector.broadcast %cst_5 : f32 to vector<32x128xf32>
    %7 = arith.mulf %6, %5 : vector<32x128xf32>
    %8 = arith.maximumf %5, %7 : vector<32x128xf32>
    %9 = arith.truncf %8 : vector<32x128xf32> to vector<32x128xbf16>
    %c0_6 = arith.constant 0 : index
    %c0_7 = arith.constant 0 : index
    %10 = vector.load %arg5[%c0_6, %c0_7] : memref<32x128xbf16, #tpu.memory_space<vmem>>, vector<32x128xbf16>
    tpu.vector_store %arg5[%c0_6, %c0_7], %9 {strides = array<i32>} : memref<32x128xbf16, #tpu.memory_space<vmem>>, vector<32x128xbf16>,
    return
  }
  func.func @transform_0(%arg0: i32, %arg1: i32) -> (i32, i32) {
    %c0_i32 = arith.constant 0 : i32
    %c0_i32_0 = arith.constant 0 : i32
    return %arg0, %c0_i32 : i32, i32
  }
  func.func @transform_1(%arg0: i32, %arg1: i32) -> (i32, i32) {
    %c0_i32 = arith.constant 0 : i32
    %c0_i32_0 = arith.constant 0 : i32
    return %c0_i32, %arg1 : i32, i32
  }
  func.func @transform_2(%arg0: i32, %arg1: i32) -> (i32, i32) {
    %c0_i32 = arith.constant 0 : i32
    %c0_i32_0 = arith.constant 0 : i32
    return %c0_i32, %arg1 : i32, i32
  }
  func.func @transform_3(%arg0: i32, %arg1: i32) -> (i32, i32) {
    %c0_i32 = arith.constant 0 : i32
    return %arg0, %arg1 : i32, i32
  }
}

module attributes {stable_mosaic.version = 11 : i64} {
  func.func @_fused_matmul_kernel(%arg0: i32, %arg1: i32, %arg2: memref<16x1152xbf16, #tpu.memory_space<vmem>>, %arg3: memref<1152x256xbf16, #tpu.memory_space<vmem>>, %arg4: memref<1x256xf32, #tpu.memory_space<vmem>>, %arg5: memref<16x256xbf16, #tpu.memory_space<vmem>>) attributes {dimension_semantics = [#tpu.dimension_semantics<parallel>, #tpu.dimension_semantics<parallel>], iteration_bounds = array<i64: 1, 1>, scalar_prefetch = 0 : i64, scratch_operands = 0 : i64, tpu.core_type = #tpu.core_type<tc>, window_params = [{transform_indices = @transform_0, window_bounds = array<i64: 16, 1152>}, {transform_indices = @transform_1, window_bounds = array<i64: 1152, 256>}, {transform_indices = @transform_2, window_bounds = array<i64: 1, 256>}, {transform_indices = @transform_3, window_bounds = array<i64: 16, 256>}]} {
    %c0 = arith.constant 0 : index
    %c0_0 = arith.constant 0 : index
    %0 = vector.load %arg2[%c0, %c0_0] : memref<16x1152xbf16, #tpu.memory_space<vmem>>, vector<16x1152xbf16>
    %c0_1 = arith.constant 0 : index
    %c0_2 = arith.constant 0 : index
    %1 = vector.load %arg3[%c0_1, %c0_2] : memref<1152x256xbf16, #tpu.memory_space<vmem>>, vector<1152x256xbf16>
    %cst = arith.constant dense<0.000000e+00> : vector<16x256xf32>
    %2 = tpu.matmul %0, %1, %cst {dimension_numbers = #tpu.dot_dimension_numbers<[1], [0], [0], [1], [0, 0, 1, 1], [], []>} : vector<16x1152xbf16>, vector<1152x256xbf16>, vector<16x256xf32> -> vector<16x256xf32>
    %c0_3 = arith.constant 0 : index
    %c0_4 = arith.constant 0 : index
    %3 = vector.load %arg4[%c0_3, %c0_4] : memref<1x256xf32, #tpu.memory_space<vmem>>, vector<1x256xf32>
    %4 = vector.broadcast %3 : vector<1x256xf32> to vector<16x256xf32>
    %5 = arith.addf %2, %4 : vector<16x256xf32>
    %cst_5 = arith.constant 2.000000e-01 : f32
    %6 = vector.broadcast %cst_5 : f32 to vector<16x256xf32>
    %7 = arith.mulf %6, %5 : vector<16x256xf32>
    %8 = arith.maximumf %5, %7 : vector<16x256xf32>
    %9 = arith.truncf %8 : vector<16x256xf32> to vector<16x256xbf16>
    %c0_6 = arith.constant 0 : index
    %c0_7 = arith.constant 0 : index
    %10 = vector.load %arg5[%c0_6, %c0_7] : memref<16x256xbf16, #tpu.memory_space<vmem>>, vector<16x256xbf16>
    tpu.vector_store %arg5[%c0_6, %c0_7], %9 {strides = array<i32>} : memref<16x256xbf16, #tpu.memory_space<vmem>>, vector<16x256xbf16>,
    return
  }
  func.func @transform_0(%arg0: i32, %arg1: i32) -> (i32, i32) {
    %c0_i32 = arith.constant 0 : i32
    %c0_i32_0 = arith.constant 0 : i32
    return %arg0, %c0_i32 : i32, i32
  }
  func.func @transform_1(%arg0: i32, %arg1: i32) -> (i32, i32) {
    %c0_i32 = arith.constant 0 : i32
    %c0_i32_0 = arith.constant 0 : i32
    return %c0_i32, %arg1 : i32, i32
  }
  func.func @transform_2(%arg0: i32, %arg1: i32) -> (i32, i32) {
    %c0_i32 = arith.constant 0 : i32
    %c0_i32_0 = arith.constant 0 : i32
    return %c0_i32, %arg1 : i32, i32
  }
  func.func @transform_3(%arg0: i32, %arg1: i32) -> (i32, i32) {
    %c0_i32 = arith.constant 0 : i32
    return %arg0, %arg1 : i32, i32
  }
}

module attributes {stable_mosaic.version = 11 : i64} {
  func.func @_fused_matmul_kernel(%arg0: i32, %arg1: i32, %arg2: memref<16x1024xbf16, #tpu.memory_space<vmem>>, %arg3: memref<1024x1024xbf16, #tpu.memory_space<vmem>>, %arg4: memref<1x1024xf32, #tpu.memory_space<vmem>>, %arg5: memref<16x1024xbf16, #tpu.memory_space<vmem>>) attributes {dimension_semantics = [#tpu.dimension_semantics<parallel>, #tpu.dimension_semantics<parallel>], iteration_bounds = array<i64: 1, 2>, scalar_prefetch = 0 : i64, scratch_operands = 0 : i64, tpu.core_type = #tpu.core_type<tc>, window_params = [{transform_indices = @transform_0, window_bounds = array<i64: 16, 1024>}, {transform_indices = @transform_1, window_bounds = array<i64: 1024, 1024>}, {transform_indices = @transform_2, window_bounds = array<i64: 1, 1024>}, {transform_indices = @transform_3, window_bounds = array<i64: 16, 1024>}]} {
    %c0 = arith.constant 0 : index
    %c0_0 = arith.constant 0 : index
    %0 = vector.load %arg2[%c0, %c0_0] : memref<16x1024xbf16, #tpu.memory_space<vmem>>, vector<16x1024xbf16>
    %c0_1 = arith.constant 0 : index
    %c0_2 = arith.constant 0 : index
    %1 = vector.load %arg3[%c0_1, %c0_2] : memref<1024x1024xbf16, #tpu.memory_space<vmem>>, vector<1024x1024xbf16>
    %cst = arith.constant dense<0.000000e+00> : vector<16x1024xf32>
    %2 = tpu.matmul %0, %1, %cst {dimension_numbers = #tpu.dot_dimension_numbers<[1], [0], [0], [1], [0, 0, 1, 1], [], []>} : vector<16x1024xbf16>, vector<1024x1024xbf16>, vector<16x1024xf32> -> vector<16x1024xf32>
    %c0_3 = arith.constant 0 : index
    %c0_4 = arith.constant 0 : index
    %3 = vector.load %arg4[%c0_3, %c0_4] : memref<1x1024xf32, #tpu.memory_space<vmem>>, vector<1x1024xf32>
    %4 = vector.broadcast %3 : vector<1x1024xf32> to vector<16x1024xf32>
    %5 = arith.addf %2, %4 : vector<16x1024xf32>
    %cst_5 = arith.constant 2.000000e-01 : f32
    %6 = vector.broadcast %cst_5 : f32 to vector<16x1024xf32>
    %7 = arith.mulf %6, %5 : vector<16x1024xf32>
    %8 = arith.maximumf %5, %7 : vector<16x1024xf32>
    %9 = arith.truncf %8 : vector<16x1024xf32> to vector<16x1024xbf16>
    %c0_6 = arith.constant 0 : index
    %c0_7 = arith.constant 0 : index
    %10 = vector.load %arg5[%c0_6, %c0_7] : memref<16x1024xbf16, #tpu.memory_space<vmem>>, vector<16x1024xbf16>
    tpu.vector_store %arg5[%c0_6, %c0_7], %9 {strides = array<i32>} : memref<16x1024xbf16, #tpu.memory_space<vmem>>, vector<16x1024xbf16>,
    return
  }
  func.func @transform_0(%arg0: i32, %arg1: i32) -> (i32, i32) {
    %c0_i32 = arith.constant 0 : i32
    %c0_i32_0 = arith.constant 0 : i32
    return %arg0, %c0_i32 : i32, i32
  }
  func.func @transform_1(%arg0: i32, %arg1: i32) -> (i32, i32) {
    %c0_i32 = arith.constant 0 : i32
    %c0_i32_0 = arith.constant 0 : i32
    return %c0_i32, %arg1 : i32, i32
  }
  func.func @transform_2(%arg0: i32, %arg1: i32) -> (i32, i32) {
    %c0_i32 = arith.constant 0 : i32
    %c0_i32_0 = arith.constant 0 : i32
    return %c0_i32, %arg1 : i32, i32
  }
  func.func @transform_3(%arg0: i32, %arg1: i32) -> (i32, i32) {
    %c0_i32 = arith.constant 0 : i32
    return %arg0, %arg1 : i32, i32
  }
}

module attributes {stable_mosaic.version = 11 : i64} {
  func.func @_double_matmul_kernel(%arg0: i32, %arg1: memref<16x2048xbf16, #tpu.memory_space<vmem>>, %arg2: memref<2048x512xbf16, #tpu.memory_space<vmem>>, %arg3: memref<1x512xf32, #tpu.memory_space<vmem>>, %arg4: memref<512x1024xbf16, #tpu.memory_space<vmem>>, %arg5: memref<1x1024xf32, #tpu.memory_space<vmem>>, %arg6: memref<16x1024xbf16, #tpu.memory_space<vmem>>) attributes {dimension_semantics = [#tpu.dimension_semantics<parallel>], iteration_bounds = array<i64: 1>, scalar_prefetch = 0 : i64, scratch_operands = 0 : i64, tpu.core_type = #tpu.core_type<tc>, window_params = [{transform_indices = @transform_0, window_bounds = array<i64: 16, 2048>}, {pipeline_mode = #tpu.pipeline_mode<synchronous>, transform_indices = @transform_1, window_bounds = array<i64: 2048, 512>}, {pipeline_mode = #tpu.pipeline_mode<synchronous>, transform_indices = @transform_2, window_bounds = array<i64: 1, 512>}, {pipeline_mode = #tpu.pipeline_mode<synchronous>, transform_indices = @transform_3, window_bounds = array<i64: 512, 1024>}, {pipeline_mode = #tpu.pipeline_mode<synchronous>, transform_indices = @transform_4, window_bounds = array<i64: 1, 1024>}, {transform_indices = @transform_5, window_bounds = array<i64: 16, 1024>}]} {
    %c0 = arith.constant 0 : index
    %c0_0 = arith.constant 0 : index
    %0 = vector.load %arg1[%c0, %c0_0] : memref<16x2048xbf16, #tpu.memory_space<vmem>>, vector<16x2048xbf16>
    %c0_1 = arith.constant 0 : index
    %c0_2 = arith.constant 0 : index
    %1 = vector.load %arg2[%c0_1, %c0_2] : memref<2048x512xbf16, #tpu.memory_space<vmem>>, vector<2048x512xbf16>
    %cst = arith.constant dense<0.000000e+00> : vector<16x512xf32>
    %2 = tpu.matmul %0, %1, %cst {dimension_numbers = #tpu.dot_dimension_numbers<[1], [0], [0], [1], [0, 0, 1, 1], [], []>} : vector<16x2048xbf16>, vector<2048x512xbf16>, vector<16x512xf32> -> vector<16x512xf32>
    %c0_3 = arith.constant 0 : index
    %c0_4 = arith.constant 0 : index
    %3 = vector.load %arg3[%c0_3, %c0_4] : memref<1x512xf32, #tpu.memory_space<vmem>>, vector<1x512xf32>
    %4 = vector.broadcast %3 : vector<1x512xf32> to vector<16x512xf32>
    %5 = arith.addf %2, %4 : vector<16x512xf32>
    %cst_5 = arith.constant 0.000000e+00 : f32
    %6 = vector.broadcast %cst_5 : f32 to vector<16x512xf32>
    %7 = arith.maximumf %5, %6 : vector<16x512xf32>
    %8 = arith.truncf %7 : vector<16x512xf32> to vector<16x512xbf16>
    %c0_6 = arith.constant 0 : index
    %c0_7 = arith.constant 0 : index
    %9 = vector.load %arg4[%c0_6, %c0_7] : memref<512x1024xbf16, #tpu.memory_space<vmem>>, vector<512x1024xbf16>
    %cst_8 = arith.constant dense<0.000000e+00> : vector<16x1024xf32>
    %10 = tpu.matmul %8, %9, %cst_8 {dimension_numbers = #tpu.dot_dimension_numbers<[1], [0], [0], [1], [0, 0, 1, 1], [], []>} : vector<16x512xbf16>, vector<512x1024xbf16>, vector<16x1024xf32> -> vector<16x1024xf32>
    %c0_9 = arith.constant 0 : index
    %c0_10 = arith.constant 0 : index
    %11 = vector.load %arg5[%c0_9, %c0_10] : memref<1x1024xf32, #tpu.memory_space<vmem>>, vector<1x1024xf32>
    %12 = vector.broadcast %11 : vector<1x1024xf32> to vector<16x1024xf32>
    %13 = arith.addf %10, %12 : vector<16x1024xf32>
    %cst_11 = arith.constant 0.000000e+00 : f32
    %14 = vector.broadcast %cst_11 : f32 to vector<16x1024xf32>
    %15 = arith.maximumf %13, %14 : vector<16x1024xf32>
    %16 = arith.truncf %15 : vector<16x1024xf32> to vector<16x1024xbf16>
    %c0_12 = arith.constant 0 : index
    %c0_13 = arith.constant 0 : index
    %17 = vector.load %arg6[%c0_12, %c0_13] : memref<16x1024xbf16, #tpu.memory_space<vmem>>, vector<16x1024xbf16>
    tpu.vector_store %arg6[%c0_12, %c0_13], %16 {strides = array<i32>} : memref<16x1024xbf16, #tpu.memory_space<vmem>>, vector<16x1024xbf16>,
    return
  }
  func.func @transform_0(%arg0: i32) -> (i32, i32) {
    %c0_i32 = arith.constant 0 : i32
    %c0_i32_0 = arith.constant 0 : i32
    return %arg0, %c0_i32 : i32, i32
  }
  func.func @transform_1(%arg0: i32) -> (i32, i32) {
    %c0_i32 = arith.constant 0 : i32
    %c0_i32_0 = arith.constant 0 : i32
    %c0_i32_1 = arith.constant 0 : i32
    return %c0_i32, %c0_i32_0 : i32, i32
  }
  func.func @transform_2(%arg0: i32) -> (i32, i32) {
    %c0_i32 = arith.constant 0 : i32
    %c0_i32_0 = arith.constant 0 : i32
    %c0_i32_1 = arith.constant 0 : i32
    return %c0_i32, %c0_i32_0 : i32, i32
  }
  func.func @transform_3(%arg0: i32) -> (i32, i32) {
    %c0_i32 = arith.constant 0 : i32
    %c0_i32_0 = arith.constant 0 : i32
    %c0_i32_1 = arith.constant 0 : i32
    return %c0_i32, %c0_i32_0 : i32, i32
  }
  func.func @transform_4(%arg0: i32) -> (i32, i32) {
    %c0_i32 = arith.constant 0 : i32
    %c0_i32_0 = arith.constant 0 : i32
    %c0_i32_1 = arith.constant 0 : i32
    return %c0_i32, %c0_i32_0 : i32, i32
  }
  func.func @transform_5(%arg0: i32) -> (i32, i32) {
    %c0_i32 = arith.constant 0 : i32
    %c0_i32_0 = arith.constant 0 : i32
    return %arg0, %c0_i32 : i32, i32
  }
}

module attributes {stable_mosaic.version = 11 : i64} {
  func.func @_fused_matmul_kernel(%arg0: i32, %arg1: i32, %arg2: memref<32x256xbf16, #tpu.memory_space<vmem>>, %arg3: memref<256x128xbf16, #tpu.memory_space<vmem>>, %arg4: memref<1x128xf32, #tpu.memory_space<vmem>>, %arg5: memref<32x128xbf16, #tpu.memory_space<vmem>>) attributes {dimension_semantics = [#tpu.dimension_semantics<parallel>, #tpu.dimension_semantics<parallel>], iteration_bounds = array<i64: 1, 1>, scalar_prefetch = 0 : i64, scratch_operands = 0 : i64, tpu.core_type = #tpu.core_type<tc>, window_params = [{transform_indices = @transform_0, window_bounds = array<i64: 32, 256>}, {transform_indices = @transform_1, window_bounds = array<i64: 256, 128>}, {transform_indices = @transform_2, window_bounds = array<i64: 1, 128>}, {transform_indices = @transform_3, window_bounds = array<i64: 32, 128>}]} {
    %c0 = arith.constant 0 : index
    %c0_0 = arith.constant 0 : index
    %0 = vector.load %arg2[%c0, %c0_0] : memref<32x256xbf16, #tpu.memory_space<vmem>>, vector<32x256xbf16>
    %c0_1 = arith.constant 0 : index
    %c0_2 = arith.constant 0 : index
    %1 = vector.load %arg3[%c0_1, %c0_2] : memref<256x128xbf16, #tpu.memory_space<vmem>>, vector<256x128xbf16>
    %cst = arith.constant dense<0.000000e+00> : vector<32x128xf32>
    %2 = tpu.matmul %0, %1, %cst {dimension_numbers = #tpu.dot_dimension_numbers<[1], [0], [0], [1], [0, 0, 1, 1], [], []>} : vector<32x256xbf16>, vector<256x128xbf16>, vector<32x128xf32> -> vector<32x128xf32>
    %c0_3 = arith.constant 0 : index
    %c0_4 = arith.constant 0 : index
    %3 = vector.load %arg4[%c0_3, %c0_4] : memref<1x128xf32, #tpu.memory_space<vmem>>, vector<1x128xf32>
    %4 = vector.broadcast %3 : vector<1x128xf32> to vector<32x128xf32>
    %5 = arith.addf %2, %4 : vector<32x128xf32>
    %cst_5 = arith.constant 0.000000e+00 : f32
    %6 = vector.broadcast %cst_5 : f32 to vector<32x128xf32>
    %7 = arith.maximumf %5, %6 : vector<32x128xf32>
    %8 = arith.truncf %7 : vector<32x128xf32> to vector<32x128xbf16>
    %c0_6 = arith.constant 0 : index
    %c0_7 = arith.constant 0 : index
    %9 = vector.load %arg5[%c0_6, %c0_7] : memref<32x128xbf16, #tpu.memory_space<vmem>>, vector<32x128xbf16>
    tpu.vector_store %arg5[%c0_6, %c0_7], %8 {strides = array<i32>} : memref<32x128xbf16, #tpu.memory_space<vmem>>, vector<32x128xbf16>,
    return
  }
  func.func @transform_0(%arg0: i32, %arg1: i32) -> (i32, i32) {
    %c0_i32 = arith.constant 0 : i32
    %c0_i32_0 = arith.constant 0 : i32
    return %arg0, %c0_i32 : i32, i32
  }
  func.func @transform_1(%arg0: i32, %arg1: i32) -> (i32, i32) {
    %c0_i32 = arith.constant 0 : i32
    %c0_i32_0 = arith.constant 0 : i32
    return %c0_i32, %arg1 : i32, i32
  }
  func.func @transform_2(%arg0: i32, %arg1: i32) -> (i32, i32) {
    %c0_i32 = arith.constant 0 : i32
    %c0_i32_0 = arith.constant 0 : i32
    return %c0_i32, %arg1 : i32, i32
  }
  func.func @transform_3(%arg0: i32, %arg1: i32) -> (i32, i32) {
    %c0_i32 = arith.constant 0 : i32
    return %arg0, %arg1 : i32, i32
  }
}

module attributes {stable_mosaic.version = 11 : i64} {
  func.func @_fused_matmul_kernel(%arg0: i32, %arg1: i32, %arg2: memref<112x288xbf16, #tpu.memory_space<vmem>>, %arg3: memref<288x128xbf16, #tpu.memory_space<vmem>>, %arg4: memref<1x128xf32, #tpu.memory_space<vmem>>, %arg5: memref<112x128xbf16, #tpu.memory_space<vmem>>) attributes {dimension_semantics = [#tpu.dimension_semantics<parallel>, #tpu.dimension_semantics<parallel>], iteration_bounds = array<i64: 1, 1>, scalar_prefetch = 0 : i64, scratch_operands = 0 : i64, tpu.core_type = #tpu.core_type<tc>, window_params = [{transform_indices = @transform_0, window_bounds = array<i64: 112, 288>}, {transform_indices = @transform_1, window_bounds = array<i64: 288, 128>}, {transform_indices = @transform_2, window_bounds = array<i64: 1, 128>}, {transform_indices = @transform_3, window_bounds = array<i64: 112, 128>}]} {
    %c0 = arith.constant 0 : index
    %c0_0 = arith.constant 0 : index
    %0 = vector.load %arg2[%c0, %c0_0] : memref<112x288xbf16, #tpu.memory_space<vmem>>, vector<112x288xbf16>
    %c0_1 = arith.constant 0 : index
    %c0_2 = arith.constant 0 : index
    %1 = vector.load %arg3[%c0_1, %c0_2] : memref<288x128xbf16, #tpu.memory_space<vmem>>, vector<288x128xbf16>
    %cst = arith.constant dense<0.000000e+00> : vector<112x128xf32>
    %2 = tpu.matmul %0, %1, %cst {dimension_numbers = #tpu.dot_dimension_numbers<[1], [0], [0], [1], [0, 0, 1, 1], [], []>} : vector<112x288xbf16>, vector<288x128xbf16>, vector<112x128xf32> -> vector<112x128xf32>
    %c0_3 = arith.constant 0 : index
    %c0_4 = arith.constant 0 : index
    %3 = vector.load %arg4[%c0_3, %c0_4] : memref<1x128xf32, #tpu.memory_space<vmem>>, vector<1x128xf32>
    %4 = vector.broadcast %3 : vector<1x128xf32> to vector<112x128xf32>
    %5 = arith.addf %2, %4 : vector<112x128xf32>
    %cst_5 = arith.constant 0.000000e+00 : f32
    %6 = vector.broadcast %cst_5 : f32 to vector<112x128xf32>
    %7 = arith.maximumf %5, %6 : vector<112x128xf32>
    %8 = arith.truncf %7 : vector<112x128xf32> to vector<112x128xbf16>
    %c0_6 = arith.constant 0 : index
    %c0_7 = arith.constant 0 : index
    %9 = vector.load %arg5[%c0_6, %c0_7] : memref<112x128xbf16, #tpu.memory_space<vmem>>, vector<112x128xbf16>
    tpu.vector_store %arg5[%c0_6, %c0_7], %8 {strides = array<i32>} : memref<112x128xbf16, #tpu.memory_space<vmem>>, vector<112x128xbf16>,
    return
  }
  func.func @transform_0(%arg0: i32, %arg1: i32) -> (i32, i32) {
    %c0_i32 = arith.constant 0 : i32
    %c0_i32_0 = arith.constant 0 : i32
    return %arg0, %c0_i32 : i32, i32
  }
  func.func @transform_1(%arg0: i32, %arg1: i32) -> (i32, i32) {
    %c0_i32 = arith.constant 0 : i32
    %c0_i32_0 = arith.constant 0 : i32
    return %c0_i32, %arg1 : i32, i32
  }
  func.func @transform_2(%arg0: i32, %arg1: i32) -> (i32, i32) {
    %c0_i32 = arith.constant 0 : i32
    %c0_i32_0 = arith.constant 0 : i32
    return %c0_i32, %arg1 : i32, i32
  }
  func.func @transform_3(%arg0: i32, %arg1: i32) -> (i32, i32) {
    %c0_i32 = arith.constant 0 : i32
    return %arg0, %arg1 : i32, i32
  }
}

module attributes {stable_mosaic.version = 11 : i64} {
  func.func @_fused_matmul_kernel(%arg0: i32, %arg1: i32, %arg2: memref<208x144xbf16, #tpu.memory_space<vmem>>, %arg3: memref<144x128xbf16, #tpu.memory_space<vmem>>, %arg4: memref<1x128xf32, #tpu.memory_space<vmem>>, %arg5: memref<208x128xf32, #tpu.memory_space<vmem>>) attributes {dimension_semantics = [#tpu.dimension_semantics<parallel>, #tpu.dimension_semantics<parallel>], iteration_bounds = array<i64: 2, 1>, scalar_prefetch = 0 : i64, scratch_operands = 0 : i64, tpu.core_type = #tpu.core_type<tc>, window_params = [{transform_indices = @transform_0, window_bounds = array<i64: 208, 144>}, {transform_indices = @transform_1, window_bounds = array<i64: 144, 128>}, {transform_indices = @transform_2, window_bounds = array<i64: 1, 128>}, {transform_indices = @transform_3, window_bounds = array<i64: 208, 128>}]} {
    %c0 = arith.constant 0 : index
    %c0_0 = arith.constant 0 : index
    %0 = vector.load %arg2[%c0, %c0_0] : memref<208x144xbf16, #tpu.memory_space<vmem>>, vector<208x144xbf16>
    %c0_1 = arith.constant 0 : index
    %c0_2 = arith.constant 0 : index
    %1 = vector.load %arg3[%c0_1, %c0_2] : memref<144x128xbf16, #tpu.memory_space<vmem>>, vector<144x128xbf16>
    %cst = arith.constant dense<0.000000e+00> : vector<208x128xf32>
    %2 = tpu.matmul %0, %1, %cst {dimension_numbers = #tpu.dot_dimension_numbers<[1], [0], [0], [1], [0, 0, 1, 1], [], []>} : vector<208x144xbf16>, vector<144x128xbf16>, vector<208x128xf32> -> vector<208x128xf32>
    %c0_3 = arith.constant 0 : index
    %c0_4 = arith.constant 0 : index
    %3 = vector.load %arg4[%c0_3, %c0_4] : memref<1x128xf32, #tpu.memory_space<vmem>>, vector<1x128xf32>
    %4 = vector.broadcast %3 : vector<1x128xf32> to vector<208x128xf32>
    %5 = arith.addf %2, %4 : vector<208x128xf32>
    %cst_5 = arith.constant 0.000000e+00 : f32
    %6 = vector.broadcast %cst_5 : f32 to vector<208x128xf32>
    %7 = arith.subf %6, %5 : vector<208x128xf32>
    %8 = math.exp %7 : vector<208x128xf32>
    %cst_6 = arith.constant 1.000000e+00 : f32
    %9 = vector.broadcast %cst_6 : f32 to vector<208x128xf32>
    %10 = arith.addf %9, %8 : vector<208x128xf32>
    %cst_7 = arith.constant 1.000000e+00 : f32
    %11 = vector.broadcast %cst_7 : f32 to vector<208x128xf32>
    %12 = arith.divf %11, %10 : vector<208x128xf32>
    %c0_8 = arith.constant 0 : index
    %c0_9 = arith.constant 0 : index
    %13 = vector.load %arg5[%c0_8, %c0_9] : memref<208x128xf32, #tpu.memory_space<vmem>>, vector<208x128xf32>
    tpu.vector_store %arg5[%c0_8, %c0_9], %12 {strides = array<i32>} : memref<208x128xf32, #tpu.memory_space<vmem>>, vector<208x128xf32>,
    return
  }
  func.func @transform_0(%arg0: i32, %arg1: i32) -> (i32, i32) {
    %c0_i32 = arith.constant 0 : i32
    %c0_i32_0 = arith.constant 0 : i32
    return %arg0, %c0_i32 : i32, i32
  }
  func.func @transform_1(%arg0: i32, %arg1: i32) -> (i32, i32) {
    %c0_i32 = arith.constant 0 : i32
    %c0_i32_0 = arith.constant 0 : i32
    return %c0_i32, %arg1 : i32, i32
  }
  func.func @transform_2(%arg0: i32, %arg1: i32) -> (i32, i32) {
    %c0_i32 = arith.constant 0 : i32
    %c0_i32_0 = arith.constant 0 : i32
    return %c0_i32, %arg1 : i32, i32
  }
  func.func @transform_3(%arg0: i32, %arg1: i32) -> (i32, i32) {
    %c0_i32 = arith.constant 0 : i32
    return %arg0, %arg1 : i32, i32
  }
}

</mosaic_0001>

<bundles_post_ra>
// kernel: network_forward.10
= control target key start
LH: loop header
LB: loop body
LE: loop exit
PB: predicated region body
PF: predicated region fallthrough
CT: control target
= control target key end

     0   :  { %s1233_s12 = smov 0   ;;  %s1235_s13 = smov 0   ;;  %s1365_s0 = inlined_call_operand.vmem [shape: bf16[1536,16], index: 0, kind: input, shape index: {}]   ;;  %s1366_s1 = inlined_call_operand.vmem [shape: bf16[16,128], index: 1, kind: input, shape index: {}]   ;;  %s1367_s2 = inlined_call_operand.vmem [shape: f32[1,128], index: 2, kind: input, shape index: {}]   ;;  %s1368_s3 = inlined_call_operand.vmem [shape: bf16[1536,128], index: 3, kind: output, shape index: {}]  }
   0x1   :  { %s1237_s14 = smov 0  }
   0x2 LB: > { %s25_s15 = sadd.s32 1, %s1207_s13  ;;  %p895_p0 = scmp.ge.s32.totalorder %s1211_s14, 1  ;;  %s1211_s14 = sphi %s1237_s14, %s13_s14   ;;  %s1207_s13 = sphi %s1235_s13, %s1370_s13   ;;  %s1203_s12 = sphi %s1233_s12, %s1369_s12  }
   0x3   : > { %p27_p1 = scmp.ge.s32.totalorder %s25_s15, 6  ;;  %p169_p2 = scmp.lt.s32.totalorder %s1211_s14, 7 }
   0x5   : > { %s1372_s15 = smov (%p27_p1, %s25_s15), 0  ;;  %p170_p3 = pnand %p895_p0, %p169_p2 }
   0x6   : > { %v1172_v0 = vld [vmem:[%s1366_s1] sm:$0xff] (!%p170_p3)   ;;  %s896_s18 = sshll.u32 (!%p170_p3), %s1203_s12, 5  ;;  %vm353_vm0 = vcmask (!%p170_p3), 130048  }
   0x7   : > { %173 = sbr.rel (%p170_p3) target bundleno = 268 (0x10c), region = 32  ;;  %p204_p4 = scmp.lt.s32.totalorder (!%p170_p3), %s896_s18, 191  ;;  %1112 = vmatprep.subr.bf16.mxu0 (!%p170_p3), %v1172_v0  ;;  %1146 = vmatprep.subr.bf16.mxu1 (!%p170_p3), %v1172_v0  ;;  %v1299_v17 = vld [vmem:[%s1367_s2] ss:$0 sm:$0xff] (!%p170_p3) }
   0x8   : > { %1113 = vmatpush3.bf16.msra.mxu0 (!%p170_p3), %v1172_v0  ;;  %1147 = vmatpush3.bf16.msra.mxu1 (!%p170_p3), %v1172_v0 }
   0xe   : > { %s1374_s18 = smov (!%p204_p4, %s896_s18), 191 }
   0xf   : > { %s897_s19 = sshll.u32 %s1374_s18, 2 }
  0x10   : > { %s1262_s22 = scalar_lea.vmem %s1365_s0, %s897_s19  ;;  %s1314_s27 = scalar_lea.vmem %s1368_s3, %s897_s19 }
  0x11   : > { %v1173_v1 = vld [vmem:[%s1262_s22] sm:$0xff]   ;;  %v1175_v3 = vld [vmem:[%s1262_s22 + $0x8] sm:$0xff]   ;;  %v1177_v5 = vld [vmem:[%s1262_s22 + $0x10] sm:$0xff]  }
  0x12   : > { %v1174_v2 = vld [vmem:[%s1262_s22 + $0x40] sm:$0xff]   ;;  %1114 = vmatprep.mubr.msk.bf16.mxu0 %vm353_vm0, %v1173_v1  ;;  %v1176_v4 = vld [vmem:[%s1262_s22 + $0x48] sm:$0xff]   ;;  %v1178_v6 = vld [vmem:[%s1262_s22 + $0x50] sm:$0xff]  }
  0x13   : > { %1130 = vmatprep.mubr.msk.bf16.mxu1 %vm353_vm0, %v1174_v2  ;;  %1115 = vmatmul.mubr.msk.bf16.vlgmr.msra.gmra.mrb[0].mxu0 %vm353_vm0, %v1175_v3  ;;  %v1179_v7 = vld [vmem:[%s1262_s22 + $0x18] sm:$0xff]   ;;  %v1181_v9 = vld [vmem:[%s1262_s22 + $0x20] sm:$0xff]   ;;  %v1183_v11 = vld [vmem:[%s1262_s22 + $0x28] sm:$0xff]  }
  0x14   : > { %1131 = vmatmul.mubr.msk.bf16.vlgmr.msra.gmra.mrb[0].mxu1 %vm353_vm0, %v1176_v4  ;;  %1118 = vmatprep.mubr.msk.bf16.mxu0 %vm353_vm0, %v1177_v5  ;;  %v1180_v8 = vld [vmem:[%s1262_s22 + $0x58] sm:$0xff]   ;;  %v1182_v10 = vld [vmem:[%s1262_s22 + $0x60] sm:$0xff]   ;;  %v1184_v12 = vld [vmem:[%s1262_s22 + $0x68] sm:$0xff]  }
  0x15   : > { %1134 = vmatprep.mubr.msk.bf16.mxu1 %vm353_vm0, %v1178_v6  ;;  %v1185_v13 = vld [vmem:[%s1262_s22 + $0x30] sm:$0xff]   ;;  %v1187_v15 = vld [vmem:[%s1262_s22 + $0x38] sm:$0xff]  }
  0x16   : > { %v1186_v14 = vld [vmem:[%s1262_s22 + $0x70] sm:$0xff]   ;;  %v1188_v16 = vld [vmem:[%s1262_s22 + $0x78] sm:$0xff]  }
  0x1b   : > { %1119 = vmatmul.mubr.msk.bf16.gmra.mrb[4].mxu0 %vm353_vm0, %v1179_v7 }
  0x1c   : > { %1135 = vmatmul.mubr.msk.bf16.gmra.mrb[4].mxu1 %vm353_vm0, %v1180_v8  ;;  %1122 = vmatprep.mubr.msk.bf16.mxu0 %vm353_vm0, %v1181_v9 }
  0x1d   : > { %1138 = vmatprep.mubr.msk.bf16.mxu1 %vm353_vm0, %v1182_v10 }
  0x23   : > { %1123 = vmatmul.mubr.msk.bf16.gmra.mrb[8].mxu0 %vm353_vm0, %v1183_v11 }
  0x24   : > { %1139 = vmatmul.mubr.msk.bf16.gmra.mrb[8].mxu1 %vm353_vm0, %v1184_v12  ;;  %1126 = vmatprep.mubr.msk.bf16.mxu0 %vm353_vm0, %v1185_v13 }
  0x25   : > { %1142 = vmatprep.mubr.msk.bf16.mxu1 %vm353_vm0, %v1186_v14 }
  0x2b   : > { %1127 = vmatmul.mubr.msk.bf16.gmra.mrb[12].mxu0 %vm353_vm0, %v1187_v15 }
  0x2c   : > { %1143 = vmatmul.mubr.msk.bf16.gmra.mrb[12].mxu1 %vm353_vm0, %v1188_v16 }
  0xe6   : > { %v1116_v18 = vpop.f32.mrb[0].mxu0 }
  0xe7   : > { %v445_v19 = vadd.f32 %v1116_v18, %v1299_v17  ;;  %v1132_v20 = vpop.f32.mrb[0].mxu1  ;;  %v436_v21 = vpop.f32.mrb[1].mxu0 }
  0xe8   : > { %v509_v22 = vadd.f32 %v1132_v20, %v1299_v17  ;;  %v437_v23 = vadd.f32 %v1299_v17, %v436_v21  ;;  %v500_v24 = vpop.f32.mrb[1].mxu1  ;;  %v1117_v25 = vpop.f32.mrb[2].mxu0 }
  0xe9   : > { %v565_v26 = vmul.f32 0.2, %v445_v19  ;;  %v501_v27 = vadd.f32 %v1299_v17, %v500_v24  ;;  %v448_v28 = vadd.f32 %v1117_v25, %v1299_v17  ;;  %v1133_v29 = vpop.f32.mrb[2].mxu1  ;;  %v439_v30 = vpop.f32.mrb[3].mxu0 }
  0xea   : > { %v581_v31 = vmul.f32 0.2, %v509_v22  ;;  %v563_v32 = vmul.f32 0.2, %v437_v23  ;;  %v512_v33 = vadd.f32 %v1133_v29, %v1299_v17  ;;  %v440_v34 = vadd.f32 %v1299_v17, %v439_v30  ;;  %v503_v35 = vpop.f32.mrb[3].mxu1 }
  0xeb   : > { %v579_v36 = vmul.f32 0.2, %v501_v27  ;;  %v566_v37 = vmul.f32 0.2, %v448_v28  ;;  %v504_v38 = vadd.f32 %v1299_v17, %v503_v35  ;;  %v597_v41 = vmax.f32 %v445_v19, %v565_v26 }
  0xec   : > { %v582_v39 = vmul.f32 0.2, %v512_v33  ;;  %v564_v40 = vmul.f32 0.2, %v440_v34  ;;  %v613_v44 = vmax.f32 %v509_v22, %v581_v31  ;;  %v595_v45 = vmax.f32 %v437_v23, %v563_v32 }
  0xed   : > { %v598_v42 = vmax.f32 %v448_v28, %v566_v37  ;;  %v580_v43 = vmul.f32 0.2, %v504_v38  ;;  %v611_v49 = vmax.f32 %v501_v27, %v579_v36 }
  0xee   : > { %v614_v46 = vmax.f32 %v512_v33, %v582_v39  ;;  %v596_v47 = vmax.f32 %v440_v34, %v564_v40  ;;  %v1120_v48 = vpop.f32.mrb[4].mxu0 }
  0xef   : > { %v1008_v50 = vpack.c.bf16 %v598_v42, %v597_v41  ;;  %v612_v51 = vmax.f32 %v504_v38, %v580_v43  ;;  %v461_v52 = vadd.f32 %v1120_v48, %v1299_v17  ;;  %v1136_v53 = vpop.f32.mrb[4].mxu1  ;;  %v452_v54 = vpop.f32.mrb[5].mxu0 }
  0xf0   : > { %v1048_v55 = vpack.c.bf16 %v614_v46, %v613_v44  ;;  %v1003_v56 = vpack.c.bf16 %v596_v47, %v595_v45  ;;  %v525_v57 = vadd.f32 %v1136_v53, %v1299_v17  ;;  %v453_v58 = vadd.f32 %v1299_v17, %v452_v54  ;;  %v516_v59 = vpop.f32.mrb[5].mxu1  ;;  %v1121_v60 = vpop.f32.mrb[6].mxu0 }
  0xf1   : > { %1080 = vst [vmem:[%s1314_s27 + $0x8] sm:$0xff] %v1008_v50   ;;  %v1043_v61 = vpack.c.bf16 %v612_v51, %v611_v49  ;;  %v569_v62 = vmul.f32 0.2, %v461_v52  ;;  %v517_v63 = vadd.f32 %v1299_v17, %v516_v59  ;;  %v464_v0 = vadd.f32 %v1121_v60, %v1299_v17  ;;  %v1137_v1 = vpop.f32.mrb[6].mxu1  ;;  %v455_v2 = vpop.f32.mrb[7].mxu0 }
  0xf2   : > { %1088 = vst [vmem:[%s1314_s27 + $0x48] sm:$0xff] %v1048_v55   ;;  %1004 = vst [vmem:[%s1314_s27] sm:$0xff] %v1003_v56   ;;  %v585_v3 = vmul.f32 0.2, %v525_v57  ;;  %v567_v4 = vmul.f32 0.2, %v453_v58  ;;  %v528_v5 = vadd.f32 %v1137_v1, %v1299_v17  ;;  %v456_v6 = vadd.f32 %v1299_v17, %v455_v2  ;;  %v519_v7 = vpop.f32.mrb[7].mxu1 }
  0xf3   : > { %1087 = vst [vmem:[%s1314_s27 + $0x40] sm:$0xff] %v1043_v61   ;;  %v583_v8 = vmul.f32 0.2, %v517_v63  ;;  %v570_v9 = vmul.f32 0.2, %v464_v0  ;;  %v520_v10 = vadd.f32 %v1299_v17, %v519_v7  ;;  %v601_v13 = vmax.f32 %v461_v52, %v569_v62 }
  0xf4   : > { %v586_v11 = vmul.f32 0.2, %v528_v5  ;;  %v568_v12 = vmul.f32 0.2, %v456_v6  ;;  %v617_v16 = vmax.f32 %v525_v57, %v585_v3  ;;  %v599_v18 = vmax.f32 %v453_v58, %v567_v4 }
  0xf5   : > { %v602_v14 = vmax.f32 %v464_v0, %v570_v9  ;;  %v584_v15 = vmul.f32 0.2, %v520_v10  ;;  %v615_v22 = vmax.f32 %v517_v63, %v583_v8 }
  0xf6   : > { %v618_v19 = vmax.f32 %v528_v5, %v586_v11  ;;  %v600_v20 = vmax.f32 %v456_v6, %v568_v12  ;;  %v1124_v21 = vpop.f32.mrb[8].mxu0 }
  0xf7   : > { %v1018_v23 = vpack.c.bf16 %v602_v14, %v601_v13  ;;  %v616_v24 = vmax.f32 %v520_v10, %v584_v15  ;;  %v477_v25 = vadd.f32 %v1124_v21, %v1299_v17  ;;  %v1140_v26 = vpop.f32.mrb[8].mxu1  ;;  %v468_v27 = vpop.f32.mrb[9].mxu0 }
  0xf8   : > { %v1058_v28 = vpack.c.bf16 %v618_v19, %v617_v16  ;;  %v1013_v29 = vpack.c.bf16 %v600_v20, %v599_v18  ;;  %v541_v30 = vadd.f32 %v1140_v26, %v1299_v17  ;;  %v469_v31 = vadd.f32 %v1299_v17, %v468_v27  ;;  %v532_v32 = vpop.f32.mrb[9].mxu1  ;;  %v1125_v33 = vpop.f32.mrb[10].mxu0 }
  0xf9   : > { %1082 = vst [vmem:[%s1314_s27 + $0x18] sm:$0xff] %v1018_v23   ;;  %v1053_v34 = vpack.c.bf16 %v616_v24, %v615_v22  ;;  %v573_v35 = vmul.f32 0.2, %v477_v25  ;;  %v533_v36 = vadd.f32 %v1299_v17, %v532_v32  ;;  %v480_v37 = vadd.f32 %v1125_v33, %v1299_v17  ;;  %v1141_v38 = vpop.f32.mrb[10].mxu1  ;;  %v471_v39 = vpop.f32.mrb[11].mxu0 }
  0xfa   : > { %1090 = vst [vmem:[%s1314_s27 + $0x58] sm:$0xff] %v1058_v28   ;;  %1081 = vst [vmem:[%s1314_s27 + $0x10] sm:$0xff] %v1013_v29   ;;  %v589_v40 = vmul.f32 0.2, %v541_v30  ;;  %v571_v41 = vmul.f32 0.2, %v469_v31  ;;  %v544_v42 = vadd.f32 %v1141_v38, %v1299_v17  ;;  %v472_v43 = vadd.f32 %v1299_v17, %v471_v39 }
  0xfb   : > { %v535_v44 = vpop.f32.mrb[11].mxu1  ;;  %1089 = vst [vmem:[%s1314_s27 + $0x50] sm:$0xff] %v1053_v34   ;;  %v587_v45 = vmul.f32 0.2, %v533_v36  ;;  %v574_v46 = vmul.f32 0.2, %v480_v37  ;;  %v605_v50 = vmax.f32 %v477_v25, %v573_v35 }
  0xfc   : > { %v536_v47 = vadd.f32 %v1299_v17, %v535_v44  ;;  %v590_v48 = vmul.f32 0.2, %v544_v42  ;;  %v572_v49 = vmul.f32 0.2, %v472_v43  ;;  %v621_v53 = vmax.f32 %v541_v30, %v589_v40 }
  0xfd   : > { %v606_v51 = vmax.f32 %v480_v37, %v574_v46  ;;  %v603_v54 = vmax.f32 %v469_v31, %v571_v41  ;;  %v619_v58 = vmax.f32 %v533_v36, %v587_v45 }
  0xfe   : > { %v588_v52 = vmul.f32 0.2, %v536_v47  ;;  %v622_v55 = vmax.f32 %v544_v42, %v590_v48  ;;  %v604_v56 = vmax.f32 %v472_v43, %v572_v49  ;;  %v1128_v57 = vpop.f32.mrb[12].mxu0 }
  0xff   : > { %v1028_v59 = vpack.c.bf16 %v606_v51, %v605_v50  ;;  %v493_v61 = vadd.f32 %v1128_v57, %v1299_v17  ;;  %v1144_v62 = vpop.f32.mrb[12].mxu1  ;;  %v484_v63 = vpop.f32.mrb[13].mxu0 }
 0x100   : > { %v620_v60 = vmax.f32 %v536_v47, %v588_v52  ;;  %v1068_v0 = vpack.c.bf16 %v622_v55, %v621_v53  ;;  %v1023_v1 = vpack.c.bf16 %v604_v56, %v603_v54  ;;  %v557_v2 = vadd.f32 %v1144_v62, %v1299_v17  ;;  %v548_v4 = vpop.f32.mrb[13].mxu1  ;;  %v1129_v5 = vpop.f32.mrb[14].mxu0 }
 0x101   : > { %v485_v3 = vadd.f32 %v1299_v17, %v484_v63  ;;  %1084 = vst [vmem:[%s1314_s27 + $0x28] sm:$0xff] %v1028_v59   ;;  %v577_v7 = vmul.f32 0.2, %v493_v61  ;;  %v549_v8 = vadd.f32 %v1299_v17, %v548_v4  ;;  %v496_v9 = vadd.f32 %v1129_v5, %v1299_v17  ;;  %v1145_v10 = vpop.f32.mrb[14].mxu1  ;;  %v487_v11 = vpop.f32.mrb[15].mxu0 }
 0x102   : > { %v1063_v6 = vpack.c.bf16 %v620_v60, %v619_v58  ;;  %1092 = vst [vmem:[%s1314_s27 + $0x68] sm:$0xff] %v1068_v0   ;;  %1083 = vst [vmem:[%s1314_s27 + $0x20] sm:$0xff] %v1023_v1   ;;  %v593_v12 = vmul.f32 0.2, %v557_v2  ;;  %v560_v14 = vadd.f32 %v1145_v10, %v1299_v17  ;;  %v488_v15 = vadd.f32 %v1299_v17, %v487_v11  ;;  %v551_v16 = vpop.f32.mrb[15].mxu1 }
 0x103   : > { %v575_v13 = vmul.f32 0.2, %v485_v3  ;;  %v591_v18 = vmul.f32 0.2, %v549_v8  ;;  %v578_v19 = vmul.f32 0.2, %v496_v9  ;;  %v552_v20 = vadd.f32 %v1299_v17, %v551_v16 }
 0x104   : > { %1091 = vst [vmem:[%s1314_s27 + $0x60] sm:$0xff] %v1063_v6   ;;  %v594_v21 = vmul.f32 0.2, %v560_v14  ;;  %v576_v22 = vmul.f32 0.2, %v488_v15  ;;  %v609_v23 = vmax.f32 %v493_v61, %v577_v7  ;;  %v625_v26 = vmax.f32 %v557_v2, %v593_v12 }
 0x105   : > { %v610_v24 = vmax.f32 %v496_v9, %v578_v19  ;;  %v592_v25 = vmul.f32 0.2, %v552_v20  ;;  %v607_v27 = vmax.f32 %v485_v3, %v575_v13  ;;  %v623_v30 = vmax.f32 %v549_v8, %v591_v18 }
 0x106   : > { %v626_v28 = vmax.f32 %v560_v14, %v594_v21  ;;  %v608_v29 = vmax.f32 %v488_v15, %v576_v22 }
 0x107   : > { %v1038_v31 = vpack.c.bf16 %v610_v24, %v609_v23  ;;  %v624_v32 = vmax.f32 %v552_v20, %v592_v25 }
 0x108   : > { %v1078_v33 = vpack.c.bf16 %v626_v28, %v625_v26  ;;  %v1033_v34 = vpack.c.bf16 %v608_v29, %v607_v27 }
 0x109   : > { %1086 = vst [vmem:[%s1314_s27 + $0x38] sm:$0xff] %v1038_v31   ;;  %v1073_v35 = vpack.c.bf16 %v624_v32, %v623_v30 }
 0x10a   : > { %1094 = vst [vmem:[%s1314_s27 + $0x78] sm:$0xff] %v1078_v33   ;;  %1085 = vst [vmem:[%s1314_s27 + $0x30] sm:$0xff] %v1033_v34  }
 0x10b   : > { %1093 = vst [vmem:[%s1314_s27 + $0x70] sm:$0xff] %v1073_v35  }
 0x10c PF: > { %s13_s14 = sadd.s32 1, %s1211_s14   ;;  %s1369_s12 = smov %s1207_s13 }
 0x10d   : > { %p10_p5 = scmp.ge.s32.totalorder %s13_s14, 8   ;;  %s1370_s13 = smov %s1372_s15 }
 0x10f   :  { %12 = sbr.rel (!%p10_p5) target bundleno = 2 (0x2), region = 68 }

// kernel: network_forward.11
= control target key start
LH: loop header
LB: loop body
LE: loop exit
PB: predicated region body
PF: predicated region fallthrough
CT: control target
= control target key end

     0   :  { %s1249_s12 = smov 0   ;;  %s1251_s13 = smov 0   ;;  %s1398_s0 = inlined_call_operand.vmem [shape: bf16[352,256], index: 0, kind: input, shape index: {}]   ;;  %s1399_s1 = inlined_call_operand.vmem [shape: bf16[256,128], index: 1, kind: input, shape index: {}]   ;;  %s1400_s2 = inlined_call_operand.vmem [shape: f32[1,128], index: 2, kind: input, shape index: {}]   ;;  %s1401_s3 = inlined_call_operand.vmem [shape: bf16[352,128], index: 3, kind: output, shape index: {}]  }
   0x1   :  { %s1253_s14 = smov 0  }
   0x2 LB: > { %s25_s15 = sadd.s32 1, %s1223_s13  ;;  %p879_p0 = scmp.ge.s32.totalorder %s1227_s14, 1  ;;  %s1227_s14 = sphi %s1253_s14, %s13_s14   ;;  %s1223_s13 = sphi %s1251_s13, %s1403_s13   ;;  %s1219_s12 = sphi %s1249_s12, %s1402_s12  }
   0x3   : > { %p27_p1 = scmp.ge.s32.totalorder %s25_s15, 2  ;;  %p170_p2 = scmp.lt.s32.totalorder %s1227_s14, 3 }
   0x5   : > { %s1405_s15 = smov (%p27_p1, %s25_s15), 0  ;;  %p171_p3 = pnand %p879_p0, %p170_p2 }
   0x6   : > { %v1156_v0 = vld [vmem:[%s1399_s1 + $0x40] sm:$0xff] (!%p171_p3)   ;;  %s205_s18 = smul.u32 (!%p171_p3), 22, %s1219_s12  ;;  %v1158_v2 = vld [vmem:[%s1399_s1 + $0x48] sm:$0xff] (!%p171_p3)   ;;  %v1160_v4 = vld [vmem:[%s1399_s1 + $0x50] sm:$0xff] (!%p171_p3)  }
   0x7   : > { %174 = sbr.rel (%p171_p3) target bundleno = 305 (0x131), region = 32  ;;  %v1157_v1 = vld [vmem:[%s1399_s1] sm:$0xff] (!%p171_p3)   ;;  %1034 = vmatprep.subr.bf16.mxu0 (!%p171_p3), %v1156_v0  ;;  %1116 = vmatprep.subr.bf16.mxu1 (!%p171_p3), %v1156_v0  ;;  %v1159_v3 = vld [vmem:[%s1399_s1 + $0x8] sm:$0xff] (!%p171_p3)   ;;  %v1161_v5 = vld [vmem:[%s1399_s1 + $0x10] sm:$0xff] (!%p171_p3)  }
   0x8   : > { %1035 = vmatpush3.bf16.msra.mxu0 (!%p171_p3), %v1157_v1  ;;  %1124 = vmatpush3.bf16.msra.mxu1 (!%p171_p3), %v1157_v1  ;;  %p206_p4 = scmp.lt.s32.totalorder (!%p171_p3), %s205_s18, 43  ;;  %v1162_v6 = vld [vmem:[%s1399_s1 + $0x58] sm:$0xff] (!%p171_p3)   ;;  %v1164_v8 = vld [vmem:[%s1399_s1 + $0x60] sm:$0xff] (!%p171_p3)   ;;  %v1166_v10 = vld [vmem:[%s1399_s1 + $0x68] sm:$0xff] (!%p171_p3)  }
   0x9   : > { %1036 = vmatprep.subr.bf16.mxu0 (!%p171_p3), %v1158_v2  ;;  %1117 = vmatprep.subr.bf16.mxu1 (!%p171_p3), %v1158_v2  ;;  %v1163_v7 = vld [vmem:[%s1399_s1 + $0x18] sm:$0xff] (!%p171_p3)   ;;  %v1165_v9 = vld [vmem:[%s1399_s1 + $0x20] sm:$0xff] (!%p171_p3)   ;;  %v1167_v13 = vld [vmem:[%s1399_s1 + $0x28] sm:$0xff] (!%p171_p3)  }
   0xa   : > { %v1168_v14 = vld [vmem:[%s1399_s1 + $0x70] sm:$0xff] (!%p171_p3)   ;;  %v1170_v16 = vld [vmem:[%s1399_s1 + $0x78] sm:$0xff] (!%p171_p3)   ;;  %v1348_v40 = vld [vmem:[%s1400_s2] ss:$0 sm:$0xff] (!%p171_p3) }
   0xb   : > { %v1169_v15 = vld [vmem:[%s1399_s1 + $0x30] sm:$0xff] (!%p171_p3)   ;;  %v1171_v17 = vld [vmem:[%s1399_s1 + $0x38] sm:$0xff] (!%p171_p3)  }
   0xc   : > { %1037 = vmatpush3.bf16.msra.mxu0 (!%p171_p3), %v1159_v3  ;;  %1125 = vmatpush3.bf16.msra.mxu1 (!%p171_p3), %v1159_v3 }
   0xd   : > { %1038 = vmatprep.subr.bf16.mxu0 (!%p171_p3), %v1160_v4  ;;  %1118 = vmatprep.subr.bf16.mxu1 (!%p171_p3), %v1160_v4 }
   0xe   : > { %s1407_s18 = smov (!%p206_p4, %s205_s18), 43 }
   0xf   : > { %s946_s6 = sshll.u32 %s1407_s18, 3  ;;  %s882_s5 = sshll.u32 %s1407_s18, 2 }
  0x10   : > { %1039 = vmatpush3.bf16.msra.mxu0 %v1161_v5  ;;  %1126 = vmatpush3.bf16.msra.mxu1 %v1161_v5  ;;  %s1300_s11 = scalar_lea.vmem %s1398_s0, %s946_s6  ;;  %s1358_s8 = scalar_lea.vmem %s1401_s3, %s882_s5 }
  0x11   : > { %1040 = vmatprep.subr.bf16.mxu0 %v1162_v6  ;;  %1119 = vmatprep.subr.bf16.mxu1 %v1162_v6  ;;  %v1174_v11 = vld [vmem:[%s1300_s11 + $0x4] ss:$8 sps:$4 sm:$0xff]   ;;  %v1172_v18 = vld [vmem:[%s1300_s11] ss:$8 sps:$4 sm:$0xff]   ;;  %v1178_v20 = vld [vmem:[%s1300_s11 + $0x14] ss:$8 sps:$4 sm:$0xff]  }
  0x12   : > { %v1177_v12 = vld [vmem:[%s1300_s11 + $0x64] ss:$8 sps:$4 sm:$0xff]   ;;  %528 = vmatprep.mubr.bf16.mxu0 %v1174_v11  ;;  %v1175_v19 = vld [vmem:[%s1300_s11 + $0x60] ss:$8 sps:$4 sm:$0xff]   ;;  %v1181_v21 = vld [vmem:[%s1300_s11 + $0x74] ss:$8 sps:$4 sm:$0xff]  }
  0x13   : > { %576 = vmatprep.mubr.bf16.mxu1 %v1177_v12  ;;  %v1180_v22 = vld [vmem:[%s1300_s11 + $0x10] ss:$8 sps:$4 sm:$0xff]   ;;  %v1184_v24 = vld [vmem:[%s1300_s11 + $0x24] ss:$8 sps:$4 sm:$0xff]   ;;  %v1186_v26 = vld [vmem:[%s1300_s11 + $0x20] ss:$8 sps:$4 sm:$0xff]  }
  0x14   : > { %1041 = vmatpush3.bf16.msra.mxu0 %v1163_v7  ;;  %1127 = vmatpush3.bf16.msra.mxu1 %v1163_v7  ;;  %v1183_v23 = vld [vmem:[%s1300_s11 + $0x70] ss:$8 sps:$4 sm:$0xff]   ;;  %v1187_v25 = vld [vmem:[%s1300_s11 + $0x84] ss:$8 sps:$4 sm:$0xff]   ;;  %v1189_v27 = vld [vmem:[%s1300_s11 + $0x80] ss:$8 sps:$4 sm:$0xff]  }
  0x15   : > { %1042 = vmatprep.subr.bf16.mxu0 %v1164_v8  ;;  %1120 = vmatprep.subr.bf16.mxu1 %v1164_v8  ;;  %v1190_v28 = vld [vmem:[%s1300_s11 + $0x34] ss:$8 sps:$4 sm:$0xff]   ;;  %v1192_v30 = vld [vmem:[%s1300_s11 + $0x30] ss:$8 sps:$4 sm:$0xff]   ;;  %v1196_v32 = vld [vmem:[%s1300_s11 + $0x44] ss:$8 sps:$4 sm:$0xff]  }
  0x16   : > { %v1193_v29 = vld [vmem:[%s1300_s11 + $0x94] ss:$8 sps:$4 sm:$0xff]   ;;  %v1195_v31 = vld [vmem:[%s1300_s11 + $0x90] ss:$8 sps:$4 sm:$0xff]   ;;  %v1199_v33 = vld [vmem:[%s1300_s11 + $0xa4] ss:$8 sps:$4 sm:$0xff]  }
  0x17   : > { %v1198_v34 = vld [vmem:[%s1300_s11 + $0x40] ss:$8 sps:$4 sm:$0xff]   ;;  %v1202_v36 = vld [vmem:[%s1300_s11 + $0x54] ss:$8 sps:$4 sm:$0xff]   ;;  %v1204_v37 = vld [vmem:[%s1300_s11 + $0x50] ss:$8 sps:$4 sm:$0xff]  }
  0x18   : > { %1043 = vmatpush3.bf16.msra.mxu0 %v1165_v9  ;;  %1128 = vmatpush3.bf16.msra.mxu1 %v1165_v9  ;;  %v1201_v35 = vld [vmem:[%s1300_s11 + $0xa0] ss:$8 sps:$4 sm:$0xff]  }
  0x19   : > { %1044 = vmatprep.subr.bf16.mxu0 %v1166_v10  ;;  %1121 = vmatprep.subr.bf16.mxu1 %v1166_v10 }
  0x1c   : > { %1045 = vmatpush3.bf16.msra.mxu0 %v1167_v13  ;;  %1129 = vmatpush3.bf16.msra.mxu1 %v1167_v13 }
  0x1d   : > { %1046 = vmatprep.subr.bf16.mxu0 %v1168_v14  ;;  %1122 = vmatprep.subr.bf16.mxu1 %v1168_v14 }
  0x20   : > { %1047 = vmatpush3.bf16.msra.mxu0 %v1169_v15  ;;  %1130 = vmatpush3.bf16.msra.mxu1 %v1169_v15 }
  0x21   : > { %1048 = vmatprep.subr.bf16.mxu0 %v1170_v16  ;;  %1123 = vmatprep.subr.bf16.mxu1 %v1170_v16 }
  0x24   : > { %1049 = vmatpush3.bf16.msra.mxu0 %v1171_v17  ;;  %1131 = vmatpush3.bf16.msra.mxu1 %v1171_v17 }
  0x27   : > { %529 = vmatmul.mubr.bf16.vlgmr.msra.gmra.mrb[0].mxu0 %v1172_v18  ;;  %577 = vmatmul.mubr.bf16.vlgmr.msra.gmra.mrb[0].mxu1 %v1175_v19 }
  0x28   : > { %536 = vmatprep.mubr.bf16.mxu0 %v1178_v20  ;;  %584 = vmatprep.mubr.bf16.mxu1 %v1181_v21 }
  0x2f   : > { %537 = vmatmul.mubr.bf16.gmra.mrb[4].mxu0 %v1180_v22  ;;  %585 = vmatmul.mubr.bf16.gmra.mrb[4].mxu1 %v1183_v23 }
  0x30   : > { %544 = vmatprep.mubr.bf16.mxu0 %v1184_v24  ;;  %592 = vmatprep.mubr.bf16.mxu1 %v1187_v25 }
  0x37   : > { %545 = vmatmul.mubr.bf16.gmra.mrb[8].mxu0 %v1186_v26  ;;  %593 = vmatmul.mubr.bf16.gmra.mrb[8].mxu1 %v1189_v27 }
  0x38   : > { %552 = vmatprep.mubr.bf16.mxu0 %v1190_v28  ;;  %600 = vmatprep.mubr.bf16.mxu1 %v1193_v29 }
  0x3f   : > { %553 = vmatmul.mubr.bf16.gmra.mrb[12].mxu0 %v1192_v30  ;;  %601 = vmatmul.mubr.bf16.gmra.mrb[12].mxu1 %v1195_v31 }
  0x40   : > { %560 = vmatprep.mubr.bf16.mxu0 %v1196_v32  ;;  %608 = vmatprep.mubr.bf16.mxu1 %v1199_v33 }
  0x47   : > { %561 = vmatmul.mubr.bf16.gmra.mrb[16].mxu0 %v1198_v34  ;;  %609 = vmatmul.mubr.bf16.gmra.mrb[16].mxu1 %v1201_v35 }
  0x48   : > { %568 = vmatprep.mubr.bf16.mxu0 %v1202_v36 }
  0x4f   : > { %569 = vmatmul.mubr.bf16.gmra.mrb[20].mxu0 %v1204_v37 }
  0xfa   : > { %v1050_v38 = vpop.f32.mrb[0].mxu0  ;;  %v1086_v39 = vpop.f32.mrb[0].mxu1 }
  0xfb   : > { %v1051_v41 = vpop.f32.mrb[1].mxu0  ;;  %v1087_v42 = vpop.f32.mrb[1].mxu1 }
  0xfc   : > { %v1052_v43 = vadd.f32 %v1051_v41, %v1050_v38  ;;  %v1053_v44 = vpop.f32.mrb[2].mxu0  ;;  %v1088_v45 = vadd.f32 %v1087_v42, %v1086_v39  ;;  %v1089_v46 = vpop.f32.mrb[2].mxu1 }
  0xfd   : > { %v1054_v47 = vpop.f32.mrb[3].mxu0  ;;  %v1090_v48 = vpop.f32.mrb[3].mxu1 }
  0xfe   : > { %v531_v49 = vadd.f32 %v1052_v43, %v1348_v40  ;;  %v1055_v50 = vadd.f32 %v1054_v47, %v1053_v44  ;;  %v579_v51 = vadd.f32 %v1088_v45, %v1348_v40  ;;  %v1091_v52 = vadd.f32 %v1090_v48, %v1089_v46 }
 0x100   : > { %v617_v53 = vmul.f32 0.2, %v531_v49  ;;  %v534_v54 = vadd.f32 %v1055_v50, %v1348_v40  ;;  %v629_v55 = vmul.f32 0.2, %v579_v51  ;;  %v582_v56 = vadd.f32 %v1091_v52, %v1348_v40 }
 0x102   : > { %v618_v57 = vmul.f32 0.2, %v534_v54  ;;  %v651_v58 = vmax.f32 %v579_v51, %v629_v55  ;;  %v630_v59 = vmul.f32 0.2, %v582_v56  ;;  %v1056_v60 = vpop.f32.mrb[4].mxu0  ;;  %v1092_v61 = vpop.f32.mrb[4].mxu1  ;;  %v639_v62 = vmax.f32 %v531_v49, %v617_v53 }
 0x103   : > { %v1057_v63 = vpop.f32.mrb[5].mxu0  ;;  %v1093_v0 = vpop.f32.mrb[5].mxu1 }
 0x104   : > { %v640_v1 = vmax.f32 %v534_v54, %v618_v57  ;;  %v652_v2 = vmax.f32 %v582_v56, %v630_v59  ;;  %v1058_v3 = vadd.f32 %v1057_v63, %v1056_v60  ;;  %v1059_v4 = vpop.f32.mrb[6].mxu0  ;;  %v1094_v5 = vadd.f32 %v1093_v0, %v1092_v61  ;;  %v1095_v6 = vpop.f32.mrb[6].mxu1 }
 0x105   : > { %v1060_v7 = vpop.f32.mrb[7].mxu0  ;;  %v1096_v8 = vpop.f32.mrb[7].mxu1 }
 0x106   : > { %v972_v9 = vpack.c.bf16 %v640_v1, %v639_v62  ;;  %v1002_v10 = vpack.c.bf16 %v652_v2, %v651_v58  ;;  %v539_v11 = vadd.f32 %v1058_v3, %v1348_v40  ;;  %v1061_v12 = vadd.f32 %v1060_v7, %v1059_v4 }
 0x107   : > { %v587_v13 = vadd.f32 %v1094_v5, %v1348_v40  ;;  %v1097_v14 = vadd.f32 %v1096_v8, %v1095_v6 }
 0x108   : > { %973 = vst [vmem:[%s1358_s8] sm:$0xff] %v972_v9   ;;  %1029 = vst [vmem:[%s1358_s8 + $0x30] sm:$0xff] %v1002_v10   ;;  %v619_v15 = vmul.f32 0.2, %v539_v11  ;;  %v542_v16 = vadd.f32 %v1061_v12, %v1348_v40 }
 0x109   : > { %v631_v17 = vmul.f32 0.2, %v587_v13  ;;  %v590_v18 = vadd.f32 %v1097_v14, %v1348_v40 }
 0x10a   : > { %v620_v19 = vmul.f32 0.2, %v542_v16  ;;  %v1062_v20 = vpop.f32.mrb[8].mxu0  ;;  %v1098_v21 = vpop.f32.mrb[8].mxu1  ;;  %v641_v26 = vmax.f32 %v539_v11, %v619_v15 }
 0x10b   : > { %v653_v22 = vmax.f32 %v587_v13, %v631_v17  ;;  %v632_v23 = vmul.f32 0.2, %v590_v18  ;;  %v1063_v24 = vpop.f32.mrb[9].mxu0  ;;  %v1099_v25 = vpop.f32.mrb[9].mxu1 }
 0x10c   : > { %v642_v27 = vmax.f32 %v542_v16, %v620_v19  ;;  %v1064_v28 = vadd.f32 %v1063_v24, %v1062_v20  ;;  %v1065_v29 = vpop.f32.mrb[10].mxu0  ;;  %v1100_v30 = vadd.f32 %v1099_v25, %v1098_v21  ;;  %v1101_v31 = vpop.f32.mrb[10].mxu1 }
 0x10d   : > { %v654_v32 = vmax.f32 %v590_v18, %v632_v23  ;;  %v1066_v33 = vpop.f32.mrb[11].mxu0  ;;  %v1102_v34 = vpop.f32.mrb[11].mxu1 }
 0x10e   : > { %v977_v35 = vpack.c.bf16 %v642_v27, %v641_v26  ;;  %v547_v36 = vadd.f32 %v1064_v28, %v1348_v40  ;;  %v1067_v37 = vadd.f32 %v1066_v33, %v1065_v29  ;;  %v595_v38 = vadd.f32 %v1100_v30, %v1348_v40 }
 0x10f   : > { %v1007_v39 = vpack.c.bf16 %v654_v32, %v653_v22  ;;  %v1103_v41 = vadd.f32 %v1102_v34, %v1101_v31 }
 0x110   : > { %1024 = vst [vmem:[%s1358_s8 + $0x8] sm:$0xff] %v977_v35   ;;  %v621_v42 = vmul.f32 0.2, %v547_v36  ;;  %v550_v43 = vadd.f32 %v1067_v37, %v1348_v40  ;;  %v633_v44 = vmul.f32 0.2, %v595_v38 }
 0x111   : > { %1030 = vst [vmem:[%s1358_s8 + $0x38] sm:$0xff] %v1007_v39   ;;  %v598_v45 = vadd.f32 %v1103_v41, %v1348_v40 }
 0x112   : > { %v622_v46 = vmul.f32 0.2, %v550_v43  ;;  %v1068_v47 = vpop.f32.mrb[12].mxu0  ;;  %v1104_v48 = vpop.f32.mrb[12].mxu1  ;;  %v655_v49 = vmax.f32 %v595_v38, %v633_v44  ;;  %v643_v53 = vmax.f32 %v547_v36, %v621_v42 }
 0x113   : > { %v634_v50 = vmul.f32 0.2, %v598_v45  ;;  %v1069_v51 = vpop.f32.mrb[13].mxu0  ;;  %v1105_v52 = vpop.f32.mrb[13].mxu1 }
 0x114   : > { %v644_v54 = vmax.f32 %v550_v43, %v622_v46  ;;  %v1070_v55 = vadd.f32 %v1069_v51, %v1068_v47  ;;  %v1071_v56 = vpop.f32.mrb[14].mxu0  ;;  %v1106_v57 = vadd.f32 %v1105_v52, %v1104_v48  ;;  %v1107_v58 = vpop.f32.mrb[14].mxu1 }
 0x115   : > { %v656_v59 = vmax.f32 %v598_v45, %v634_v50  ;;  %v1072_v60 = vpop.f32.mrb[15].mxu0  ;;  %v1108_v61 = vpop.f32.mrb[15].mxu1 }
 0x116   : > { %v982_v62 = vpack.c.bf16 %v644_v54, %v643_v53  ;;  %v555_v63 = vadd.f32 %v1070_v55, %v1348_v40  ;;  %v1073_v0 = vadd.f32 %v1072_v60, %v1071_v56  ;;  %v603_v1 = vadd.f32 %v1106_v57, %v1348_v40 }
 0x117   : > { %v1012_v2 = vpack.c.bf16 %v656_v59, %v655_v49  ;;  %v1109_v3 = vadd.f32 %v1108_v61, %v1107_v58 }
 0x118   : > { %1025 = vst [vmem:[%s1358_s8 + $0x10] sm:$0xff] %v982_v62   ;;  %v623_v4 = vmul.f32 0.2, %v555_v63  ;;  %v558_v5 = vadd.f32 %v1073_v0, %v1348_v40  ;;  %v635_v6 = vmul.f32 0.2, %v603_v1 }
 0x119   : > { %1031 = vst [vmem:[%s1358_s8 + $0x40] sm:$0xff] %v1012_v2   ;;  %v606_v7 = vadd.f32 %v1109_v3, %v1348_v40 }
 0x11a   : > { %v624_v8 = vmul.f32 0.2, %v558_v5  ;;  %v1074_v9 = vpop.f32.mrb[16].mxu0  ;;  %v1110_v10 = vpop.f32.mrb[16].mxu1  ;;  %v657_v11 = vmax.f32 %v603_v1, %v635_v6  ;;  %v645_v15 = vmax.f32 %v555_v63, %v623_v4 }
 0x11b   : > { %v636_v12 = vmul.f32 0.2, %v606_v7  ;;  %v1075_v13 = vpop.f32.mrb[17].mxu0  ;;  %v1111_v14 = vpop.f32.mrb[17].mxu1 }
 0x11c   : > { %v646_v16 = vmax.f32 %v558_v5, %v624_v8  ;;  %v1076_v17 = vadd.f32 %v1075_v13, %v1074_v9  ;;  %v1077_v18 = vpop.f32.mrb[18].mxu0  ;;  %v1112_v19 = vadd.f32 %v1111_v14, %v1110_v10  ;;  %v1113_v20 = vpop.f32.mrb[18].mxu1 }
 0x11d   : > { %v658_v21 = vmax.f32 %v606_v7, %v636_v12  ;;  %v1078_v22 = vpop.f32.mrb[19].mxu0  ;;  %v1114_v23 = vpop.f32.mrb[19].mxu1 }
 0x11e   : > { %v987_v24 = vpack.c.bf16 %v646_v16, %v645_v15  ;;  %v563_v25 = vadd.f32 %v1076_v17, %v1348_v40  ;;  %v1079_v26 = vadd.f32 %v1078_v22, %v1077_v18  ;;  %v611_v27 = vadd.f32 %v1112_v19, %v1348_v40 }
 0x11f   : > { %v1017_v28 = vpack.c.bf16 %v658_v21, %v657_v11  ;;  %v1115_v29 = vadd.f32 %v1114_v23, %v1113_v20 }
 0x120   : > { %1026 = vst [vmem:[%s1358_s8 + $0x18] sm:$0xff] %v987_v24   ;;  %v625_v30 = vmul.f32 0.2, %v563_v25  ;;  %v566_v31 = vadd.f32 %v1079_v26, %v1348_v40  ;;  %v637_v32 = vmul.f32 0.2, %v611_v27 }
 0x121   : > { %1032 = vst [vmem:[%s1358_s8 + $0x48] sm:$0xff] %v1017_v28   ;;  %v614_v33 = vadd.f32 %v1115_v29, %v1348_v40 }
 0x122   : > { %v626_v34 = vmul.f32 0.2, %v566_v31  ;;  %v1080_v35 = vpop.f32.mrb[20].mxu0  ;;  %v659_v36 = vmax.f32 %v611_v27, %v637_v32  ;;  %v647_v39 = vmax.f32 %v563_v25, %v625_v30 }
 0x123   : > { %v638_v37 = vmul.f32 0.2, %v614_v33  ;;  %v1081_v38 = vpop.f32.mrb[21].mxu0 }
 0x124   : > { %v648_v41 = vmax.f32 %v566_v31, %v626_v34  ;;  %v1082_v42 = vadd.f32 %v1081_v38, %v1080_v35  ;;  %v1083_v43 = vpop.f32.mrb[22].mxu0 }
 0x125   : > { %v660_v44 = vmax.f32 %v614_v33, %v638_v37  ;;  %v1084_v45 = vpop.f32.mrb[23].mxu0 }
 0x126   : > { %v992_v46 = vpack.c.bf16 %v648_v41, %v647_v39  ;;  %v571_v47 = vadd.f32 %v1082_v42, %v1348_v40  ;;  %v1085_v48 = vadd.f32 %v1084_v45, %v1083_v43 }
 0x127   : > { %v1022_v49 = vpack.c.bf16 %v660_v44, %v659_v36 }
 0x128   : > { %1027 = vst [vmem:[%s1358_s8 + $0x20] sm:$0xff] %v992_v46   ;;  %v627_v50 = vmul.f32 0.2, %v571_v47  ;;  %v574_v51 = vadd.f32 %v1085_v48, %v1348_v40 }
 0x129   : > { %1033 = vst [vmem:[%s1358_s8 + $0x50] sm:$0xff] %v1022_v49  }
 0x12a   : > { %v628_v52 = vmul.f32 0.2, %v574_v51  ;;  %v649_v53 = vmax.f32 %v571_v47, %v627_v50 }
 0x12c   : > { %v650_v54 = vmax.f32 %v574_v51, %v628_v52 }
 0x12e   : > { %v997_v55 = vpack.c.bf16 %v650_v54, %v649_v53 }
 0x130   : > { %1028 = vst [vmem:[%s1358_s8 + $0x28] sm:$0xff] %v997_v55  }
 0x131 PF: > { %s13_s14 = sadd.s32 1, %s1227_s14   ;;  %s1402_s12 = smov %s1223_s13 }
 0x132   : > { %p10_p5 = scmp.ge.s32.totalorder %s13_s14, 4   ;;  %s1403_s13 = smov %s1405_s15 }
 0x134   :  { %12 = sbr.rel (!%p10_p5) target bundleno = 2 (0x2), region = 68 }

// kernel: network_forward.12
= control target key start
LH: loop header
LB: loop body
LE: loop exit
PB: predicated region body
PF: predicated region fallthrough
CT: control target
= control target key end

     0   :  { %s1080_s1 = inlined_call_operand.vmem [shape: bf16[512,128], index: 1, kind: input, shape index: {}]   ;;  %s1081_s0 = inlined_call_operand.vmem [shape: bf16[80,512], index: 0, kind: input, shape index: {}]   ;;  %s1082_s2 = inlined_call_operand.vmem [shape: f32[1,128], index: 2, kind: input, shape index: {}]   ;;  %s1083_s3 = inlined_call_operand.vmem [shape: bf16[80,128], index: 3, kind: output, shape index: {}]  }
   0x1   :  { %v812_v0 = vld [vmem:[%s1080_s1 + $0x40] sm:$0xff]   ;;  %v816_v4 = vld [vmem:[%s1080_s1 + $0x48] sm:$0xff]   ;;  %v820_v8 = vld [vmem:[%s1080_s1 + $0x50] sm:$0xff]  }
   0x2   :  { %v813_v1 = vld [vmem:[%s1080_s1 + $0xc0] sm:$0xff]   ;;  %720 = vmatprep.subr.bf16.mxu0 %v812_v0  ;;  %v817_v5 = vld [vmem:[%s1080_s1 + $0xc8] sm:$0xff]   ;;  %v821_v9 = vld [vmem:[%s1080_s1 + $0xd0] sm:$0xff]  }
   0x3   :  { %v814_v2 = vld [vmem:[%s1080_s1] sm:$0xff]   ;;  %766 = vmatprep.subr.bf16.mxu1 %v813_v1  ;;  %v818_v6 = vld [vmem:[%s1080_s1 + $0x8] sm:$0xff]   ;;  %v822_v10 = vld [vmem:[%s1080_s1 + $0x10] sm:$0xff]  }
   0x4   :  { %v815_v3 = vld [vmem:[%s1080_s1 + $0x80] sm:$0xff]   ;;  %721 = vmatpush3.bf16.msra.mxu0 %v814_v2  ;;  %v819_v7 = vld [vmem:[%s1080_s1 + $0x88] sm:$0xff]   ;;  %v823_v11 = vld [vmem:[%s1080_s1 + $0x90] sm:$0xff]  }
   0x5   :  { %767 = vmatpush3.bf16.msra.mxu1 %v815_v3  ;;  %722 = vmatprep.subr.bf16.mxu0 %v816_v4  ;;  %v824_v12 = vld [vmem:[%s1080_s1 + $0x58] sm:$0xff]   ;;  %v828_v16 = vld [vmem:[%s1080_s1 + $0x60] sm:$0xff]   ;;  %v832_v20 = vld [vmem:[%s1080_s1 + $0x68] sm:$0xff]  }
   0x6   :  { %768 = vmatprep.subr.bf16.mxu1 %v817_v5  ;;  %v825_v13 = vld [vmem:[%s1080_s1 + $0xd8] sm:$0xff]   ;;  %v829_v17 = vld [vmem:[%s1080_s1 + $0xe0] sm:$0xff]   ;;  %v833_v21 = vld [vmem:[%s1080_s1 + $0xe8] sm:$0xff]  }
   0x7   :  { %v826_v14 = vld [vmem:[%s1080_s1 + $0x18] sm:$0xff]   ;;  %v830_v18 = vld [vmem:[%s1080_s1 + $0x20] sm:$0xff]   ;;  %v834_v22 = vld [vmem:[%s1080_s1 + $0x28] sm:$0xff]  }
   0x8   :  { %723 = vmatpush3.bf16.msra.mxu0 %v818_v6  ;;  %v827_v15 = vld [vmem:[%s1080_s1 + $0x98] sm:$0xff]   ;;  %v831_v19 = vld [vmem:[%s1080_s1 + $0xa0] sm:$0xff]   ;;  %v835_v23 = vld [vmem:[%s1080_s1 + $0xa8] sm:$0xff]  }
   0x9   :  { %769 = vmatpush3.bf16.msra.mxu1 %v819_v7  ;;  %724 = vmatprep.subr.bf16.mxu0 %v820_v8  ;;  %v836_v24 = vld [vmem:[%s1080_s1 + $0x70] sm:$0xff]   ;;  %v840_v28 = vld [vmem:[%s1080_s1 + $0x78] sm:$0xff]   ;;  %v1053_v54 = vld [vmem:[%s1082_s2] ss:$0 sm:$0xff] }
   0xa   :  { %770 = vmatprep.subr.bf16.mxu1 %v821_v9  ;;  %v837_v25 = vld [vmem:[%s1080_s1 + $0xf0] sm:$0xff]   ;;  %v841_v29 = vld [vmem:[%s1080_s1 + $0xf8] sm:$0xff]  }
   0xb   :  { %v838_v26 = vld [vmem:[%s1080_s1 + $0x30] sm:$0xff]   ;;  %v842_v30 = vld [vmem:[%s1080_s1 + $0x38] sm:$0xff]  }
   0xc   :  { %725 = vmatpush3.bf16.msra.mxu0 %v822_v10  ;;  %v839_v27 = vld [vmem:[%s1080_s1 + $0xb0] sm:$0xff]   ;;  %v843_v31 = vld [vmem:[%s1080_s1 + $0xb8] sm:$0xff]  }
   0xd   :  { %771 = vmatpush3.bf16.msra.mxu1 %v823_v11  ;;  %726 = vmatprep.subr.bf16.mxu0 %v824_v12  ;;  %v844_v32 = vld [vmem:[%s1081_s0] ss:$16 sps:$4 sm:$0xff]   ;;  %v846_v33 = vld [vmem:[%s1081_s0 + $0x4] ss:$16 sps:$4 sm:$0xff]   ;;  %v847_v34 = vld [vmem:[%s1081_s0 + $0x8] ss:$16 sps:$4 sm:$0xff]  }
   0xe   :  { %772 = vmatprep.subr.bf16.mxu1 %v825_v13  ;;  %v849_v35 = vld [vmem:[%s1081_s0 + $0xc] ss:$16 sps:$4 sm:$0xff]   ;;  %430 = vmatprep.mubr.bf16.mxu0 %v846_v33  ;;  %v850_v36 = vld [vmem:[%s1081_s0 + $0x24] ss:$16 sps:$4 sm:$0xff]   ;;  %v854_v38 = vld [vmem:[%s1081_s0 + $0x20] ss:$16 sps:$4 sm:$0xff]  }
   0xf   :  { %503 = vmatprep.mubr.bf16.mxu1 %v849_v35  ;;  %v852_v37 = vld [vmem:[%s1081_s0 + $0x2c] ss:$16 sps:$4 sm:$0xff]   ;;  %v855_v39 = vld [vmem:[%s1081_s0 + $0x28] ss:$16 sps:$4 sm:$0xff]   ;;  %v856_v40 = vld [vmem:[%s1081_s0 + $0x44] ss:$16 sps:$4 sm:$0xff]  }
  0x10   :  { %727 = vmatpush3.bf16.msra.mxu0 %v826_v14  ;;  %v858_v41 = vld [vmem:[%s1081_s0 + $0x4c] ss:$16 sps:$4 sm:$0xff]   ;;  %v860_v42 = vld [vmem:[%s1081_s0 + $0x40] ss:$16 sps:$4 sm:$0xff]   ;;  %v861_v43 = vld [vmem:[%s1081_s0 + $0x48] ss:$16 sps:$4 sm:$0xff]  }
  0x11   :  { %773 = vmatpush3.bf16.msra.mxu1 %v827_v15  ;;  %728 = vmatprep.subr.bf16.mxu0 %v828_v16  ;;  %v862_v44 = vld [vmem:[%s1081_s0 + $0x64] ss:$16 sps:$4 sm:$0xff]   ;;  %v864_v45 = vld [vmem:[%s1081_s0 + $0x6c] ss:$16 sps:$4 sm:$0xff]   ;;  %v866_v46 = vld [vmem:[%s1081_s0 + $0x60] ss:$16 sps:$4 sm:$0xff]  }
  0x12   :  { %774 = vmatprep.subr.bf16.mxu1 %v829_v17  ;;  %v867_v47 = vld [vmem:[%s1081_s0 + $0x68] ss:$16 sps:$4 sm:$0xff]   ;;  %v868_v48 = vld [vmem:[%s1081_s0 + $0x84] ss:$16 sps:$4 sm:$0xff]   ;;  %v870_v49 = vld [vmem:[%s1081_s0 + $0x8c] ss:$16 sps:$4 sm:$0xff]  }
  0x13   :  { %v872_v50 = vld [vmem:[%s1081_s0 + $0x80] ss:$16 sps:$4 sm:$0xff]   ;;  %v873_v51 = vld [vmem:[%s1081_s0 + $0x88] ss:$16 sps:$4 sm:$0xff]  }
  0x14   :  { %729 = vmatpush3.bf16.msra.mxu0 %v830_v18 }
  0x15   :  { %775 = vmatpush3.bf16.msra.mxu1 %v831_v19  ;;  %730 = vmatprep.subr.bf16.mxu0 %v832_v20 }
  0x16   :  { %776 = vmatprep.subr.bf16.mxu1 %v833_v21 }
  0x18   :  { %731 = vmatpush3.bf16.msra.mxu0 %v834_v22 }
  0x19   :  { %777 = vmatpush3.bf16.msra.mxu1 %v835_v23  ;;  %732 = vmatprep.subr.bf16.mxu0 %v836_v24 }
  0x1a   :  { %778 = vmatprep.subr.bf16.mxu1 %v837_v25 }
  0x1c   :  { %733 = vmatpush3.bf16.msra.mxu0 %v838_v26 }
  0x1d   :  { %779 = vmatpush3.bf16.msra.mxu1 %v839_v27  ;;  %734 = vmatprep.subr.bf16.mxu0 %v840_v28 }
  0x1e   :  { %780 = vmatprep.subr.bf16.mxu1 %v841_v29 }
  0x20   :  { %735 = vmatpush3.bf16.msra.mxu0 %v842_v30 }
  0x21   :  { %781 = vmatpush3.bf16.msra.mxu1 %v843_v31 }
  0x23   :  { %431 = vmatmul.mubr.bf16.vlgmr.msra.gmra.mrb[0].mxu0 %v844_v32 }
  0x24   :  { %504 = vmatmul.mubr.bf16.vlgmr.msra.gmra.mrb[0].mxu1 %v847_v34  ;;  %438 = vmatprep.mubr.bf16.mxu0 %v850_v36 }
  0x25   :  { %511 = vmatprep.mubr.bf16.mxu1 %v852_v37 }
  0x2b   :  { %439 = vmatmul.mubr.bf16.gmra.mrb[4].mxu0 %v854_v38 }
  0x2c   :  { %512 = vmatmul.mubr.bf16.gmra.mrb[4].mxu1 %v855_v39  ;;  %446 = vmatprep.mubr.bf16.mxu0 %v856_v40 }
  0x2d   :  { %519 = vmatprep.mubr.bf16.mxu1 %v858_v41 }
  0x33   :  { %447 = vmatmul.mubr.bf16.gmra.mrb[8].mxu0 %v860_v42 }
  0x34   :  { %520 = vmatmul.mubr.bf16.gmra.mrb[8].mxu1 %v861_v43  ;;  %454 = vmatprep.mubr.bf16.mxu0 %v862_v44 }
  0x35   :  { %527 = vmatprep.mubr.bf16.mxu1 %v864_v45 }
  0x3b   :  { %455 = vmatmul.mubr.bf16.gmra.mrb[12].mxu0 %v866_v46 }
  0x3c   :  { %528 = vmatmul.mubr.bf16.gmra.mrb[12].mxu1 %v867_v47  ;;  %462 = vmatprep.mubr.bf16.mxu0 %v868_v48 }
  0x3d   :  { %535 = vmatprep.mubr.bf16.mxu1 %v870_v49 }
  0x43   :  { %463 = vmatmul.mubr.bf16.gmra.mrb[16].mxu0 %v872_v50 }
  0x44   :  { %536 = vmatmul.mubr.bf16.gmra.mrb[16].mxu1 %v873_v51 }
  0xf6   :  { %v736_v52 = vpop.f32.mrb[0].mxu0 }
  0xf7   :  { %v782_v53 = vpop.f32.mrb[0].mxu1  ;;  %v737_v55 = vpop.f32.mrb[1].mxu0 }
  0xf8   :  { %v738_v56 = vadd.f32 %v737_v55, %v736_v52  ;;  %v783_v57 = vpop.f32.mrb[1].mxu1  ;;  %v739_v58 = vpop.f32.mrb[2].mxu0 }
  0xf9   :  { %v784_v59 = vadd.f32 %v783_v57, %v782_v53  ;;  %v785_v60 = vpop.f32.mrb[2].mxu1  ;;  %v740_v61 = vpop.f32.mrb[3].mxu0 }
  0xfa   :  { %v433_v62 = vadd.f32 %v738_v56, %v1053_v54  ;;  %v741_v63 = vadd.f32 %v740_v61, %v739_v58  ;;  %v786_v0 = vpop.f32.mrb[3].mxu1 }
  0xfb   :  { %v787_v1 = vadd.f32 %v786_v0, %v785_v60 }
  0xfc   :  { %v506_v2 = vadd.f32 %v784_v59, %v433_v62  ;;  %v436_v3 = vadd.f32 %v741_v63, %v1053_v54 }
  0xfe   :  { %v544_v4 = vmul.f32 0.2, %v506_v2  ;;  %v509_v5 = vadd.f32 %v787_v1, %v436_v3  ;;  %v742_v6 = vpop.f32.mrb[4].mxu0 }
  0xff   :  { %v788_v7 = vpop.f32.mrb[4].mxu1  ;;  %v743_v8 = vpop.f32.mrb[5].mxu0 }
 0x100   :  { %v545_v9 = vmul.f32 0.2, %v509_v5  ;;  %v744_v10 = vadd.f32 %v743_v8, %v742_v6  ;;  %v789_v11 = vpop.f32.mrb[5].mxu1  ;;  %v745_v12 = vpop.f32.mrb[6].mxu0  ;;  %v554_v16 = vmax.f32 %v506_v2, %v544_v4 }
 0x101   :  { %v790_v13 = vadd.f32 %v789_v11, %v788_v7  ;;  %v791_v14 = vpop.f32.mrb[6].mxu1  ;;  %v746_v15 = vpop.f32.mrb[7].mxu0 }
 0x102   :  { %v555_v17 = vmax.f32 %v509_v5, %v545_v9  ;;  %v441_v18 = vadd.f32 %v744_v10, %v1053_v54  ;;  %v747_v19 = vadd.f32 %v746_v15, %v745_v12  ;;  %v792_v20 = vpop.f32.mrb[7].mxu1 }
 0x103   :  { %v793_v21 = vadd.f32 %v792_v20, %v791_v14 }
 0x104   :  { %v694_v22 = vpack.c.bf16 %v555_v17, %v554_v16  ;;  %v514_v23 = vadd.f32 %v790_v13, %v441_v18  ;;  %v444_v24 = vadd.f32 %v747_v19, %v1053_v54 }
 0x106   :  { %695 = vst [vmem:[%s1083_s3] sm:$0xff] %v694_v22   ;;  %v546_v25 = vmul.f32 0.2, %v514_v23  ;;  %v517_v26 = vadd.f32 %v793_v21, %v444_v24  ;;  %v748_v27 = vpop.f32.mrb[8].mxu0 }
 0x107   :  { %v794_v28 = vpop.f32.mrb[8].mxu1  ;;  %v749_v29 = vpop.f32.mrb[9].mxu0 }
 0x108   :  { %v547_v30 = vmul.f32 0.2, %v517_v26  ;;  %v750_v31 = vadd.f32 %v749_v29, %v748_v27  ;;  %v795_v32 = vpop.f32.mrb[9].mxu1  ;;  %v751_v33 = vpop.f32.mrb[10].mxu0  ;;  %v556_v37 = vmax.f32 %v514_v23, %v546_v25 }
 0x109   :  { %v796_v34 = vadd.f32 %v795_v32, %v794_v28  ;;  %v797_v35 = vpop.f32.mrb[10].mxu1  ;;  %v752_v36 = vpop.f32.mrb[11].mxu0 }
 0x10a   :  { %v557_v38 = vmax.f32 %v517_v26, %v547_v30  ;;  %v449_v39 = vadd.f32 %v750_v31, %v1053_v54  ;;  %v753_v40 = vadd.f32 %v752_v36, %v751_v33  ;;  %v798_v41 = vpop.f32.mrb[11].mxu1 }
 0x10b   :  { %v799_v42 = vadd.f32 %v798_v41, %v797_v35 }
 0x10c   :  { %v699_v43 = vpack.c.bf16 %v557_v38, %v556_v37  ;;  %v522_v44 = vadd.f32 %v796_v34, %v449_v39  ;;  %v452_v45 = vadd.f32 %v753_v40, %v1053_v54 }
 0x10e   :  { %716 = vst [vmem:[%s1083_s3 + $0x8] sm:$0xff] %v699_v43   ;;  %v548_v46 = vmul.f32 0.2, %v522_v44  ;;  %v525_v47 = vadd.f32 %v799_v42, %v452_v45  ;;  %v754_v48 = vpop.f32.mrb[12].mxu0 }
 0x10f   :  { %v800_v49 = vpop.f32.mrb[12].mxu1  ;;  %v755_v50 = vpop.f32.mrb[13].mxu0 }
 0x110   :  { %v549_v51 = vmul.f32 0.2, %v525_v47  ;;  %v756_v52 = vadd.f32 %v755_v50, %v754_v48  ;;  %v801_v53 = vpop.f32.mrb[13].mxu1  ;;  %v757_v55 = vpop.f32.mrb[14].mxu0  ;;  %v558_v59 = vmax.f32 %v522_v44, %v548_v46 }
 0x111   :  { %v802_v56 = vadd.f32 %v801_v53, %v800_v49  ;;  %v803_v57 = vpop.f32.mrb[14].mxu1  ;;  %v758_v58 = vpop.f32.mrb[15].mxu0 }
 0x112   :  { %v559_v60 = vmax.f32 %v525_v47, %v549_v51  ;;  %v457_v61 = vadd.f32 %v756_v52, %v1053_v54  ;;  %v759_v62 = vadd.f32 %v758_v58, %v757_v55  ;;  %v804_v63 = vpop.f32.mrb[15].mxu1 }
 0x113   :  { %v805_v0 = vadd.f32 %v804_v63, %v803_v57 }
 0x114   :  { %v704_v1 = vpack.c.bf16 %v559_v60, %v558_v59  ;;  %v530_v2 = vadd.f32 %v802_v56, %v457_v61  ;;  %v460_v3 = vadd.f32 %v759_v62, %v1053_v54 }
 0x116   :  { %717 = vst [vmem:[%s1083_s3 + $0x10] sm:$0xff] %v704_v1   ;;  %v550_v4 = vmul.f32 0.2, %v530_v2  ;;  %v533_v5 = vadd.f32 %v805_v0, %v460_v3  ;;  %v760_v6 = vpop.f32.mrb[16].mxu0 }
 0x117   :  { %v806_v7 = vpop.f32.mrb[16].mxu1  ;;  %v761_v8 = vpop.f32.mrb[17].mxu0 }
 0x118   :  { %v551_v9 = vmul.f32 0.2, %v533_v5  ;;  %v762_v10 = vadd.f32 %v761_v8, %v760_v6  ;;  %v807_v11 = vpop.f32.mrb[17].mxu1  ;;  %v763_v12 = vpop.f32.mrb[18].mxu0  ;;  %v560_v16 = vmax.f32 %v530_v2, %v550_v4 }
 0x119   :  { %v808_v13 = vadd.f32 %v807_v11, %v806_v7  ;;  %v809_v14 = vpop.f32.mrb[18].mxu1  ;;  %v764_v15 = vpop.f32.mrb[19].mxu0 }
 0x11a   :  { %v561_v17 = vmax.f32 %v533_v5, %v551_v9  ;;  %v465_v18 = vadd.f32 %v762_v10, %v1053_v54  ;;  %v765_v19 = vadd.f32 %v764_v15, %v763_v12  ;;  %v810_v20 = vpop.f32.mrb[19].mxu1 }
 0x11b   :  { %v811_v21 = vadd.f32 %v810_v20, %v809_v14 }
 0x11c   :  { %v709_v22 = vpack.c.bf16 %v561_v17, %v560_v16  ;;  %v538_v23 = vadd.f32 %v808_v13, %v465_v18  ;;  %v468_v24 = vadd.f32 %v765_v19, %v1053_v54 }
 0x11e   :  { %718 = vst [vmem:[%s1083_s3 + $0x18] sm:$0xff] %v709_v22   ;;  %v552_v25 = vmul.f32 0.2, %v538_v23  ;;  %v541_v26 = vadd.f32 %v811_v21, %v468_v24 }
 0x120   :  { %v553_v27 = vmul.f32 0.2, %v541_v26  ;;  %v562_v28 = vmax.f32 %v538_v23, %v552_v25 }
 0x122   :  { %v563_v29 = vmax.f32 %v541_v26, %v553_v27 }
 0x124   :  { %v714_v30 = vpack.c.bf16 %v563_v29, %v562_v28 }
 0x126   :  { %719 = vst [vmem:[%s1083_s3 + $0x20] sm:$0xff] %v714_v30  }

// kernel: network_forward.13
= control target key start
LH: loop header
LB: loop body
LE: loop exit
PB: predicated region body
PF: predicated region fallthrough
CT: control target
= control target key end

     0   :  { %s1403_s1 = inlined_call_operand.vmem [shape: bf16[1024,128], index: 1, kind: input, shape index: {}]   ;;  %s1404_s0 = inlined_call_operand.vmem [shape: bf16[32,1024], index: 0, kind: input, shape index: {}]   ;;  %s1405_s2 = inlined_call_operand.vmem [shape: f32[1,128], index: 2, kind: input, shape index: {}]   ;;  %s1406_s3 = inlined_call_operand.vmem [shape: bf16[32,128], index: 3, kind: output, shape index: {}]  }
   0x1   :  { %v1070_v0 = vld [vmem:[%s1403_s1 + $0x40] sm:$0xff]   ;;  %v1074_v4 = vld [vmem:[%s1403_s1 + $0x48] sm:$0xff]   ;;  %v1078_v8 = vld [vmem:[%s1403_s1 + $0x50] sm:$0xff]  }
   0x2   :  { %v1071_v1 = vld [vmem:[%s1403_s1 + $0xc0] sm:$0xff]   ;;  %958 = vmatprep.subr.bf16.mxu0 %v1070_v0  ;;  %v1075_v5 = vld [vmem:[%s1403_s1 + $0xc8] sm:$0xff]   ;;  %v1079_v9 = vld [vmem:[%s1403_s1 + $0xd0] sm:$0xff]  }
   0x3   :  { %v1072_v2 = vld [vmem:[%s1403_s1] sm:$0xff]   ;;  %986 = vmatprep.subr.bf16.mxu1 %v1071_v1  ;;  %v1076_v6 = vld [vmem:[%s1403_s1 + $0x8] sm:$0xff]   ;;  %v1080_v10 = vld [vmem:[%s1403_s1 + $0x10] sm:$0xff]  }
   0x4   :  { %v1073_v3 = vld [vmem:[%s1403_s1 + $0x80] sm:$0xff]   ;;  %959 = vmatpush3.bf16.msra.mxu0 %v1072_v2  ;;  %v1077_v7 = vld [vmem:[%s1403_s1 + $0x88] sm:$0xff]   ;;  %v1081_v11 = vld [vmem:[%s1403_s1 + $0x90] sm:$0xff]  }
   0x5   :  { %987 = vmatpush3.bf16.msra.mxu1 %v1073_v3  ;;  %960 = vmatprep.subr.bf16.mxu0 %v1074_v4  ;;  %v1082_v12 = vld [vmem:[%s1403_s1 + $0x58] sm:$0xff]   ;;  %v1086_v16 = vld [vmem:[%s1403_s1 + $0x60] sm:$0xff]   ;;  %v1090_v20 = vld [vmem:[%s1403_s1 + $0x68] sm:$0xff]  }
   0x6   :  { %988 = vmatprep.subr.bf16.mxu1 %v1075_v5  ;;  %v1083_v13 = vld [vmem:[%s1403_s1 + $0xd8] sm:$0xff]   ;;  %v1087_v17 = vld [vmem:[%s1403_s1 + $0xe0] sm:$0xff]   ;;  %v1091_v21 = vld [vmem:[%s1403_s1 + $0xe8] sm:$0xff]  }
   0x7   :  { %v1084_v14 = vld [vmem:[%s1403_s1 + $0x18] sm:$0xff]   ;;  %v1088_v18 = vld [vmem:[%s1403_s1 + $0x20] sm:$0xff]   ;;  %v1092_v22 = vld [vmem:[%s1403_s1 + $0x28] sm:$0xff]  }
   0x8   :  { %961 = vmatpush3.bf16.msra.mxu0 %v1076_v6  ;;  %v1085_v15 = vld [vmem:[%s1403_s1 + $0x98] sm:$0xff]   ;;  %v1089_v19 = vld [vmem:[%s1403_s1 + $0xa0] sm:$0xff]   ;;  %v1093_v23 = vld [vmem:[%s1403_s1 + $0xa8] sm:$0xff]  }
   0x9   :  { %989 = vmatpush3.bf16.msra.mxu1 %v1077_v7  ;;  %962 = vmatprep.subr.bf16.mxu0 %v1078_v8  ;;  %v1094_v24 = vld [vmem:[%s1403_s1 + $0x70] sm:$0xff]   ;;  %v1098_v28 = vld [vmem:[%s1403_s1 + $0x78] sm:$0xff]   ;;  %v15_v32 = vld [vmem:[%s1404_s0] sm:$0xff] }
   0xa   :  { %990 = vmatprep.subr.bf16.mxu1 %v1079_v9  ;;  %v1095_v25 = vld [vmem:[%s1403_s1 + $0xf0] sm:$0xff]   ;;  %v1099_v29 = vld [vmem:[%s1403_s1 + $0xf8] sm:$0xff]   ;;  %v19_v33 = vld [vmem:[%s1404_s0 + $0x20] sm:$0xff] }
   0xb   :  { %v1096_v26 = vld [vmem:[%s1403_s1 + $0x30] sm:$0xff]   ;;  %v1100_v30 = vld [vmem:[%s1403_s1 + $0x38] sm:$0xff]   ;;  %v16_v34 = vld [vmem:[%s1404_s0 + $0x8] sm:$0xff]  ;;  %v859_v35 = vcombine.low %v15_v32, %v19_v33  ;;  %v860_v36 = vcombine.high %v15_v32, %v19_v33 }
   0xc   :  { %963 = vmatpush3.bf16.msra.mxu0 %v1080_v10  ;;  %v1097_v27 = vld [vmem:[%s1403_s1 + $0xb0] sm:$0xff]   ;;  %v1101_v31 = vld [vmem:[%s1403_s1 + $0xb8] sm:$0xff]   ;;  %v20_v37 = vld [vmem:[%s1404_s0 + $0x28] sm:$0xff] }
   0xd   :  { %991 = vmatpush3.bf16.msra.mxu1 %v1081_v11  ;;  %964 = vmatprep.subr.bf16.mxu0 %v1082_v12  ;;  %v861_v38 = vcombine.low %v16_v34, %v20_v37  ;;  %v862_v39 = vcombine.high %v16_v34, %v20_v37  ;;  %v1102_v40 = vld [vmem:[%s1403_s1 + $0x140] sm:$0xff]   ;;  %v1106_v44 = vld [vmem:[%s1403_s1 + $0x148] sm:$0xff]   ;;  %v1110_v48 = vld [vmem:[%s1403_s1 + $0x150] sm:$0xff]  }
   0xe   :  { %992 = vmatprep.subr.bf16.mxu1 %v1083_v13  ;;  %662 = vmatprep.mubr.bf16.mxu0 %v860_v36  ;;  %v1103_v41 = vld [vmem:[%s1403_s1 + $0x1c0] sm:$0xff]   ;;  %v1107_v45 = vld [vmem:[%s1403_s1 + $0x1c8] sm:$0xff]   ;;  %v1111_v49 = vld [vmem:[%s1403_s1 + $0x1d0] sm:$0xff]  }
   0xf   :  { %711 = vmatprep.mubr.bf16.mxu1 %v862_v39  ;;  %v1104_v42 = vld [vmem:[%s1403_s1 + $0x100] sm:$0xff]   ;;  %v1108_v46 = vld [vmem:[%s1403_s1 + $0x108] sm:$0xff]   ;;  %v1112_v50 = vld [vmem:[%s1403_s1 + $0x110] sm:$0xff]  }
  0x10   :  { %965 = vmatpush3.bf16.msra.mxu0 %v1084_v14  ;;  %v1105_v43 = vld [vmem:[%s1403_s1 + $0x180] sm:$0xff]   ;;  %v1109_v47 = vld [vmem:[%s1403_s1 + $0x188] sm:$0xff]   ;;  %v1113_v51 = vld [vmem:[%s1403_s1 + $0x190] sm:$0xff]  }
  0x11   :  { %993 = vmatpush3.bf16.msra.mxu1 %v1085_v15  ;;  %966 = vmatprep.subr.bf16.mxu0 %v1086_v16  ;;  %v1114_v52 = vld [vmem:[%s1403_s1 + $0x158] sm:$0xff]   ;;  %v1118_v56 = vld [vmem:[%s1403_s1 + $0x160] sm:$0xff]   ;;  %v1122_v63 = vld [vmem:[%s1403_s1 + $0x168] sm:$0xff]  }
  0x12   :  { %994 = vmatprep.subr.bf16.mxu1 %v1087_v17  ;;  %v1115_v53 = vld [vmem:[%s1403_s1 + $0x1d8] sm:$0xff]   ;;  %v1119_v57 = vld [vmem:[%s1403_s1 + $0x1e0] sm:$0xff]   ;;  %v1123_v1 = vld [vmem:[%s1403_s1 + $0x1e8] sm:$0xff]  }
  0x13   :  { %v1116_v54 = vld [vmem:[%s1403_s1 + $0x118] sm:$0xff]   ;;  %v1120_v58 = vld [vmem:[%s1403_s1 + $0x120] sm:$0xff]   ;;  %v1124_v2 = vld [vmem:[%s1403_s1 + $0x128] sm:$0xff]  }
  0x14   :  { %967 = vmatpush3.bf16.msra.mxu0 %v1088_v18  ;;  %v1117_v55 = vld [vmem:[%s1403_s1 + $0x198] sm:$0xff]   ;;  %v1121_v59 = vld [vmem:[%s1403_s1 + $0x1a0] sm:$0xff]   ;;  %v1125_v3 = vld [vmem:[%s1403_s1 + $0x1a8] sm:$0xff]  }
  0x15   :  { %995 = vmatpush3.bf16.msra.mxu1 %v1089_v19  ;;  %968 = vmatprep.subr.bf16.mxu0 %v1090_v20  ;;  %v23_v60 = vld [vmem:[%s1404_s0 + $0x40] sm:$0xff]  ;;  %v24_v4 = vld [vmem:[%s1404_s0 + $0x48] sm:$0xff]  ;;  %v1126_v8 = vld [vmem:[%s1403_s1 + $0x170] sm:$0xff]  }
  0x16   :  { %996 = vmatprep.subr.bf16.mxu1 %v1091_v21  ;;  %v27_v61 = vld [vmem:[%s1404_s0 + $0x60] sm:$0xff]  ;;  %v28_v5 = vld [vmem:[%s1404_s0 + $0x68] sm:$0xff]  ;;  %v1127_v9 = vld [vmem:[%s1403_s1 + $0x1f0] sm:$0xff]  }
  0x17   :  { %v868_v62 = vcombine.high %v23_v60, %v27_v61  ;;  %v867_v0 = vcombine.low %v23_v60, %v27_v61  ;;  %v870_v6 = vcombine.high %v24_v4, %v28_v5  ;;  %v869_v7 = vcombine.low %v24_v4, %v28_v5  ;;  %v1128_v10 = vld [vmem:[%s1403_s1 + $0x130] sm:$0xff]   ;;  %v1130_v12 = vld [vmem:[%s1403_s1 + $0x178] sm:$0xff]   ;;  %v858_v34 = vld [vmem:[%s1405_s2] ss:$0 sm:$0xff] }
  0x18   :  { %969 = vmatpush3.bf16.msra.mxu0 %v1092_v22  ;;  %v1129_v11 = vld [vmem:[%s1403_s1 + $0x1b0] sm:$0xff]   ;;  %v1131_v13 = vld [vmem:[%s1403_s1 + $0x1f8] sm:$0xff]  }
  0x19   :  { %997 = vmatpush3.bf16.msra.mxu1 %v1093_v23  ;;  %970 = vmatprep.subr.bf16.mxu0 %v1094_v24  ;;  %v1132_v14 = vld [vmem:[%s1403_s1 + $0x138] sm:$0xff]   ;;  %v17_v16 = vld [vmem:[%s1404_s0 + $0x10] sm:$0xff] }
  0x1a   :  { %998 = vmatprep.subr.bf16.mxu1 %v1095_v25  ;;  %v1133_v15 = vld [vmem:[%s1403_s1 + $0x1b8] sm:$0xff]   ;;  %v21_v17 = vld [vmem:[%s1404_s0 + $0x30] sm:$0xff] }
  0x1b   :  { %v18_v18 = vld [vmem:[%s1404_s0 + $0x18] sm:$0xff]  ;;  %v863_v20 = vcombine.low %v17_v16, %v21_v17  ;;  %v864_v21 = vcombine.high %v17_v16, %v21_v17  ;;  %v25_v24 = vld [vmem:[%s1404_s0 + $0x50] sm:$0xff] }
  0x1c   :  { %971 = vmatpush3.bf16.msra.mxu0 %v1096_v26  ;;  %v22_v19 = vld [vmem:[%s1404_s0 + $0x38] sm:$0xff]  ;;  %v29_v25 = vld [vmem:[%s1404_s0 + $0x70] sm:$0xff] }
  0x1d   :  { %999 = vmatpush3.bf16.msra.mxu1 %v1097_v27  ;;  %972 = vmatprep.subr.bf16.mxu0 %v1098_v28  ;;  %v865_v22 = vcombine.low %v18_v18, %v22_v19  ;;  %v866_v23 = vcombine.high %v18_v18, %v22_v19  ;;  %v26_v26 = vld [vmem:[%s1404_s0 + $0x58] sm:$0xff]  ;;  %v872_v27 = vcombine.high %v25_v24, %v29_v25 }
  0x1e   :  { %1000 = vmatprep.subr.bf16.mxu1 %v1099_v29  ;;  %v30_v28 = vld [vmem:[%s1404_s0 + $0x78] sm:$0xff] }
  0x1f   :  { %v874_v29 = vcombine.high %v26_v26, %v30_v28 }
  0x20   :  { %973 = vmatpush3.bf16.msra.mxu0 %v1100_v30  ;;  %v871_v30 = vcombine.low %v25_v24, %v29_v25 }
  0x21   :  { %1001 = vmatpush3.bf16.msra.mxu1 %v1101_v31  ;;  %1014 = vmatprep.subr.bf16.mxu0 %v1102_v40  ;;  %v873_v31 = vcombine.low %v26_v26, %v30_v28 }
  0x22   :  { %1042 = vmatprep.subr.bf16.mxu1 %v1103_v41 }
  0x23   :  { %663 = vmatmul.mubr.bf16.vlgmr.msra.gmra.mrb[0].mxu0 %v859_v35 }
  0x24   :  { %712 = vmatmul.mubr.bf16.vlgmr.msra.gmra.mrb[0].mxu1 %v861_v38  ;;  %1015 = vmatpush3.bf16.msra.mxu0 %v1104_v42 }
  0x25   :  { %1043 = vmatpush3.bf16.msra.mxu1 %v1105_v43  ;;  %1016 = vmatprep.subr.bf16.mxu0 %v1106_v44 }
  0x26   :  { %1044 = vmatprep.subr.bf16.mxu1 %v1107_v45  ;;  %670 = vmatprep.mubr.bf16.mxu0 %v868_v62 }
  0x27   :  { %719 = vmatprep.mubr.bf16.mxu1 %v870_v6 }
  0x28   :  { %1017 = vmatpush3.bf16.msra.mxu0 %v1108_v46 }
  0x29   :  { %1045 = vmatpush3.bf16.msra.mxu1 %v1109_v47  ;;  %1018 = vmatprep.subr.bf16.mxu0 %v1110_v48 }
  0x2a   :  { %1046 = vmatprep.subr.bf16.mxu1 %v1111_v49 }
  0x2b   :  { %671 = vmatmul.mubr.bf16.gmra.mrb[4].mxu0 %v867_v0 }
  0x2c   :  { %1019 = vmatpush3.bf16.msra.mxu0 %v1112_v50  ;;  %720 = vmatmul.mubr.bf16.gmra.mrb[4].mxu1 %v869_v7 }
  0x2d   :  { %1047 = vmatpush3.bf16.msra.mxu1 %v1113_v51  ;;  %1020 = vmatprep.subr.bf16.mxu0 %v1114_v52 }
  0x2e   :  { %1048 = vmatprep.subr.bf16.mxu1 %v1115_v53  ;;  %760 = vmatprep.mubr.bf16.mxu0 %v864_v21 }
  0x2f   :  { %809 = vmatprep.mubr.bf16.mxu1 %v866_v23 }
  0x30   :  { %1021 = vmatpush3.bf16.msra.mxu0 %v1116_v54 }
  0x31   :  { %1049 = vmatpush3.bf16.msra.mxu1 %v1117_v55  ;;  %1022 = vmatprep.subr.bf16.mxu0 %v1118_v56 }
  0x32   :  { %1050 = vmatprep.subr.bf16.mxu1 %v1119_v57 }
  0x34   :  { %1023 = vmatpush3.bf16.msra.mxu0 %v1120_v58 }
  0x35   :  { %1051 = vmatpush3.bf16.msra.mxu1 %v1121_v59  ;;  %1024 = vmatprep.subr.bf16.mxu0 %v1122_v63 }
  0x36   :  { %1052 = vmatprep.subr.bf16.mxu1 %v1123_v1 }
  0x38   :  { %1025 = vmatpush3.bf16.msra.mxu0 %v1124_v2 }
  0x39   :  { %1053 = vmatpush3.bf16.msra.mxu1 %v1125_v3  ;;  %1026 = vmatprep.subr.bf16.mxu0 %v1126_v8 }
  0x3a   :  { %1054 = vmatprep.subr.bf16.mxu1 %v1127_v9 }
  0x3c   :  { %1027 = vmatpush3.bf16.msra.mxu0 %v1128_v10 }
  0x3d   :  { %1055 = vmatpush3.bf16.msra.mxu1 %v1129_v11  ;;  %1028 = vmatprep.subr.bf16.mxu0 %v1130_v12 }
  0x3e   :  { %1056 = vmatprep.subr.bf16.mxu1 %v1131_v13 }
  0x40   :  { %1029 = vmatpush3.bf16.msra.mxu0 %v1132_v14 }
  0x41   :  { %1057 = vmatpush3.bf16.msra.mxu1 %v1133_v15 }
  0x43   :  { %761 = vmatmul.mubr.bf16.vlgmr.msra.gmra.mrb[8].mxu0 %v863_v20 }
  0x44   :  { %810 = vmatmul.mubr.bf16.vlgmr.msra.gmra.mrb[8].mxu1 %v865_v22  ;;  %768 = vmatprep.mubr.bf16.mxu0 %v872_v27 }
  0x45   :  { %817 = vmatprep.mubr.bf16.mxu1 %v874_v29 }
  0x4b   :  { %769 = vmatmul.mubr.bf16.gmra.mrb[12].mxu0 %v871_v30 }
  0x4c   :  { %818 = vmatmul.mubr.bf16.gmra.mrb[12].mxu1 %v873_v31 }
  0xf6   :  { %v974_v32 = vpop.f32.mrb[0].mxu0 }
  0xf7   :  { %v1002_v33 = vpop.f32.mrb[0].mxu1  ;;  %v975_v35 = vpop.f32.mrb[1].mxu0 }
  0xf8   :  { %v976_v36 = vadd.f32 %v975_v35, %v974_v32  ;;  %v1003_v37 = vpop.f32.mrb[1].mxu1  ;;  %v977_v38 = vpop.f32.mrb[2].mxu0 }
  0xf9   :  { %v1004_v39 = vadd.f32 %v1003_v37, %v1002_v33  ;;  %v1005_v40 = vpop.f32.mrb[2].mxu1  ;;  %v978_v41 = vpop.f32.mrb[3].mxu0 }
  0xfa   :  { %v665_v42 = vadd.f32 %v976_v36, %v858_v34  ;;  %v979_v43 = vadd.f32 %v978_v41, %v977_v38  ;;  %v1006_v44 = vpop.f32.mrb[3].mxu1 }
  0xfb   :  { %v1007_v45 = vadd.f32 %v1006_v44, %v1005_v40 }
  0xfc   :  { %v714_v46 = vadd.f32 %v1004_v39, %v665_v42  ;;  %v668_v47 = vadd.f32 %v979_v43, %v858_v34 }
  0xfe   :  { %v717_v48 = vadd.f32 %v1007_v45, %v668_v47  ;;  %v980_v49 = vpop.f32.mrb[4].mxu0 }
  0xff   :  { %v981_v50 = vpop.f32.mrb[5].mxu0  ;;  %v1008_v56 = vpop.f32.mrb[4].mxu1 }
 0x100   :  { %v982_v51 = vadd.f32 %v981_v50, %v980_v49  ;;  %v983_v52 = vpop.f32.mrb[6].mxu0  ;;  %v1009_v57 = vpop.f32.mrb[5].mxu1 }
 0x101   :  { %v984_v53 = vpop.f32.mrb[7].mxu0  ;;  %v1010_v59 = vadd.f32 %v1009_v57, %v1008_v56  ;;  %v1011_v60 = vpop.f32.mrb[6].mxu1 }
 0x102   :  { %v985_v54 = vadd.f32 %v984_v53, %v983_v52  ;;  %v673_v55 = vadd.f32 %v982_v51, %v858_v34  ;;  %v1012_v61 = vpop.f32.mrb[7].mxu1 }
 0x103   :  { %v1013_v63 = vadd.f32 %v1012_v61, %v1011_v60 }
 0x104   :  { %v676_v58 = vadd.f32 %v985_v54, %v858_v34  ;;  %v722_v62 = vadd.f32 %v1010_v59, %v673_v55 }
 0x106   :  { %v725_v0 = vadd.f32 %v1013_v63, %v676_v58 }
 0x116   :  { %v1030_v1 = vpop.f32.mrb[8].mxu0 }
 0x117   :  { %v1058_v2 = vpop.f32.mrb[8].mxu1  ;;  %v1031_v3 = vpop.f32.mrb[9].mxu0 }
 0x118   :  { %v1059_v4 = vpop.f32.mrb[9].mxu1  ;;  %v1032_v5 = vadd.f32 %v1031_v3, %v1030_v1  ;;  %v1033_v7 = vpop.f32.mrb[10].mxu0 }
 0x119   :  { %v1060_v6 = vadd.f32 %v1059_v4, %v1058_v2  ;;  %v1061_v8 = vpop.f32.mrb[10].mxu1  ;;  %v1034_v9 = vpop.f32.mrb[11].mxu0 }
 0x11a   :  { %v1062_v10 = vpop.f32.mrb[11].mxu1  ;;  %v763_v11 = vadd.f32 %v1032_v5, %v714_v46  ;;  %v1035_v12 = vadd.f32 %v1034_v9, %v1033_v7 }
 0x11b   :  { %v1063_v13 = vadd.f32 %v1062_v10, %v1061_v8 }
 0x11c   :  { %v812_v14 = vadd.f32 %v1060_v6, %v763_v11  ;;  %v766_v15 = vadd.f32 %v1035_v12, %v717_v48 }
 0x11e   :  { %v826_v16 = vmul.f32 0.2, %v812_v14  ;;  %v815_v17 = vadd.f32 %v1063_v13, %v766_v15  ;;  %v1036_v18 = vpop.f32.mrb[12].mxu0 }
 0x11f   :  { %v1064_v19 = vpop.f32.mrb[12].mxu1  ;;  %v1037_v20 = vpop.f32.mrb[13].mxu0 }
 0x120   :  { %v1065_v21 = vpop.f32.mrb[13].mxu1  ;;  %v827_v22 = vmul.f32 0.2, %v815_v17  ;;  %v1038_v23 = vadd.f32 %v1037_v20, %v1036_v18  ;;  %v1039_v25 = vpop.f32.mrb[14].mxu0  ;;  %v830_v27 = vmax.f32 %v812_v14, %v826_v16 }
 0x121   :  { %v1066_v24 = vadd.f32 %v1065_v21, %v1064_v19  ;;  %v1067_v26 = vpop.f32.mrb[14].mxu1  ;;  %v1040_v28 = vpop.f32.mrb[15].mxu0 }
 0x122   :  { %v1068_v29 = vpop.f32.mrb[15].mxu1  ;;  %v831_v30 = vmax.f32 %v815_v17, %v827_v22  ;;  %v771_v31 = vadd.f32 %v1038_v23, %v722_v62  ;;  %v1041_v32 = vadd.f32 %v1040_v28, %v1039_v25 }
 0x123   :  { %v1069_v33 = vadd.f32 %v1068_v29, %v1067_v26 }
 0x124   :  { %v950_v34 = vpack.c.bf16 %v831_v30, %v830_v27  ;;  %v820_v35 = vadd.f32 %v1066_v24, %v771_v31  ;;  %v774_v36 = vadd.f32 %v1041_v32, %v725_v0 }
 0x126   :  { %951 = vst [vmem:[%s1406_s3] sm:$0xff] %v950_v34   ;;  %v828_v37 = vmul.f32 0.2, %v820_v35  ;;  %v823_v38 = vadd.f32 %v1069_v33, %v774_v36 }
 0x128   :  { %v829_v39 = vmul.f32 0.2, %v823_v38  ;;  %v832_v40 = vmax.f32 %v820_v35, %v828_v37 }
 0x12a   :  { %v833_v41 = vmax.f32 %v823_v38, %v829_v39 }
 0x12c   :  { %v955_v42 = vpack.c.bf16 %v833_v41, %v832_v40 }
 0x12e   :  { %957 = vst [vmem:[%s1406_s3 + $0x8] sm:$0xff] %v955_v42  }

// kernel: network_forward.14
= control target key start
LH: loop header
LB: loop body
LE: loop exit
PB: predicated region body
PF: predicated region fallthrough
CT: control target
= control target key end

     0   :  { %s2084_s1 = inlined_call_operand.vmem [shape: bf16[1152,256], index: 1, kind: input, shape index: {}]   ;;  %s2085_s0 = inlined_call_operand.vmem [shape: bf16[16,1152], index: 0, kind: input, shape index: {}]   ;;  %s2086_s2 = inlined_call_operand.vmem [shape: f32[1,256], index: 2, kind: input, shape index: {}]   ;;  %s2087_s3 = inlined_call_operand.vmem [shape: bf16[16,256], index: 3, kind: output, shape index: {}]  }
   0x1   :  { %v1366_v0 = vld [vmem:[%s2084_s1 + $0x4] ss:$8 sps:$4 sm:$0xff]   ;;  %v1370_v2 = vld [vmem:[%s2084_s1] ss:$8 sps:$4 sm:$0xff]   ;;  %v1372_v4 = vld [vmem:[%s2084_s1 + $0x14] ss:$8 sps:$4 sm:$0xff]  }
   0x2   :  { %v1368_v1 = vld [vmem:[%s2084_s1 + $0x204] ss:$8 sps:$4 sm:$0xff]   ;;  %947 = vmatprep.subr.bf16.mxu1 %v1366_v0  ;;  %v1371_v3 = vld [vmem:[%s2084_s1 + $0x200] ss:$8 sps:$4 sm:$0xff]   ;;  %v1374_v5 = vld [vmem:[%s2084_s1 + $0x214] ss:$8 sps:$4 sm:$0xff]  }
   0x3   :  { %1033 = vmatprep.subr.bf16.mxu0 %v1368_v1  ;;  %948 = vmatpush1.bf16.msra.mxu1 %v1370_v2  ;;  %v1376_v6 = vld [vmem:[%s2084_s1 + $0x10] ss:$8 sps:$4 sm:$0xff]   ;;  %v1378_v8 = vld [vmem:[%s2084_s1 + $0x24] ss:$8 sps:$4 sm:$0xff]   ;;  %v1382_v10 = vld [vmem:[%s2084_s1 + $0x20] ss:$8 sps:$4 sm:$0xff]  }
   0x4   :  { %1034 = vmatpush1.bf16.msra.mxu0 %v1371_v3  ;;  %949 = vmatprep.subr.bf16.mxu1 %v1372_v4  ;;  %v1377_v7 = vld [vmem:[%s2084_s1 + $0x210] ss:$8 sps:$4 sm:$0xff]   ;;  %v1380_v9 = vld [vmem:[%s2084_s1 + $0x224] ss:$8 sps:$4 sm:$0xff]   ;;  %v1383_v11 = vld [vmem:[%s2084_s1 + $0x220] ss:$8 sps:$4 sm:$0xff]  }
   0x5   :  { %1035 = vmatprep.subr.bf16.mxu0 %v1374_v5  ;;  %v1384_v12 = vld [vmem:[%s2084_s1 + $0x34] ss:$8 sps:$4 sm:$0xff]   ;;  %v1388_v14 = vld [vmem:[%s2084_s1 + $0x30] ss:$8 sps:$4 sm:$0xff]   ;;  %v1390_v16 = vld [vmem:[%s2084_s1 + $0x44] ss:$8 sps:$4 sm:$0xff]  }
   0x6   :  { %v1386_v13 = vld [vmem:[%s2084_s1 + $0x234] ss:$8 sps:$4 sm:$0xff]   ;;  %v1389_v15 = vld [vmem:[%s2084_s1 + $0x230] ss:$8 sps:$4 sm:$0xff]   ;;  %v1392_v17 = vld [vmem:[%s2084_s1 + $0x244] ss:$8 sps:$4 sm:$0xff]  }
   0x7   :  { %950 = vmatpush1.bf16.msra.mxu1 %v1376_v6  ;;  %v1394_v18 = vld [vmem:[%s2084_s1 + $0x40] ss:$8 sps:$4 sm:$0xff]   ;;  %v1396_v20 = vld [vmem:[%s2084_s1 + $0x54] ss:$8 sps:$4 sm:$0xff]   ;;  %v1400_v22 = vld [vmem:[%s2084_s1 + $0x50] ss:$8 sps:$4 sm:$0xff]  }
   0x8   :  { %1036 = vmatpush1.bf16.msra.mxu0 %v1377_v7  ;;  %951 = vmatprep.subr.bf16.mxu1 %v1378_v8  ;;  %v1395_v19 = vld [vmem:[%s2084_s1 + $0x240] ss:$8 sps:$4 sm:$0xff]   ;;  %v1398_v21 = vld [vmem:[%s2084_s1 + $0x254] ss:$8 sps:$4 sm:$0xff]   ;;  %v1401_v23 = vld [vmem:[%s2084_s1 + $0x250] ss:$8 sps:$4 sm:$0xff]  }
   0x9   :  { %1037 = vmatprep.subr.bf16.mxu0 %v1380_v9  ;;  %v1402_v24 = vld [vmem:[%s2084_s1 + $0x64] ss:$8 sps:$4 sm:$0xff]   ;;  %v1406_v26 = vld [vmem:[%s2084_s1 + $0x60] ss:$8 sps:$4 sm:$0xff]   ;;  %v1408_v28 = vld [vmem:[%s2084_s1 + $0x74] ss:$8 sps:$4 sm:$0xff]  }
   0xa   :  { %v1404_v25 = vld [vmem:[%s2084_s1 + $0x264] ss:$8 sps:$4 sm:$0xff]   ;;  %v1407_v27 = vld [vmem:[%s2084_s1 + $0x260] ss:$8 sps:$4 sm:$0xff]   ;;  %v1410_v29 = vld [vmem:[%s2084_s1 + $0x274] ss:$8 sps:$4 sm:$0xff]  }
   0xb   :  { %952 = vmatpush1.bf16.msra.mxu1 %v1382_v10  ;;  %v1412_v30 = vld [vmem:[%s2084_s1 + $0x70] ss:$8 sps:$4 sm:$0xff]   ;;  %v1414_v32 = vld [vmem:[%s2084_s1 + $0x84] ss:$8 sps:$4 sm:$0xff]   ;;  %v1418_v34 = vld [vmem:[%s2084_s1 + $0x80] ss:$8 sps:$4 sm:$0xff]  }
   0xc   :  { %1038 = vmatpush1.bf16.msra.mxu0 %v1383_v11  ;;  %953 = vmatprep.subr.bf16.mxu1 %v1384_v12  ;;  %v1413_v31 = vld [vmem:[%s2084_s1 + $0x270] ss:$8 sps:$4 sm:$0xff]   ;;  %v1416_v33 = vld [vmem:[%s2084_s1 + $0x284] ss:$8 sps:$4 sm:$0xff]   ;;  %v1419_v35 = vld [vmem:[%s2084_s1 + $0x280] ss:$8 sps:$4 sm:$0xff]  }
   0xd   :  { %1039 = vmatprep.subr.bf16.mxu0 %v1386_v13  ;;  %v1420_v36 = vld [vmem:[%s2084_s1 + $0x94] ss:$8 sps:$4 sm:$0xff]   ;;  %v1424_v38 = vld [vmem:[%s2084_s1 + $0x90] ss:$8 sps:$4 sm:$0xff]   ;;  %v1426_v40 = vld [vmem:[%s2084_s1 + $0xa4] ss:$8 sps:$4 sm:$0xff]  }
   0xe   :  { %v1422_v37 = vld [vmem:[%s2084_s1 + $0x294] ss:$8 sps:$4 sm:$0xff]   ;;  %v1425_v39 = vld [vmem:[%s2084_s1 + $0x290] ss:$8 sps:$4 sm:$0xff]   ;;  %v1428_v41 = vld [vmem:[%s2084_s1 + $0x2a4] ss:$8 sps:$4 sm:$0xff]  }
   0xf   :  { %954 = vmatpush1.bf16.msra.mxu1 %v1388_v14  ;;  %v1430_v42 = vld [vmem:[%s2084_s1 + $0xa0] ss:$8 sps:$4 sm:$0xff]   ;;  %v1432_v44 = vld [vmem:[%s2084_s1 + $0xb4] ss:$8 sps:$4 sm:$0xff]   ;;  %v1436_v46 = vld [vmem:[%s2084_s1 + $0xb0] ss:$8 sps:$4 sm:$0xff]  }
  0x10   :  { %1040 = vmatpush1.bf16.msra.mxu0 %v1389_v15  ;;  %955 = vmatprep.subr.bf16.mxu1 %v1390_v16  ;;  %v1431_v43 = vld [vmem:[%s2084_s1 + $0x2a0] ss:$8 sps:$4 sm:$0xff]   ;;  %v1434_v45 = vld [vmem:[%s2084_s1 + $0x2b4] ss:$8 sps:$4 sm:$0xff]   ;;  %v1437_v47 = vld [vmem:[%s2084_s1 + $0x2b0] ss:$8 sps:$4 sm:$0xff]  }
  0x11   :  { %1041 = vmatprep.subr.bf16.mxu0 %v1392_v17  ;;  %v1464_v48 = vld [vmem:[%s2085_s0 + $0x4] ss:$36 sps:$4 sm:$0xff]   ;;  %v1470_v51 = vld [vmem:[%s2085_s0 + $0x14] ss:$36 sps:$4 sm:$0xff]  }
  0x12   :  { %v1438_v49 = vld [vmem:[%s2084_s1 + $0xc4] ss:$8 sps:$4 sm:$0xff]   ;;  %979 = vmatprep.mubr.bf16.mxu1 %v1464_v48  ;;  %v1442_v52 = vld [vmem:[%s2084_s1 + $0xc0] ss:$8 sps:$4 sm:$0xff]   ;;  %v1444_v54 = vld [vmem:[%s2084_s1 + $0xd4] ss:$8 sps:$4 sm:$0xff]   ;;  %1065 = vmatprep.mubr.bf16.mxu0 %v1470_v51 }
  0x13   :  { %956 = vmatpush1.bf16.msra.mxu1 %v1394_v18  ;;  %v1440_v50 = vld [vmem:[%s2084_s1 + $0x2c4] ss:$8 sps:$4 sm:$0xff]   ;;  %v1443_v53 = vld [vmem:[%s2084_s1 + $0x2c0] ss:$8 sps:$4 sm:$0xff]   ;;  %v1446_v55 = vld [vmem:[%s2084_s1 + $0x2d4] ss:$8 sps:$4 sm:$0xff]  }
  0x14   :  { %1042 = vmatpush1.bf16.msra.mxu0 %v1395_v19  ;;  %957 = vmatprep.subr.bf16.mxu1 %v1396_v20  ;;  %v1448_v56 = vld [vmem:[%s2084_s1 + $0xd0] ss:$8 sps:$4 sm:$0xff]   ;;  %v1450_v58 = vld [vmem:[%s2084_s1 + $0xe4] ss:$8 sps:$4 sm:$0xff]   ;;  %v1454_v60 = vld [vmem:[%s2084_s1 + $0xe0] ss:$8 sps:$4 sm:$0xff]  }
  0x15   :  { %1043 = vmatprep.subr.bf16.mxu0 %v1398_v21  ;;  %v1449_v57 = vld [vmem:[%s2084_s1 + $0x2d0] ss:$8 sps:$4 sm:$0xff]   ;;  %v1452_v59 = vld [vmem:[%s2084_s1 + $0x2e4] ss:$8 sps:$4 sm:$0xff]   ;;  %v1455_v61 = vld [vmem:[%s2084_s1 + $0x2e0] ss:$8 sps:$4 sm:$0xff]  }
  0x16   :  { %v1456_v62 = vld [vmem:[%s2084_s1 + $0xf4] ss:$8 sps:$4 sm:$0xff]   ;;  %v1460_v0 = vld [vmem:[%s2084_s1 + $0xf0] ss:$8 sps:$4 sm:$0xff]   ;;  %v1467_v2 = vld [vmem:[%s2084_s1 + $0x104] ss:$8 sps:$4 sm:$0xff]  }
  0x17   :  { %958 = vmatpush1.bf16.msra.mxu1 %v1400_v22  ;;  %v1458_v63 = vld [vmem:[%s2084_s1 + $0x2f4] ss:$8 sps:$4 sm:$0xff]   ;;  %v1461_v1 = vld [vmem:[%s2084_s1 + $0x2f0] ss:$8 sps:$4 sm:$0xff]   ;;  %v1473_v3 = vld [vmem:[%s2084_s1 + $0x304] ss:$8 sps:$4 sm:$0xff]  }
  0x18   :  { %1044 = vmatpush1.bf16.msra.mxu0 %v1401_v23  ;;  %959 = vmatprep.subr.bf16.mxu1 %v1402_v24  ;;  %v1462_v4 = vld [vmem:[%s2085_s0] ss:$36 sps:$4 sm:$0xff]   ;;  %v1468_v6 = vld [vmem:[%s2085_s0 + $0x10] ss:$36 sps:$4 sm:$0xff]  }
  0x19   :  { %1045 = vmatprep.subr.bf16.mxu0 %v1404_v25  ;;  %v1465_v5 = vld [vmem:[%s2084_s1 + $0x100] ss:$8 sps:$4 sm:$0xff]   ;;  %v1476_v8 = vld [vmem:[%s2084_s1 + $0x114] ss:$8 sps:$4 sm:$0xff]   ;;  %v1474_v10 = vld [vmem:[%s2084_s1 + $0x110] ss:$8 sps:$4 sm:$0xff]  }
  0x1a   :  { %v1471_v7 = vld [vmem:[%s2084_s1 + $0x300] ss:$8 sps:$4 sm:$0xff]   ;;  %v1479_v9 = vld [vmem:[%s2084_s1 + $0x314] ss:$8 sps:$4 sm:$0xff]   ;;  %v1477_v11 = vld [vmem:[%s2084_s1 + $0x310] ss:$8 sps:$4 sm:$0xff]  }
  0x1b   :  { %960 = vmatpush1.bf16.msra.mxu1 %v1406_v26  ;;  %v1482_v12 = vld [vmem:[%s2084_s1 + $0x124] ss:$8 sps:$4 sm:$0xff]   ;;  %v1480_v14 = vld [vmem:[%s2084_s1 + $0x120] ss:$8 sps:$4 sm:$0xff]   ;;  %v1488_v16 = vld [vmem:[%s2084_s1 + $0x134] ss:$8 sps:$4 sm:$0xff]  }
  0x1c   :  { %1046 = vmatpush1.bf16.msra.mxu0 %v1407_v27  ;;  %961 = vmatprep.subr.bf16.mxu1 %v1408_v28  ;;  %v1485_v13 = vld [vmem:[%s2084_s1 + $0x324] ss:$8 sps:$4 sm:$0xff]   ;;  %v1483_v15 = vld [vmem:[%s2084_s1 + $0x320] ss:$8 sps:$4 sm:$0xff]   ;;  %v1491_v17 = vld [vmem:[%s2084_s1 + $0x334] ss:$8 sps:$4 sm:$0xff]  }
  0x1d   :  { %1047 = vmatprep.subr.bf16.mxu0 %v1410_v29  ;;  %v1486_v18 = vld [vmem:[%s2084_s1 + $0x130] ss:$8 sps:$4 sm:$0xff]   ;;  %v1494_v20 = vld [vmem:[%s2084_s1 + $0x144] ss:$8 sps:$4 sm:$0xff]   ;;  %v1492_v22 = vld [vmem:[%s2084_s1 + $0x140] ss:$8 sps:$4 sm:$0xff]  }
  0x1e   :  { %v1489_v19 = vld [vmem:[%s2084_s1 + $0x330] ss:$8 sps:$4 sm:$0xff]   ;;  %v1497_v21 = vld [vmem:[%s2084_s1 + $0x344] ss:$8 sps:$4 sm:$0xff]   ;;  %v1495_v23 = vld [vmem:[%s2084_s1 + $0x340] ss:$8 sps:$4 sm:$0xff]  }
  0x1f   :  { %962 = vmatpush1.bf16.msra.mxu1 %v1412_v30  ;;  %v1500_v24 = vld [vmem:[%s2084_s1 + $0x154] ss:$8 sps:$4 sm:$0xff]   ;;  %v1498_v26 = vld [vmem:[%s2084_s1 + $0x150] ss:$8 sps:$4 sm:$0xff]   ;;  %v1506_v28 = vld [vmem:[%s2084_s1 + $0x164] ss:$8 sps:$4 sm:$0xff]  }
  0x20   :  { %1048 = vmatpush1.bf16.msra.mxu0 %v1413_v31  ;;  %963 = vmatprep.subr.bf16.mxu1 %v1414_v32  ;;  %v1503_v25 = vld [vmem:[%s2084_s1 + $0x354] ss:$8 sps:$4 sm:$0xff]   ;;  %v1501_v27 = vld [vmem:[%s2084_s1 + $0x350] ss:$8 sps:$4 sm:$0xff]   ;;  %v1509_v29 = vld [vmem:[%s2084_s1 + $0x364] ss:$8 sps:$4 sm:$0xff]  }
  0x21   :  { %1049 = vmatprep.subr.bf16.mxu0 %v1416_v33  ;;  %v1504_v30 = vld [vmem:[%s2084_s1 + $0x160] ss:$8 sps:$4 sm:$0xff]   ;;  %v1512_v32 = vld [vmem:[%s2084_s1 + $0x174] ss:$8 sps:$4 sm:$0xff]  }
  0x22   :  { %v1507_v31 = vld [vmem:[%s2084_s1 + $0x360] ss:$8 sps:$4 sm:$0xff]   ;;  %v1515_v33 = vld [vmem:[%s2084_s1 + $0x374] ss:$8 sps:$4 sm:$0xff]  }
  0x23   :  { %964 = vmatpush1.bf16.msra.mxu1 %v1418_v34  ;;  %v1566_v34 = vld [vmem:[%s2085_s0 + $0xc] ss:$36 sps:$4 sm:$0xff]   ;;  %v1528_v48 = vld [vmem:[%s2084_s1 + $0x1a0] ss:$8 sps:$4 sm:$0xff]   ;;  %v1539_v51 = vld [vmem:[%s2084_s1 + $0x3b4] ss:$8 sps:$4 sm:$0xff]  }
  0x24   :  { %1050 = vmatpush1.bf16.msra.mxu0 %v1419_v35  ;;  %965 = vmatprep.subr.bf16.mxu1 %v1420_v36  ;;  %v1569_v35 = vld [vmem:[%s2085_s0 + $0x1c] ss:$36 sps:$4 sm:$0xff]   ;;  %v1510_v36 = vld [vmem:[%s2084_s1 + $0x170] ss:$8 sps:$4 sm:$0xff]  }
  0x25   :  { %1051 = vmatprep.subr.bf16.mxu0 %v1422_v37  ;;  %v1513_v37 = vld [vmem:[%s2084_s1 + $0x370] ss:$8 sps:$4 sm:$0xff]  }
  0x27   :  { %966 = vmatpush1.bf16.msra.mxu1 %v1424_v38  ;;  %v1518_v38 = vld [vmem:[%s2084_s1 + $0x184] ss:$8 sps:$4 sm:$0xff]  }
  0x28   :  { %1052 = vmatpush1.bf16.msra.mxu0 %v1425_v39  ;;  %967 = vmatprep.subr.bf16.mxu1 %v1426_v40  ;;  %v1521_v39 = vld [vmem:[%s2084_s1 + $0x384] ss:$8 sps:$4 sm:$0xff]   ;;  %v1516_v40 = vld [vmem:[%s2084_s1 + $0x180] ss:$8 sps:$4 sm:$0xff]  }
  0x29   :  { %1053 = vmatprep.subr.bf16.mxu0 %v1428_v41  ;;  %v1519_v41 = vld [vmem:[%s2084_s1 + $0x380] ss:$8 sps:$4 sm:$0xff]  }
  0x2b   :  { %968 = vmatpush1.bf16.msra.mxu1 %v1430_v42  ;;  %v1524_v42 = vld [vmem:[%s2084_s1 + $0x194] ss:$8 sps:$4 sm:$0xff]  }
  0x2c   :  { %1054 = vmatpush1.bf16.msra.mxu0 %v1431_v43  ;;  %969 = vmatprep.subr.bf16.mxu1 %v1432_v44  ;;  %v1527_v43 = vld [vmem:[%s2084_s1 + $0x394] ss:$8 sps:$4 sm:$0xff]   ;;  %v1522_v44 = vld [vmem:[%s2084_s1 + $0x190] ss:$8 sps:$4 sm:$0xff]  }
  0x2d   :  { %1055 = vmatprep.subr.bf16.mxu0 %v1434_v45  ;;  %v1525_v45 = vld [vmem:[%s2084_s1 + $0x390] ss:$8 sps:$4 sm:$0xff]  }
  0x2f   :  { %970 = vmatpush1.bf16.msra.mxu1 %v1436_v46  ;;  %v1530_v46 = vld [vmem:[%s2084_s1 + $0x1a4] ss:$8 sps:$4 sm:$0xff]  }
  0x30   :  { %1056 = vmatpush1.bf16.msra.mxu0 %v1437_v47  ;;  %971 = vmatprep.subr.bf16.mxu1 %v1438_v49  ;;  %v1533_v47 = vld [vmem:[%s2084_s1 + $0x3a4] ss:$8 sps:$4 sm:$0xff]   ;;  %v1531_v49 = vld [vmem:[%s2084_s1 + $0x3a0] ss:$8 sps:$4 sm:$0xff]  }
  0x31   :  { %1057 = vmatprep.subr.bf16.mxu0 %v1440_v50  ;;  %v1536_v50 = vld [vmem:[%s2084_s1 + $0x1b4] ss:$8 sps:$4 sm:$0xff]  }
  0x33   :  { %972 = vmatpush1.bf16.msra.mxu1 %v1442_v52  ;;  %v1534_v52 = vld [vmem:[%s2084_s1 + $0x1b0] ss:$8 sps:$4 sm:$0xff]  }
  0x34   :  { %1058 = vmatpush1.bf16.msra.mxu0 %v1443_v53  ;;  %973 = vmatprep.subr.bf16.mxu1 %v1444_v54  ;;  %v1537_v53 = vld [vmem:[%s2084_s1 + $0x3b0] ss:$8 sps:$4 sm:$0xff]   ;;  %v1542_v54 = vld [vmem:[%s2084_s1 + $0x1c4] ss:$8 sps:$4 sm:$0xff]  }
  0x35   :  { %1059 = vmatprep.subr.bf16.mxu0 %v1446_v55  ;;  %v1545_v55 = vld [vmem:[%s2084_s1 + $0x3c4] ss:$8 sps:$4 sm:$0xff]  }
  0x37   :  { %974 = vmatpush1.bf16.msra.mxu1 %v1448_v56  ;;  %v1540_v56 = vld [vmem:[%s2084_s1 + $0x1c0] ss:$8 sps:$4 sm:$0xff]  }
  0x38   :  { %1060 = vmatpush1.bf16.msra.mxu0 %v1449_v57  ;;  %975 = vmatprep.subr.bf16.mxu1 %v1450_v58  ;;  %v1543_v57 = vld [vmem:[%s2084_s1 + $0x3c0] ss:$8 sps:$4 sm:$0xff]   ;;  %v1548_v58 = vld [vmem:[%s2084_s1 + $0x1d4] ss:$8 sps:$4 sm:$0xff]  }
  0x39   :  { %1061 = vmatprep.subr.bf16.mxu0 %v1452_v59  ;;  %v1551_v59 = vld [vmem:[%s2084_s1 + $0x3d4] ss:$8 sps:$4 sm:$0xff]  }
  0x3b   :  { %976 = vmatpush1.bf16.msra.mxu1 %v1454_v60  ;;  %v1546_v60 = vld [vmem:[%s2084_s1 + $0x1d0] ss:$8 sps:$4 sm:$0xff]  }
  0x3c   :  { %1062 = vmatpush1.bf16.msra.mxu0 %v1455_v61  ;;  %977 = vmatprep.subr.bf16.mxu1 %v1456_v62  ;;  %v1549_v61 = vld [vmem:[%s2084_s1 + $0x3d0] ss:$8 sps:$4 sm:$0xff]   ;;  %v1554_v62 = vld [vmem:[%s2084_s1 + $0x1e4] ss:$8 sps:$4 sm:$0xff]  }
  0x3d   :  { %1063 = vmatprep.subr.bf16.mxu0 %v1458_v63  ;;  %v1557_v63 = vld [vmem:[%s2084_s1 + $0x3e4] ss:$8 sps:$4 sm:$0xff]  }
  0x3f   :  { %978 = vmatpush1.bf16.msra.mxu1 %v1460_v0  ;;  %v1552_v0 = vld [vmem:[%s2084_s1 + $0x1e0] ss:$8 sps:$4 sm:$0xff]  }
  0x40   :  { %1064 = vmatpush1.bf16.msra.mxu0 %v1461_v1  ;;  %990 = vmatprep.subr.bf16.mxu1 %v1467_v2  ;;  %v1555_v1 = vld [vmem:[%s2084_s1 + $0x3e0] ss:$8 sps:$4 sm:$0xff]   ;;  %v1560_v2 = vld [vmem:[%s2084_s1 + $0x1f4] ss:$8 sps:$4 sm:$0xff]  }
  0x41   :  { %1076 = vmatprep.subr.bf16.mxu0 %v1473_v3  ;;  %v1563_v3 = vld [vmem:[%s2084_s1 + $0x3f4] ss:$8 sps:$4 sm:$0xff]  }
  0x42   :  { %980 = vmatmul.mubr.bf16.vlgmr.msra.gmra.mrb[0].mxu1 %v1462_v4  ;;  %v1558_v4 = vld [vmem:[%s2084_s1 + $0x1f0] ss:$8 sps:$4 sm:$0xff]  }
  0x43   :  { %1066 = vmatmul.mubr.bf16.vlgmr.msra.gmra.mrb[0].mxu0 %v1468_v6  ;;  %991 = vmatpush1.bf16.msra.mxu1 %v1465_v5  ;;  %v1561_v5 = vld [vmem:[%s2084_s1 + $0x3f0] ss:$8 sps:$4 sm:$0xff]   ;;  %v1572_v6 = vld [vmem:[%s2084_s1 + $0x404] ss:$8 sps:$4 sm:$0xff]  }
  0x44   :  { %1077 = vmatpush1.bf16.msra.mxu0 %v1471_v7  ;;  %992 = vmatprep.subr.bf16.mxu1 %v1476_v8  ;;  %v1564_v7 = vld [vmem:[%s2085_s0 + $0x8] ss:$36 sps:$4 sm:$0xff]   ;;  %v1567_v8 = vld [vmem:[%s2085_s0 + $0x18] ss:$36 sps:$4 sm:$0xff]  }
  0x45   :  { %1078 = vmatprep.subr.bf16.mxu0 %v1479_v9  ;;  %1022 = vmatprep.mubr.bf16.mxu1 %v1566_v34  ;;  %v1570_v9 = vld [vmem:[%s2084_s1 + $0x400] ss:$8 sps:$4 sm:$0xff]  }
  0x46   :  { %1108 = vmatprep.mubr.bf16.mxu0 %v1569_v35 }
  0x47   :  { %993 = vmatpush1.bf16.msra.mxu1 %v1474_v10  ;;  %v1575_v10 = vld [vmem:[%s2084_s1 + $0x414] ss:$8 sps:$4 sm:$0xff]  }
  0x48   :  { %1079 = vmatpush1.bf16.msra.mxu0 %v1477_v11  ;;  %994 = vmatprep.subr.bf16.mxu1 %v1482_v12  ;;  %v1573_v11 = vld [vmem:[%s2084_s1 + $0x410] ss:$8 sps:$4 sm:$0xff]   ;;  %v1595_v12 = vmov 0  }
  0x49   :  { %1080 = vmatprep.subr.bf16.mxu0 %v1485_v13  ;;  %v1578_v13 = vld [vmem:[%s2084_s1 + $0x424] ss:$8 sps:$4 sm:$0xff]  }
  0x4b   :  { %995 = vmatpush1.bf16.msra.mxu1 %v1480_v14  ;;  %v1576_v14 = vld [vmem:[%s2084_s1 + $0x420] ss:$8 sps:$4 sm:$0xff]  }
  0x4c   :  { %1081 = vmatpush1.bf16.msra.mxu0 %v1483_v15  ;;  %996 = vmatprep.subr.bf16.mxu1 %v1488_v16  ;;  %v1581_v15 = vld [vmem:[%s2084_s1 + $0x434] ss:$8 sps:$4 sm:$0xff]   ;;  %v1579_v16 = vld [vmem:[%s2084_s1 + $0x430] ss:$8 sps:$4 sm:$0xff]  }
  0x4d   :  { %1082 = vmatprep.subr.bf16.mxu0 %v1491_v17  ;;  %v1584_v17 = vld [vmem:[%s2084_s1 + $0x444] ss:$8 sps:$4 sm:$0xff]  }
  0x4f   :  { %997 = vmatpush1.bf16.msra.mxu1 %v1486_v18  ;;  %v1582_v18 = vld [vmem:[%s2084_s1 + $0x440] ss:$8 sps:$4 sm:$0xff]  }
  0x50   :  { %1083 = vmatpush1.bf16.msra.mxu0 %v1489_v19  ;;  %998 = vmatprep.subr.bf16.mxu1 %v1494_v20  ;;  %v1587_v19 = vld [vmem:[%s2084_s1 + $0x454] ss:$8 sps:$4 sm:$0xff]   ;;  %v1585_v20 = vld [vmem:[%s2084_s1 + $0x450] ss:$8 sps:$4 sm:$0xff]  }
  0x51   :  { %1084 = vmatprep.subr.bf16.mxu0 %v1497_v21  ;;  %v1590_v21 = vld [vmem:[%s2084_s1 + $0x464] ss:$8 sps:$4 sm:$0xff]  }
  0x53   :  { %999 = vmatpush1.bf16.msra.mxu1 %v1492_v22  ;;  %v1588_v22 = vld [vmem:[%s2084_s1 + $0x460] ss:$8 sps:$4 sm:$0xff]  }
  0x54   :  { %1085 = vmatpush1.bf16.msra.mxu0 %v1495_v23  ;;  %1000 = vmatprep.subr.bf16.mxu1 %v1500_v24  ;;  %v1593_v23 = vld [vmem:[%s2084_s1 + $0x474] ss:$8 sps:$4 sm:$0xff]   ;;  %v1591_v24 = vld [vmem:[%s2084_s1 + $0x470] ss:$8 sps:$4 sm:$0xff]  }
  0x55   :  { %1086 = vmatprep.subr.bf16.mxu0 %v1503_v25  ;;  %v1594_v25 = vld [vmem:[%s2085_s0 + $0x20] ss:$36 sps:$4 sm:$0xff]  }
  0x57   :  { %1001 = vmatpush1.bf16.msra.mxu1 %v1498_v26 }
  0x58   :  { %1087 = vmatpush1.bf16.msra.mxu0 %v1501_v27  ;;  %1002 = vmatprep.subr.bf16.mxu1 %v1506_v28 }
  0x59   :  { %1088 = vmatprep.subr.bf16.mxu0 %v1509_v29 }
  0x5b   :  { %1003 = vmatpush1.bf16.msra.mxu1 %v1504_v30  ;;  %v171_v30 = vlaneseq }
  0x5c   :  { %1089 = vmatpush1.bf16.msra.mxu0 %v1507_v31  ;;  %1004 = vmatprep.subr.bf16.mxu1 %v1512_v32 }
  0x5d   :  { %1090 = vmatprep.subr.bf16.mxu0 %v1515_v33  ;;  %v172_v31 = vshrl.u32 %v171_v30, 7  ;;  %v169_v33 = vld [vmem:[%s2086_s2] sm:$0x3] }
  0x5f   :  { %1005 = vmatpush1.bf16.msra.mxu1 %v1510_v36  ;;  %v173_v32 = vsub.s32 0, %v172_v31  ;;  %v177_v34 = vsub.s32 1, %v172_v31 }
  0x60   :  { %1091 = vmatpush1.bf16.msra.mxu0 %v1513_v37  ;;  %1006 = vmatprep.subr.bf16.mxu1 %v1518_v38 }
  0x61   :  { %1092 = vmatprep.subr.bf16.mxu0 %v1521_v39  ;;  %v174_v35 = vrot.slane %v169_v33, %v173_v32  ;;  %v178_v36 = vrot.slane %v169_v33, %v177_v34 }
  0x63   :  { %1007 = vmatpush1.bf16.msra.mxu1 %v1516_v40 }
  0x64   :  { %1093 = vmatpush1.bf16.msra.mxu0 %v1519_v41  ;;  %1008 = vmatprep.subr.bf16.mxu1 %v1524_v42 }
  0x65   :  { %1094 = vmatprep.subr.bf16.mxu0 %v1527_v43 }
  0x67   :  { %1009 = vmatpush1.bf16.msra.mxu1 %v1522_v44 }
  0x68   :  { %1095 = vmatpush1.bf16.msra.mxu0 %v1525_v45  ;;  %1010 = vmatprep.subr.bf16.mxu1 %v1530_v46 }
  0x69   :  { %1096 = vmatprep.subr.bf16.mxu0 %v1533_v47 }
  0x6b   :  { %1011 = vmatpush1.bf16.msra.mxu1 %v1528_v48 }
  0x6c   :  { %1097 = vmatpush1.bf16.msra.mxu0 %v1531_v49  ;;  %1012 = vmatprep.subr.bf16.mxu1 %v1536_v50 }
  0x6d   :  { %1098 = vmatprep.subr.bf16.mxu0 %v1539_v51 }
  0x6f   :  { %1013 = vmatpush1.bf16.msra.mxu1 %v1534_v52 }
  0x70   :  { %1099 = vmatpush1.bf16.msra.mxu0 %v1537_v53  ;;  %1014 = vmatprep.subr.bf16.mxu1 %v1542_v54 }
  0x71   :  { %1100 = vmatprep.subr.bf16.mxu0 %v1545_v55 }
  0x73   :  { %1015 = vmatpush1.bf16.msra.mxu1 %v1540_v56 }
  0x74   :  { %1101 = vmatpush1.bf16.msra.mxu0 %v1543_v57  ;;  %1016 = vmatprep.subr.bf16.mxu1 %v1548_v58 }
  0x75   :  { %1102 = vmatprep.subr.bf16.mxu0 %v1551_v59 }
  0x77   :  { %1017 = vmatpush1.bf16.msra.mxu1 %v1546_v60 }
  0x78   :  { %1103 = vmatpush1.bf16.msra.mxu0 %v1549_v61  ;;  %1018 = vmatprep.subr.bf16.mxu1 %v1554_v62 }
  0x79   :  { %1104 = vmatprep.subr.bf16.mxu0 %v1557_v63 }
  0x7b   :  { %1019 = vmatpush1.bf16.msra.mxu1 %v1552_v0 }
  0x7c   :  { %1105 = vmatpush1.bf16.msra.mxu0 %v1555_v1  ;;  %1020 = vmatprep.subr.bf16.mxu1 %v1560_v2 }
  0x7d   :  { %1106 = vmatprep.subr.bf16.mxu0 %v1563_v3 }
  0x7f   :  { %1021 = vmatpush1.bf16.msra.mxu1 %v1558_v4 }
  0x80   :  { %1107 = vmatpush1.bf16.msra.mxu0 %v1561_v5 }
  0x81   :  { %1119 = vmatprep.subr.bf16.mxu0 %v1572_v6 }
  0x82   :  { %1023 = vmatmul.mubr.bf16.vlgmr.msra.gmra.mrb[0].mxu1 %v1564_v7 }
  0x83   :  { %1109 = vmatmul.mubr.bf16.vlgmr.msra.gmra.mrb[0].mxu0 %v1567_v8 }
  0x84   :  { %1120 = vmatpush1.bf16.msra.mxu0 %v1570_v9  ;;  %1151 = vmatprep.mubr.bf16.mxu0 %v1595_v12 }
  0x85   :  { %1121 = vmatprep.subr.bf16.mxu0 %v1575_v10 }
  0x88   :  { %1122 = vmatpush1.bf16.msra.mxu0 %v1573_v11 }
  0x89   :  { %1123 = vmatprep.subr.bf16.mxu0 %v1578_v13 }
  0x8c   :  { %1124 = vmatpush1.bf16.msra.mxu0 %v1576_v14 }
  0x8d   :  { %1125 = vmatprep.subr.bf16.mxu0 %v1581_v15 }
  0x90   :  { %1126 = vmatpush1.bf16.msra.mxu0 %v1579_v16 }
  0x91   :  { %1127 = vmatprep.subr.bf16.mxu0 %v1584_v17 }
  0x94   :  { %1128 = vmatpush1.bf16.msra.mxu0 %v1582_v18 }
  0x95   :  { %1129 = vmatprep.subr.bf16.mxu0 %v1587_v19 }
  0x98   :  { %1130 = vmatpush1.bf16.msra.mxu0 %v1585_v20 }
  0x99   :  { %1131 = vmatprep.subr.bf16.mxu0 %v1590_v21 }
  0x9c   :  { %1132 = vmatpush1.bf16.msra.mxu0 %v1588_v22 }
  0x9d   :  { %1133 = vmatprep.subr.bf16.mxu0 %v1593_v23 }
  0xa0   :  { %1134 = vmatpush1.bf16.msra.mxu0 %v1591_v24 }
  0xa3   :  { %1152 = vmatmul.mubr.bf16.vlgmr.msra.gmra.mrb[0].mxu0 %v1594_v25 }
 0x155   :  { %v1024_v26 = vpop.f32.mrb[0].mxu1 }
 0x156   :  { %v1026_v27 = vpop.f32.mrb[1].mxu1  ;;  %v1345_v37 = vadd.f32 %v1024_v26, %v174_v35 }
 0x157   :  { %v1028_v28 = vpop.f32.mrb[2].mxu1  ;;  %v1347_v38 = vadd.f32 %v1026_v27, %v178_v36 }
 0x158   :  { %v1030_v29 = vpop.f32.mrb[3].mxu1  ;;  %v1349_v40 = vadd.f32 %v1028_v28, %v174_v35 }
 0x159   :  { %v1351_v43 = vadd.f32 %v1030_v29, %v178_v36 }
 0x176   :  { %v1153_v39 = vpop.f32.mrb[0].mxu0 }
 0x177   :  { %v1346_v41 = vadd.f32 %v1345_v37, %v1153_v39  ;;  %v1155_v42 = vpop.f32.mrb[1].mxu0 }
 0x178   :  { %v1348_v44 = vadd.f32 %v1347_v38, %v1155_v42  ;;  %v1157_v45 = vpop.f32.mrb[2].mxu0 }
 0x179   :  { %v1162_v46 = vmul.f32 0.2, %v1346_v41  ;;  %v1350_v47 = vadd.f32 %v1349_v40, %v1157_v45  ;;  %v1159_v48 = vpop.f32.mrb[3].mxu0 }
 0x17a   :  { %v1163_v49 = vmul.f32 0.2, %v1348_v44  ;;  %v1352_v50 = vadd.f32 %v1351_v43, %v1159_v48 }
 0x17b   :  { %v1166_v51 = vmax.f32 %v1346_v41, %v1162_v46  ;;  %v1164_v52 = vmul.f32 0.2, %v1350_v47 }
 0x17c   :  { %v1167_v53 = vmax.f32 %v1348_v44, %v1163_v49  ;;  %v1165_v54 = vmul.f32 0.2, %v1352_v50 }
 0x17d   :  { %v1168_v55 = vmax.f32 %v1350_v47, %v1164_v52 }
 0x17e   :  { %v1343_v56 = vpack.c.bf16 %v1167_v53, %v1166_v51  ;;  %v1169_v57 = vmax.f32 %v1352_v50, %v1165_v54 }
 0x180   :  { %1182 = vst [vmem:[%s2087_s3] sm:$0xff] %v1343_v56  ;;  %v1344_v58 = vpack.c.bf16 %v1169_v57, %v1168_v55 }
 0x182   :  { %1183 = vst [vmem:[%s2087_s3 + $0x8] sm:$0xff] %v1344_v58 }

// kernel: network_forward.17
= control target key start
LH: loop header
LB: loop body
LE: loop exit
PB: predicated region body
PF: predicated region fallthrough
CT: control target
= control target key end

     0   :  { %s446_s1 = inlined_call_operand.vmem [shape: bf16[256,128], index: 1, kind: input, shape index: {}]   ;;  %s447_s0 = inlined_call_operand.vmem [shape: bf16[32,256], index: 0, kind: input, shape index: {}]   ;;  %s448_s2 = inlined_call_operand.vmem [shape: f32[1,128], index: 2, kind: input, shape index: {}]   ;;  %s449_s3 = inlined_call_operand.vmem [shape: bf16[32,128], index: 3, kind: output, shape index: {}]  }
   0x1   :  { %v335_v0 = vld [vmem:[%s446_s1 + $0x40] sm:$0xff]   ;;  %v337_v2 = vld [vmem:[%s446_s1 + $0x48] sm:$0xff]   ;;  %v339_v4 = vld [vmem:[%s446_s1 + $0x50] sm:$0xff]  }
   0x2   :  { %v336_v1 = vld [vmem:[%s446_s1] sm:$0xff]   ;;  %291 = vmatprep.subr.bf16.mxu0 %v335_v0  ;;  %319 = vmatprep.subr.bf16.mxu1 %v335_v0  ;;  %v338_v3 = vld [vmem:[%s446_s1 + $0x8] sm:$0xff]   ;;  %v340_v5 = vld [vmem:[%s446_s1 + $0x10] sm:$0xff]  }
   0x3   :  { %292 = vmatpush3.bf16.msra.mxu0 %v336_v1  ;;  %327 = vmatpush3.bf16.msra.mxu1 %v336_v1  ;;  %v341_v6 = vld [vmem:[%s446_s1 + $0x58] sm:$0xff]   ;;  %v343_v8 = vld [vmem:[%s446_s1 + $0x60] sm:$0xff]   ;;  %v345_v10 = vld [vmem:[%s446_s1 + $0x68] sm:$0xff]  }
   0x4   :  { %293 = vmatprep.subr.bf16.mxu0 %v337_v2  ;;  %320 = vmatprep.subr.bf16.mxu1 %v337_v2  ;;  %v342_v7 = vld [vmem:[%s446_s1 + $0x18] sm:$0xff]   ;;  %v344_v9 = vld [vmem:[%s446_s1 + $0x20] sm:$0xff]   ;;  %v346_v13 = vld [vmem:[%s446_s1 + $0x28] sm:$0xff]  }
   0x5   :  { %v353_v11 = vld [vmem:[%s447_s0 + $0x4] ss:$8 sps:$4 sm:$0xff]   ;;  %v356_v12 = vld [vmem:[%s447_s0 + $0x14] ss:$8 sps:$4 sm:$0xff]   ;;  %v351_v18 = vld [vmem:[%s447_s0] ss:$8 sps:$4 sm:$0xff]  }
   0x6   :  { %v347_v14 = vld [vmem:[%s446_s1 + $0x70] sm:$0xff]   ;;  %206 = vmatprep.mubr.bf16.mxu0 %v353_v11  ;;  %214 = vmatprep.mubr.bf16.mxu1 %v356_v12  ;;  %v349_v16 = vld [vmem:[%s446_s1 + $0x78] sm:$0xff]   ;;  %v251_v22 = vld [vmem:[%s448_s2] ss:$0 sm:$0xff] }
   0x7   :  { %294 = vmatpush3.bf16.msra.mxu0 %v338_v3  ;;  %328 = vmatpush3.bf16.msra.mxu1 %v338_v3  ;;  %v348_v15 = vld [vmem:[%s446_s1 + $0x30] sm:$0xff]   ;;  %v350_v17 = vld [vmem:[%s446_s1 + $0x38] sm:$0xff]  }
   0x8   :  { %295 = vmatprep.subr.bf16.mxu0 %v339_v4  ;;  %321 = vmatprep.subr.bf16.mxu1 %v339_v4  ;;  %v354_v19 = vld [vmem:[%s447_s0 + $0x10] ss:$8 sps:$4 sm:$0xff]  }
   0xb   :  { %296 = vmatpush3.bf16.msra.mxu0 %v340_v5  ;;  %329 = vmatpush3.bf16.msra.mxu1 %v340_v5 }
   0xc   :  { %297 = vmatprep.subr.bf16.mxu0 %v341_v6  ;;  %322 = vmatprep.subr.bf16.mxu1 %v341_v6 }
   0xf   :  { %298 = vmatpush3.bf16.msra.mxu0 %v342_v7  ;;  %330 = vmatpush3.bf16.msra.mxu1 %v342_v7 }
  0x10   :  { %299 = vmatprep.subr.bf16.mxu0 %v343_v8  ;;  %323 = vmatprep.subr.bf16.mxu1 %v343_v8 }
  0x13   :  { %300 = vmatpush3.bf16.msra.mxu0 %v344_v9  ;;  %331 = vmatpush3.bf16.msra.mxu1 %v344_v9 }
  0x14   :  { %301 = vmatprep.subr.bf16.mxu0 %v345_v10  ;;  %324 = vmatprep.subr.bf16.mxu1 %v345_v10 }
  0x17   :  { %302 = vmatpush3.bf16.msra.mxu0 %v346_v13  ;;  %332 = vmatpush3.bf16.msra.mxu1 %v346_v13 }
  0x18   :  { %303 = vmatprep.subr.bf16.mxu0 %v347_v14  ;;  %325 = vmatprep.subr.bf16.mxu1 %v347_v14 }
  0x1b   :  { %304 = vmatpush3.bf16.msra.mxu0 %v348_v15  ;;  %333 = vmatpush3.bf16.msra.mxu1 %v348_v15 }
  0x1c   :  { %305 = vmatprep.subr.bf16.mxu0 %v349_v16  ;;  %326 = vmatprep.subr.bf16.mxu1 %v349_v16 }
  0x1f   :  { %306 = vmatpush3.bf16.msra.mxu0 %v350_v17  ;;  %334 = vmatpush3.bf16.msra.mxu1 %v350_v17 }
  0x22   :  { %207 = vmatmul.mubr.bf16.vlgmr.msra.gmra.mrb[0].mxu0 %v351_v18  ;;  %215 = vmatmul.mubr.bf16.vlgmr.msra.gmra.mrb[0].mxu1 %v354_v19 }
  0xf5   :  { %v307_v20 = vpop.f32.mrb[0].mxu0  ;;  %v313_v21 = vpop.f32.mrb[0].mxu1 }
  0xf6   :  { %v308_v23 = vpop.f32.mrb[1].mxu0  ;;  %v314_v24 = vpop.f32.mrb[1].mxu1 }
  0xf7   :  { %v309_v25 = vadd.f32 %v308_v23, %v307_v20  ;;  %v315_v26 = vadd.f32 %v314_v24, %v313_v21  ;;  %v310_v27 = vpop.f32.mrb[2].mxu0  ;;  %v316_v28 = vpop.f32.mrb[2].mxu1 }
  0xf8   :  { %v311_v29 = vpop.f32.mrb[3].mxu0  ;;  %v317_v30 = vpop.f32.mrb[3].mxu1 }
  0xf9   :  { %v209_v31 = vadd.f32 %v309_v25, %v251_v22  ;;  %v217_v32 = vadd.f32 %v315_v26, %v251_v22  ;;  %v312_v33 = vadd.f32 %v311_v29, %v310_v27  ;;  %v318_v34 = vadd.f32 %v317_v30, %v316_v28 }
  0xfb   :  { %v212_v35 = vadd.f32 %v312_v33, %v251_v22  ;;  %v220_v36 = vadd.f32 %v318_v34, %v251_v22  ;;  %v223_v37 = vmax.f32 %v209_v31, 0.0  ;;  %v225_v38 = vmax.f32 %v217_v32, 0.0 }
  0xfd   :  { %v224_v39 = vmax.f32 %v212_v35, 0.0  ;;  %v226_v40 = vmax.f32 %v220_v36, 0.0 }
  0xff   :  { %v283_v41 = vpack.c.bf16 %v224_v39, %v223_v37  ;;  %v288_v42 = vpack.c.bf16 %v226_v40, %v225_v38 }
 0x101   :  { %284 = vst [vmem:[%s449_s3] sm:$0xff] %v283_v41   ;;  %290 = vst [vmem:[%s449_s3 + $0x8] sm:$0xff] %v288_v42  }

// kernel: network_forward.15
= control target key start
LH: loop header
LB: loop body
LE: loop exit
PB: predicated region body
PF: predicated region fallthrough
CT: control target
= control target key end

     0   :  { %s6061_s12 = smov 0   ;;  %s6063_s13 = smov 0   ;;  %s7842_s0 = inlined_call_operand.vmem [shape: bf16[16,1024], index: 0, kind: input, shape index: {}]   ;;  %s7843_s1 = inlined_call_operand.vmem [shape: bf16[1024,2048], index: 1, kind: input, shape index: {}]   ;;  %s7844_s2 = inlined_call_operand.vmem [shape: f32[1,2048], index: 2, kind: input, shape index: {}]   ;;  %s7845_s3 = inlined_call_operand.vmem [shape: bf16[16,2048], index: 3, kind: output, shape index: {}]  }
   0x1   :  { %s6065_s14 = smov 0   ;;  %s6067_s15 = smov 0  }
   0x2   :  { %s6069_s16 = smov 0  }
   0x3 LB: > { %s22_s17 = sadd.s32 1, %s6035_s15  ;;  %s5342_s18 = sadd.s32 4294967295, %s6039_s16   ;;  %s6039_s16 = sphi %s6069_s16, %s13_s16   ;;  %s6035_s15 = sphi %s6067_s15, %s7851_s15   ;;  %s6031_s14 = sphi %s6065_s14, %s7850_s14   ;;  %s6027_s13 = sphi %s6063_s13, %s7849_s13   ;;  %s6023_s12 = sphi %s6061_s12, %s7848_s12  }
   0x4   : > { %p23_p0 = scmp.ge.s32.totalorder %s22_s17, 2  ;;  %p65_p1 = scmp.ne.s32.totalorder %s6027_s13, %s6023_s12 }
   0x5   : > { %p66_p2 = scmp.eq.s32.totalorder %s6039_s16, 0  ;;  %p123_p4 = scmp.eq.s32.totalorder %s5342_s18, 1 }
   0x6   : > { %s7853_s17 = smov (%p23_p0, %s22_s17), 0  ;;  %s58_s20 = sadd.s32 1, %s6027_s13 }
   0x7   : > { %p67_p3 = por %p66_p2, %p65_p1  ;;  %s55_s19 = ssub.s32 %s6035_s15, %s7853_s17 }
   0x8   : > { %p56_p5 = scmp.eq.s32.totalorder %s55_s19, 0  ;;  %p6096_p6 = por %p123_p4, %p65_p1 }
   0x9   : > { %p5346_p7 = scmp.ge.s32.totalorder %s6039_s16, 2 }
   0xa   : > { %s6101_s22 = scalar_select %p56_p5, %s6027_s13, %s58_s20  }
   0xb   : > { %155 = sbr.rel (%p5346_p7) target bundleno = 278 (0x116), region = 20 }
  0x12   : > { %158 = sbr.rel (!%p67_p3) target bundleno = 278 (0x116), region = 24  ;;  %s160_s23 = sand.u32 (%p67_p3), 1, %s6027_s13  }
  0x13   : > { %s5887_s24 = sshll.u32 (%p67_p3), %s6035_s15, 5  ;;  %s5347_s25 = sshll.u32 (%p67_p3), %s160_s23, 12 }
  0x14   : > { %s6109_s28 = scalar_lea.vmem (%p67_p3), %s7843_s1, %s5887_s24  ;;  %s6114_s29 = scalar_lea.vmem (%p67_p3), [#allocation2], %s5347_s25 }
  0x15   : > { %v178_v0 = vld [vmem:[%s6109_s28] sm:$0xff] (%p67_p3)  ;;  %v180_v1 = vld [vmem:[%s6109_s28 + $0x8] sm:$0xff] (%p67_p3)  ;;  %v182_v2 = vld [vmem:[%s6109_s28 + $0x10] sm:$0xff] (%p67_p3) }
  0x16   : > { %179 = vst [vmem:[%s6114_s29] sm:$0xff] (%p67_p3), %v178_v0  ;;  %181 = vst [vmem:[%s6114_s29 + $0x8] sm:$0xff] (%p67_p3), %v180_v1  ;;  %v184_v3 = vld [vmem:[%s6109_s28 + $0x18] sm:$0xff] (%p67_p3)  ;;  %v186_v4 = vld [vmem:[%s6109_s28 + $0x40] sm:$0xff] (%p67_p3) }
  0x17   : > { %183 = vst [vmem:[%s6114_s29 + $0x10] sm:$0xff] (%p67_p3), %v182_v2  ;;  %v188_v5 = vld [vmem:[%s6109_s28 + $0x48] sm:$0xff] (%p67_p3)  ;;  %185 = vst [vmem:[%s6114_s29 + $0x18] sm:$0xff] (%p67_p3), %v184_v3  ;;  %v190_v6 = vld [vmem:[%s6109_s28 + $0x50] sm:$0xff] (%p67_p3) }
  0x18   : > { %187 = vst [vmem:[%s6114_s29 + $0x20] sm:$0xff] (%p67_p3), %v186_v4  ;;  %189 = vst [vmem:[%s6114_s29 + $0x28] sm:$0xff] (%p67_p3), %v188_v5  ;;  %v192_v7 = vld [vmem:[%s6109_s28 + $0x58] sm:$0xff] (%p67_p3)  ;;  %v194_v8 = vld [vmem:[%s6109_s28 + $0x80] sm:$0xff] (%p67_p3) }
  0x19   : > { %191 = vst [vmem:[%s6114_s29 + $0x30] sm:$0xff] %v190_v6  ;;  %193 = vst [vmem:[%s6114_s29 + $0x38] sm:$0xff] %v192_v7  ;;  %v196_v9 = vld [vmem:[%s6109_s28 + $0x88] sm:$0xff]  ;;  %v198_v10 = vld [vmem:[%s6109_s28 + $0x90] sm:$0xff] }
  0x1a   : > { %195 = vst [vmem:[%s6114_s29 + $0x40] sm:$0xff] %v194_v8  ;;  %v200_v11 = vld [vmem:[%s6109_s28 + $0x98] sm:$0xff]  ;;  %197 = vst [vmem:[%s6114_s29 + $0x48] sm:$0xff] %v196_v9  ;;  %v202_v12 = vld [vmem:[%s6109_s28 + $0xc0] sm:$0xff] }
  0x1b   : > { %199 = vst [vmem:[%s6114_s29 + $0x50] sm:$0xff] %v198_v10  ;;  %201 = vst [vmem:[%s6114_s29 + $0x58] sm:$0xff] %v200_v11  ;;  %v204_v13 = vld [vmem:[%s6109_s28 + $0xc8] sm:$0xff]  ;;  %v206_v14 = vld [vmem:[%s6109_s28 + $0xd0] sm:$0xff] }
  0x1c   : > { %203 = vst [vmem:[%s6114_s29 + $0x60] sm:$0xff] %v202_v12  ;;  %205 = vst [vmem:[%s6114_s29 + $0x68] sm:$0xff] %v204_v13  ;;  %v208_v15 = vld [vmem:[%s6109_s28 + $0xd8] sm:$0xff]  ;;  %v210_v16 = vld [vmem:[%s6109_s28 + $0x100] sm:$0xff] }
  0x1d   : > { %207 = vst [vmem:[%s6114_s29 + $0x70] sm:$0xff] %v206_v14  ;;  %v212_v17 = vld [vmem:[%s6109_s28 + $0x108] sm:$0xff]  ;;  %209 = vst [vmem:[%s6114_s29 + $0x78] sm:$0xff] %v208_v15  ;;  %v214_v18 = vld [vmem:[%s6109_s28 + $0x110] sm:$0xff] }
  0x1e   : > { %211 = vst [vmem:[%s6114_s29 + $0x80] sm:$0xff] %v210_v16  ;;  %213 = vst [vmem:[%s6114_s29 + $0x88] sm:$0xff] %v212_v17  ;;  %v216_v19 = vld [vmem:[%s6109_s28 + $0x118] sm:$0xff]  ;;  %v218_v20 = vld [vmem:[%s6109_s28 + $0x140] sm:$0xff] }
  0x1f   : > { %215 = vst [vmem:[%s6114_s29 + $0x90] sm:$0xff] %v214_v18  ;;  %217 = vst [vmem:[%s6114_s29 + $0x98] sm:$0xff] %v216_v19  ;;  %v220_v21 = vld [vmem:[%s6109_s28 + $0x148] sm:$0xff]  ;;  %v222_v22 = vld [vmem:[%s6109_s28 + $0x150] sm:$0xff] }
  0x20   : > { %219 = vst [vmem:[%s6114_s29 + $0xa0] sm:$0xff] %v218_v20  ;;  %v224_v23 = vld [vmem:[%s6109_s28 + $0x158] sm:$0xff]  ;;  %221 = vst [vmem:[%s6114_s29 + $0xa8] sm:$0xff] %v220_v21  ;;  %v226_v24 = vld [vmem:[%s6109_s28 + $0x180] sm:$0xff] }
  0x21   : > { %223 = vst [vmem:[%s6114_s29 + $0xb0] sm:$0xff] %v222_v22  ;;  %225 = vst [vmem:[%s6114_s29 + $0xb8] sm:$0xff] %v224_v23  ;;  %v228_v25 = vld [vmem:[%s6109_s28 + $0x188] sm:$0xff]  ;;  %v230_v26 = vld [vmem:[%s6109_s28 + $0x190] sm:$0xff] }
  0x22   : > { %227 = vst [vmem:[%s6114_s29 + $0xc0] sm:$0xff] %v226_v24  ;;  %229 = vst [vmem:[%s6114_s29 + $0xc8] sm:$0xff] %v228_v25  ;;  %v232_v27 = vld [vmem:[%s6109_s28 + $0x198] sm:$0xff]  ;;  %v234_v28 = vld [vmem:[%s6109_s28 + $0x1c0] sm:$0xff] }
  0x23   : > { %231 = vst [vmem:[%s6114_s29 + $0xd0] sm:$0xff] %v230_v26  ;;  %v236_v29 = vld [vmem:[%s6109_s28 + $0x1c8] sm:$0xff]  ;;  %233 = vst [vmem:[%s6114_s29 + $0xd8] sm:$0xff] %v232_v27  ;;  %v238_v30 = vld [vmem:[%s6109_s28 + $0x1d0] sm:$0xff] }
  0x24   : > { %235 = vst [vmem:[%s6114_s29 + $0xe0] sm:$0xff] %v234_v28  ;;  %237 = vst [vmem:[%s6114_s29 + $0xe8] sm:$0xff] %v236_v29  ;;  %v240_v31 = vld [vmem:[%s6109_s28 + $0x1d8] sm:$0xff]  ;;  %v242_v32 = vld [vmem:[%s6109_s28 + $0x200] sm:$0xff] }
  0x25   : > { %239 = vst [vmem:[%s6114_s29 + $0xf0] sm:$0xff] %v238_v30  ;;  %241 = vst [vmem:[%s6114_s29 + $0xf8] sm:$0xff] %v240_v31  ;;  %v244_v33 = vld [vmem:[%s6109_s28 + $0x208] sm:$0xff]  ;;  %v246_v34 = vld [vmem:[%s6109_s28 + $0x210] sm:$0xff] }
  0x26   : > { %243 = vst [vmem:[%s6114_s29 + $0x100] sm:$0xff] %v242_v32  ;;  %v248_v35 = vld [vmem:[%s6109_s28 + $0x218] sm:$0xff]  ;;  %245 = vst [vmem:[%s6114_s29 + $0x108] sm:$0xff] %v244_v33  ;;  %v250_v36 = vld [vmem:[%s6109_s28 + $0x240] sm:$0xff] }
  0x27   : > { %247 = vst [vmem:[%s6114_s29 + $0x110] sm:$0xff] %v246_v34  ;;  %249 = vst [vmem:[%s6114_s29 + $0x118] sm:$0xff] %v248_v35  ;;  %v252_v37 = vld [vmem:[%s6109_s28 + $0x248] sm:$0xff]  ;;  %v254_v38 = vld [vmem:[%s6109_s28 + $0x250] sm:$0xff] }
  0x28   : > { %251 = vst [vmem:[%s6114_s29 + $0x120] sm:$0xff] %v250_v36  ;;  %253 = vst [vmem:[%s6114_s29 + $0x128] sm:$0xff] %v252_v37  ;;  %v256_v39 = vld [vmem:[%s6109_s28 + $0x258] sm:$0xff]  ;;  %v258_v40 = vld [vmem:[%s6109_s28 + $0x280] sm:$0xff] }
  0x29   : > { %255 = vst [vmem:[%s6114_s29 + $0x130] sm:$0xff] %v254_v38  ;;  %v260_v41 = vld [vmem:[%s6109_s28 + $0x288] sm:$0xff]  ;;  %257 = vst [vmem:[%s6114_s29 + $0x138] sm:$0xff] %v256_v39  ;;  %v262_v42 = vld [vmem:[%s6109_s28 + $0x290] sm:$0xff] }
  0x2a   : > { %259 = vst [vmem:[%s6114_s29 + $0x140] sm:$0xff] %v258_v40  ;;  %261 = vst [vmem:[%s6114_s29 + $0x148] sm:$0xff] %v260_v41  ;;  %v264_v43 = vld [vmem:[%s6109_s28 + $0x298] sm:$0xff]  ;;  %v266_v44 = vld [vmem:[%s6109_s28 + $0x2c0] sm:$0xff] }
  0x2b   : > { %263 = vst [vmem:[%s6114_s29 + $0x150] sm:$0xff] %v262_v42  ;;  %265 = vst [vmem:[%s6114_s29 + $0x158] sm:$0xff] %v264_v43  ;;  %v268_v45 = vld [vmem:[%s6109_s28 + $0x2c8] sm:$0xff]  ;;  %v270_v46 = vld [vmem:[%s6109_s28 + $0x2d0] sm:$0xff] }
  0x2c   : > { %267 = vst [vmem:[%s6114_s29 + $0x160] sm:$0xff] %v266_v44  ;;  %v272_v47 = vld [vmem:[%s6109_s28 + $0x2d8] sm:$0xff]  ;;  %269 = vst [vmem:[%s6114_s29 + $0x168] sm:$0xff] %v268_v45  ;;  %v274_v48 = vld [vmem:[%s6109_s28 + $0x300] sm:$0xff] }
  0x2d   : > { %271 = vst [vmem:[%s6114_s29 + $0x170] sm:$0xff] %v270_v46  ;;  %273 = vst [vmem:[%s6114_s29 + $0x178] sm:$0xff] %v272_v47  ;;  %v276_v49 = vld [vmem:[%s6109_s28 + $0x308] sm:$0xff]  ;;  %v278_v50 = vld [vmem:[%s6109_s28 + $0x310] sm:$0xff] }
  0x2e   : > { %275 = vst [vmem:[%s6114_s29 + $0x180] sm:$0xff] %v274_v48  ;;  %277 = vst [vmem:[%s6114_s29 + $0x188] sm:$0xff] %v276_v49  ;;  %v280_v51 = vld [vmem:[%s6109_s28 + $0x318] sm:$0xff]  ;;  %v282_v52 = vld [vmem:[%s6109_s28 + $0x340] sm:$0xff] }
  0x2f   : > { %279 = vst [vmem:[%s6114_s29 + $0x190] sm:$0xff] %v278_v50  ;;  %v284_v53 = vld [vmem:[%s6109_s28 + $0x348] sm:$0xff]  ;;  %281 = vst [vmem:[%s6114_s29 + $0x198] sm:$0xff] %v280_v51  ;;  %v286_v54 = vld [vmem:[%s6109_s28 + $0x350] sm:$0xff] }
  0x30   : > { %283 = vst [vmem:[%s6114_s29 + $0x1a0] sm:$0xff] %v282_v52  ;;  %285 = vst [vmem:[%s6114_s29 + $0x1a8] sm:$0xff] %v284_v53  ;;  %v288_v55 = vld [vmem:[%s6109_s28 + $0x358] sm:$0xff]  ;;  %v290_v56 = vld [vmem:[%s6109_s28 + $0x380] sm:$0xff] }
  0x31   : > { %287 = vst [vmem:[%s6114_s29 + $0x1b0] sm:$0xff] %v286_v54  ;;  %289 = vst [vmem:[%s6114_s29 + $0x1b8] sm:$0xff] %v288_v55  ;;  %v292_v57 = vld [vmem:[%s6109_s28 + $0x388] sm:$0xff]  ;;  %v294_v58 = vld [vmem:[%s6109_s28 + $0x390] sm:$0xff] }
  0x32   : > { %291 = vst [vmem:[%s6114_s29 + $0x1c0] sm:$0xff] %v290_v56  ;;  %v296_v59 = vld [vmem:[%s6109_s28 + $0x398] sm:$0xff]  ;;  %293 = vst [vmem:[%s6114_s29 + $0x1c8] sm:$0xff] %v292_v57  ;;  %v298_v60 = vld [vmem:[%s6109_s28 + $0x3c0] sm:$0xff] }
  0x33   : > { %295 = vst [vmem:[%s6114_s29 + $0x1d0] sm:$0xff] %v294_v58  ;;  %297 = vst [vmem:[%s6114_s29 + $0x1d8] sm:$0xff] %v296_v59  ;;  %v300_v61 = vld [vmem:[%s6109_s28 + $0x3c8] sm:$0xff]  ;;  %v302_v62 = vld [vmem:[%s6109_s28 + $0x3d0] sm:$0xff] }
  0x34   : > { %299 = vst [vmem:[%s6114_s29 + $0x1e0] sm:$0xff] %v298_v60  ;;  %301 = vst [vmem:[%s6114_s29 + $0x1e8] sm:$0xff] %v300_v61  ;;  %v304_v63 = vld [vmem:[%s6109_s28 + $0x3d8] sm:$0xff]  ;;  %v306_v0 = vld [vmem:[%s6109_s28 + $0x400] sm:$0xff] }
  0x35   : > { %303 = vst [vmem:[%s6114_s29 + $0x1f0] sm:$0xff] %v302_v62  ;;  %v308_v1 = vld [vmem:[%s6109_s28 + $0x408] sm:$0xff]  ;;  %305 = vst [vmem:[%s6114_s29 + $0x1f8] sm:$0xff] %v304_v63  ;;  %v310_v2 = vld [vmem:[%s6109_s28 + $0x410] sm:$0xff] }
  0x36   : > { %307 = vst [vmem:[%s6114_s29 + $0x200] sm:$0xff] %v306_v0  ;;  %309 = vst [vmem:[%s6114_s29 + $0x208] sm:$0xff] %v308_v1  ;;  %v312_v3 = vld [vmem:[%s6109_s28 + $0x418] sm:$0xff]  ;;  %v314_v4 = vld [vmem:[%s6109_s28 + $0x440] sm:$0xff] }
  0x37   : > { %311 = vst [vmem:[%s6114_s29 + $0x210] sm:$0xff] %v310_v2  ;;  %313 = vst [vmem:[%s6114_s29 + $0x218] sm:$0xff] %v312_v3  ;;  %v316_v5 = vld [vmem:[%s6109_s28 + $0x448] sm:$0xff]  ;;  %v318_v6 = vld [vmem:[%s6109_s28 + $0x450] sm:$0xff] }
  0x38   : > { %315 = vst [vmem:[%s6114_s29 + $0x220] sm:$0xff] %v314_v4  ;;  %v320_v7 = vld [vmem:[%s6109_s28 + $0x458] sm:$0xff]  ;;  %317 = vst [vmem:[%s6114_s29 + $0x228] sm:$0xff] %v316_v5  ;;  %v322_v8 = vld [vmem:[%s6109_s28 + $0x480] sm:$0xff] }
  0x39   : > { %319 = vst [vmem:[%s6114_s29 + $0x230] sm:$0xff] %v318_v6  ;;  %321 = vst [vmem:[%s6114_s29 + $0x238] sm:$0xff] %v320_v7  ;;  %v324_v9 = vld [vmem:[%s6109_s28 + $0x488] sm:$0xff]  ;;  %v326_v10 = vld [vmem:[%s6109_s28 + $0x490] sm:$0xff] }
  0x3a   : > { %323 = vst [vmem:[%s6114_s29 + $0x240] sm:$0xff] %v322_v8  ;;  %325 = vst [vmem:[%s6114_s29 + $0x248] sm:$0xff] %v324_v9  ;;  %v328_v11 = vld [vmem:[%s6109_s28 + $0x498] sm:$0xff]  ;;  %v330_v12 = vld [vmem:[%s6109_s28 + $0x4c0] sm:$0xff] }
  0x3b   : > { %327 = vst [vmem:[%s6114_s29 + $0x250] sm:$0xff] %v326_v10  ;;  %v332_v13 = vld [vmem:[%s6109_s28 + $0x4c8] sm:$0xff]  ;;  %329 = vst [vmem:[%s6114_s29 + $0x258] sm:$0xff] %v328_v11  ;;  %v334_v14 = vld [vmem:[%s6109_s28 + $0x4d0] sm:$0xff] }
  0x3c   : > { %331 = vst [vmem:[%s6114_s29 + $0x260] sm:$0xff] %v330_v12  ;;  %333 = vst [vmem:[%s6114_s29 + $0x268] sm:$0xff] %v332_v13  ;;  %v336_v15 = vld [vmem:[%s6109_s28 + $0x4d8] sm:$0xff]  ;;  %v338_v16 = vld [vmem:[%s6109_s28 + $0x500] sm:$0xff] }
  0x3d   : > { %335 = vst [vmem:[%s6114_s29 + $0x270] sm:$0xff] %v334_v14  ;;  %337 = vst [vmem:[%s6114_s29 + $0x278] sm:$0xff] %v336_v15  ;;  %v340_v17 = vld [vmem:[%s6109_s28 + $0x508] sm:$0xff]  ;;  %v342_v18 = vld [vmem:[%s6109_s28 + $0x510] sm:$0xff] }
  0x3e   : > { %339 = vst [vmem:[%s6114_s29 + $0x280] sm:$0xff] %v338_v16  ;;  %v344_v19 = vld [vmem:[%s6109_s28 + $0x518] sm:$0xff]  ;;  %341 = vst [vmem:[%s6114_s29 + $0x288] sm:$0xff] %v340_v17  ;;  %v346_v20 = vld [vmem:[%s6109_s28 + $0x540] sm:$0xff] }
  0x3f   : > { %343 = vst [vmem:[%s6114_s29 + $0x290] sm:$0xff] %v342_v18  ;;  %345 = vst [vmem:[%s6114_s29 + $0x298] sm:$0xff] %v344_v19  ;;  %v348_v21 = vld [vmem:[%s6109_s28 + $0x548] sm:$0xff]  ;;  %v350_v22 = vld [vmem:[%s6109_s28 + $0x550] sm:$0xff] }
  0x40   : > { %347 = vst [vmem:[%s6114_s29 + $0x2a0] sm:$0xff] %v346_v20  ;;  %349 = vst [vmem:[%s6114_s29 + $0x2a8] sm:$0xff] %v348_v21  ;;  %v352_v23 = vld [vmem:[%s6109_s28 + $0x558] sm:$0xff]  ;;  %v354_v24 = vld [vmem:[%s6109_s28 + $0x580] sm:$0xff] }
  0x41   : > { %351 = vst [vmem:[%s6114_s29 + $0x2b0] sm:$0xff] %v350_v22  ;;  %v356_v25 = vld [vmem:[%s6109_s28 + $0x588] sm:$0xff]  ;;  %353 = vst [vmem:[%s6114_s29 + $0x2b8] sm:$0xff] %v352_v23  ;;  %v358_v26 = vld [vmem:[%s6109_s28 + $0x590] sm:$0xff] }
  0x42   : > { %355 = vst [vmem:[%s6114_s29 + $0x2c0] sm:$0xff] %v354_v24  ;;  %357 = vst [vmem:[%s6114_s29 + $0x2c8] sm:$0xff] %v356_v25  ;;  %v360_v27 = vld [vmem:[%s6109_s28 + $0x598] sm:$0xff]  ;;  %v362_v28 = vld [vmem:[%s6109_s28 + $0x5c0] sm:$0xff] }
  0x43   : > { %359 = vst [vmem:[%s6114_s29 + $0x2d0] sm:$0xff] %v358_v26  ;;  %361 = vst [vmem:[%s6114_s29 + $0x2d8] sm:$0xff] %v360_v27  ;;  %v364_v29 = vld [vmem:[%s6109_s28 + $0x5c8] sm:$0xff]  ;;  %v366_v30 = vld [vmem:[%s6109_s28 + $0x5d0] sm:$0xff] }
  0x44   : > { %363 = vst [vmem:[%s6114_s29 + $0x2e0] sm:$0xff] %v362_v28  ;;  %v368_v31 = vld [vmem:[%s6109_s28 + $0x5d8] sm:$0xff]  ;;  %365 = vst [vmem:[%s6114_s29 + $0x2e8] sm:$0xff] %v364_v29  ;;  %v370_v32 = vld [vmem:[%s6109_s28 + $0x600] sm:$0xff] }
  0x45   : > { %367 = vst [vmem:[%s6114_s29 + $0x2f0] sm:$0xff] %v366_v30  ;;  %369 = vst [vmem:[%s6114_s29 + $0x2f8] sm:$0xff] %v368_v31  ;;  %v372_v33 = vld [vmem:[%s6109_s28 + $0x608] sm:$0xff]  ;;  %v374_v34 = vld [vmem:[%s6109_s28 + $0x610] sm:$0xff] }
  0x46   : > { %371 = vst [vmem:[%s6114_s29 + $0x300] sm:$0xff] %v370_v32  ;;  %373 = vst [vmem:[%s6114_s29 + $0x308] sm:$0xff] %v372_v33  ;;  %v376_v35 = vld [vmem:[%s6109_s28 + $0x618] sm:$0xff]  ;;  %v378_v36 = vld [vmem:[%s6109_s28 + $0x640] sm:$0xff] }
  0x47   : > { %375 = vst [vmem:[%s6114_s29 + $0x310] sm:$0xff] %v374_v34  ;;  %v380_v37 = vld [vmem:[%s6109_s28 + $0x648] sm:$0xff]  ;;  %377 = vst [vmem:[%s6114_s29 + $0x318] sm:$0xff] %v376_v35  ;;  %v382_v38 = vld [vmem:[%s6109_s28 + $0x650] sm:$0xff] }
  0x48   : > { %379 = vst [vmem:[%s6114_s29 + $0x320] sm:$0xff] %v378_v36  ;;  %381 = vst [vmem:[%s6114_s29 + $0x328] sm:$0xff] %v380_v37  ;;  %v384_v39 = vld [vmem:[%s6109_s28 + $0x658] sm:$0xff]  ;;  %v386_v40 = vld [vmem:[%s6109_s28 + $0x680] sm:$0xff] }
  0x49   : > { %383 = vst [vmem:[%s6114_s29 + $0x330] sm:$0xff] %v382_v38  ;;  %385 = vst [vmem:[%s6114_s29 + $0x338] sm:$0xff] %v384_v39  ;;  %v388_v41 = vld [vmem:[%s6109_s28 + $0x688] sm:$0xff]  ;;  %v390_v42 = vld [vmem:[%s6109_s28 + $0x690] sm:$0xff] }
  0x4a   : > { %387 = vst [vmem:[%s6114_s29 + $0x340] sm:$0xff] %v386_v40  ;;  %v392_v43 = vld [vmem:[%s6109_s28 + $0x698] sm:$0xff]  ;;  %389 = vst [vmem:[%s6114_s29 + $0x348] sm:$0xff] %v388_v41  ;;  %v394_v44 = vld [vmem:[%s6109_s28 + $0x6c0] sm:$0xff] }
  0x4b   : > { %391 = vst [vmem:[%s6114_s29 + $0x350] sm:$0xff] %v390_v42  ;;  %393 = vst [vmem:[%s6114_s29 + $0x358] sm:$0xff] %v392_v43  ;;  %v396_v45 = vld [vmem:[%s6109_s28 + $0x6c8] sm:$0xff]  ;;  %v398_v46 = vld [vmem:[%s6109_s28 + $0x6d0] sm:$0xff] }
  0x4c   : > { %395 = vst [vmem:[%s6114_s29 + $0x360] sm:$0xff] %v394_v44  ;;  %397 = vst [vmem:[%s6114_s29 + $0x368] sm:$0xff] %v396_v45  ;;  %v400_v47 = vld [vmem:[%s6109_s28 + $0x6d8] sm:$0xff]  ;;  %v402_v48 = vld [vmem:[%s6109_s28 + $0x700] sm:$0xff] }
  0x4d   : > { %399 = vst [vmem:[%s6114_s29 + $0x370] sm:$0xff] %v398_v46  ;;  %v404_v49 = vld [vmem:[%s6109_s28 + $0x708] sm:$0xff]  ;;  %401 = vst [vmem:[%s6114_s29 + $0x378] sm:$0xff] %v400_v47  ;;  %v406_v50 = vld [vmem:[%s6109_s28 + $0x710] sm:$0xff] }
  0x4e   : > { %403 = vst [vmem:[%s6114_s29 + $0x380] sm:$0xff] %v402_v48  ;;  %405 = vst [vmem:[%s6114_s29 + $0x388] sm:$0xff] %v404_v49  ;;  %v408_v51 = vld [vmem:[%s6109_s28 + $0x718] sm:$0xff]  ;;  %v410_v52 = vld [vmem:[%s6109_s28 + $0x740] sm:$0xff] }
  0x4f   : > { %407 = vst [vmem:[%s6114_s29 + $0x390] sm:$0xff] %v406_v50  ;;  %409 = vst [vmem:[%s6114_s29 + $0x398] sm:$0xff] %v408_v51  ;;  %v412_v53 = vld [vmem:[%s6109_s28 + $0x748] sm:$0xff]  ;;  %v414_v54 = vld [vmem:[%s6109_s28 + $0x750] sm:$0xff] }
  0x50   : > { %411 = vst [vmem:[%s6114_s29 + $0x3a0] sm:$0xff] %v410_v52  ;;  %v416_v55 = vld [vmem:[%s6109_s28 + $0x758] sm:$0xff]  ;;  %413 = vst [vmem:[%s6114_s29 + $0x3a8] sm:$0xff] %v412_v53  ;;  %v418_v56 = vld [vmem:[%s6109_s28 + $0x780] sm:$0xff] }
  0x51   : > { %415 = vst [vmem:[%s6114_s29 + $0x3b0] sm:$0xff] %v414_v54  ;;  %417 = vst [vmem:[%s6114_s29 + $0x3b8] sm:$0xff] %v416_v55  ;;  %v420_v57 = vld [vmem:[%s6109_s28 + $0x788] sm:$0xff]  ;;  %v422_v58 = vld [vmem:[%s6109_s28 + $0x790] sm:$0xff] }
  0x52   : > { %419 = vst [vmem:[%s6114_s29 + $0x3c0] sm:$0xff] %v418_v56  ;;  %421 = vst [vmem:[%s6114_s29 + $0x3c8] sm:$0xff] %v420_v57  ;;  %v424_v59 = vld [vmem:[%s6109_s28 + $0x798] sm:$0xff]  ;;  %v426_v60 = vld [vmem:[%s6109_s28 + $0x7c0] sm:$0xff] }
  0x53   : > { %423 = vst [vmem:[%s6114_s29 + $0x3d0] sm:$0xff] %v422_v58  ;;  %v428_v61 = vld [vmem:[%s6109_s28 + $0x7c8] sm:$0xff]  ;;  %425 = vst [vmem:[%s6114_s29 + $0x3d8] sm:$0xff] %v424_v59  ;;  %v430_v62 = vld [vmem:[%s6109_s28 + $0x7d0] sm:$0xff] }
  0x54   : > { %427 = vst [vmem:[%s6114_s29 + $0x3e0] sm:$0xff] %v426_v60  ;;  %429 = vst [vmem:[%s6114_s29 + $0x3e8] sm:$0xff] %v428_v61  ;;  %v432_v63 = vld [vmem:[%s6109_s28 + $0x7d8] sm:$0xff]  ;;  %v434_v0 = vld [vmem:[%s6109_s28 + $0x800] sm:$0xff] }
  0x55   : > { %431 = vst [vmem:[%s6114_s29 + $0x3f0] sm:$0xff] %v430_v62  ;;  %433 = vst [vmem:[%s6114_s29 + $0x3f8] sm:$0xff] %v432_v63  ;;  %v436_v1 = vld [vmem:[%s6109_s28 + $0x808] sm:$0xff]  ;;  %v438_v2 = vld [vmem:[%s6109_s28 + $0x810] sm:$0xff] }
  0x56   : > { %435 = vst [vmem:[%s6114_s29 + $0x400] sm:$0xff] %v434_v0  ;;  %v440_v3 = vld [vmem:[%s6109_s28 + $0x818] sm:$0xff]  ;;  %437 = vst [vmem:[%s6114_s29 + $0x408] sm:$0xff] %v436_v1  ;;  %v442_v4 = vld [vmem:[%s6109_s28 + $0x840] sm:$0xff] }
  0x57   : > { %439 = vst [vmem:[%s6114_s29 + $0x410] sm:$0xff] %v438_v2  ;;  %441 = vst [vmem:[%s6114_s29 + $0x418] sm:$0xff] %v440_v3  ;;  %v444_v5 = vld [vmem:[%s6109_s28 + $0x848] sm:$0xff]  ;;  %v446_v6 = vld [vmem:[%s6109_s28 + $0x850] sm:$0xff] }
  0x58   : > { %443 = vst [vmem:[%s6114_s29 + $0x420] sm:$0xff] %v442_v4  ;;  %445 = vst [vmem:[%s6114_s29 + $0x428] sm:$0xff] %v444_v5  ;;  %v448_v7 = vld [vmem:[%s6109_s28 + $0x858] sm:$0xff]  ;;  %v450_v8 = vld [vmem:[%s6109_s28 + $0x880] sm:$0xff] }
  0x59   : > { %447 = vst [vmem:[%s6114_s29 + $0x430] sm:$0xff] %v446_v6  ;;  %v452_v9 = vld [vmem:[%s6109_s28 + $0x888] sm:$0xff]  ;;  %449 = vst [vmem:[%s6114_s29 + $0x438] sm:$0xff] %v448_v7  ;;  %v454_v10 = vld [vmem:[%s6109_s28 + $0x890] sm:$0xff] }
  0x5a   : > { %451 = vst [vmem:[%s6114_s29 + $0x440] sm:$0xff] %v450_v8  ;;  %453 = vst [vmem:[%s6114_s29 + $0x448] sm:$0xff] %v452_v9  ;;  %v456_v11 = vld [vmem:[%s6109_s28 + $0x898] sm:$0xff]  ;;  %v458_v12 = vld [vmem:[%s6109_s28 + $0x8c0] sm:$0xff] }
  0x5b   : > { %455 = vst [vmem:[%s6114_s29 + $0x450] sm:$0xff] %v454_v10  ;;  %457 = vst [vmem:[%s6114_s29 + $0x458] sm:$0xff] %v456_v11  ;;  %v460_v13 = vld [vmem:[%s6109_s28 + $0x8c8] sm:$0xff]  ;;  %v462_v14 = vld [vmem:[%s6109_s28 + $0x8d0] sm:$0xff] }
  0x5c   : > { %459 = vst [vmem:[%s6114_s29 + $0x460] sm:$0xff] %v458_v12  ;;  %v464_v15 = vld [vmem:[%s6109_s28 + $0x8d8] sm:$0xff]  ;;  %461 = vst [vmem:[%s6114_s29 + $0x468] sm:$0xff] %v460_v13  ;;  %v466_v16 = vld [vmem:[%s6109_s28 + $0x900] sm:$0xff] }
  0x5d   : > { %463 = vst [vmem:[%s6114_s29 + $0x470] sm:$0xff] %v462_v14  ;;  %465 = vst [vmem:[%s6114_s29 + $0x478] sm:$0xff] %v464_v15  ;;  %v468_v17 = vld [vmem:[%s6109_s28 + $0x908] sm:$0xff]  ;;  %v470_v18 = vld [vmem:[%s6109_s28 + $0x910] sm:$0xff] }
  0x5e   : > { %467 = vst [vmem:[%s6114_s29 + $0x480] sm:$0xff] %v466_v16  ;;  %469 = vst [vmem:[%s6114_s29 + $0x488] sm:$0xff] %v468_v17  ;;  %v472_v19 = vld [vmem:[%s6109_s28 + $0x918] sm:$0xff]  ;;  %v474_v20 = vld [vmem:[%s6109_s28 + $0x940] sm:$0xff] }
  0x5f   : > { %471 = vst [vmem:[%s6114_s29 + $0x490] sm:$0xff] %v470_v18  ;;  %v476_v21 = vld [vmem:[%s6109_s28 + $0x948] sm:$0xff]  ;;  %473 = vst [vmem:[%s6114_s29 + $0x498] sm:$0xff] %v472_v19  ;;  %v478_v22 = vld [vmem:[%s6109_s28 + $0x950] sm:$0xff] }
  0x60   : > { %475 = vst [vmem:[%s6114_s29 + $0x4a0] sm:$0xff] %v474_v20  ;;  %477 = vst [vmem:[%s6114_s29 + $0x4a8] sm:$0xff] %v476_v21  ;;  %v480_v23 = vld [vmem:[%s6109_s28 + $0x958] sm:$0xff]  ;;  %v482_v24 = vld [vmem:[%s6109_s28 + $0x980] sm:$0xff] }
  0x61   : > { %479 = vst [vmem:[%s6114_s29 + $0x4b0] sm:$0xff] %v478_v22  ;;  %481 = vst [vmem:[%s6114_s29 + $0x4b8] sm:$0xff] %v480_v23  ;;  %v484_v25 = vld [vmem:[%s6109_s28 + $0x988] sm:$0xff]  ;;  %v486_v26 = vld [vmem:[%s6109_s28 + $0x990] sm:$0xff] }
  0x62   : > { %483 = vst [vmem:[%s6114_s29 + $0x4c0] sm:$0xff] %v482_v24  ;;  %v488_v27 = vld [vmem:[%s6109_s28 + $0x998] sm:$0xff]  ;;  %485 = vst [vmem:[%s6114_s29 + $0x4c8] sm:$0xff] %v484_v25  ;;  %v490_v28 = vld [vmem:[%s6109_s28 + $0x9c0] sm:$0xff] }
  0x63   : > { %487 = vst [vmem:[%s6114_s29 + $0x4d0] sm:$0xff] %v486_v26  ;;  %489 = vst [vmem:[%s6114_s29 + $0x4d8] sm:$0xff] %v488_v27  ;;  %v492_v29 = vld [vmem:[%s6109_s28 + $0x9c8] sm:$0xff]  ;;  %v494_v30 = vld [vmem:[%s6109_s28 + $0x9d0] sm:$0xff] }
  0x64   : > { %491 = vst [vmem:[%s6114_s29 + $0x4e0] sm:$0xff] %v490_v28  ;;  %493 = vst [vmem:[%s6114_s29 + $0x4e8] sm:$0xff] %v492_v29  ;;  %v496_v31 = vld [vmem:[%s6109_s28 + $0x9d8] sm:$0xff]  ;;  %v498_v32 = vld [vmem:[%s6109_s28 + $0xa00] sm:$0xff] }
  0x65   : > { %495 = vst [vmem:[%s6114_s29 + $0x4f0] sm:$0xff] %v494_v30  ;;  %v500_v33 = vld [vmem:[%s6109_s28 + $0xa08] sm:$0xff]  ;;  %497 = vst [vmem:[%s6114_s29 + $0x4f8] sm:$0xff] %v496_v31  ;;  %v502_v34 = vld [vmem:[%s6109_s28 + $0xa10] sm:$0xff] }
  0x66   : > { %499 = vst [vmem:[%s6114_s29 + $0x500] sm:$0xff] %v498_v32  ;;  %501 = vst [vmem:[%s6114_s29 + $0x508] sm:$0xff] %v500_v33  ;;  %v504_v35 = vld [vmem:[%s6109_s28 + $0xa18] sm:$0xff]  ;;  %v506_v36 = vld [vmem:[%s6109_s28 + $0xa40] sm:$0xff] }
  0x67   : > { %503 = vst [vmem:[%s6114_s29 + $0x510] sm:$0xff] %v502_v34  ;;  %505 = vst [vmem:[%s6114_s29 + $0x518] sm:$0xff] %v504_v35  ;;  %v508_v37 = vld [vmem:[%s6109_s28 + $0xa48] sm:$0xff]  ;;  %v510_v38 = vld [vmem:[%s6109_s28 + $0xa50] sm:$0xff] }
  0x68   : > { %507 = vst [vmem:[%s6114_s29 + $0x520] sm:$0xff] %v506_v36  ;;  %v512_v39 = vld [vmem:[%s6109_s28 + $0xa58] sm:$0xff]  ;;  %509 = vst [vmem:[%s6114_s29 + $0x528] sm:$0xff] %v508_v37  ;;  %v514_v40 = vld [vmem:[%s6109_s28 + $0xa80] sm:$0xff] }
  0x69   : > { %511 = vst [vmem:[%s6114_s29 + $0x530] sm:$0xff] %v510_v38  ;;  %513 = vst [vmem:[%s6114_s29 + $0x538] sm:$0xff] %v512_v39  ;;  %v516_v41 = vld [vmem:[%s6109_s28 + $0xa88] sm:$0xff]  ;;  %v518_v42 = vld [vmem:[%s6109_s28 + $0xa90] sm:$0xff] }
  0x6a   : > { %515 = vst [vmem:[%s6114_s29 + $0x540] sm:$0xff] %v514_v40  ;;  %517 = vst [vmem:[%s6114_s29 + $0x548] sm:$0xff] %v516_v41  ;;  %v520_v43 = vld [vmem:[%s6109_s28 + $0xa98] sm:$0xff]  ;;  %v522_v44 = vld [vmem:[%s6109_s28 + $0xac0] sm:$0xff] }
  0x6b   : > { %519 = vst [vmem:[%s6114_s29 + $0x550] sm:$0xff] %v518_v42  ;;  %v524_v45 = vld [vmem:[%s6109_s28 + $0xac8] sm:$0xff]  ;;  %521 = vst [vmem:[%s6114_s29 + $0x558] sm:$0xff] %v520_v43  ;;  %v526_v46 = vld [vmem:[%s6109_s28 + $0xad0] sm:$0xff] }
  0x6c   : > { %523 = vst [vmem:[%s6114_s29 + $0x560] sm:$0xff] %v522_v44  ;;  %525 = vst [vmem:[%s6114_s29 + $0x568] sm:$0xff] %v524_v45  ;;  %v528_v47 = vld [vmem:[%s6109_s28 + $0xad8] sm:$0xff]  ;;  %v530_v48 = vld [vmem:[%s6109_s28 + $0xb00] sm:$0xff] }
  0x6d   : > { %527 = vst [vmem:[%s6114_s29 + $0x570] sm:$0xff] %v526_v46  ;;  %529 = vst [vmem:[%s6114_s29 + $0x578] sm:$0xff] %v528_v47  ;;  %v532_v49 = vld [vmem:[%s6109_s28 + $0xb08] sm:$0xff]  ;;  %v534_v50 = vld [vmem:[%s6109_s28 + $0xb10] sm:$0xff] }
  0x6e   : > { %531 = vst [vmem:[%s6114_s29 + $0x580] sm:$0xff] %v530_v48  ;;  %v536_v51 = vld [vmem:[%s6109_s28 + $0xb18] sm:$0xff]  ;;  %533 = vst [vmem:[%s6114_s29 + $0x588] sm:$0xff] %v532_v49  ;;  %v538_v52 = vld [vmem:[%s6109_s28 + $0xb40] sm:$0xff] }
  0x6f   : > { %535 = vst [vmem:[%s6114_s29 + $0x590] sm:$0xff] %v534_v50  ;;  %537 = vst [vmem:[%s6114_s29 + $0x598] sm:$0xff] %v536_v51  ;;  %v540_v53 = vld [vmem:[%s6109_s28 + $0xb48] sm:$0xff]  ;;  %v542_v54 = vld [vmem:[%s6109_s28 + $0xb50] sm:$0xff] }
  0x70   : > { %539 = vst [vmem:[%s6114_s29 + $0x5a0] sm:$0xff] %v538_v52  ;;  %541 = vst [vmem:[%s6114_s29 + $0x5a8] sm:$0xff] %v540_v53  ;;  %v544_v55 = vld [vmem:[%s6109_s28 + $0xb58] sm:$0xff]  ;;  %v546_v56 = vld [vmem:[%s6109_s28 + $0xb80] sm:$0xff] }
  0x71   : > { %543 = vst [vmem:[%s6114_s29 + $0x5b0] sm:$0xff] %v542_v54  ;;  %v548_v57 = vld [vmem:[%s6109_s28 + $0xb88] sm:$0xff]  ;;  %545 = vst [vmem:[%s6114_s29 + $0x5b8] sm:$0xff] %v544_v55  ;;  %v550_v58 = vld [vmem:[%s6109_s28 + $0xb90] sm:$0xff] }
  0x72   : > { %547 = vst [vmem:[%s6114_s29 + $0x5c0] sm:$0xff] %v546_v56  ;;  %549 = vst [vmem:[%s6114_s29 + $0x5c8] sm:$0xff] %v548_v57  ;;  %v552_v59 = vld [vmem:[%s6109_s28 + $0xb98] sm:$0xff]  ;;  %v554_v60 = vld [vmem:[%s6109_s28 + $0xbc0] sm:$0xff] }
  0x73   : > { %551 = vst [vmem:[%s6114_s29 + $0x5d0] sm:$0xff] %v550_v58  ;;  %553 = vst [vmem:[%s6114_s29 + $0x5d8] sm:$0xff] %v552_v59  ;;  %v556_v61 = vld [vmem:[%s6109_s28 + $0xbc8] sm:$0xff]  ;;  %v558_v62 = vld [vmem:[%s6109_s28 + $0xbd0] sm:$0xff] }
  0x74   : > { %555 = vst [vmem:[%s6114_s29 + $0x5e0] sm:$0xff] %v554_v60  ;;  %v560_v63 = vld [vmem:[%s6109_s28 + $0xbd8] sm:$0xff]  ;;  %557 = vst [vmem:[%s6114_s29 + $0x5e8] sm:$0xff] %v556_v61  ;;  %v562_v0 = vld [vmem:[%s6109_s28 + $0xc00] sm:$0xff] }
  0x75   : > { %559 = vst [vmem:[%s6114_s29 + $0x5f0] sm:$0xff] %v558_v62  ;;  %561 = vst [vmem:[%s6114_s29 + $0x5f8] sm:$0xff] %v560_v63  ;;  %v564_v1 = vld [vmem:[%s6109_s28 + $0xc08] sm:$0xff]  ;;  %v566_v2 = vld [vmem:[%s6109_s28 + $0xc10] sm:$0xff] }
  0x76   : > { %563 = vst [vmem:[%s6114_s29 + $0x600] sm:$0xff] %v562_v0  ;;  %565 = vst [vmem:[%s6114_s29 + $0x608] sm:$0xff] %v564_v1  ;;  %v568_v3 = vld [vmem:[%s6109_s28 + $0xc18] sm:$0xff]  ;;  %v570_v4 = vld [vmem:[%s6109_s28 + $0xc40] sm:$0xff] }
  0x77   : > { %567 = vst [vmem:[%s6114_s29 + $0x610] sm:$0xff] %v566_v2  ;;  %v572_v5 = vld [vmem:[%s6109_s28 + $0xc48] sm:$0xff]  ;;  %569 = vst [vmem:[%s6114_s29 + $0x618] sm:$0xff] %v568_v3  ;;  %v574_v6 = vld [vmem:[%s6109_s28 + $0xc50] sm:$0xff] }
  0x78   : > { %571 = vst [vmem:[%s6114_s29 + $0x620] sm:$0xff] %v570_v4  ;;  %573 = vst [vmem:[%s6114_s29 + $0x628] sm:$0xff] %v572_v5  ;;  %v576_v7 = vld [vmem:[%s6109_s28 + $0xc58] sm:$0xff]  ;;  %v578_v8 = vld [vmem:[%s6109_s28 + $0xc80] sm:$0xff] }
  0x79   : > { %575 = vst [vmem:[%s6114_s29 + $0x630] sm:$0xff] %v574_v6  ;;  %577 = vst [vmem:[%s6114_s29 + $0x638] sm:$0xff] %v576_v7  ;;  %v580_v9 = vld [vmem:[%s6109_s28 + $0xc88] sm:$0xff]  ;;  %v582_v10 = vld [vmem:[%s6109_s28 + $0xc90] sm:$0xff] }
  0x7a   : > { %579 = vst [vmem:[%s6114_s29 + $0x640] sm:$0xff] %v578_v8  ;;  %v584_v11 = vld [vmem:[%s6109_s28 + $0xc98] sm:$0xff]  ;;  %581 = vst [vmem:[%s6114_s29 + $0x648] sm:$0xff] %v580_v9  ;;  %v586_v12 = vld [vmem:[%s6109_s28 + $0xcc0] sm:$0xff] }
  0x7b   : > { %583 = vst [vmem:[%s6114_s29 + $0x650] sm:$0xff] %v582_v10  ;;  %585 = vst [vmem:[%s6114_s29 + $0x658] sm:$0xff] %v584_v11  ;;  %v588_v13 = vld [vmem:[%s6109_s28 + $0xcc8] sm:$0xff]  ;;  %v590_v14 = vld [vmem:[%s6109_s28 + $0xcd0] sm:$0xff] }
  0x7c   : > { %587 = vst [vmem:[%s6114_s29 + $0x660] sm:$0xff] %v586_v12  ;;  %589 = vst [vmem:[%s6114_s29 + $0x668] sm:$0xff] %v588_v13  ;;  %v592_v15 = vld [vmem:[%s6109_s28 + $0xcd8] sm:$0xff]  ;;  %v594_v16 = vld [vmem:[%s6109_s28 + $0xd00] sm:$0xff] }
  0x7d   : > { %591 = vst [vmem:[%s6114_s29 + $0x670] sm:$0xff] %v590_v14  ;;  %v596_v17 = vld [vmem:[%s6109_s28 + $0xd08] sm:$0xff]  ;;  %593 = vst [vmem:[%s6114_s29 + $0x678] sm:$0xff] %v592_v15  ;;  %v598_v18 = vld [vmem:[%s6109_s28 + $0xd10] sm:$0xff] }
  0x7e   : > { %595 = vst [vmem:[%s6114_s29 + $0x680] sm:$0xff] %v594_v16  ;;  %597 = vst [vmem:[%s6114_s29 + $0x688] sm:$0xff] %v596_v17  ;;  %v600_v19 = vld [vmem:[%s6109_s28 + $0xd18] sm:$0xff]  ;;  %v602_v20 = vld [vmem:[%s6109_s28 + $0xd40] sm:$0xff] }
  0x7f   : > { %599 = vst [vmem:[%s6114_s29 + $0x690] sm:$0xff] %v598_v18  ;;  %601 = vst [vmem:[%s6114_s29 + $0x698] sm:$0xff] %v600_v19  ;;  %v604_v21 = vld [vmem:[%s6109_s28 + $0xd48] sm:$0xff]  ;;  %v606_v22 = vld [vmem:[%s6109_s28 + $0xd50] sm:$0xff] }
  0x80   : > { %603 = vst [vmem:[%s6114_s29 + $0x6a0] sm:$0xff] %v602_v20  ;;  %v608_v23 = vld [vmem:[%s6109_s28 + $0xd58] sm:$0xff]  ;;  %605 = vst [vmem:[%s6114_s29 + $0x6a8] sm:$0xff] %v604_v21  ;;  %v610_v24 = vld [vmem:[%s6109_s28 + $0xd80] sm:$0xff] }
  0x81   : > { %607 = vst [vmem:[%s6114_s29 + $0x6b0] sm:$0xff] %v606_v22  ;;  %609 = vst [vmem:[%s6114_s29 + $0x6b8] sm:$0xff] %v608_v23  ;;  %v612_v25 = vld [vmem:[%s6109_s28 + $0xd88] sm:$0xff]  ;;  %v614_v26 = vld [vmem:[%s6109_s28 + $0xd90] sm:$0xff] }
  0x82   : > { %611 = vst [vmem:[%s6114_s29 + $0x6c0] sm:$0xff] %v610_v24  ;;  %613 = vst [vmem:[%s6114_s29 + $0x6c8] sm:$0xff] %v612_v25  ;;  %v616_v27 = vld [vmem:[%s6109_s28 + $0xd98] sm:$0xff]  ;;  %v618_v28 = vld [vmem:[%s6109_s28 + $0xdc0] sm:$0xff] }
  0x83   : > { %615 = vst [vmem:[%s6114_s29 + $0x6d0] sm:$0xff] %v614_v26  ;;  %v620_v29 = vld [vmem:[%s6109_s28 + $0xdc8] sm:$0xff]  ;;  %617 = vst [vmem:[%s6114_s29 + $0x6d8] sm:$0xff] %v616_v27  ;;  %v622_v30 = vld [vmem:[%s6109_s28 + $0xdd0] sm:$0xff] }
  0x84   : > { %619 = vst [vmem:[%s6114_s29 + $0x6e0] sm:$0xff] %v618_v28  ;;  %621 = vst [vmem:[%s6114_s29 + $0x6e8] sm:$0xff] %v620_v29  ;;  %v624_v31 = vld [vmem:[%s6109_s28 + $0xdd8] sm:$0xff]  ;;  %v626_v32 = vld [vmem:[%s6109_s28 + $0xe00] sm:$0xff] }
  0x85   : > { %623 = vst [vmem:[%s6114_s29 + $0x6f0] sm:$0xff] %v622_v30  ;;  %625 = vst [vmem:[%s6114_s29 + $0x6f8] sm:$0xff] %v624_v31  ;;  %v628_v33 = vld [vmem:[%s6109_s28 + $0xe08] sm:$0xff]  ;;  %v630_v34 = vld [vmem:[%s6109_s28 + $0xe10] sm:$0xff] }
  0x86   : > { %627 = vst [vmem:[%s6114_s29 + $0x700] sm:$0xff] %v626_v32  ;;  %v632_v35 = vld [vmem:[%s6109_s28 + $0xe18] sm:$0xff]  ;;  %629 = vst [vmem:[%s6114_s29 + $0x708] sm:$0xff] %v628_v33  ;;  %v634_v36 = vld [vmem:[%s6109_s28 + $0xe40] sm:$0xff] }
  0x87   : > { %631 = vst [vmem:[%s6114_s29 + $0x710] sm:$0xff] %v630_v34  ;;  %633 = vst [vmem:[%s6114_s29 + $0x718] sm:$0xff] %v632_v35  ;;  %v636_v37 = vld [vmem:[%s6109_s28 + $0xe48] sm:$0xff]  ;;  %v638_v38 = vld [vmem:[%s6109_s28 + $0xe50] sm:$0xff] }
  0x88   : > { %635 = vst [vmem:[%s6114_s29 + $0x720] sm:$0xff] %v634_v36  ;;  %637 = vst [vmem:[%s6114_s29 + $0x728] sm:$0xff] %v636_v37  ;;  %v640_v39 = vld [vmem:[%s6109_s28 + $0xe58] sm:$0xff]  ;;  %v642_v40 = vld [vmem:[%s6109_s28 + $0xe80] sm:$0xff] }
  0x89   : > { %639 = vst [vmem:[%s6114_s29 + $0x730] sm:$0xff] %v638_v38  ;;  %v644_v41 = vld [vmem:[%s6109_s28 + $0xe88] sm:$0xff]  ;;  %641 = vst [vmem:[%s6114_s29 + $0x738] sm:$0xff] %v640_v39  ;;  %v646_v42 = vld [vmem:[%s6109_s28 + $0xe90] sm:$0xff] }
  0x8a   : > { %643 = vst [vmem:[%s6114_s29 + $0x740] sm:$0xff] %v642_v40  ;;  %645 = vst [vmem:[%s6114_s29 + $0x748] sm:$0xff] %v644_v41  ;;  %v648_v43 = vld [vmem:[%s6109_s28 + $0xe98] sm:$0xff]  ;;  %v650_v44 = vld [vmem:[%s6109_s28 + $0xec0] sm:$0xff] }
  0x8b   : > { %647 = vst [vmem:[%s6114_s29 + $0x750] sm:$0xff] %v646_v42  ;;  %649 = vst [vmem:[%s6114_s29 + $0x758] sm:$0xff] %v648_v43  ;;  %v652_v45 = vld [vmem:[%s6109_s28 + $0xec8] sm:$0xff]  ;;  %v654_v46 = vld [vmem:[%s6109_s28 + $0xed0] sm:$0xff] }
  0x8c   : > { %651 = vst [vmem:[%s6114_s29 + $0x760] sm:$0xff] %v650_v44  ;;  %v656_v47 = vld [vmem:[%s6109_s28 + $0xed8] sm:$0xff]  ;;  %653 = vst [vmem:[%s6114_s29 + $0x768] sm:$0xff] %v652_v45  ;;  %v658_v48 = vld [vmem:[%s6109_s28 + $0xf00] sm:$0xff] }
  0x8d   : > { %655 = vst [vmem:[%s6114_s29 + $0x770] sm:$0xff] %v654_v46  ;;  %657 = vst [vmem:[%s6114_s29 + $0x778] sm:$0xff] %v656_v47  ;;  %v660_v49 = vld [vmem:[%s6109_s28 + $0xf08] sm:$0xff]  ;;  %v662_v50 = vld [vmem:[%s6109_s28 + $0xf10] sm:$0xff] }
  0x8e   : > { %659 = vst [vmem:[%s6114_s29 + $0x780] sm:$0xff] %v658_v48  ;;  %661 = vst [vmem:[%s6114_s29 + $0x788] sm:$0xff] %v660_v49  ;;  %v664_v51 = vld [vmem:[%s6109_s28 + $0xf18] sm:$0xff]  ;;  %v666_v52 = vld [vmem:[%s6109_s28 + $0xf40] sm:$0xff] }
  0x8f   : > { %663 = vst [vmem:[%s6114_s29 + $0x790] sm:$0xff] %v662_v50  ;;  %v668_v53 = vld [vmem:[%s6109_s28 + $0xf48] sm:$0xff]  ;;  %665 = vst [vmem:[%s6114_s29 + $0x798] sm:$0xff] %v664_v51  ;;  %v670_v54 = vld [vmem:[%s6109_s28 + $0xf50] sm:$0xff] }
  0x90   : > { %667 = vst [vmem:[%s6114_s29 + $0x7a0] sm:$0xff] %v666_v52  ;;  %669 = vst [vmem:[%s6114_s29 + $0x7a8] sm:$0xff] %v668_v53  ;;  %v672_v55 = vld [vmem:[%s6109_s28 + $0xf58] sm:$0xff]  ;;  %v674_v56 = vld [vmem:[%s6109_s28 + $0xf80] sm:$0xff] }
  0x91   : > { %671 = vst [vmem:[%s6114_s29 + $0x7b0] sm:$0xff] %v670_v54  ;;  %673 = vst [vmem:[%s6114_s29 + $0x7b8] sm:$0xff] %v672_v55  ;;  %v676_v57 = vld [vmem:[%s6109_s28 + $0xf88] sm:$0xff]  ;;  %v678_v58 = vld [vmem:[%s6109_s28 + $0xf90] sm:$0xff] }
  0x92   : > { %675 = vst [vmem:[%s6114_s29 + $0x7c0] sm:$0xff] %v674_v56  ;;  %v680_v59 = vld [vmem:[%s6109_s28 + $0xf98] sm:$0xff]  ;;  %677 = vst [vmem:[%s6114_s29 + $0x7c8] sm:$0xff] %v676_v57  ;;  %v682_v60 = vld [vmem:[%s6109_s28 + $0xfc0] sm:$0xff] }
  0x93   : > { %679 = vst [vmem:[%s6114_s29 + $0x7d0] sm:$0xff] %v678_v58  ;;  %681 = vst [vmem:[%s6114_s29 + $0x7d8] sm:$0xff] %v680_v59  ;;  %v684_v61 = vld [vmem:[%s6109_s28 + $0xfc8] sm:$0xff]  ;;  %v686_v62 = vld [vmem:[%s6109_s28 + $0xfd0] sm:$0xff] }
  0x94   : > { %683 = vst [vmem:[%s6114_s29 + $0x7e0] sm:$0xff] %v682_v60  ;;  %685 = vst [vmem:[%s6114_s29 + $0x7e8] sm:$0xff] %v684_v61  ;;  %v688_v63 = vld [vmem:[%s6109_s28 + $0xfd8] sm:$0xff]  ;;  %v690_v0 = vld [vmem:[%s6109_s28 + $0x1000] sm:$0xff] }
  0x95   : > { %687 = vst [vmem:[%s6114_s29 + $0x7f0] sm:$0xff] %v686_v62  ;;  %v692_v1 = vld [vmem:[%s6109_s28 + $0x1008] sm:$0xff]  ;;  %689 = vst [vmem:[%s6114_s29 + $0x7f8] sm:$0xff] %v688_v63  ;;  %v694_v2 = vld [vmem:[%s6109_s28 + $0x1010] sm:$0xff] }
  0x96   : > { %691 = vst [vmem:[%s6114_s29 + $0x800] sm:$0xff] %v690_v0  ;;  %693 = vst [vmem:[%s6114_s29 + $0x808] sm:$0xff] %v692_v1  ;;  %v696_v3 = vld [vmem:[%s6109_s28 + $0x1018] sm:$0xff]  ;;  %v698_v4 = vld [vmem:[%s6109_s28 + $0x1040] sm:$0xff] }
  0x97   : > { %695 = vst [vmem:[%s6114_s29 + $0x810] sm:$0xff] %v694_v2  ;;  %697 = vst [vmem:[%s6114_s29 + $0x818] sm:$0xff] %v696_v3  ;;  %v700_v5 = vld [vmem:[%s6109_s28 + $0x1048] sm:$0xff]  ;;  %v702_v6 = vld [vmem:[%s6109_s28 + $0x1050] sm:$0xff] }
  0x98   : > { %699 = vst [vmem:[%s6114_s29 + $0x820] sm:$0xff] %v698_v4  ;;  %v704_v7 = vld [vmem:[%s6109_s28 + $0x1058] sm:$0xff]  ;;  %701 = vst [vmem:[%s6114_s29 + $0x828] sm:$0xff] %v700_v5  ;;  %v706_v8 = vld [vmem:[%s6109_s28 + $0x1080] sm:$0xff] }
  0x99   : > { %703 = vst [vmem:[%s6114_s29 + $0x830] sm:$0xff] %v702_v6  ;;  %705 = vst [vmem:[%s6114_s29 + $0x838] sm:$0xff] %v704_v7  ;;  %v708_v9 = vld [vmem:[%s6109_s28 + $0x1088] sm:$0xff]  ;;  %v710_v10 = vld [vmem:[%s6109_s28 + $0x1090] sm:$0xff] }
  0x9a   : > { %707 = vst [vmem:[%s6114_s29 + $0x840] sm:$0xff] %v706_v8  ;;  %709 = vst [vmem:[%s6114_s29 + $0x848] sm:$0xff] %v708_v9  ;;  %v712_v11 = vld [vmem:[%s6109_s28 + $0x1098] sm:$0xff]  ;;  %v714_v12 = vld [vmem:[%s6109_s28 + $0x10c0] sm:$0xff] }
  0x9b   : > { %711 = vst [vmem:[%s6114_s29 + $0x850] sm:$0xff] %v710_v10  ;;  %v716_v13 = vld [vmem:[%s6109_s28 + $0x10c8] sm:$0xff]  ;;  %713 = vst [vmem:[%s6114_s29 + $0x858] sm:$0xff] %v712_v11  ;;  %v718_v14 = vld [vmem:[%s6109_s28 + $0x10d0] sm:$0xff] }
  0x9c   : > { %715 = vst [vmem:[%s6114_s29 + $0x860] sm:$0xff] %v714_v12  ;;  %717 = vst [vmem:[%s6114_s29 + $0x868] sm:$0xff] %v716_v13  ;;  %v720_v15 = vld [vmem:[%s6109_s28 + $0x10d8] sm:$0xff]  ;;  %v722_v16 = vld [vmem:[%s6109_s28 + $0x1100] sm:$0xff] }
  0x9d   : > { %719 = vst [vmem:[%s6114_s29 + $0x870] sm:$0xff] %v718_v14  ;;  %721 = vst [vmem:[%s6114_s29 + $0x878] sm:$0xff] %v720_v15  ;;  %v724_v17 = vld [vmem:[%s6109_s28 + $0x1108] sm:$0xff]  ;;  %v726_v18 = vld [vmem:[%s6109_s28 + $0x1110] sm:$0xff] }
  0x9e   : > { %723 = vst [vmem:[%s6114_s29 + $0x880] sm:$0xff] %v722_v16  ;;  %v728_v19 = vld [vmem:[%s6109_s28 + $0x1118] sm:$0xff]  ;;  %725 = vst [vmem:[%s6114_s29 + $0x888] sm:$0xff] %v724_v17  ;;  %v730_v20 = vld [vmem:[%s6109_s28 + $0x1140] sm:$0xff] }
  0x9f   : > { %727 = vst [vmem:[%s6114_s29 + $0x890] sm:$0xff] %v726_v18  ;;  %729 = vst [vmem:[%s6114_s29 + $0x898] sm:$0xff] %v728_v19  ;;  %v732_v21 = vld [vmem:[%s6109_s28 + $0x1148] sm:$0xff]  ;;  %v734_v22 = vld [vmem:[%s6109_s28 + $0x1150] sm:$0xff] }
  0xa0   : > { %731 = vst [vmem:[%s6114_s29 + $0x8a0] sm:$0xff] %v730_v20  ;;  %733 = vst [vmem:[%s6114_s29 + $0x8a8] sm:$0xff] %v732_v21  ;;  %v736_v23 = vld [vmem:[%s6109_s28 + $0x1158] sm:$0xff]  ;;  %v738_v24 = vld [vmem:[%s6109_s28 + $0x1180] sm:$0xff] }
  0xa1   : > { %735 = vst [vmem:[%s6114_s29 + $0x8b0] sm:$0xff] %v734_v22  ;;  %v740_v25 = vld [vmem:[%s6109_s28 + $0x1188] sm:$0xff]  ;;  %737 = vst [vmem:[%s6114_s29 + $0x8b8] sm:$0xff] %v736_v23  ;;  %v742_v26 = vld [vmem:[%s6109_s28 + $0x1190] sm:$0xff] }
  0xa2   : > { %739 = vst [vmem:[%s6114_s29 + $0x8c0] sm:$0xff] %v738_v24  ;;  %741 = vst [vmem:[%s6114_s29 + $0x8c8] sm:$0xff] %v740_v25  ;;  %v744_v27 = vld [vmem:[%s6109_s28 + $0x1198] sm:$0xff]  ;;  %v746_v28 = vld [vmem:[%s6109_s28 + $0x11c0] sm:$0xff] }
  0xa3   : > { %743 = vst [vmem:[%s6114_s29 + $0x8d0] sm:$0xff] %v742_v26  ;;  %745 = vst [vmem:[%s6114_s29 + $0x8d8] sm:$0xff] %v744_v27  ;;  %v748_v29 = vld [vmem:[%s6109_s28 + $0x11c8] sm:$0xff]  ;;  %v750_v30 = vld [vmem:[%s6109_s28 + $0x11d0] sm:$0xff] }
  0xa4   : > { %747 = vst [vmem:[%s6114_s29 + $0x8e0] sm:$0xff] %v746_v28  ;;  %v752_v31 = vld [vmem:[%s6109_s28 + $0x11d8] sm:$0xff]  ;;  %749 = vst [vmem:[%s6114_s29 + $0x8e8] sm:$0xff] %v748_v29  ;;  %v754_v32 = vld [vmem:[%s6109_s28 + $0x1200] sm:$0xff] }
  0xa5   : > { %751 = vst [vmem:[%s6114_s29 + $0x8f0] sm:$0xff] %v750_v30  ;;  %753 = vst [vmem:[%s6114_s29 + $0x8f8] sm:$0xff] %v752_v31  ;;  %v756_v33 = vld [vmem:[%s6109_s28 + $0x1208] sm:$0xff]  ;;  %v758_v34 = vld [vmem:[%s6109_s28 + $0x1210] sm:$0xff] }
  0xa6   : > { %755 = vst [vmem:[%s6114_s29 + $0x900] sm:$0xff] %v754_v32  ;;  %757 = vst [vmem:[%s6114_s29 + $0x908] sm:$0xff] %v756_v33  ;;  %v760_v35 = vld [vmem:[%s6109_s28 + $0x1218] sm:$0xff]  ;;  %v762_v36 = vld [vmem:[%s6109_s28 + $0x1240] sm:$0xff] }
  0xa7   : > { %759 = vst [vmem:[%s6114_s29 + $0x910] sm:$0xff] %v758_v34  ;;  %v764_v37 = vld [vmem:[%s6109_s28 + $0x1248] sm:$0xff]  ;;  %761 = vst [vmem:[%s6114_s29 + $0x918] sm:$0xff] %v760_v35  ;;  %v766_v38 = vld [vmem:[%s6109_s28 + $0x1250] sm:$0xff] }
  0xa8   : > { %763 = vst [vmem:[%s6114_s29 + $0x920] sm:$0xff] %v762_v36  ;;  %765 = vst [vmem:[%s6114_s29 + $0x928] sm:$0xff] %v764_v37  ;;  %v768_v39 = vld [vmem:[%s6109_s28 + $0x1258] sm:$0xff]  ;;  %v770_v40 = vld [vmem:[%s6109_s28 + $0x1280] sm:$0xff] }
  0xa9   : > { %767 = vst [vmem:[%s6114_s29 + $0x930] sm:$0xff] %v766_v38  ;;  %769 = vst [vmem:[%s6114_s29 + $0x938] sm:$0xff] %v768_v39  ;;  %v772_v41 = vld [vmem:[%s6109_s28 + $0x1288] sm:$0xff]  ;;  %v774_v42 = vld [vmem:[%s6109_s28 + $0x1290] sm:$0xff] }
  0xaa   : > { %771 = vst [vmem:[%s6114_s29 + $0x940] sm:$0xff] %v770_v40  ;;  %v776_v43 = vld [vmem:[%s6109_s28 + $0x1298] sm:$0xff]  ;;  %773 = vst [vmem:[%s6114_s29 + $0x948] sm:$0xff] %v772_v41  ;;  %v778_v44 = vld [vmem:[%s6109_s28 + $0x12c0] sm:$0xff] }
  0xab   : > { %775 = vst [vmem:[%s6114_s29 + $0x950] sm:$0xff] %v774_v42  ;;  %777 = vst [vmem:[%s6114_s29 + $0x958] sm:$0xff] %v776_v43  ;;  %v780_v45 = vld [vmem:[%s6109_s28 + $0x12c8] sm:$0xff]  ;;  %v782_v46 = vld [vmem:[%s6109_s28 + $0x12d0] sm:$0xff] }
  0xac   : > { %779 = vst [vmem:[%s6114_s29 + $0x960] sm:$0xff] %v778_v44  ;;  %781 = vst [vmem:[%s6114_s29 + $0x968] sm:$0xff] %v780_v45  ;;  %v784_v47 = vld [vmem:[%s6109_s28 + $0x12d8] sm:$0xff]  ;;  %v786_v48 = vld [vmem:[%s6109_s28 + $0x1300] sm:$0xff] }
  0xad   : > { %783 = vst [vmem:[%s6114_s29 + $0x970] sm:$0xff] %v782_v46  ;;  %v788_v49 = vld [vmem:[%s6109_s28 + $0x1308] sm:$0xff]  ;;  %785 = vst [vmem:[%s6114_s29 + $0x978] sm:$0xff] %v784_v47  ;;  %v790_v50 = vld [vmem:[%s6109_s28 + $0x1310] sm:$0xff] }
  0xae   : > { %787 = vst [vmem:[%s6114_s29 + $0x980] sm:$0xff] %v786_v48  ;;  %789 = vst [vmem:[%s6114_s29 + $0x988] sm:$0xff] %v788_v49  ;;  %v792_v51 = vld [vmem:[%s6109_s28 + $0x1318] sm:$0xff]  ;;  %v794_v52 = vld [vmem:[%s6109_s28 + $0x1340] sm:$0xff] }
  0xaf   : > { %791 = vst [vmem:[%s6114_s29 + $0x990] sm:$0xff] %v790_v50  ;;  %793 = vst [vmem:[%s6114_s29 + $0x998] sm:$0xff] %v792_v51  ;;  %v796_v53 = vld [vmem:[%s6109_s28 + $0x1348] sm:$0xff]  ;;  %v798_v54 = vld [vmem:[%s6109_s28 + $0x1350] sm:$0xff] }
  0xb0   : > { %795 = vst [vmem:[%s6114_s29 + $0x9a0] sm:$0xff] %v794_v52  ;;  %v800_v55 = vld [vmem:[%s6109_s28 + $0x1358] sm:$0xff]  ;;  %797 = vst [vmem:[%s6114_s29 + $0x9a8] sm:$0xff] %v796_v53  ;;  %v802_v56 = vld [vmem:[%s6109_s28 + $0x1380] sm:$0xff] }
  0xb1   : > { %799 = vst [vmem:[%s6114_s29 + $0x9b0] sm:$0xff] %v798_v54  ;;  %801 = vst [vmem:[%s6114_s29 + $0x9b8] sm:$0xff] %v800_v55  ;;  %v804_v57 = vld [vmem:[%s6109_s28 + $0x1388] sm:$0xff]  ;;  %v806_v58 = vld [vmem:[%s6109_s28 + $0x1390] sm:$0xff] }
  0xb2   : > { %803 = vst [vmem:[%s6114_s29 + $0x9c0] sm:$0xff] %v802_v56  ;;  %805 = vst [vmem:[%s6114_s29 + $0x9c8] sm:$0xff] %v804_v57  ;;  %v808_v59 = vld [vmem:[%s6109_s28 + $0x1398] sm:$0xff]  ;;  %v810_v60 = vld [vmem:[%s6109_s28 + $0x13c0] sm:$0xff] }
  0xb3   : > { %807 = vst [vmem:[%s6114_s29 + $0x9d0] sm:$0xff] %v806_v58  ;;  %v812_v61 = vld [vmem:[%s6109_s28 + $0x13c8] sm:$0xff]  ;;  %809 = vst [vmem:[%s6114_s29 + $0x9d8] sm:$0xff] %v808_v59  ;;  %v814_v62 = vld [vmem:[%s6109_s28 + $0x13d0] sm:$0xff] }
  0xb4   : > { %811 = vst [vmem:[%s6114_s29 + $0x9e0] sm:$0xff] %v810_v60  ;;  %813 = vst [vmem:[%s6114_s29 + $0x9e8] sm:$0xff] %v812_v61  ;;  %v816_v63 = vld [vmem:[%s6109_s28 + $0x13d8] sm:$0xff]  ;;  %v818_v0 = vld [vmem:[%s6109_s28 + $0x1400] sm:$0xff] }
  0xb5   : > { %815 = vst [vmem:[%s6114_s29 + $0x9f0] sm:$0xff] %v814_v62  ;;  %817 = vst [vmem:[%s6114_s29 + $0x9f8] sm:$0xff] %v816_v63  ;;  %v820_v1 = vld [vmem:[%s6109_s28 + $0x1408] sm:$0xff]  ;;  %v822_v2 = vld [vmem:[%s6109_s28 + $0x1410] sm:$0xff] }
  0xb6   : > { %819 = vst [vmem:[%s6114_s29 + $0xa00] sm:$0xff] %v818_v0  ;;  %v824_v3 = vld [vmem:[%s6109_s28 + $0x1418] sm:$0xff]  ;;  %821 = vst [vmem:[%s6114_s29 + $0xa08] sm:$0xff] %v820_v1  ;;  %v826_v4 = vld [vmem:[%s6109_s28 + $0x1440] sm:$0xff] }
  0xb7   : > { %823 = vst [vmem:[%s6114_s29 + $0xa10] sm:$0xff] %v822_v2  ;;  %825 = vst [vmem:[%s6114_s29 + $0xa18] sm:$0xff] %v824_v3  ;;  %v828_v5 = vld [vmem:[%s6109_s28 + $0x1448] sm:$0xff]  ;;  %v830_v6 = vld [vmem:[%s6109_s28 + $0x1450] sm:$0xff] }
  0xb8   : > { %827 = vst [vmem:[%s6114_s29 + $0xa20] sm:$0xff] %v826_v4  ;;  %829 = vst [vmem:[%s6114_s29 + $0xa28] sm:$0xff] %v828_v5  ;;  %v832_v7 = vld [vmem:[%s6109_s28 + $0x1458] sm:$0xff]  ;;  %v834_v8 = vld [vmem:[%s6109_s28 + $0x1480] sm:$0xff] }
  0xb9   : > { %831 = vst [vmem:[%s6114_s29 + $0xa30] sm:$0xff] %v830_v6  ;;  %v836_v9 = vld [vmem:[%s6109_s28 + $0x1488] sm:$0xff]  ;;  %833 = vst [vmem:[%s6114_s29 + $0xa38] sm:$0xff] %v832_v7  ;;  %v838_v10 = vld [vmem:[%s6109_s28 + $0x1490] sm:$0xff] }
  0xba   : > { %835 = vst [vmem:[%s6114_s29 + $0xa40] sm:$0xff] %v834_v8  ;;  %837 = vst [vmem:[%s6114_s29 + $0xa48] sm:$0xff] %v836_v9  ;;  %v840_v11 = vld [vmem:[%s6109_s28 + $0x1498] sm:$0xff]  ;;  %v842_v12 = vld [vmem:[%s6109_s28 + $0x14c0] sm:$0xff] }
  0xbb   : > { %839 = vst [vmem:[%s6114_s29 + $0xa50] sm:$0xff] %v838_v10  ;;  %841 = vst [vmem:[%s6114_s29 + $0xa58] sm:$0xff] %v840_v11  ;;  %v844_v13 = vld [vmem:[%s6109_s28 + $0x14c8] sm:$0xff]  ;;  %v846_v14 = vld [vmem:[%s6109_s28 + $0x14d0] sm:$0xff] }
  0xbc   : > { %843 = vst [vmem:[%s6114_s29 + $0xa60] sm:$0xff] %v842_v12  ;;  %v848_v15 = vld [vmem:[%s6109_s28 + $0x14d8] sm:$0xff]  ;;  %845 = vst [vmem:[%s6114_s29 + $0xa68] sm:$0xff] %v844_v13  ;;  %v850_v16 = vld [vmem:[%s6109_s28 + $0x1500] sm:$0xff] }
  0xbd   : > { %847 = vst [vmem:[%s6114_s29 + $0xa70] sm:$0xff] %v846_v14  ;;  %849 = vst [vmem:[%s6114_s29 + $0xa78] sm:$0xff] %v848_v15  ;;  %v852_v17 = vld [vmem:[%s6109_s28 + $0x1508] sm:$0xff]  ;;  %v854_v18 = vld [vmem:[%s6109_s28 + $0x1510] sm:$0xff] }
  0xbe   : > { %851 = vst [vmem:[%s6114_s29 + $0xa80] sm:$0xff] %v850_v16  ;;  %853 = vst [vmem:[%s6114_s29 + $0xa88] sm:$0xff] %v852_v17  ;;  %v856_v19 = vld [vmem:[%s6109_s28 + $0x1518] sm:$0xff]  ;;  %v858_v20 = vld [vmem:[%s6109_s28 + $0x1540] sm:$0xff] }
  0xbf   : > { %855 = vst [vmem:[%s6114_s29 + $0xa90] sm:$0xff] %v854_v18  ;;  %v860_v21 = vld [vmem:[%s6109_s28 + $0x1548] sm:$0xff]  ;;  %857 = vst [vmem:[%s6114_s29 + $0xa98] sm:$0xff] %v856_v19  ;;  %v862_v22 = vld [vmem:[%s6109_s28 + $0x1550] sm:$0xff] }
  0xc0   : > { %859 = vst [vmem:[%s6114_s29 + $0xaa0] sm:$0xff] %v858_v20  ;;  %861 = vst [vmem:[%s6114_s29 + $0xaa8] sm:$0xff] %v860_v21  ;;  %v864_v23 = vld [vmem:[%s6109_s28 + $0x1558] sm:$0xff]  ;;  %v866_v24 = vld [vmem:[%s6109_s28 + $0x1580] sm:$0xff] }
  0xc1   : > { %863 = vst [vmem:[%s6114_s29 + $0xab0] sm:$0xff] %v862_v22  ;;  %865 = vst [vmem:[%s6114_s29 + $0xab8] sm:$0xff] %v864_v23  ;;  %v868_v25 = vld [vmem:[%s6109_s28 + $0x1588] sm:$0xff]  ;;  %v870_v26 = vld [vmem:[%s6109_s28 + $0x1590] sm:$0xff] }
  0xc2   : > { %867 = vst [vmem:[%s6114_s29 + $0xac0] sm:$0xff] %v866_v24  ;;  %v872_v27 = vld [vmem:[%s6109_s28 + $0x1598] sm:$0xff]  ;;  %869 = vst [vmem:[%s6114_s29 + $0xac8] sm:$0xff] %v868_v25  ;;  %v874_v28 = vld [vmem:[%s6109_s28 + $0x15c0] sm:$0xff] }
  0xc3   : > { %871 = vst [vmem:[%s6114_s29 + $0xad0] sm:$0xff] %v870_v26  ;;  %873 = vst [vmem:[%s6114_s29 + $0xad8] sm:$0xff] %v872_v27  ;;  %v876_v29 = vld [vmem:[%s6109_s28 + $0x15c8] sm:$0xff]  ;;  %v878_v30 = vld [vmem:[%s6109_s28 + $0x15d0] sm:$0xff] }
  0xc4   : > { %875 = vst [vmem:[%s6114_s29 + $0xae0] sm:$0xff] %v874_v28  ;;  %877 = vst [vmem:[%s6114_s29 + $0xae8] sm:$0xff] %v876_v29  ;;  %v880_v31 = vld [vmem:[%s6109_s28 + $0x15d8] sm:$0xff]  ;;  %v882_v32 = vld [vmem:[%s6109_s28 + $0x1600] sm:$0xff] }
  0xc5   : > { %879 = vst [vmem:[%s6114_s29 + $0xaf0] sm:$0xff] %v878_v30  ;;  %v884_v33 = vld [vmem:[%s6109_s28 + $0x1608] sm:$0xff]  ;;  %881 = vst [vmem:[%s6114_s29 + $0xaf8] sm:$0xff] %v880_v31  ;;  %v886_v34 = vld [vmem:[%s6109_s28 + $0x1610] sm:$0xff] }
  0xc6   : > { %883 = vst [vmem:[%s6114_s29 + $0xb00] sm:$0xff] %v882_v32  ;;  %885 = vst [vmem:[%s6114_s29 + $0xb08] sm:$0xff] %v884_v33  ;;  %v888_v35 = vld [vmem:[%s6109_s28 + $0x1618] sm:$0xff]  ;;  %v890_v36 = vld [vmem:[%s6109_s28 + $0x1640] sm:$0xff] }
  0xc7   : > { %887 = vst [vmem:[%s6114_s29 + $0xb10] sm:$0xff] %v886_v34  ;;  %889 = vst [vmem:[%s6114_s29 + $0xb18] sm:$0xff] %v888_v35  ;;  %v892_v37 = vld [vmem:[%s6109_s28 + $0x1648] sm:$0xff]  ;;  %v894_v38 = vld [vmem:[%s6109_s28 + $0x1650] sm:$0xff] }
  0xc8   : > { %891 = vst [vmem:[%s6114_s29 + $0xb20] sm:$0xff] %v890_v36  ;;  %v896_v39 = vld [vmem:[%s6109_s28 + $0x1658] sm:$0xff]  ;;  %893 = vst [vmem:[%s6114_s29 + $0xb28] sm:$0xff] %v892_v37  ;;  %v898_v40 = vld [vmem:[%s6109_s28 + $0x1680] sm:$0xff] }
  0xc9   : > { %895 = vst [vmem:[%s6114_s29 + $0xb30] sm:$0xff] %v894_v38  ;;  %897 = vst [vmem:[%s6114_s29 + $0xb38] sm:$0xff] %v896_v39  ;;  %v900_v41 = vld [vmem:[%s6109_s28 + $0x1688] sm:$0xff]  ;;  %v902_v42 = vld [vmem:[%s6109_s28 + $0x1690] sm:$0xff] }
  0xca   : > { %899 = vst [vmem:[%s6114_s29 + $0xb40] sm:$0xff] %v898_v40  ;;  %901 = vst [vmem:[%s6114_s29 + $0xb48] sm:$0xff] %v900_v41  ;;  %v904_v43 = vld [vmem:[%s6109_s28 + $0x1698] sm:$0xff]  ;;  %v906_v44 = vld [vmem:[%s6109_s28 + $0x16c0] sm:$0xff] }
  0xcb   : > { %903 = vst [vmem:[%s6114_s29 + $0xb50] sm:$0xff] %v902_v42  ;;  %v908_v45 = vld [vmem:[%s6109_s28 + $0x16c8] sm:$0xff]  ;;  %905 = vst [vmem:[%s6114_s29 + $0xb58] sm:$0xff] %v904_v43  ;;  %v910_v46 = vld [vmem:[%s6109_s28 + $0x16d0] sm:$0xff] }
  0xcc   : > { %907 = vst [vmem:[%s6114_s29 + $0xb60] sm:$0xff] %v906_v44  ;;  %909 = vst [vmem:[%s6114_s29 + $0xb68] sm:$0xff] %v908_v45  ;;  %v912_v47 = vld [vmem:[%s6109_s28 + $0x16d8] sm:$0xff]  ;;  %v914_v48 = vld [vmem:[%s6109_s28 + $0x1700] sm:$0xff] }
  0xcd   : > { %911 = vst [vmem:[%s6114_s29 + $0xb70] sm:$0xff] %v910_v46  ;;  %913 = vst [vmem:[%s6114_s29 + $0xb78] sm:$0xff] %v912_v47  ;;  %v916_v49 = vld [vmem:[%s6109_s28 + $0x1708] sm:$0xff]  ;;  %v918_v50 = vld [vmem:[%s6109_s28 + $0x1710] sm:$0xff] }
  0xce   : > { %915 = vst [vmem:[%s6114_s29 + $0xb80] sm:$0xff] %v914_v48  ;;  %v920_v51 = vld [vmem:[%s6109_s28 + $0x1718] sm:$0xff]  ;;  %917 = vst [vmem:[%s6114_s29 + $0xb88] sm:$0xff] %v916_v49  ;;  %v922_v52 = vld [vmem:[%s6109_s28 + $0x1740] sm:$0xff] }
  0xcf   : > { %919 = vst [vmem:[%s6114_s29 + $0xb90] sm:$0xff] %v918_v50  ;;  %921 = vst [vmem:[%s6114_s29 + $0xb98] sm:$0xff] %v920_v51  ;;  %v924_v53 = vld [vmem:[%s6109_s28 + $0x1748] sm:$0xff]  ;;  %v926_v54 = vld [vmem:[%s6109_s28 + $0x1750] sm:$0xff] }
  0xd0   : > { %923 = vst [vmem:[%s6114_s29 + $0xba0] sm:$0xff] %v922_v52  ;;  %925 = vst [vmem:[%s6114_s29 + $0xba8] sm:$0xff] %v924_v53  ;;  %v928_v55 = vld [vmem:[%s6109_s28 + $0x1758] sm:$0xff]  ;;  %v930_v56 = vld [vmem:[%s6109_s28 + $0x1780] sm:$0xff] }
  0xd1   : > { %927 = vst [vmem:[%s6114_s29 + $0xbb0] sm:$0xff] %v926_v54  ;;  %v932_v57 = vld [vmem:[%s6109_s28 + $0x1788] sm:$0xff]  ;;  %929 = vst [vmem:[%s6114_s29 + $0xbb8] sm:$0xff] %v928_v55  ;;  %v934_v58 = vld [vmem:[%s6109_s28 + $0x1790] sm:$0xff] }
  0xd2   : > { %931 = vst [vmem:[%s6114_s29 + $0xbc0] sm:$0xff] %v930_v56  ;;  %933 = vst [vmem:[%s6114_s29 + $0xbc8] sm:$0xff] %v932_v57  ;;  %v936_v59 = vld [vmem:[%s6109_s28 + $0x1798] sm:$0xff]  ;;  %v938_v60 = vld [vmem:[%s6109_s28 + $0x17c0] sm:$0xff] }
  0xd3   : > { %935 = vst [vmem:[%s6114_s29 + $0xbd0] sm:$0xff] %v934_v58  ;;  %937 = vst [vmem:[%s6114_s29 + $0xbd8] sm:$0xff] %v936_v59  ;;  %v940_v61 = vld [vmem:[%s6109_s28 + $0x17c8] sm:$0xff]  ;;  %v942_v62 = vld [vmem:[%s6109_s28 + $0x17d0] sm:$0xff] }
  0xd4   : > { %939 = vst [vmem:[%s6114_s29 + $0xbe0] sm:$0xff] %v938_v60  ;;  %v944_v63 = vld [vmem:[%s6109_s28 + $0x17d8] sm:$0xff]  ;;  %941 = vst [vmem:[%s6114_s29 + $0xbe8] sm:$0xff] %v940_v61  ;;  %v946_v0 = vld [vmem:[%s6109_s28 + $0x1800] sm:$0xff] }
  0xd5   : > { %943 = vst [vmem:[%s6114_s29 + $0xbf0] sm:$0xff] %v942_v62  ;;  %945 = vst [vmem:[%s6114_s29 + $0xbf8] sm:$0xff] %v944_v63  ;;  %v948_v1 = vld [vmem:[%s6109_s28 + $0x1808] sm:$0xff]  ;;  %v950_v2 = vld [vmem:[%s6109_s28 + $0x1810] sm:$0xff] }
  0xd6   : > { %947 = vst [vmem:[%s6114_s29 + $0xc00] sm:$0xff] %v946_v0  ;;  %949 = vst [vmem:[%s6114_s29 + $0xc08] sm:$0xff] %v948_v1  ;;  %v952_v3 = vld [vmem:[%s6109_s28 + $0x1818] sm:$0xff]  ;;  %v954_v4 = vld [vmem:[%s6109_s28 + $0x1840] sm:$0xff] }
  0xd7   : > { %951 = vst [vmem:[%s6114_s29 + $0xc10] sm:$0xff] %v950_v2  ;;  %v956_v5 = vld [vmem:[%s6109_s28 + $0x1848] sm:$0xff]  ;;  %953 = vst [vmem:[%s6114_s29 + $0xc18] sm:$0xff] %v952_v3  ;;  %v958_v6 = vld [vmem:[%s6109_s28 + $0x1850] sm:$0xff] }
  0xd8   : > { %955 = vst [vmem:[%s6114_s29 + $0xc20] sm:$0xff] %v954_v4  ;;  %957 = vst [vmem:[%s6114_s29 + $0xc28] sm:$0xff] %v956_v5  ;;  %v960_v7 = vld [vmem:[%s6109_s28 + $0x1858] sm:$0xff]  ;;  %v962_v8 = vld [vmem:[%s6109_s28 + $0x1880] sm:$0xff] }
  0xd9   : > { %959 = vst [vmem:[%s6114_s29 + $0xc30] sm:$0xff] %v958_v6  ;;  %961 = vst [vmem:[%s6114_s29 + $0xc38] sm:$0xff] %v960_v7  ;;  %v964_v9 = vld [vmem:[%s6109_s28 + $0x1888] sm:$0xff]  ;;  %v966_v10 = vld [vmem:[%s6109_s28 + $0x1890] sm:$0xff] }
  0xda   : > { %963 = vst [vmem:[%s6114_s29 + $0xc40] sm:$0xff] %v962_v8  ;;  %v968_v11 = vld [vmem:[%s6109_s28 + $0x1898] sm:$0xff]  ;;  %965 = vst [vmem:[%s6114_s29 + $0xc48] sm:$0xff] %v964_v9  ;;  %v970_v12 = vld [vmem:[%s6109_s28 + $0x18c0] sm:$0xff] }
  0xdb   : > { %967 = vst [vmem:[%s6114_s29 + $0xc50] sm:$0xff] %v966_v10  ;;  %969 = vst [vmem:[%s6114_s29 + $0xc58] sm:$0xff] %v968_v11  ;;  %v972_v13 = vld [vmem:[%s6109_s28 + $0x18c8] sm:$0xff]  ;;  %v974_v14 = vld [vmem:[%s6109_s28 + $0x18d0] sm:$0xff] }
  0xdc   : > { %971 = vst [vmem:[%s6114_s29 + $0xc60] sm:$0xff] %v970_v12  ;;  %973 = vst [vmem:[%s6114_s29 + $0xc68] sm:$0xff] %v972_v13  ;;  %v976_v15 = vld [vmem:[%s6109_s28 + $0x18d8] sm:$0xff]  ;;  %v978_v16 = vld [vmem:[%s6109_s28 + $0x1900] sm:$0xff] }
  0xdd   : > { %975 = vst [vmem:[%s6114_s29 + $0xc70] sm:$0xff] %v974_v14  ;;  %v980_v17 = vld [vmem:[%s6109_s28 + $0x1908] sm:$0xff]  ;;  %977 = vst [vmem:[%s6114_s29 + $0xc78] sm:$0xff] %v976_v15  ;;  %v982_v18 = vld [vmem:[%s6109_s28 + $0x1910] sm:$0xff] }
  0xde   : > { %979 = vst [vmem:[%s6114_s29 + $0xc80] sm:$0xff] %v978_v16  ;;  %981 = vst [vmem:[%s6114_s29 + $0xc88] sm:$0xff] %v980_v17  ;;  %v984_v19 = vld [vmem:[%s6109_s28 + $0x1918] sm:$0xff]  ;;  %v986_v20 = vld [vmem:[%s6109_s28 + $0x1940] sm:$0xff] }
  0xdf   : > { %983 = vst [vmem:[%s6114_s29 + $0xc90] sm:$0xff] %v982_v18  ;;  %985 = vst [vmem:[%s6114_s29 + $0xc98] sm:$0xff] %v984_v19  ;;  %v988_v21 = vld [vmem:[%s6109_s28 + $0x1948] sm:$0xff]  ;;  %v990_v22 = vld [vmem:[%s6109_s28 + $0x1950] sm:$0xff] }
  0xe0   : > { %987 = vst [vmem:[%s6114_s29 + $0xca0] sm:$0xff] %v986_v20  ;;  %v992_v23 = vld [vmem:[%s6109_s28 + $0x1958] sm:$0xff]  ;;  %989 = vst [vmem:[%s6114_s29 + $0xca8] sm:$0xff] %v988_v21  ;;  %v994_v24 = vld [vmem:[%s6109_s28 + $0x1980] sm:$0xff] }
  0xe1   : > { %991 = vst [vmem:[%s6114_s29 + $0xcb0] sm:$0xff] %v990_v22  ;;  %993 = vst [vmem:[%s6114_s29 + $0xcb8] sm:$0xff] %v992_v23  ;;  %v996_v25 = vld [vmem:[%s6109_s28 + $0x1988] sm:$0xff]  ;;  %v998_v26 = vld [vmem:[%s6109_s28 + $0x1990] sm:$0xff] }
  0xe2   : > { %995 = vst [vmem:[%s6114_s29 + $0xcc0] sm:$0xff] %v994_v24  ;;  %997 = vst [vmem:[%s6114_s29 + $0xcc8] sm:$0xff] %v996_v25  ;;  %v1000_v27 = vld [vmem:[%s6109_s28 + $0x1998] sm:$0xff]  ;;  %v1002_v28 = vld [vmem:[%s6109_s28 + $0x19c0] sm:$0xff] }
  0xe3   : > { %999 = vst [vmem:[%s6114_s29 + $0xcd0] sm:$0xff] %v998_v26  ;;  %v1004_v29 = vld [vmem:[%s6109_s28 + $0x19c8] sm:$0xff]  ;;  %1001 = vst [vmem:[%s6114_s29 + $0xcd8] sm:$0xff] %v1000_v27  ;;  %v1006_v30 = vld [vmem:[%s6109_s28 + $0x19d0] sm:$0xff] }
  0xe4   : > { %1003 = vst [vmem:[%s6114_s29 + $0xce0] sm:$0xff] %v1002_v28  ;;  %1005 = vst [vmem:[%s6114_s29 + $0xce8] sm:$0xff] %v1004_v29  ;;  %v1008_v31 = vld [vmem:[%s6109_s28 + $0x19d8] sm:$0xff]  ;;  %v1010_v32 = vld [vmem:[%s6109_s28 + $0x1a00] sm:$0xff] }
  0xe5   : > { %1007 = vst [vmem:[%s6114_s29 + $0xcf0] sm:$0xff] %v1006_v30  ;;  %1009 = vst [vmem:[%s6114_s29 + $0xcf8] sm:$0xff] %v1008_v31  ;;  %v1012_v33 = vld [vmem:[%s6109_s28 + $0x1a08] sm:$0xff]  ;;  %v1014_v34 = vld [vmem:[%s6109_s28 + $0x1a10] sm:$0xff] }
  0xe6   : > { %1011 = vst [vmem:[%s6114_s29 + $0xd00] sm:$0xff] %v1010_v32  ;;  %v1016_v35 = vld [vmem:[%s6109_s28 + $0x1a18] sm:$0xff]  ;;  %1013 = vst [vmem:[%s6114_s29 + $0xd08] sm:$0xff] %v1012_v33  ;;  %v1018_v36 = vld [vmem:[%s6109_s28 + $0x1a40] sm:$0xff] }
  0xe7   : > { %1015 = vst [vmem:[%s6114_s29 + $0xd10] sm:$0xff] %v1014_v34  ;;  %1017 = vst [vmem:[%s6114_s29 + $0xd18] sm:$0xff] %v1016_v35  ;;  %v1020_v37 = vld [vmem:[%s6109_s28 + $0x1a48] sm:$0xff]  ;;  %v1022_v38 = vld [vmem:[%s6109_s28 + $0x1a50] sm:$0xff] }
  0xe8   : > { %1019 = vst [vmem:[%s6114_s29 + $0xd20] sm:$0xff] %v1018_v36  ;;  %1021 = vst [vmem:[%s6114_s29 + $0xd28] sm:$0xff] %v1020_v37  ;;  %v1024_v39 = vld [vmem:[%s6109_s28 + $0x1a58] sm:$0xff]  ;;  %v1026_v40 = vld [vmem:[%s6109_s28 + $0x1a80] sm:$0xff] }
  0xe9   : > { %1023 = vst [vmem:[%s6114_s29 + $0xd30] sm:$0xff] %v1022_v38  ;;  %v1028_v41 = vld [vmem:[%s6109_s28 + $0x1a88] sm:$0xff]  ;;  %1025 = vst [vmem:[%s6114_s29 + $0xd38] sm:$0xff] %v1024_v39  ;;  %v1030_v42 = vld [vmem:[%s6109_s28 + $0x1a90] sm:$0xff] }
  0xea   : > { %1027 = vst [vmem:[%s6114_s29 + $0xd40] sm:$0xff] %v1026_v40  ;;  %1029 = vst [vmem:[%s6114_s29 + $0xd48] sm:$0xff] %v1028_v41  ;;  %v1032_v43 = vld [vmem:[%s6109_s28 + $0x1a98] sm:$0xff]  ;;  %v1034_v44 = vld [vmem:[%s6109_s28 + $0x1ac0] sm:$0xff] }
  0xeb   : > { %1031 = vst [vmem:[%s6114_s29 + $0xd50] sm:$0xff] %v1030_v42  ;;  %1033 = vst [vmem:[%s6114_s29 + $0xd58] sm:$0xff] %v1032_v43  ;;  %v1036_v45 = vld [vmem:[%s6109_s28 + $0x1ac8] sm:$0xff]  ;;  %v1038_v46 = vld [vmem:[%s6109_s28 + $0x1ad0] sm:$0xff] }
  0xec   : > { %1035 = vst [vmem:[%s6114_s29 + $0xd60] sm:$0xff] %v1034_v44  ;;  %v1040_v47 = vld [vmem:[%s6109_s28 + $0x1ad8] sm:$0xff]  ;;  %1037 = vst [vmem:[%s6114_s29 + $0xd68] sm:$0xff] %v1036_v45  ;;  %v1042_v48 = vld [vmem:[%s6109_s28 + $0x1b00] sm:$0xff] }
  0xed   : > { %1039 = vst [vmem:[%s6114_s29 + $0xd70] sm:$0xff] %v1038_v46  ;;  %1041 = vst [vmem:[%s6114_s29 + $0xd78] sm:$0xff] %v1040_v47  ;;  %v1044_v49 = vld [vmem:[%s6109_s28 + $0x1b08] sm:$0xff]  ;;  %v1046_v50 = vld [vmem:[%s6109_s28 + $0x1b10] sm:$0xff] }
  0xee   : > { %1043 = vst [vmem:[%s6114_s29 + $0xd80] sm:$0xff] %v1042_v48  ;;  %1045 = vst [vmem:[%s6114_s29 + $0xd88] sm:$0xff] %v1044_v49  ;;  %v1048_v51 = vld [vmem:[%s6109_s28 + $0x1b18] sm:$0xff]  ;;  %v1050_v52 = vld [vmem:[%s6109_s28 + $0x1b40] sm:$0xff] }
  0xef   : > { %1047 = vst [vmem:[%s6114_s29 + $0xd90] sm:$0xff] %v1046_v50  ;;  %v1052_v53 = vld [vmem:[%s6109_s28 + $0x1b48] sm:$0xff]  ;;  %1049 = vst [vmem:[%s6114_s29 + $0xd98] sm:$0xff] %v1048_v51  ;;  %v1054_v54 = vld [vmem:[%s6109_s28 + $0x1b50] sm:$0xff] }
  0xf0   : > { %1051 = vst [vmem:[%s6114_s29 + $0xda0] sm:$0xff] %v1050_v52  ;;  %1053 = vst [vmem:[%s6114_s29 + $0xda8] sm:$0xff] %v1052_v53  ;;  %v1056_v55 = vld [vmem:[%s6109_s28 + $0x1b58] sm:$0xff]  ;;  %v1058_v56 = vld [vmem:[%s6109_s28 + $0x1b80] sm:$0xff] }
  0xf1   : > { %1055 = vst [vmem:[%s6114_s29 + $0xdb0] sm:$0xff] %v1054_v54  ;;  %1057 = vst [vmem:[%s6114_s29 + $0xdb8] sm:$0xff] %v1056_v55  ;;  %v1060_v57 = vld [vmem:[%s6109_s28 + $0x1b88] sm:$0xff]  ;;  %v1062_v58 = vld [vmem:[%s6109_s28 + $0x1b90] sm:$0xff] }
  0xf2   : > { %1059 = vst [vmem:[%s6114_s29 + $0xdc0] sm:$0xff] %v1058_v56  ;;  %v1064_v59 = vld [vmem:[%s6109_s28 + $0x1b98] sm:$0xff]  ;;  %1061 = vst [vmem:[%s6114_s29 + $0xdc8] sm:$0xff] %v1060_v57  ;;  %v1066_v60 = vld [vmem:[%s6109_s28 + $0x1bc0] sm:$0xff] }
  0xf3   : > { %1063 = vst [vmem:[%s6114_s29 + $0xdd0] sm:$0xff] %v1062_v58  ;;  %1065 = vst [vmem:[%s6114_s29 + $0xdd8] sm:$0xff] %v1064_v59  ;;  %v1068_v61 = vld [vmem:[%s6109_s28 + $0x1bc8] sm:$0xff]  ;;  %v1070_v62 = vld [vmem:[%s6109_s28 + $0x1bd0] sm:$0xff] }
  0xf4   : > { %1067 = vst [vmem:[%s6114_s29 + $0xde0] sm:$0xff] %v1066_v60  ;;  %1069 = vst [vmem:[%s6114_s29 + $0xde8] sm:$0xff] %v1068_v61  ;;  %v1072_v63 = vld [vmem:[%s6109_s28 + $0x1bd8] sm:$0xff]  ;;  %v1074_v0 = vld [vmem:[%s6109_s28 + $0x1c00] sm:$0xff] }
  0xf5   : > { %1071 = vst [vmem:[%s6114_s29 + $0xdf0] sm:$0xff] %v1070_v62  ;;  %v1076_v1 = vld [vmem:[%s6109_s28 + $0x1c08] sm:$0xff]  ;;  %1073 = vst [vmem:[%s6114_s29 + $0xdf8] sm:$0xff] %v1072_v63  ;;  %v1078_v2 = vld [vmem:[%s6109_s28 + $0x1c10] sm:$0xff] }
  0xf6   : > { %1075 = vst [vmem:[%s6114_s29 + $0xe00] sm:$0xff] %v1074_v0  ;;  %1077 = vst [vmem:[%s6114_s29 + $0xe08] sm:$0xff] %v1076_v1  ;;  %v1080_v3 = vld [vmem:[%s6109_s28 + $0x1c18] sm:$0xff]  ;;  %v1082_v4 = vld [vmem:[%s6109_s28 + $0x1c40] sm:$0xff] }
  0xf7   : > { %1079 = vst [vmem:[%s6114_s29 + $0xe10] sm:$0xff] %v1078_v2  ;;  %1081 = vst [vmem:[%s6114_s29 + $0xe18] sm:$0xff] %v1080_v3  ;;  %v1084_v5 = vld [vmem:[%s6109_s28 + $0x1c48] sm:$0xff]  ;;  %v1086_v6 = vld [vmem:[%s6109_s28 + $0x1c50] sm:$0xff] }
  0xf8   : > { %1083 = vst [vmem:[%s6114_s29 + $0xe20] sm:$0xff] %v1082_v4  ;;  %v1088_v7 = vld [vmem:[%s6109_s28 + $0x1c58] sm:$0xff]  ;;  %1085 = vst [vmem:[%s6114_s29 + $0xe28] sm:$0xff] %v1084_v5  ;;  %v1090_v8 = vld [vmem:[%s6109_s28 + $0x1c80] sm:$0xff] }
  0xf9   : > { %1087 = vst [vmem:[%s6114_s29 + $0xe30] sm:$0xff] %v1086_v6  ;;  %1089 = vst [vmem:[%s6114_s29 + $0xe38] sm:$0xff] %v1088_v7  ;;  %v1092_v9 = vld [vmem:[%s6109_s28 + $0x1c88] sm:$0xff]  ;;  %v1094_v10 = vld [vmem:[%s6109_s28 + $0x1c90] sm:$0xff] }
  0xfa   : > { %1091 = vst [vmem:[%s6114_s29 + $0xe40] sm:$0xff] %v1090_v8  ;;  %1093 = vst [vmem:[%s6114_s29 + $0xe48] sm:$0xff] %v1092_v9  ;;  %v1096_v11 = vld [vmem:[%s6109_s28 + $0x1c98] sm:$0xff]  ;;  %v1098_v12 = vld [vmem:[%s6109_s28 + $0x1cc0] sm:$0xff] }
  0xfb   : > { %1095 = vst [vmem:[%s6114_s29 + $0xe50] sm:$0xff] %v1094_v10  ;;  %v1100_v13 = vld [vmem:[%s6109_s28 + $0x1cc8] sm:$0xff]  ;;  %1097 = vst [vmem:[%s6114_s29 + $0xe58] sm:$0xff] %v1096_v11  ;;  %v1102_v14 = vld [vmem:[%s6109_s28 + $0x1cd0] sm:$0xff] }
  0xfc   : > { %1099 = vst [vmem:[%s6114_s29 + $0xe60] sm:$0xff] %v1098_v12  ;;  %1101 = vst [vmem:[%s6114_s29 + $0xe68] sm:$0xff] %v1100_v13  ;;  %v1104_v15 = vld [vmem:[%s6109_s28 + $0x1cd8] sm:$0xff]  ;;  %v1106_v16 = vld [vmem:[%s6109_s28 + $0x1d00] sm:$0xff] }
  0xfd   : > { %1103 = vst [vmem:[%s6114_s29 + $0xe70] sm:$0xff] %v1102_v14  ;;  %1105 = vst [vmem:[%s6114_s29 + $0xe78] sm:$0xff] %v1104_v15  ;;  %v1108_v17 = vld [vmem:[%s6109_s28 + $0x1d08] sm:$0xff]  ;;  %v1110_v18 = vld [vmem:[%s6109_s28 + $0x1d10] sm:$0xff] }
  0xfe   : > { %1107 = vst [vmem:[%s6114_s29 + $0xe80] sm:$0xff] %v1106_v16  ;;  %v1112_v19 = vld [vmem:[%s6109_s28 + $0x1d18] sm:$0xff]  ;;  %1109 = vst [vmem:[%s6114_s29 + $0xe88] sm:$0xff] %v1108_v17  ;;  %v1114_v20 = vld [vmem:[%s6109_s28 + $0x1d40] sm:$0xff] }
  0xff   : > { %1111 = vst [vmem:[%s6114_s29 + $0xe90] sm:$0xff] %v1110_v18  ;;  %1113 = vst [vmem:[%s6114_s29 + $0xe98] sm:$0xff] %v1112_v19  ;;  %v1116_v21 = vld [vmem:[%s6109_s28 + $0x1d48] sm:$0xff]  ;;  %v1118_v22 = vld [vmem:[%s6109_s28 + $0x1d50] sm:$0xff] }
 0x100   : > { %1115 = vst [vmem:[%s6114_s29 + $0xea0] sm:$0xff] %v1114_v20  ;;  %1117 = vst [vmem:[%s6114_s29 + $0xea8] sm:$0xff] %v1116_v21  ;;  %v1120_v23 = vld [vmem:[%s6109_s28 + $0x1d58] sm:$0xff]  ;;  %v1122_v24 = vld [vmem:[%s6109_s28 + $0x1d80] sm:$0xff] }
 0x101   : > { %1119 = vst [vmem:[%s6114_s29 + $0xeb0] sm:$0xff] %v1118_v22  ;;  %v1124_v25 = vld [vmem:[%s6109_s28 + $0x1d88] sm:$0xff]  ;;  %1121 = vst [vmem:[%s6114_s29 + $0xeb8] sm:$0xff] %v1120_v23  ;;  %v1126_v26 = vld [vmem:[%s6109_s28 + $0x1d90] sm:$0xff] }
 0x102   : > { %1123 = vst [vmem:[%s6114_s29 + $0xec0] sm:$0xff] %v1122_v24  ;;  %1125 = vst [vmem:[%s6114_s29 + $0xec8] sm:$0xff] %v1124_v25  ;;  %v1128_v27 = vld [vmem:[%s6109_s28 + $0x1d98] sm:$0xff]  ;;  %v1130_v28 = vld [vmem:[%s6109_s28 + $0x1dc0] sm:$0xff] }
 0x103   : > { %1127 = vst [vmem:[%s6114_s29 + $0xed0] sm:$0xff] %v1126_v26  ;;  %1129 = vst [vmem:[%s6114_s29 + $0xed8] sm:$0xff] %v1128_v27  ;;  %v1132_v29 = vld [vmem:[%s6109_s28 + $0x1dc8] sm:$0xff]  ;;  %v1134_v30 = vld [vmem:[%s6109_s28 + $0x1dd0] sm:$0xff] }
 0x104   : > { %1131 = vst [vmem:[%s6114_s29 + $0xee0] sm:$0xff] %v1130_v28  ;;  %v1136_v31 = vld [vmem:[%s6109_s28 + $0x1dd8] sm:$0xff]  ;;  %1133 = vst [vmem:[%s6114_s29 + $0xee8] sm:$0xff] %v1132_v29  ;;  %v1138_v32 = vld [vmem:[%s6109_s28 + $0x1e00] sm:$0xff] }
 0x105   : > { %1135 = vst [vmem:[%s6114_s29 + $0xef0] sm:$0xff] %v1134_v30  ;;  %1137 = vst [vmem:[%s6114_s29 + $0xef8] sm:$0xff] %v1136_v31  ;;  %v1140_v33 = vld [vmem:[%s6109_s28 + $0x1e08] sm:$0xff]  ;;  %v1142_v34 = vld [vmem:[%s6109_s28 + $0x1e10] sm:$0xff] }
 0x106   : > { %1139 = vst [vmem:[%s6114_s29 + $0xf00] sm:$0xff] %v1138_v32  ;;  %1141 = vst [vmem:[%s6114_s29 + $0xf08] sm:$0xff] %v1140_v33  ;;  %v1144_v35 = vld [vmem:[%s6109_s28 + $0x1e18] sm:$0xff]  ;;  %v1146_v36 = vld [vmem:[%s6109_s28 + $0x1e40] sm:$0xff] }
 0x107   : > { %1143 = vst [vmem:[%s6114_s29 + $0xf10] sm:$0xff] %v1142_v34  ;;  %v1148_v37 = vld [vmem:[%s6109_s28 + $0x1e48] sm:$0xff]  ;;  %1145 = vst [vmem:[%s6114_s29 + $0xf18] sm:$0xff] %v1144_v35  ;;  %v1150_v38 = vld [vmem:[%s6109_s28 + $0x1e50] sm:$0xff] }
 0x108   : > { %1147 = vst [vmem:[%s6114_s29 + $0xf20] sm:$0xff] %v1146_v36  ;;  %1149 = vst [vmem:[%s6114_s29 + $0xf28] sm:$0xff] %v1148_v37  ;;  %v1152_v39 = vld [vmem:[%s6109_s28 + $0x1e58] sm:$0xff]  ;;  %v1154_v40 = vld [vmem:[%s6109_s28 + $0x1e80] sm:$0xff] }
 0x109   : > { %1151 = vst [vmem:[%s6114_s29 + $0xf30] sm:$0xff] %v1150_v38  ;;  %1153 = vst [vmem:[%s6114_s29 + $0xf38] sm:$0xff] %v1152_v39  ;;  %v1156_v41 = vld [vmem:[%s6109_s28 + $0x1e88] sm:$0xff]  ;;  %v1158_v42 = vld [vmem:[%s6109_s28 + $0x1e90] sm:$0xff] }
 0x10a   : > { %1155 = vst [vmem:[%s6114_s29 + $0xf40] sm:$0xff] %v1154_v40  ;;  %v1160_v43 = vld [vmem:[%s6109_s28 + $0x1e98] sm:$0xff]  ;;  %1157 = vst [vmem:[%s6114_s29 + $0xf48] sm:$0xff] %v1156_v41  ;;  %v1162_v44 = vld [vmem:[%s6109_s28 + $0x1ec0] sm:$0xff] }
 0x10b   : > { %1159 = vst [vmem:[%s6114_s29 + $0xf50] sm:$0xff] %v1158_v42  ;;  %1161 = vst [vmem:[%s6114_s29 + $0xf58] sm:$0xff] %v1160_v43  ;;  %v1164_v45 = vld [vmem:[%s6109_s28 + $0x1ec8] sm:$0xff]  ;;  %v1166_v46 = vld [vmem:[%s6109_s28 + $0x1ed0] sm:$0xff] }
 0x10c   : > { %1163 = vst [vmem:[%s6114_s29 + $0xf60] sm:$0xff] %v1162_v44  ;;  %1165 = vst [vmem:[%s6114_s29 + $0xf68] sm:$0xff] %v1164_v45  ;;  %v1168_v47 = vld [vmem:[%s6109_s28 + $0x1ed8] sm:$0xff]  ;;  %v1170_v48 = vld [vmem:[%s6109_s28 + $0x1f00] sm:$0xff] }
 0x10d   : > { %1167 = vst [vmem:[%s6114_s29 + $0xf70] sm:$0xff] %v1166_v46  ;;  %v1172_v49 = vld [vmem:[%s6109_s28 + $0x1f08] sm:$0xff]  ;;  %1169 = vst [vmem:[%s6114_s29 + $0xf78] sm:$0xff] %v1168_v47  ;;  %v1174_v50 = vld [vmem:[%s6109_s28 + $0x1f10] sm:$0xff] }
 0x10e   : > { %1171 = vst [vmem:[%s6114_s29 + $0xf80] sm:$0xff] %v1170_v48  ;;  %1173 = vst [vmem:[%s6114_s29 + $0xf88] sm:$0xff] %v1172_v49  ;;  %v1176_v51 = vld [vmem:[%s6109_s28 + $0x1f18] sm:$0xff]  ;;  %v1178_v52 = vld [vmem:[%s6109_s28 + $0x1f40] sm:$0xff] }
 0x10f   : > { %1175 = vst [vmem:[%s6114_s29 + $0xf90] sm:$0xff] %v1174_v50  ;;  %1177 = vst [vmem:[%s6114_s29 + $0xf98] sm:$0xff] %v1176_v51  ;;  %v1180_v53 = vld [vmem:[%s6109_s28 + $0x1f48] sm:$0xff]  ;;  %v1182_v54 = vld [vmem:[%s6109_s28 + $0x1f50] sm:$0xff] }
 0x110   : > { %1179 = vst [vmem:[%s6114_s29 + $0xfa0] sm:$0xff] %v1178_v52  ;;  %v1184_v55 = vld [vmem:[%s6109_s28 + $0x1f58] sm:$0xff]  ;;  %1181 = vst [vmem:[%s6114_s29 + $0xfa8] sm:$0xff] %v1180_v53  ;;  %v1186_v56 = vld [vmem:[%s6109_s28 + $0x1f80] sm:$0xff] }
 0x111   : > { %1183 = vst [vmem:[%s6114_s29 + $0xfb0] sm:$0xff] %v1182_v54  ;;  %1185 = vst [vmem:[%s6114_s29 + $0xfb8] sm:$0xff] %v1184_v55  ;;  %v1188_v57 = vld [vmem:[%s6109_s28 + $0x1f88] sm:$0xff]  ;;  %v1190_v58 = vld [vmem:[%s6109_s28 + $0x1f90] sm:$0xff] }
 0x112   : > { %1187 = vst [vmem:[%s6114_s29 + $0xfc0] sm:$0xff] %v1186_v56  ;;  %1189 = vst [vmem:[%s6114_s29 + $0xfc8] sm:$0xff] %v1188_v57  ;;  %v1192_v59 = vld [vmem:[%s6109_s28 + $0x1f98] sm:$0xff]  ;;  %v1194_v60 = vld [vmem:[%s6109_s28 + $0x1fc0] sm:$0xff] }
 0x113   : > { %1191 = vst [vmem:[%s6114_s29 + $0xfd0] sm:$0xff] %v1190_v58  ;;  %v1196_v61 = vld [vmem:[%s6109_s28 + $0x1fc8] sm:$0xff]  ;;  %1193 = vst [vmem:[%s6114_s29 + $0xfd8] sm:$0xff] %v1192_v59  ;;  %v1198_v62 = vld [vmem:[%s6109_s28 + $0x1fd0] sm:$0xff] }
 0x114   : > { %1195 = vst [vmem:[%s6114_s29 + $0xfe0] sm:$0xff] %v1194_v60  ;;  %1197 = vst [vmem:[%s6114_s29 + $0xfe8] sm:$0xff] %v1196_v61  ;;  %v1200_v63 = vld [vmem:[%s6109_s28 + $0x1fd8] sm:$0xff] }
 0x115   : > { %1199 = vst [vmem:[%s6114_s29 + $0xff0] sm:$0xff] %v1198_v62  ;;  %1201 = vst [vmem:[%s6114_s29 + $0xff8] sm:$0xff] %v1200_v63 }
 0x116 PF: > { %p5350_p8 = scmp.ge.s32.totalorder %s6039_s16, 1  ;;  %p1214_p9 = scmp.lt.s32.totalorder %s6039_s16, 3 }
 0x118   : > { %p1215_p10 = pnand %p5350_p8, %p1214_p9 }
 0x119   : > { %s1221_s30 = sand.u32 (!%p1215_p10), 1, %s6023_s12   ;;  %v1268_v0 = vld [vmem:[%s7842_s0] sm:$0xff] (!%p1215_p10)  ;;  %s5353_s4 = sshll.u32 (!%p1215_p10), %s6031_s14, 3 }
 0x11a   : > { %1218 = sbr.rel (%p1215_p10) target bundleno = 1032 (0x408), region = 51  ;;  %v1272_v1 = vld [vmem:[%s7842_s0 + $0x20] sm:$0xff] (!%p1215_p10)  ;;  %s5351_s8 = sshll.u32 (!%p1215_p10), %s1221_s30, 12 }
 0x11b   : > { %v7148_v2 = vcombine.high (!%p1215_p10), %v1268_v0, %v1272_v1  ;;  %v7150_v3 = vcombine.low (!%p1215_p10), %v1268_v0, %v1272_v1  ;;  %s7152_s9 = scalar_lea.vmem (!%p1215_p10), [#allocation2], %s5351_s8  ;;  %p7697_p11 = scmp.lt.s32.totalorder (!%p1215_p10), %s5353_s4, 15 }
 0x11c   : > { %v1276_v4 = vld [vmem:[%s7152_s9] sm:$0xff] (!%p1215_p10)  ;;  %v1277_v6 = vld [vmem:[%s7152_s9 + $0x8] sm:$0xff] (!%p1215_p10)  ;;  %s7756_s10 = sshll.u32 (!%p1215_p10), %s1221_s30, 6 }
 0x11d   : > { %v1280_v5 = vld [vmem:[%s7152_s9 + $0x20] sm:$0xff] (!%p1215_p10)  ;;  %4462 = vmatprep.mubr.bf16.mxu0 (!%p1215_p10), %v7148_v2  ;;  %4634 = vmatprep.mubr.bf16.mxu1 (!%p1215_p10), %v7148_v2  ;;  %v1281_v8 = vld [vmem:[%s7152_s9 + $0x28] sm:$0xff] (!%p1215_p10)  ;;  %s7769_s12 = scalar_lea.vmem (!%p1215_p10), [#allocation3], %s7756_s10 }
 0x11e   : > { %v5363_v7 = vcombine.high (!%p1215_p10), %v1276_v4, %v1280_v5  ;;  %v5362_v9 = vcombine.low (!%p1215_p10), %v1276_v4, %v1280_v5  ;;  %v1284_v10 = vld [vmem:[%s7152_s9 + $0x40] sm:$0xff] (!%p1215_p10)  ;;  %v5365_v12 = vcombine.high (!%p1215_p10), %v1277_v6, %v1281_v8  ;;  %v5364_v13 = vcombine.low (!%p1215_p10), %v1277_v6, %v1281_v8  ;;  %v1285_v15 = vld [vmem:[%s7152_s9 + $0x48] sm:$0xff] (!%p1215_p10) }
 0x11f   : > { %v1288_v11 = vld [vmem:[%s7152_s9 + $0x60] sm:$0xff] (!%p1215_p10)  ;;  %v1289_v16 = vld [vmem:[%s7152_s9 + $0x68] sm:$0xff] (!%p1215_p10) }
 0x120   : > { %v5371_v14 = vcombine.high (!%p1215_p10), %v1284_v10, %v1288_v11  ;;  %v1292_v17 = vld [vmem:[%s7152_s9 + $0x80] sm:$0xff] (!%p1215_p10)  ;;  %4430 = vmatprep.subr.bf16.mxu0 (!%p1215_p10), %v5363_v7  ;;  %v5373_v18 = vcombine.high (!%p1215_p10), %v1285_v15, %v1289_v16  ;;  %v1293_v20 = vld [vmem:[%s7152_s9 + $0x88] sm:$0xff] (!%p1215_p10)  ;;  %4602 = vmatprep.subr.bf16.mxu1 (!%p1215_p10), %v5365_v12  ;;  %v5370_v22 = vcombine.low (!%p1215_p10), %v1284_v10, %v1288_v11 }
 0x121   : > { %v1296_v19 = vld [vmem:[%s7152_s9 + $0xa0] sm:$0xff]  ;;  %v1297_v21 = vld [vmem:[%s7152_s9 + $0xa8] sm:$0xff]  ;;  %4431 = vmatpush1.bf16.msra.mxu0 %v5362_v9  ;;  %4603 = vmatpush1.bf16.msra.mxu1 %v5364_v13  ;;  %v5372_v23 = vcombine.low %v1285_v15, %v1289_v16  ;;  %s7855_s4 = smov (!%p7697_p11, %s5353_s4), 15  ;;  %s5896_s30 = sshll.u32 (%p6096_p6), %s6031_s14, 5 }
 0x122   : > { %4432 = vmatprep.subr.bf16.mxu0 %v5371_v14  ;;  %v5379_v24 = vcombine.high %v1292_v17, %v1296_v19  ;;  %4604 = vmatprep.subr.bf16.mxu1 %v5373_v18  ;;  %v5381_v25 = vcombine.high %v1293_v20, %v1297_v21  ;;  %v1300_v26 = vld [vmem:[%s7152_s9 + $0xc0] sm:$0xff]  ;;  %v1301_v28 = vld [vmem:[%s7152_s9 + $0xc8] sm:$0xff]  ;;  %v5378_v30 = vcombine.low %v1292_v17, %v1296_v19  ;;  %s1264_s8 = scalar_lea.vmem %s7844_s2, %s7855_s4  ;;  %s5218_s18 = scalar_lea.vmem (%p6096_p6), %s7845_s3, %s5896_s30 }
 0x123   : > { %v1304_v27 = vld [vmem:[%s7152_s9 + $0xe0] sm:$0xff]  ;;  %v1305_v29 = vld [vmem:[%s7152_s9 + $0xe8] sm:$0xff]  ;;  %v5380_v31 = vcombine.low %v1293_v20, %v1297_v21 }
 0x124   : > { %v5387_v32 = vcombine.high %v1300_v26, %v1304_v27  ;;  %v5389_v33 = vcombine.high %v1301_v28, %v1305_v29  ;;  %v1308_v34 = vld [vmem:[%s7152_s9 + $0x100] sm:$0xff]  ;;  %v1309_v36 = vld [vmem:[%s7152_s9 + $0x108] sm:$0xff]  ;;  %v5386_v38 = vcombine.low %v1300_v26, %v1304_v27  ;;  %v5388_v39 = vcombine.low %v1301_v28, %v1305_v29 }
 0x125   : > { %4433 = vmatpush1.bf16.msra.mxu0 %v5370_v22  ;;  %4605 = vmatpush1.bf16.msra.mxu1 %v5372_v23  ;;  %v1312_v35 = vld [vmem:[%s7152_s9 + $0x120] sm:$0xff]  ;;  %v1313_v37 = vld [vmem:[%s7152_s9 + $0x128] sm:$0xff] }
 0x126   : > { %4434 = vmatprep.subr.bf16.mxu0 %v5379_v24  ;;  %4606 = vmatprep.subr.bf16.mxu1 %v5381_v25  ;;  %v5395_v40 = vcombine.high %v1308_v34, %v1312_v35  ;;  %v5397_v41 = vcombine.high %v1309_v36, %v1313_v37  ;;  %v1316_v42 = vld [vmem:[%s7152_s9 + $0x140] sm:$0xff]  ;;  %v1317_v44 = vld [vmem:[%s7152_s9 + $0x148] sm:$0xff]  ;;  %v5394_v46 = vcombine.low %v1308_v34, %v1312_v35 }
 0x127   : > { %v1320_v43 = vld [vmem:[%s7152_s9 + $0x160] sm:$0xff]  ;;  %v1321_v45 = vld [vmem:[%s7152_s9 + $0x168] sm:$0xff]  ;;  %v5396_v47 = vcombine.low %v1309_v36, %v1313_v37 }
 0x128   : > { %v5403_v48 = vcombine.high %v1316_v42, %v1320_v43  ;;  %v5405_v49 = vcombine.high %v1317_v44, %v1321_v45  ;;  %v1324_v50 = vld [vmem:[%s7152_s9 + $0x180] sm:$0xff]  ;;  %v1325_v52 = vld [vmem:[%s7152_s9 + $0x188] sm:$0xff]  ;;  %v5402_v54 = vcombine.low %v1316_v42, %v1320_v43  ;;  %v5404_v55 = vcombine.low %v1317_v44, %v1321_v45 }
 0x129   : > { %4435 = vmatpush1.bf16.msra.mxu0 %v5378_v30  ;;  %4607 = vmatpush1.bf16.msra.mxu1 %v5380_v31  ;;  %v1328_v51 = vld [vmem:[%s7152_s9 + $0x1a0] sm:$0xff]  ;;  %v1329_v53 = vld [vmem:[%s7152_s9 + $0x1a8] sm:$0xff] }
 0x12a   : > { %4436 = vmatprep.subr.bf16.mxu0 %v5387_v32  ;;  %4608 = vmatprep.subr.bf16.mxu1 %v5389_v33  ;;  %v5411_v56 = vcombine.high %v1324_v50, %v1328_v51  ;;  %v5413_v57 = vcombine.high %v1325_v52, %v1329_v53  ;;  %v1332_v58 = vld [vmem:[%s7152_s9 + $0x1c0] sm:$0xff]  ;;  %v1333_v60 = vld [vmem:[%s7152_s9 + $0x1c8] sm:$0xff]  ;;  %v5410_v62 = vcombine.low %v1324_v50, %v1328_v51 }
 0x12b   : > { %v1336_v59 = vld [vmem:[%s7152_s9 + $0x1e0] sm:$0xff]  ;;  %v1337_v61 = vld [vmem:[%s7152_s9 + $0x1e8] sm:$0xff]  ;;  %v5412_v63 = vcombine.low %v1325_v52, %v1329_v53 }
 0x12c   : > { %v5419_v0 = vcombine.high %v1332_v58, %v1336_v59  ;;  %v5421_v1 = vcombine.high %v1333_v60, %v1337_v61  ;;  %v1340_v4 = vld [vmem:[%s7152_s9 + $0x200] sm:$0xff]  ;;  %v1341_v6 = vld [vmem:[%s7152_s9 + $0x208] sm:$0xff]  ;;  %v5418_v8 = vcombine.low %v1332_v58, %v1336_v59  ;;  %v5420_v9 = vcombine.low %v1333_v60, %v1337_v61 }
 0x12d   : > { %4437 = vmatpush1.bf16.msra.mxu0 %v5386_v38  ;;  %4609 = vmatpush1.bf16.msra.mxu1 %v5388_v39  ;;  %v1344_v5 = vld [vmem:[%s7152_s9 + $0x220] sm:$0xff]  ;;  %v1345_v7 = vld [vmem:[%s7152_s9 + $0x228] sm:$0xff] }
 0x12e   : > { %4438 = vmatprep.subr.bf16.mxu0 %v5395_v40  ;;  %4610 = vmatprep.subr.bf16.mxu1 %v5397_v41  ;;  %v5427_v10 = vcombine.high %v1340_v4, %v1344_v5  ;;  %v5429_v11 = vcombine.high %v1341_v6, %v1345_v7  ;;  %v1348_v12 = vld [vmem:[%s7152_s9 + $0x240] sm:$0xff]  ;;  %v1349_v14 = vld [vmem:[%s7152_s9 + $0x248] sm:$0xff]  ;;  %v5426_v16 = vcombine.low %v1340_v4, %v1344_v5 }
 0x12f   : > { %v1352_v13 = vld [vmem:[%s7152_s9 + $0x260] sm:$0xff]  ;;  %v1353_v15 = vld [vmem:[%s7152_s9 + $0x268] sm:$0xff]  ;;  %v5428_v17 = vcombine.low %v1341_v6, %v1345_v7 }
 0x130   : > { %v5435_v18 = vcombine.high %v1348_v12, %v1352_v13  ;;  %v5437_v19 = vcombine.high %v1349_v14, %v1353_v15  ;;  %v1356_v20 = vld [vmem:[%s7152_s9 + $0x280] sm:$0xff]  ;;  %v1357_v22 = vld [vmem:[%s7152_s9 + $0x288] sm:$0xff]  ;;  %v5434_v24 = vcombine.low %v1348_v12, %v1352_v13  ;;  %v5436_v25 = vcombine.low %v1349_v14, %v1353_v15 }
 0x131   : > { %4439 = vmatpush1.bf16.msra.mxu0 %v5394_v46  ;;  %4611 = vmatpush1.bf16.msra.mxu1 %v5396_v47  ;;  %v1360_v21 = vld [vmem:[%s7152_s9 + $0x2a0] sm:$0xff]  ;;  %v1361_v23 = vld [vmem:[%s7152_s9 + $0x2a8] sm:$0xff] }
 0x132   : > { %4440 = vmatprep.subr.bf16.mxu0 %v5403_v48  ;;  %4612 = vmatprep.subr.bf16.mxu1 %v5405_v49  ;;  %v5443_v26 = vcombine.high %v1356_v20, %v1360_v21  ;;  %v5445_v27 = vcombine.high %v1357_v22, %v1361_v23  ;;  %v1364_v28 = vld [vmem:[%s7152_s9 + $0x2c0] sm:$0xff]  ;;  %v1365_v30 = vld [vmem:[%s7152_s9 + $0x2c8] sm:$0xff]  ;;  %v5442_v32 = vcombine.low %v1356_v20, %v1360_v21 }
 0x133   : > { %v1368_v29 = vld [vmem:[%s7152_s9 + $0x2e0] sm:$0xff]  ;;  %v1369_v31 = vld [vmem:[%s7152_s9 + $0x2e8] sm:$0xff]  ;;  %v5444_v33 = vcombine.low %v1357_v22, %v1361_v23 }
 0x134   : > { %v5451_v34 = vcombine.high %v1364_v28, %v1368_v29  ;;  %v5453_v35 = vcombine.high %v1365_v30, %v1369_v31  ;;  %v1372_v36 = vld [vmem:[%s7152_s9 + $0x300] sm:$0xff]  ;;  %v1373_v38 = vld [vmem:[%s7152_s9 + $0x308] sm:$0xff]  ;;  %v5450_v40 = vcombine.low %v1364_v28, %v1368_v29  ;;  %v5452_v41 = vcombine.low %v1365_v30, %v1369_v31 }
 0x135   : > { %4441 = vmatpush1.bf16.msra.mxu0 %v5402_v54  ;;  %4613 = vmatpush1.bf16.msra.mxu1 %v5404_v55  ;;  %v1376_v37 = vld [vmem:[%s7152_s9 + $0x320] sm:$0xff]  ;;  %v1377_v39 = vld [vmem:[%s7152_s9 + $0x328] sm:$0xff] }
 0x136   : > { %4442 = vmatprep.subr.bf16.mxu0 %v5411_v56  ;;  %4614 = vmatprep.subr.bf16.mxu1 %v5413_v57  ;;  %v5459_v42 = vcombine.high %v1372_v36, %v1376_v37  ;;  %v5461_v43 = vcombine.high %v1373_v38, %v1377_v39  ;;  %v1380_v44 = vld [vmem:[%s7152_s9 + $0x340] sm:$0xff]  ;;  %v1381_v46 = vld [vmem:[%s7152_s9 + $0x348] sm:$0xff]  ;;  %v5458_v48 = vcombine.low %v1372_v36, %v1376_v37 }
 0x137   : > { %v1384_v45 = vld [vmem:[%s7152_s9 + $0x360] sm:$0xff]  ;;  %v1385_v47 = vld [vmem:[%s7152_s9 + $0x368] sm:$0xff]  ;;  %v5460_v49 = vcombine.low %v1373_v38, %v1377_v39 }
 0x138   : > { %v5467_v50 = vcombine.high %v1380_v44, %v1384_v45  ;;  %v5469_v51 = vcombine.high %v1381_v46, %v1385_v47  ;;  %v1388_v52 = vld [vmem:[%s7152_s9 + $0x380] sm:$0xff]  ;;  %v1389_v54 = vld [vmem:[%s7152_s9 + $0x388] sm:$0xff]  ;;  %v5466_v56 = vcombine.low %v1380_v44, %v1384_v45  ;;  %v5468_v57 = vcombine.low %v1381_v46, %v1385_v47 }
 0x139   : > { %4443 = vmatpush1.bf16.msra.mxu0 %v5410_v62  ;;  %4615 = vmatpush1.bf16.msra.mxu1 %v5412_v63  ;;  %v1392_v53 = vld [vmem:[%s7152_s9 + $0x3a0] sm:$0xff]  ;;  %v1393_v55 = vld [vmem:[%s7152_s9 + $0x3a8] sm:$0xff] }
 0x13a   : > { %4444 = vmatprep.subr.bf16.mxu0 %v5419_v0  ;;  %4616 = vmatprep.subr.bf16.mxu1 %v5421_v1  ;;  %v5475_v58 = vcombine.high %v1388_v52, %v1392_v53  ;;  %v5477_v59 = vcombine.high %v1389_v54, %v1393_v55  ;;  %v1396_v60 = vld [vmem:[%s7152_s9 + $0x3c0] sm:$0xff]  ;;  %v1397_v62 = vld [vmem:[%s7152_s9 + $0x3c8] sm:$0xff]  ;;  %v5474_v0 = vcombine.low %v1388_v52, %v1392_v53 }
 0x13b   : > { %v1400_v61 = vld [vmem:[%s7152_s9 + $0x3e0] sm:$0xff]  ;;  %v1401_v63 = vld [vmem:[%s7152_s9 + $0x3e8] sm:$0xff]  ;;  %v5476_v1 = vcombine.low %v1389_v54, %v1393_v55 }
 0x13c   : > { %v5483_v4 = vcombine.high %v1396_v60, %v1400_v61  ;;  %v5485_v5 = vcombine.high %v1397_v62, %v1401_v63  ;;  %v1404_v6 = vld [vmem:[%s7152_s9 + $0x400] sm:$0xff]  ;;  %v1425_v28 = vld [vmem:[%s7152_s9 + $0x4a8] sm:$0xff] }
 0x13d   : > { %4445 = vmatpush1.bf16.msra.mxu0 %v5418_v8  ;;  %4617 = vmatpush1.bf16.msra.mxu1 %v5420_v9  ;;  %v1408_v7 = vld [vmem:[%s7152_s9 + $0x420] sm:$0xff]  ;;  %v1405_v8 = vld [vmem:[%s7152_s9 + $0x408] sm:$0xff] }
 0x13e   : > { %4446 = vmatprep.subr.bf16.mxu0 %v5427_v10  ;;  %4618 = vmatprep.subr.bf16.mxu1 %v5429_v11  ;;  %v1409_v9 = vld [vmem:[%s7152_s9 + $0x428] sm:$0xff]  ;;  %v5482_v10 = vcombine.low %v1396_v60, %v1400_v61  ;;  %v5484_v11 = vcombine.low %v1397_v62, %v1401_v63  ;;  %v5491_v12 = vcombine.high %v1404_v6, %v1408_v7  ;;  %v1412_v14 = vld [vmem:[%s7152_s9 + $0x440] sm:$0xff] }
 0x13f   : > { %v5493_v13 = vcombine.high %v1405_v8, %v1409_v9  ;;  %v1416_v15 = vld [vmem:[%s7152_s9 + $0x460] sm:$0xff]  ;;  %v5490_v20 = vcombine.low %v1404_v6, %v1408_v7  ;;  %v5492_v21 = vcombine.low %v1405_v8, %v1409_v9  ;;  %v1433_v36 = vld [vmem:[%s7152_s9 + $0x4e8] sm:$0xff] }
 0x140   : > { %v5499_v22 = vcombine.high %v1412_v14, %v1416_v15  ;;  %v5498_v29 = vcombine.low %v1412_v14, %v1416_v15  ;;  %v1441_v44 = vld [vmem:[%s7152_s9 + $0x528] sm:$0xff] }
 0x141   : > { %4447 = vmatpush1.bf16.msra.mxu0 %v5426_v16  ;;  %4619 = vmatpush1.bf16.msra.mxu1 %v5428_v17  ;;  %v1413_v16 = vld [vmem:[%s7152_s9 + $0x448] sm:$0xff] }
 0x142   : > { %4448 = vmatprep.subr.bf16.mxu0 %v5435_v18  ;;  %4620 = vmatprep.subr.bf16.mxu1 %v5437_v19  ;;  %v1417_v17 = vld [vmem:[%s7152_s9 + $0x468] sm:$0xff] }
 0x143   : > { %v7231_v18 = vld [vmem:[%s7842_s0 + $0x8] sm:$0xff]  ;;  %v5501_v23 = vcombine.high %v1413_v16, %v1417_v17  ;;  %v5500_v30 = vcombine.low %v1413_v16, %v1417_v17 }
 0x144   : > { %v7236_v19 = vld [vmem:[%s7842_s0 + $0x28] sm:$0xff] }
 0x145   : > { %4449 = vmatpush1.bf16.msra.mxu0 %v5434_v24  ;;  %4621 = vmatpush1.bf16.msra.mxu1 %v5436_v25  ;;  %v1420_v24 = vld [vmem:[%s7152_s9 + $0x480] sm:$0xff]  ;;  %v1449_v52 = vld [vmem:[%s7152_s9 + $0x568] sm:$0xff] }
 0x146   : > { %4450 = vmatprep.subr.bf16.mxu0 %v5443_v26  ;;  %4622 = vmatprep.subr.bf16.mxu1 %v5445_v27  ;;  %v1424_v25 = vld [vmem:[%s7152_s9 + $0x4a0] sm:$0xff]  ;;  %v7242_v26 = vcombine.high %v7231_v18, %v7236_v19  ;;  %v1421_v27 = vld [vmem:[%s7152_s9 + $0x488] sm:$0xff] }
 0x147   : > { %v5507_v31 = vcombine.high %v1420_v24, %v1424_v25  ;;  %v5506_v37 = vcombine.low %v1420_v24, %v1424_v25  ;;  %v5508_v38 = vcombine.low %v1421_v27, %v1425_v28  ;;  %v1457_v60 = vld [vmem:[%s7152_s9 + $0x5a8] sm:$0xff] }
 0x148   : > { %v1465_v6 = vld [vmem:[%s7152_s9 + $0x5e8] sm:$0xff] }
 0x149   : > { %4451 = vmatpush1.bf16.msra.mxu0 %v5442_v32  ;;  %4623 = vmatpush1.bf16.msra.mxu1 %v5444_v33  ;;  %v5509_v32 = vcombine.high %v1421_v27, %v1425_v28  ;;  %v1428_v33 = vld [vmem:[%s7152_s9 + $0x4c0] sm:$0xff]  ;;  %v1473_v14 = vld [vmem:[%s7152_s9 + $0x628] sm:$0xff] }
 0x14a   : > { %4452 = vmatprep.subr.bf16.mxu0 %v5451_v34  ;;  %4624 = vmatprep.subr.bf16.mxu1 %v5453_v35  ;;  %v1432_v34 = vld [vmem:[%s7152_s9 + $0x4e0] sm:$0xff]  ;;  %v1429_v35 = vld [vmem:[%s7152_s9 + $0x4c8] sm:$0xff] }
 0x14b   : > { %v5515_v39 = vcombine.high %v1428_v33, %v1432_v34  ;;  %v5514_v45 = vcombine.low %v1428_v33, %v1432_v34  ;;  %v5516_v46 = vcombine.low %v1429_v35, %v1433_v36  ;;  %v1481_v24 = vld [vmem:[%s7152_s9 + $0x668] sm:$0xff] }
 0x14c   : > { %v1489_v33 = vld [vmem:[%s7152_s9 + $0x6a8] sm:$0xff] }
 0x14d   : > { %4453 = vmatpush1.bf16.msra.mxu0 %v5450_v40  ;;  %4625 = vmatpush1.bf16.msra.mxu1 %v5452_v41  ;;  %v5517_v40 = vcombine.high %v1429_v35, %v1433_v36  ;;  %v1436_v41 = vld [vmem:[%s7152_s9 + $0x500] sm:$0xff] }
 0x14e   : > { %4454 = vmatprep.subr.bf16.mxu0 %v5459_v42  ;;  %4626 = vmatprep.subr.bf16.mxu1 %v5461_v43  ;;  %v1440_v42 = vld [vmem:[%s7152_s9 + $0x520] sm:$0xff]  ;;  %v1437_v43 = vld [vmem:[%s7152_s9 + $0x508] sm:$0xff] }
 0x14f   : > { %v5523_v47 = vcombine.high %v1436_v41, %v1440_v42  ;;  %v5522_v53 = vcombine.low %v1436_v41, %v1440_v42  ;;  %v5524_v54 = vcombine.low %v1437_v43, %v1441_v44  ;;  %v1497_v41 = vld [vmem:[%s7152_s9 + $0x6e8] sm:$0xff] }
 0x151   : > { %4455 = vmatpush1.bf16.msra.mxu0 %v5458_v48  ;;  %4627 = vmatpush1.bf16.msra.mxu1 %v5460_v49  ;;  %v5525_v48 = vcombine.high %v1437_v43, %v1441_v44  ;;  %v1444_v49 = vld [vmem:[%s7152_s9 + $0x540] sm:$0xff] }
 0x152   : > { %4456 = vmatprep.subr.bf16.mxu0 %v5467_v50  ;;  %4628 = vmatprep.subr.bf16.mxu1 %v5469_v51  ;;  %v1448_v50 = vld [vmem:[%s7152_s9 + $0x560] sm:$0xff]  ;;  %v1445_v51 = vld [vmem:[%s7152_s9 + $0x548] sm:$0xff] }
 0x153   : > { %v5531_v55 = vcombine.high %v1444_v49, %v1448_v50  ;;  %v5530_v61 = vcombine.low %v1444_v49, %v1448_v50  ;;  %v5532_v62 = vcombine.low %v1445_v51, %v1449_v52  ;;  %v1505_v49 = vld [vmem:[%s7152_s9 + $0x728] sm:$0xff] }
 0x155   : > { %4457 = vmatpush1.bf16.msra.mxu0 %v5466_v56  ;;  %4629 = vmatpush1.bf16.msra.mxu1 %v5468_v57  ;;  %v5533_v56 = vcombine.high %v1445_v51, %v1449_v52  ;;  %v1452_v57 = vld [vmem:[%s7152_s9 + $0x580] sm:$0xff] }
 0x156   : > { %4458 = vmatprep.subr.bf16.mxu0 %v5475_v58  ;;  %4630 = vmatprep.subr.bf16.mxu1 %v5477_v59  ;;  %v1456_v58 = vld [vmem:[%s7152_s9 + $0x5a0] sm:$0xff]  ;;  %v1453_v59 = vld [vmem:[%s7152_s9 + $0x588] sm:$0xff] }
 0x157   : > { %v5539_v63 = vcombine.high %v1452_v57, %v1456_v58  ;;  %v5538_v7 = vcombine.low %v1452_v57, %v1456_v58  ;;  %v5540_v8 = vcombine.low %v1453_v59, %v1457_v60  ;;  %v1513_v57 = vld [vmem:[%s7152_s9 + $0x768] sm:$0xff] }
 0x159   : > { %4459 = vmatpush1.bf16.msra.mxu0 %v5474_v0  ;;  %4631 = vmatpush1.bf16.msra.mxu1 %v5476_v1  ;;  %v5541_v0 = vcombine.high %v1453_v59, %v1457_v60  ;;  %v1460_v1 = vld [vmem:[%s7152_s9 + $0x5c0] sm:$0xff] }
 0x15a   : > { %4460 = vmatprep.subr.bf16.mxu0 %v5483_v4  ;;  %4632 = vmatprep.subr.bf16.mxu1 %v5485_v5  ;;  %v1464_v4 = vld [vmem:[%s7152_s9 + $0x5e0] sm:$0xff]  ;;  %v1461_v5 = vld [vmem:[%s7152_s9 + $0x5c8] sm:$0xff] }
 0x15b   : > { %v5547_v9 = vcombine.high %v1460_v1, %v1464_v4  ;;  %v5546_v15 = vcombine.low %v1460_v1, %v1464_v4  ;;  %v5548_v16 = vcombine.low %v1461_v5, %v1465_v6  ;;  %v1521_v1 = vld [vmem:[%s7152_s9 + $0x7a8] sm:$0xff] }
 0x15d   : > { %4461 = vmatpush1.bf16.msra.mxu0 %v5482_v10  ;;  %4633 = vmatpush1.bf16.msra.mxu1 %v5484_v11  ;;  %v5549_v10 = vcombine.high %v1461_v5, %v1465_v6  ;;  %v1468_v11 = vld [vmem:[%s7152_s9 + $0x600] sm:$0xff] }
 0x15e   : > { %4473 = vmatprep.subr.bf16.mxu0 %v5491_v12  ;;  %4645 = vmatprep.subr.bf16.mxu1 %v5493_v13  ;;  %v1472_v12 = vld [vmem:[%s7152_s9 + $0x620] sm:$0xff]  ;;  %v1469_v13 = vld [vmem:[%s7152_s9 + $0x608] sm:$0xff] }
 0x15f   : > { %v5555_v17 = vcombine.high %v1468_v11, %v1472_v12  ;;  %v5554_v25 = vcombine.low %v1468_v11, %v1472_v12  ;;  %v5556_v27 = vcombine.low %v1469_v13, %v1473_v14  ;;  %v1529_v11 = vld [vmem:[%s7152_s9 + $0x7e8] sm:$0xff] }
 0x160   : > { %4463 = vmatmul.mubr.bf16.vlgmr.msra.gmra.mrb[0].mxu0 %v7150_v3  ;;  %4635 = vmatmul.mubr.bf16.vlgmr.msra.gmra.mrb[0].mxu1 %v7150_v3 }
 0x161   : > { %4474 = vmatpush1.bf16.msra.mxu0 %v5490_v20  ;;  %4646 = vmatpush1.bf16.msra.mxu1 %v5492_v21  ;;  %v5557_v20 = vcombine.high %v1469_v13, %v1473_v14  ;;  %v1476_v21 = vld [vmem:[%s7152_s9 + $0x640] sm:$0xff] }
 0x162   : > { %4475 = vmatprep.subr.bf16.mxu0 %v5499_v22  ;;  %4647 = vmatprep.subr.bf16.mxu1 %v5501_v23  ;;  %v1480_v22 = vld [vmem:[%s7152_s9 + $0x660] sm:$0xff]  ;;  %v1477_v23 = vld [vmem:[%s7152_s9 + $0x648] sm:$0xff] }
 0x163   : > { %4505 = vmatprep.mubr.bf16.mxu0 %v7242_v26  ;;  %4677 = vmatprep.mubr.bf16.mxu1 %v7242_v26  ;;  %v5563_v28 = vcombine.high %v1476_v21, %v1480_v22  ;;  %v5562_v34 = vcombine.low %v1476_v21, %v1480_v22  ;;  %v5564_v35 = vcombine.low %v1477_v23, %v1481_v24  ;;  %v1537_v21 = vld [vmem:[%s7152_s9 + $0x828] sm:$0xff] }
 0x165   : > { %4476 = vmatpush1.bf16.msra.mxu0 %v5498_v29  ;;  %4648 = vmatpush1.bf16.msra.mxu1 %v5500_v30  ;;  %v5565_v29 = vcombine.high %v1477_v23, %v1481_v24  ;;  %v1484_v30 = vld [vmem:[%s7152_s9 + $0x680] sm:$0xff] }
 0x166   : > { %4477 = vmatprep.subr.bf16.mxu0 %v5507_v31  ;;  %4649 = vmatprep.subr.bf16.mxu1 %v5509_v32  ;;  %v1488_v31 = vld [vmem:[%s7152_s9 + $0x6a0] sm:$0xff]  ;;  %v1485_v32 = vld [vmem:[%s7152_s9 + $0x688] sm:$0xff] }
 0x167   : > { %v5571_v36 = vcombine.high %v1484_v30, %v1488_v31  ;;  %v5570_v42 = vcombine.low %v1484_v30, %v1488_v31  ;;  %v5572_v43 = vcombine.low %v1485_v32, %v1489_v33  ;;  %v7311_v30 = vcombine.low %v7231_v18, %v7236_v19  ;;  %v1545_v31 = vld [vmem:[%s7152_s9 + $0x868] sm:$0xff] }
 0x169   : > { %4478 = vmatpush1.bf16.msra.mxu0 %v5506_v37  ;;  %4650 = vmatpush1.bf16.msra.mxu1 %v5508_v38  ;;  %v5573_v37 = vcombine.high %v1485_v32, %v1489_v33  ;;  %v1492_v38 = vld [vmem:[%s7152_s9 + $0x6c0] sm:$0xff]  ;;  %v7317_v32 = vld [vmem:[%s7842_s0 + $0x10] sm:$0xff] }
 0x16a   : > { %4479 = vmatprep.subr.bf16.mxu0 %v5515_v39  ;;  %4651 = vmatprep.subr.bf16.mxu1 %v5517_v40  ;;  %v1496_v39 = vld [vmem:[%s7152_s9 + $0x6e0] sm:$0xff]  ;;  %v1493_v40 = vld [vmem:[%s7152_s9 + $0x6c8] sm:$0xff]  ;;  %v7322_v33 = vld [vmem:[%s7842_s0 + $0x30] sm:$0xff] }
 0x16b   : > { %v5579_v44 = vcombine.high %v1492_v38, %v1496_v39  ;;  %v5578_v50 = vcombine.low %v1492_v38, %v1496_v39  ;;  %v5580_v51 = vcombine.low %v1493_v40, %v1497_v41  ;;  %v7328_v38 = vcombine.high %v7317_v32, %v7322_v33  ;;  %v1549_v39 = vld [vmem:[%s7152_s9 + $0x888] sm:$0xff] }
 0x16d   : > { %4480 = vmatpush1.bf16.msra.mxu0 %v5514_v45  ;;  %4652 = vmatpush1.bf16.msra.mxu1 %v5516_v46  ;;  %v5581_v45 = vcombine.high %v1493_v40, %v1497_v41  ;;  %v1500_v46 = vld [vmem:[%s7152_s9 + $0x700] sm:$0xff]  ;;  %v1553_v40 = vld [vmem:[%s7152_s9 + $0x8a8] sm:$0xff] }
 0x16e   : > { %4481 = vmatprep.subr.bf16.mxu0 %v5523_v47  ;;  %4653 = vmatprep.subr.bf16.mxu1 %v5525_v48  ;;  %v1504_v47 = vld [vmem:[%s7152_s9 + $0x720] sm:$0xff]  ;;  %v1501_v48 = vld [vmem:[%s7152_s9 + $0x708] sm:$0xff] }
 0x16f   : > { %v5587_v52 = vcombine.high %v1500_v46, %v1504_v47  ;;  %v5586_v58 = vcombine.low %v1500_v46, %v1504_v47  ;;  %v5588_v59 = vcombine.low %v1501_v48, %v1505_v49  ;;  %v1560_v46 = vld [vmem:[%s7152_s9 + $0x8e0] sm:$0xff]  ;;  %v1557_v47 = vld [vmem:[%s7152_s9 + $0x8c8] sm:$0xff] }
 0x171   : > { %4482 = vmatpush1.bf16.msra.mxu0 %v5522_v53  ;;  %4654 = vmatpush1.bf16.msra.mxu1 %v5524_v54  ;;  %v5589_v53 = vcombine.high %v1501_v48, %v1505_v49  ;;  %v1508_v54 = vld [vmem:[%s7152_s9 + $0x740] sm:$0xff]  ;;  %v1561_v48 = vld [vmem:[%s7152_s9 + $0x8e8] sm:$0xff] }
 0x172   : > { %4483 = vmatprep.subr.bf16.mxu0 %v5531_v55  ;;  %4655 = vmatprep.subr.bf16.mxu1 %v5533_v56  ;;  %v1512_v55 = vld [vmem:[%s7152_s9 + $0x760] sm:$0xff]  ;;  %v1509_v56 = vld [vmem:[%s7152_s9 + $0x748] sm:$0xff] }
 0x173   : > { %v5595_v60 = vcombine.high %v1508_v54, %v1512_v55  ;;  %v5594_v4 = vcombine.low %v1508_v54, %v1512_v55  ;;  %v5596_v5 = vcombine.low %v1509_v56, %v1513_v57  ;;  %v1568_v54 = vld [vmem:[%s7152_s9 + $0x920] sm:$0xff]  ;;  %v1565_v55 = vld [vmem:[%s7152_s9 + $0x908] sm:$0xff] }
 0x175   : > { %4484 = vmatpush1.bf16.msra.mxu0 %v5530_v61  ;;  %4656 = vmatpush1.bf16.msra.mxu1 %v5532_v62  ;;  %v5597_v61 = vcombine.high %v1509_v56, %v1513_v57  ;;  %v1516_v62 = vld [vmem:[%s7152_s9 + $0x780] sm:$0xff]  ;;  %v1569_v56 = vld [vmem:[%s7152_s9 + $0x928] sm:$0xff] }
 0x176   : > { %4485 = vmatprep.subr.bf16.mxu0 %v5539_v63  ;;  %4657 = vmatprep.subr.bf16.mxu1 %v5541_v0  ;;  %v1520_v63 = vld [vmem:[%s7152_s9 + $0x7a0] sm:$0xff]  ;;  %v1517_v0 = vld [vmem:[%s7152_s9 + $0x788] sm:$0xff] }
 0x177   : > { %v5603_v6 = vcombine.high %v1516_v62, %v1520_v63  ;;  %v5602_v12 = vcombine.low %v1516_v62, %v1520_v63  ;;  %v5604_v13 = vcombine.low %v1517_v0, %v1521_v1  ;;  %v1576_v62 = vld [vmem:[%s7152_s9 + $0x960] sm:$0xff]  ;;  %v1573_v63 = vld [vmem:[%s7152_s9 + $0x948] sm:$0xff] }
 0x179   : > { %4486 = vmatpush1.bf16.msra.mxu0 %v5538_v7  ;;  %4658 = vmatpush1.bf16.msra.mxu1 %v5540_v8  ;;  %v5605_v7 = vcombine.high %v1517_v0, %v1521_v1  ;;  %v1524_v8 = vld [vmem:[%s7152_s9 + $0x7c0] sm:$0xff]  ;;  %v1577_v0 = vld [vmem:[%s7152_s9 + $0x968] sm:$0xff] }
 0x17a   : > { %4487 = vmatprep.subr.bf16.mxu0 %v5547_v9  ;;  %4659 = vmatprep.subr.bf16.mxu1 %v5549_v10  ;;  %v1528_v9 = vld [vmem:[%s7152_s9 + $0x7e0] sm:$0xff]  ;;  %v1525_v10 = vld [vmem:[%s7152_s9 + $0x7c8] sm:$0xff] }
 0x17b   : > { %v5611_v14 = vcombine.high %v1524_v8, %v1528_v9  ;;  %v5610_v22 = vcombine.low %v1524_v8, %v1528_v9  ;;  %v5612_v23 = vcombine.low %v1525_v10, %v1529_v11  ;;  %v1584_v8 = vld [vmem:[%s7152_s9 + $0x9a0] sm:$0xff]  ;;  %v1581_v9 = vld [vmem:[%s7152_s9 + $0x988] sm:$0xff] }
 0x17d   : > { %4488 = vmatpush1.bf16.msra.mxu0 %v5546_v15  ;;  %4660 = vmatpush1.bf16.msra.mxu1 %v5548_v16  ;;  %v5613_v15 = vcombine.high %v1525_v10, %v1529_v11  ;;  %v1532_v16 = vld [vmem:[%s7152_s9 + $0x800] sm:$0xff]  ;;  %v1585_v10 = vld [vmem:[%s7152_s9 + $0x9a8] sm:$0xff] }
 0x17e   : > { %4489 = vmatprep.subr.bf16.mxu0 %v5555_v17  ;;  %4661 = vmatprep.subr.bf16.mxu1 %v5557_v20  ;;  %v1536_v17 = vld [vmem:[%s7152_s9 + $0x820] sm:$0xff]  ;;  %v1533_v20 = vld [vmem:[%s7152_s9 + $0x808] sm:$0xff] }
 0x17f   : > { %v5619_v24 = vcombine.high %v1532_v16, %v1536_v17 }
 0x181   : > { %4490 = vmatpush1.bf16.msra.mxu0 %v5554_v25  ;;  %4662 = vmatpush1.bf16.msra.mxu1 %v5556_v27  ;;  %v5621_v25 = vcombine.high %v1533_v20, %v1537_v21  ;;  %v1540_v27 = vld [vmem:[%s7152_s9 + $0x840] sm:$0xff] }
 0x182   : > { %4491 = vmatprep.subr.bf16.mxu0 %v5563_v28  ;;  %4663 = vmatprep.subr.bf16.mxu1 %v5565_v29  ;;  %v1544_v28 = vld [vmem:[%s7152_s9 + $0x860] sm:$0xff]  ;;  %v1541_v29 = vld [vmem:[%s7152_s9 + $0x848] sm:$0xff] }
 0x183   : > { %v5627_v18 = vcombine.high %v1540_v27, %v1544_v28  ;;  %v5629_v19 = vcombine.high %v1541_v29, %v1545_v31  ;;  %v5626_v41 = vcombine.low %v1540_v27, %v1544_v28  ;;  %v1600_v27 = vld [vmem:[%s7152_s9 + $0xa20] sm:$0xff]  ;;  %v1597_v28 = vld [vmem:[%s7152_s9 + $0xa08] sm:$0xff] }
 0x185   : > { %4492 = vmatpush1.bf16.msra.mxu0 %v5562_v34  ;;  %4664 = vmatpush1.bf16.msra.mxu1 %v5564_v35  ;;  %v5618_v34 = vcombine.low %v1532_v16, %v1536_v17  ;;  %v5620_v35 = vcombine.low %v1533_v20, %v1537_v21  ;;  %v1592_v16 = vld [vmem:[%s7152_s9 + $0x9e0] sm:$0xff]  ;;  %v1589_v17 = vld [vmem:[%s7152_s9 + $0x9c8] sm:$0xff] }
 0x186   : > { %4493 = vmatprep.subr.bf16.mxu0 %v5571_v36  ;;  %4665 = vmatprep.subr.bf16.mxu1 %v5573_v37  ;;  %v1548_v36 = vld [vmem:[%s7152_s9 + $0x880] sm:$0xff]  ;;  %v1593_v20 = vld [vmem:[%s7152_s9 + $0x9e8] sm:$0xff] }
 0x187   : > { %v1552_v37 = vld [vmem:[%s7152_s9 + $0x8a0] sm:$0xff] }
 0x188   : > { %v5634_v49 = vcombine.low %v1548_v36, %v1552_v37 }
 0x189   : > { %4494 = vmatpush1.bf16.msra.mxu0 %v5570_v42  ;;  %4666 = vmatpush1.bf16.msra.mxu1 %v5572_v43  ;;  %v5628_v42 = vcombine.low %v1541_v29, %v1545_v31  ;;  %v5635_v43 = vcombine.high %v1548_v36, %v1552_v37  ;;  %v1601_v29 = vld [vmem:[%s7152_s9 + $0xa28] sm:$0xff]  ;;  %v1608_v36 = vld [vmem:[%s7152_s9 + $0xa60] sm:$0xff] }
 0x18a   : > { %4495 = vmatprep.subr.bf16.mxu0 %v5579_v44  ;;  %4667 = vmatprep.subr.bf16.mxu1 %v5581_v45  ;;  %v5637_v44 = vcombine.high %v1549_v39, %v1553_v40  ;;  %v1556_v45 = vld [vmem:[%s7152_s9 + $0x8c0] sm:$0xff]  ;;  %v1605_v37 = vld [vmem:[%s7152_s9 + $0xa48] sm:$0xff] }
 0x18b   : > { %v5642_v57 = vcombine.low %v1556_v45, %v1560_v46 }
 0x18d   : > { %4496 = vmatpush1.bf16.msra.mxu0 %v5578_v50  ;;  %4668 = vmatpush1.bf16.msra.mxu1 %v5580_v51  ;;  %v5636_v50 = vcombine.low %v1549_v39, %v1553_v40  ;;  %v5643_v51 = vcombine.high %v1556_v45, %v1560_v46  ;;  %v1609_v39 = vld [vmem:[%s7152_s9 + $0xa68] sm:$0xff]  ;;  %v1616_v45 = vld [vmem:[%s7152_s9 + $0xaa0] sm:$0xff] }
 0x18e   : > { %4497 = vmatprep.subr.bf16.mxu0 %v5587_v52  ;;  %4669 = vmatprep.subr.bf16.mxu1 %v5589_v53  ;;  %v5645_v52 = vcombine.high %v1557_v47, %v1561_v48  ;;  %v1564_v53 = vld [vmem:[%s7152_s9 + $0x900] sm:$0xff]  ;;  %v1613_v46 = vld [vmem:[%s7152_s9 + $0xa88] sm:$0xff] }
 0x18f   : > { %v5650_v1 = vcombine.low %v1564_v53, %v1568_v54 }
 0x191   : > { %4498 = vmatpush1.bf16.msra.mxu0 %v5586_v58  ;;  %4670 = vmatpush1.bf16.msra.mxu1 %v5588_v59  ;;  %v5644_v58 = vcombine.low %v1557_v47, %v1561_v48  ;;  %v5651_v59 = vcombine.high %v1564_v53, %v1568_v54  ;;  %v1617_v47 = vld [vmem:[%s7152_s9 + $0xaa8] sm:$0xff]  ;;  %v1624_v53 = vld [vmem:[%s7152_s9 + $0xae0] sm:$0xff] }
 0x192   : > { %4499 = vmatprep.subr.bf16.mxu0 %v5595_v60  ;;  %4671 = vmatprep.subr.bf16.mxu1 %v5597_v61  ;;  %v5653_v60 = vcombine.high %v1565_v55, %v1569_v56  ;;  %v1572_v61 = vld [vmem:[%s7152_s9 + $0x940] sm:$0xff]  ;;  %v1621_v54 = vld [vmem:[%s7152_s9 + $0xac8] sm:$0xff] }
 0x193   : > { %v5658_v11 = vcombine.low %v1572_v61, %v1576_v62 }
 0x195   : > { %4500 = vmatpush1.bf16.msra.mxu0 %v5594_v4  ;;  %4672 = vmatpush1.bf16.msra.mxu1 %v5596_v5  ;;  %v5652_v4 = vcombine.low %v1565_v55, %v1569_v56  ;;  %v5659_v5 = vcombine.high %v1572_v61, %v1576_v62  ;;  %v1625_v55 = vld [vmem:[%s7152_s9 + $0xae8] sm:$0xff]  ;;  %v1632_v61 = vld [vmem:[%s7152_s9 + $0xb20] sm:$0xff] }
 0x196   : > { %4501 = vmatprep.subr.bf16.mxu0 %v5603_v6  ;;  %4673 = vmatprep.subr.bf16.mxu1 %v5605_v7  ;;  %v5661_v6 = vcombine.high %v1573_v63, %v1577_v0  ;;  %v1580_v7 = vld [vmem:[%s7152_s9 + $0x980] sm:$0xff]  ;;  %v1629_v62 = vld [vmem:[%s7152_s9 + $0xb08] sm:$0xff] }
 0x197   : > { %v5666_v21 = vcombine.low %v1580_v7, %v1584_v8 }
 0x199   : > { %4502 = vmatpush1.bf16.msra.mxu0 %v5602_v12  ;;  %4674 = vmatpush1.bf16.msra.mxu1 %v5604_v13  ;;  %v5660_v12 = vcombine.low %v1573_v63, %v1577_v0  ;;  %v5667_v13 = vcombine.high %v1580_v7, %v1584_v8  ;;  %v1633_v63 = vld [vmem:[%s7152_s9 + $0xb28] sm:$0xff]  ;;  %v1640_v7 = vld [vmem:[%s7152_s9 + $0xb60] sm:$0xff] }
 0x19a   : > { %4503 = vmatprep.subr.bf16.mxu0 %v5611_v14  ;;  %4675 = vmatprep.subr.bf16.mxu1 %v5613_v15  ;;  %v5669_v14 = vcombine.high %v1581_v9, %v1585_v10  ;;  %v1588_v15 = vld [vmem:[%s7152_s9 + $0x9c0] sm:$0xff]  ;;  %v1637_v8 = vld [vmem:[%s7152_s9 + $0xb48] sm:$0xff] }
 0x19b   : > { %v5674_v31 = vcombine.low %v1588_v15, %v1592_v16 }
 0x19d   : > { %4504 = vmatpush1.bf16.msra.mxu0 %v5610_v22  ;;  %4676 = vmatpush1.bf16.msra.mxu1 %v5612_v23  ;;  %v5668_v22 = vcombine.low %v1581_v9, %v1585_v10  ;;  %v5675_v23 = vcombine.high %v1588_v15, %v1592_v16  ;;  %v1641_v9 = vld [vmem:[%s7152_s9 + $0xb68] sm:$0xff]  ;;  %v1648_v15 = vld [vmem:[%s7152_s9 + $0xba0] sm:$0xff] }
 0x19e   : > { %4516 = vmatprep.subr.bf16.mxu0 %v5619_v24  ;;  %4688 = vmatprep.subr.bf16.mxu1 %v5621_v25  ;;  %v5677_v24 = vcombine.high %v1589_v17, %v1593_v20  ;;  %v1596_v25 = vld [vmem:[%s7152_s9 + $0xa00] sm:$0xff]  ;;  %v1645_v16 = vld [vmem:[%s7152_s9 + $0xb88] sm:$0xff] }
 0x19f   : > { %v5682_v40 = vcombine.low %v1596_v25, %v1600_v27 }
 0x1a0   : > { %4506 = vmatmul.mubr.bf16.vlgmr.msra.gmra.mrb[0].mxu0 %v7311_v30  ;;  %4678 = vmatmul.mubr.bf16.vlgmr.msra.gmra.mrb[0].mxu1 %v7311_v30 }
 0x1a1   : > { %4517 = vmatpush1.bf16.msra.mxu0 %v5618_v34  ;;  %4689 = vmatpush1.bf16.msra.mxu1 %v5620_v35  ;;  %v5676_v34 = vcombine.low %v1589_v17, %v1593_v20  ;;  %v5683_v35 = vcombine.high %v1596_v25, %v1600_v27  ;;  %v1649_v17 = vld [vmem:[%s7152_s9 + $0xba8] sm:$0xff]  ;;  %v1656_v25 = vld [vmem:[%s7152_s9 + $0xbe0] sm:$0xff] }
 0x1a2   : > { %4518 = vmatprep.subr.bf16.mxu0 %v5627_v18  ;;  %4690 = vmatprep.subr.bf16.mxu1 %v5629_v19  ;;  %v5685_v18 = vcombine.high %v1597_v28, %v1601_v29  ;;  %v1604_v19 = vld [vmem:[%s7152_s9 + $0xa40] sm:$0xff]  ;;  %v1653_v27 = vld [vmem:[%s7152_s9 + $0xbc8] sm:$0xff] }
 0x1a3   : > { %4548 = vmatprep.mubr.bf16.mxu0 %v7328_v38  ;;  %4720 = vmatprep.mubr.bf16.mxu1 %v7328_v38  ;;  %v5690_v48 = vcombine.low %v1604_v19, %v1608_v36 }
 0x1a5   : > { %4519 = vmatpush1.bf16.msra.mxu0 %v5626_v41  ;;  %4691 = vmatpush1.bf16.msra.mxu1 %v5628_v42  ;;  %v5684_v41 = vcombine.low %v1597_v28, %v1601_v29  ;;  %v5691_v42 = vcombine.high %v1604_v19, %v1608_v36  ;;  %v1657_v28 = vld [vmem:[%s7152_s9 + $0xbe8] sm:$0xff]  ;;  %v1664_v19 = vld [vmem:[%s7152_s9 + $0xc20] sm:$0xff] }
 0x1a6   : > { %4520 = vmatprep.subr.bf16.mxu0 %v5635_v43  ;;  %4692 = vmatprep.subr.bf16.mxu1 %v5637_v44  ;;  %v5693_v43 = vcombine.high %v1605_v37, %v1609_v39  ;;  %v1612_v44 = vld [vmem:[%s7152_s9 + $0xa80] sm:$0xff]  ;;  %v1661_v36 = vld [vmem:[%s7152_s9 + $0xc08] sm:$0xff] }
 0x1a7   : > { %v5698_v56 = vcombine.low %v1612_v44, %v1616_v45 }
 0x1a9   : > { %4521 = vmatpush1.bf16.msra.mxu0 %v5634_v49  ;;  %4693 = vmatpush1.bf16.msra.mxu1 %v5636_v50  ;;  %v5692_v49 = vcombine.low %v1605_v37, %v1609_v39  ;;  %v5699_v50 = vcombine.high %v1612_v44, %v1616_v45  ;;  %v1665_v37 = vld [vmem:[%s7152_s9 + $0xc28] sm:$0xff]  ;;  %v1672_v44 = vld [vmem:[%s7152_s9 + $0xc60] sm:$0xff] }
 0x1aa   : > { %4522 = vmatprep.subr.bf16.mxu0 %v5643_v51  ;;  %4694 = vmatprep.subr.bf16.mxu1 %v5645_v52  ;;  %v5701_v51 = vcombine.high %v1613_v46, %v1617_v47  ;;  %v1620_v52 = vld [vmem:[%s7152_s9 + $0xac0] sm:$0xff]  ;;  %v1669_v45 = vld [vmem:[%s7152_s9 + $0xc48] sm:$0xff] }
 0x1ab   : > { %v5706_v0 = vcombine.low %v1620_v52, %v1624_v53 }
 0x1ad   : > { %4523 = vmatpush1.bf16.msra.mxu0 %v5642_v57  ;;  %4695 = vmatpush1.bf16.msra.mxu1 %v5644_v58  ;;  %v5700_v57 = vcombine.low %v1613_v46, %v1617_v47  ;;  %v5707_v58 = vcombine.high %v1620_v52, %v1624_v53  ;;  %v7397_v46 = vcombine.low %v7317_v32, %v7322_v33  ;;  %v1673_v47 = vld [vmem:[%s7152_s9 + $0xc68] sm:$0xff]  ;;  %v1676_v52 = vld [vmem:[%s7152_s9 + $0xc80] sm:$0xff] }
 0x1ae   : > { %4524 = vmatprep.subr.bf16.mxu0 %v5651_v59  ;;  %4696 = vmatprep.subr.bf16.mxu1 %v5653_v60  ;;  %v5709_v59 = vcombine.high %v1621_v54, %v1625_v55  ;;  %v1628_v60 = vld [vmem:[%s7152_s9 + $0xb00] sm:$0xff]  ;;  %v5757_v33 = vcombine.high %v1669_v45, %v1673_v47 }
 0x1af   : > { %v5714_v10 = vcombine.low %v1628_v60, %v1632_v61  ;;  %v1680_v53 = vld [vmem:[%s7152_s9 + $0xca0] sm:$0xff] }
 0x1b1   : > { %4525 = vmatpush1.bf16.msra.mxu0 %v5650_v1  ;;  %4697 = vmatpush1.bf16.msra.mxu1 %v5652_v4  ;;  %v5708_v1 = vcombine.low %v1621_v54, %v1625_v55  ;;  %v5715_v4 = vcombine.high %v1628_v60, %v1632_v61  ;;  %v1677_v55 = vld [vmem:[%s7152_s9 + $0xc88] sm:$0xff]  ;;  %v1684_v61 = vld [vmem:[%s7152_s9 + $0xcc0] sm:$0xff] }
 0x1b2   : > { %4526 = vmatprep.subr.bf16.mxu0 %v5659_v5  ;;  %4698 = vmatprep.subr.bf16.mxu1 %v5661_v6  ;;  %v5717_v5 = vcombine.high %v1629_v62, %v1633_v63  ;;  %v1636_v6 = vld [vmem:[%s7152_s9 + $0xb40] sm:$0xff] }
 0x1b3   : > { %v5722_v20 = vcombine.low %v1636_v6, %v1640_v7 }
 0x1b5   : > { %4527 = vmatpush1.bf16.msra.mxu0 %v5658_v11  ;;  %4699 = vmatpush1.bf16.msra.mxu1 %v5660_v12  ;;  %v5716_v11 = vcombine.low %v1629_v62, %v1633_v63  ;;  %v5723_v12 = vcombine.high %v1636_v6, %v1640_v7  ;;  %v1688_v62 = vld [vmem:[%s7152_s9 + $0xce0] sm:$0xff]  ;;  %v1685_v63 = vld [vmem:[%s7152_s9 + $0xcc8] sm:$0xff] }
 0x1b6   : > { %4528 = vmatprep.subr.bf16.mxu0 %v5667_v13  ;;  %4700 = vmatprep.subr.bf16.mxu1 %v5669_v14  ;;  %v5725_v13 = vcombine.high %v1637_v8, %v1641_v9  ;;  %v1644_v14 = vld [vmem:[%s7152_s9 + $0xb80] sm:$0xff] }
 0x1b7   : > { %v5730_v29 = vcombine.low %v1644_v14, %v1648_v15  ;;  %v1692_v7 = vld [vmem:[%s7152_s9 + $0xd00] sm:$0xff] }
 0x1b9   : > { %4529 = vmatpush1.bf16.msra.mxu0 %v5666_v21  ;;  %4701 = vmatpush1.bf16.msra.mxu1 %v5668_v22  ;;  %v5724_v21 = vcombine.low %v1637_v8, %v1641_v9  ;;  %v5731_v22 = vcombine.high %v1644_v14, %v1648_v15  ;;  %v1696_v8 = vld [vmem:[%s7152_s9 + $0xd20] sm:$0xff]  ;;  %v1693_v9 = vld [vmem:[%s7152_s9 + $0xd08] sm:$0xff] }
 0x1ba   : > { %4530 = vmatprep.subr.bf16.mxu0 %v5675_v23  ;;  %4702 = vmatprep.subr.bf16.mxu1 %v5677_v24  ;;  %v5733_v23 = vcombine.high %v1645_v16, %v1649_v17  ;;  %v1652_v24 = vld [vmem:[%s7152_s9 + $0xbc0] sm:$0xff] }
 0x1bb   : > { %v5738_v39 = vcombine.low %v1652_v24, %v1656_v25  ;;  %v1700_v15 = vld [vmem:[%s7152_s9 + $0xd40] sm:$0xff] }
 0x1bd   : > { %4531 = vmatpush1.bf16.msra.mxu0 %v5674_v31  ;;  %4703 = vmatpush1.bf16.msra.mxu1 %v5676_v34  ;;  %v5732_v31 = vcombine.low %v1645_v16, %v1649_v17  ;;  %v5739_v34 = vcombine.high %v1652_v24, %v1656_v25  ;;  %v1704_v16 = vld [vmem:[%s7152_s9 + $0xd60] sm:$0xff]  ;;  %v1701_v17 = vld [vmem:[%s7152_s9 + $0xd48] sm:$0xff] }
 0x1be   : > { %4532 = vmatprep.subr.bf16.mxu0 %v5683_v35  ;;  %4704 = vmatprep.subr.bf16.mxu1 %v5685_v18  ;;  %v5741_v35 = vcombine.high %v1653_v27, %v1657_v28  ;;  %v1660_v18 = vld [vmem:[%s7152_s9 + $0xc00] sm:$0xff] }
 0x1bf   : > { %v1708_v25 = vld [vmem:[%s7152_s9 + $0xd80] sm:$0xff] }
 0x1c1   : > { %4533 = vmatpush1.bf16.msra.mxu0 %v5682_v40  ;;  %4705 = vmatpush1.bf16.msra.mxu1 %v5684_v41  ;;  %v5740_v40 = vcombine.low %v1653_v27, %v1657_v28  ;;  %v5747_v41 = vcombine.high %v1660_v18, %v1664_v19  ;;  %v1712_v27 = vld [vmem:[%s7152_s9 + $0xda0] sm:$0xff]  ;;  %v1709_v28 = vld [vmem:[%s7152_s9 + $0xd88] sm:$0xff] }
 0x1c2   : > { %4534 = vmatprep.subr.bf16.mxu0 %v5691_v42  ;;  %4706 = vmatprep.subr.bf16.mxu1 %v5693_v43  ;;  %v5749_v42 = vcombine.high %v1661_v36, %v1665_v37  ;;  %v1668_v43 = vld [vmem:[%s7152_s9 + $0xc40] sm:$0xff] }
 0x1c3   : > { %v5755_v32 = vcombine.high %v1668_v43, %v1672_v44 }
 0x1c5   : > { %4535 = vmatpush1.bf16.msra.mxu0 %v5690_v48  ;;  %4707 = vmatpush1.bf16.msra.mxu1 %v5692_v49  ;;  %v7403_v48 = vld [vmem:[%s7842_s0 + $0x18] sm:$0xff] }
 0x1c6   : > { %4536 = vmatprep.subr.bf16.mxu0 %v5699_v50  ;;  %4708 = vmatprep.subr.bf16.mxu1 %v5701_v51  ;;  %v7408_v49 = vld [vmem:[%s7842_s0 + $0x38] sm:$0xff]  ;;  %v5746_v50 = vcombine.low %v1660_v18, %v1664_v19  ;;  %v5748_v51 = vcombine.low %v1661_v36, %v1665_v37  ;;  %v1716_v19 = vld [vmem:[%s7152_s9 + $0xdc0] sm:$0xff]  ;;  %v1717_v37 = vld [vmem:[%s7152_s9 + $0xdc8] sm:$0xff] }
 0x1c7   : > { %v7414_v54 = vcombine.high %v7403_v48, %v7408_v49  ;;  %v1720_v36 = vld [vmem:[%s7152_s9 + $0xde0] sm:$0xff] }
 0x1c9   : > { %4537 = vmatpush1.bf16.msra.mxu0 %v5698_v56  ;;  %4709 = vmatpush1.bf16.msra.mxu1 %v5700_v57  ;;  %v1681_v56 = vld [vmem:[%s7152_s9 + $0xca8] sm:$0xff]  ;;  %v5754_v57 = vcombine.low %v1668_v43, %v1672_v44  ;;  %v1724_v44 = vld [vmem:[%s7152_s9 + $0xe00] sm:$0xff] }
 0x1ca   : > { %4538 = vmatprep.subr.bf16.mxu0 %v5707_v58  ;;  %4710 = vmatprep.subr.bf16.mxu1 %v5709_v59  ;;  %v5756_v58 = vcombine.low %v1669_v45, %v1673_v47  ;;  %v5763_v59 = vcombine.high %v1676_v52, %v1680_v53  ;;  %v5765_v60 = vcombine.high %v1677_v55, %v1681_v56  ;;  %v1728_v45 = vld [vmem:[%s7152_s9 + $0xe20] sm:$0xff]  ;;  %v1725_v47 = vld [vmem:[%s7152_s9 + $0xe08] sm:$0xff] }
 0x1cd   : > { %4539 = vmatpush1.bf16.msra.mxu0 %v5706_v0  ;;  %4711 = vmatpush1.bf16.msra.mxu1 %v5708_v1  ;;  %v1689_v0 = vld [vmem:[%s7152_s9 + $0xce8] sm:$0xff]  ;;  %v5762_v1 = vcombine.low %v1676_v52, %v1680_v53  ;;  %v1732_v53 = vld [vmem:[%s7152_s9 + $0xe40] sm:$0xff] }
 0x1ce   : > { %4540 = vmatprep.subr.bf16.mxu0 %v5715_v4  ;;  %4712 = vmatprep.subr.bf16.mxu1 %v5717_v5  ;;  %v5764_v4 = vcombine.low %v1677_v55, %v1681_v56  ;;  %v5771_v5 = vcombine.high %v1684_v61, %v1688_v62  ;;  %v5773_v6 = vcombine.high %v1685_v63, %v1689_v0  ;;  %v1736_v55 = vld [vmem:[%s7152_s9 + $0xe60] sm:$0xff]  ;;  %v1733_v56 = vld [vmem:[%s7152_s9 + $0xe48] sm:$0xff] }
 0x1d1   : > { %4541 = vmatpush1.bf16.msra.mxu0 %v5714_v10  ;;  %4713 = vmatpush1.bf16.msra.mxu1 %v5716_v11  ;;  %v1697_v10 = vld [vmem:[%s7152_s9 + $0xd28] sm:$0xff]  ;;  %v5770_v11 = vcombine.low %v1684_v61, %v1688_v62  ;;  %v1740_v62 = vld [vmem:[%s7152_s9 + $0xe80] sm:$0xff] }
 0x1d2   : > { %4542 = vmatprep.subr.bf16.mxu0 %v5723_v12  ;;  %4714 = vmatprep.subr.bf16.mxu1 %v5725_v13  ;;  %v5772_v12 = vcombine.low %v1685_v63, %v1689_v0  ;;  %v5779_v13 = vcombine.high %v1692_v7, %v1696_v8  ;;  %v5781_v14 = vcombine.high %v1693_v9, %v1697_v10  ;;  %v1744_v63 = vld [vmem:[%s7152_s9 + $0xea0] sm:$0xff]  ;;  %v1741_v0 = vld [vmem:[%s7152_s9 + $0xe88] sm:$0xff] }
 0x1d5   : > { %4543 = vmatpush1.bf16.msra.mxu0 %v5722_v20  ;;  %4715 = vmatpush1.bf16.msra.mxu1 %v5724_v21  ;;  %v1705_v20 = vld [vmem:[%s7152_s9 + $0xd68] sm:$0xff]  ;;  %v5778_v21 = vcombine.low %v1692_v7, %v1696_v8  ;;  %v1748_v8 = vld [vmem:[%s7152_s9 + $0xec0] sm:$0xff] }
 0x1d6   : > { %4544 = vmatprep.subr.bf16.mxu0 %v5731_v22  ;;  %4716 = vmatprep.subr.bf16.mxu1 %v5733_v23  ;;  %v5780_v22 = vcombine.low %v1693_v9, %v1697_v10  ;;  %v5787_v23 = vcombine.high %v1700_v15, %v1704_v16  ;;  %v5789_v24 = vcombine.high %v1701_v17, %v1705_v20  ;;  %v1752_v9 = vld [vmem:[%s7152_s9 + $0xee0] sm:$0xff]  ;;  %v1749_v10 = vld [vmem:[%s7152_s9 + $0xec8] sm:$0xff] }
 0x1d9   : > { %4545 = vmatpush1.bf16.msra.mxu0 %v5730_v29  ;;  %4717 = vmatpush1.bf16.msra.mxu1 %v5732_v31  ;;  %v1713_v29 = vld [vmem:[%s7152_s9 + $0xda8] sm:$0xff]  ;;  %v5786_v31 = vcombine.low %v1700_v15, %v1704_v16  ;;  %v1756_v16 = vld [vmem:[%s7152_s9 + $0xf00] sm:$0xff] }
 0x1da   : > { %4546 = vmatprep.subr.bf16.mxu0 %v5739_v34  ;;  %4718 = vmatprep.subr.bf16.mxu1 %v5741_v35  ;;  %v5788_v34 = vcombine.low %v1701_v17, %v1705_v20  ;;  %v5795_v35 = vcombine.high %v1708_v25, %v1712_v27  ;;  %v5797_v18 = vcombine.high %v1709_v28, %v1713_v29  ;;  %v1760_v17 = vld [vmem:[%s7152_s9 + $0xf20] sm:$0xff]  ;;  %v1757_v20 = vld [vmem:[%s7152_s9 + $0xf08] sm:$0xff] }
 0x1dd   : > { %4547 = vmatpush1.bf16.msra.mxu0 %v5738_v39  ;;  %4719 = vmatpush1.bf16.msra.mxu1 %v5740_v40  ;;  %v1721_v39 = vld [vmem:[%s7152_s9 + $0xde8] sm:$0xff]  ;;  %v5794_v40 = vcombine.low %v1708_v25, %v1712_v27  ;;  %v1764_v27 = vld [vmem:[%s7152_s9 + $0xf40] sm:$0xff] }
 0x1de   : > { %4559 = vmatprep.subr.bf16.mxu0 %v5747_v41  ;;  %4731 = vmatprep.subr.bf16.mxu1 %v5749_v42  ;;  %v5796_v41 = vcombine.low %v1709_v28, %v1713_v29  ;;  %v5803_v42 = vcombine.high %v1716_v19, %v1720_v36  ;;  %v5805_v43 = vcombine.high %v1717_v37, %v1721_v39  ;;  %v1768_v28 = vld [vmem:[%s7152_s9 + $0xf60] sm:$0xff]  ;;  %v1765_v29 = vld [vmem:[%s7152_s9 + $0xf48] sm:$0xff] }
 0x1e0   : > { %4549 = vmatmul.mubr.bf16.vlgmr.msra.gmra.mrb[0].mxu0 %v7397_v46  ;;  %4721 = vmatmul.mubr.bf16.vlgmr.msra.gmra.mrb[0].mxu1 %v7397_v46 }
 0x1e1   : > { %4560 = vmatpush1.bf16.msra.mxu0 %v5746_v50  ;;  %4732 = vmatpush1.bf16.msra.mxu1 %v5748_v51  ;;  %v1729_v50 = vld [vmem:[%s7152_s9 + $0xe28] sm:$0xff]  ;;  %v5802_v51 = vcombine.low %v1716_v19, %v1720_v36  ;;  %v1772_v36 = vld [vmem:[%s7152_s9 + $0xf80] sm:$0xff] }
 0x1e2   : > { %4561 = vmatprep.subr.bf16.mxu0 %v5755_v32  ;;  %4733 = vmatprep.subr.bf16.mxu1 %v5757_v33  ;;  %v5804_v32 = vcombine.low %v1717_v37, %v1721_v39  ;;  %v5811_v33 = vcombine.high %v1724_v44, %v1728_v45  ;;  %v5813_v52 = vcombine.high %v1725_v47, %v1729_v50  ;;  %v1776_v37 = vld [vmem:[%s7152_s9 + $0xfa0] sm:$0xff]  ;;  %v1773_v39 = vld [vmem:[%s7152_s9 + $0xf88] sm:$0xff] }
 0x1e3   : > { %4591 = vmatprep.mubr.bf16.mxu0 %v7414_v54  ;;  %4763 = vmatprep.mubr.bf16.mxu1 %v7414_v54 }
 0x1e5   : > { %4562 = vmatpush1.bf16.msra.mxu0 %v5754_v57  ;;  %4734 = vmatpush1.bf16.msra.mxu1 %v5756_v58  ;;  %v1737_v57 = vld [vmem:[%s7152_s9 + $0xe68] sm:$0xff]  ;;  %v5810_v58 = vcombine.low %v1724_v44, %v1728_v45  ;;  %v1780_v45 = vld [vmem:[%s7152_s9 + $0xfc0] sm:$0xff] }
 0x1e6   : > { %4563 = vmatprep.subr.bf16.mxu0 %v5763_v59  ;;  %4735 = vmatprep.subr.bf16.mxu1 %v5765_v60  ;;  %v5812_v59 = vcombine.low %v1725_v47, %v1729_v50  ;;  %v5819_v60 = vcombine.high %v1732_v53, %v1736_v55  ;;  %v5821_v61 = vcombine.high %v1733_v56, %v1737_v57  ;;  %v1784_v47 = vld [vmem:[%s7152_s9 + $0xfe0] sm:$0xff]  ;;  %v1781_v50 = vld [vmem:[%s7152_s9 + $0xfc8] sm:$0xff] }
 0x1e9   : > { %4564 = vmatpush1.bf16.msra.mxu0 %v5762_v1  ;;  %4736 = vmatpush1.bf16.msra.mxu1 %v5764_v4  ;;  %v1745_v1 = vld [vmem:[%s7152_s9 + $0xea8] sm:$0xff]  ;;  %v5818_v4 = vcombine.low %v1732_v53, %v1736_v55  ;;  %v1278_v55 = vld [vmem:[%s7152_s9 + $0x10] sm:$0xff] }
 0x1ea   : > { %4565 = vmatprep.subr.bf16.mxu0 %v5771_v5  ;;  %4737 = vmatprep.subr.bf16.mxu1 %v5773_v6  ;;  %v5820_v5 = vcombine.low %v1733_v56, %v1737_v57  ;;  %v5827_v6 = vcombine.high %v1740_v62, %v1744_v63  ;;  %v5829_v7 = vcombine.high %v1741_v0, %v1745_v1  ;;  %v1282_v56 = vld [vmem:[%s7152_s9 + $0x30] sm:$0xff]  ;;  %v1279_v57 = vld [vmem:[%s7152_s9 + $0x18] sm:$0xff] }
 0x1ed   : > { %4566 = vmatpush1.bf16.msra.mxu0 %v5770_v11  ;;  %4738 = vmatpush1.bf16.msra.mxu1 %v5772_v12  ;;  %v1753_v11 = vld [vmem:[%s7152_s9 + $0xee8] sm:$0xff]  ;;  %v5826_v12 = vcombine.low %v1740_v62, %v1744_v63  ;;  %v1286_v63 = vld [vmem:[%s7152_s9 + $0x50] sm:$0xff] }
 0x1ee   : > { %4567 = vmatprep.subr.bf16.mxu0 %v5779_v13  ;;  %4739 = vmatprep.subr.bf16.mxu1 %v5781_v14  ;;  %v5828_v13 = vcombine.low %v1741_v0, %v1745_v1  ;;  %v5835_v14 = vcombine.high %v1748_v8, %v1752_v9  ;;  %v5837_v15 = vcombine.high %v1749_v10, %v1753_v11  ;;  %v1290_v0 = vld [vmem:[%s7152_s9 + $0x70] sm:$0xff] }
 0x1ef   : > { %v7482_v1 = vcombine.low %v7403_v48, %v7408_v49  ;;  %v1295_v48 = vld [vmem:[%s7152_s9 + $0x98] sm:$0xff] }
 0x1f0   : > { %v1299_v49 = vld [vmem:[%s7152_s9 + $0xb8] sm:$0xff] }
 0x1f1   : > { %4568 = vmatpush1.bf16.msra.mxu0 %v5778_v21  ;;  %4740 = vmatpush1.bf16.msra.mxu1 %v5780_v22  ;;  %v1761_v21 = vld [vmem:[%s7152_s9 + $0xf28] sm:$0xff]  ;;  %v5834_v22 = vcombine.low %v1748_v8, %v1752_v9  ;;  %v5375_v8 = vcombine.high %v1286_v63, %v1290_v0 }
 0x1f2   : > { %4569 = vmatprep.subr.bf16.mxu0 %v5787_v23  ;;  %4741 = vmatprep.subr.bf16.mxu1 %v5789_v24  ;;  %v5836_v23 = vcombine.low %v1749_v10, %v1753_v11  ;;  %v5843_v24 = vcombine.high %v1756_v16, %v1760_v17  ;;  %v5845_v25 = vcombine.high %v1757_v20, %v1761_v21  ;;  %v1294_v10 = vld [vmem:[%s7152_s9 + $0x90] sm:$0xff] }
 0x1f3   : > { %v1298_v11 = vld [vmem:[%s7152_s9 + $0xb0] sm:$0xff] }
 0x1f5   : > { %4570 = vmatpush1.bf16.msra.mxu0 %v5786_v31  ;;  %4742 = vmatpush1.bf16.msra.mxu1 %v5788_v34  ;;  %v1769_v31 = vld [vmem:[%s7152_s9 + $0xf68] sm:$0xff]  ;;  %v5842_v34 = vcombine.low %v1756_v16, %v1760_v17  ;;  %v1302_v16 = vld [vmem:[%s7152_s9 + $0xd0] sm:$0xff] }
 0x1f6   : > { %4571 = vmatprep.subr.bf16.mxu0 %v5795_v35  ;;  %4743 = vmatprep.subr.bf16.mxu1 %v5797_v18  ;;  %v5844_v35 = vcombine.low %v1757_v20, %v1761_v21  ;;  %v5851_v18 = vcombine.high %v1764_v27, %v1768_v28  ;;  %v5853_v19 = vcombine.high %v1765_v29, %v1769_v31  ;;  %v1306_v17 = vld [vmem:[%s7152_s9 + $0xf0] sm:$0xff]  ;;  %v1303_v20 = vld [vmem:[%s7152_s9 + $0xd8] sm:$0xff] }
 0x1f7   : > { %v1307_v21 = vld [vmem:[%s7152_s9 + $0xf8] sm:$0xff] }
 0x1f9   : > { %4572 = vmatpush1.bf16.msra.mxu0 %v5794_v40  ;;  %4744 = vmatpush1.bf16.msra.mxu1 %v5796_v41  ;;  %v1777_v40 = vld [vmem:[%s7152_s9 + $0xfa8] sm:$0xff]  ;;  %v5850_v41 = vcombine.low %v1764_v27, %v1768_v28  ;;  %v1310_v27 = vld [vmem:[%s7152_s9 + $0x110] sm:$0xff] }
 0x1fa   : > { %4573 = vmatprep.subr.bf16.mxu0 %v5803_v42  ;;  %4745 = vmatprep.subr.bf16.mxu1 %v5805_v43  ;;  %v5852_v42 = vcombine.low %v1765_v29, %v1769_v31  ;;  %v5859_v43 = vcombine.high %v1772_v36, %v1776_v37  ;;  %v5861_v44 = vcombine.high %v1773_v39, %v1777_v40  ;;  %v1314_v28 = vld [vmem:[%s7152_s9 + $0x130] sm:$0xff]  ;;  %v1311_v29 = vld [vmem:[%s7152_s9 + $0x118] sm:$0xff] }
 0x1fb   : > { %v1315_v31 = vld [vmem:[%s7152_s9 + $0x138] sm:$0xff] }
 0x1fd   : > { %4574 = vmatpush1.bf16.msra.mxu0 %v5802_v51  ;;  %4746 = vmatpush1.bf16.msra.mxu1 %v5804_v32  ;;  %v1785_v51 = vld [vmem:[%s7152_s9 + $0xfe8] sm:$0xff]  ;;  %v5858_v32 = vcombine.low %v1772_v36, %v1776_v37  ;;  %v1322_v36 = vld [vmem:[%s7152_s9 + $0x170] sm:$0xff]  ;;  %v1319_v37 = vld [vmem:[%s7152_s9 + $0x158] sm:$0xff] }
 0x1fe   : > { %4575 = vmatprep.subr.bf16.mxu0 %v5811_v33  ;;  %4747 = vmatprep.subr.bf16.mxu1 %v5813_v52  ;;  %v5860_v33 = vcombine.low %v1773_v39, %v1777_v40  ;;  %v5867_v52 = vcombine.high %v1780_v45, %v1784_v47  ;;  %v5869_v53 = vcombine.high %v1781_v50, %v1785_v51  ;;  %v1323_v39 = vld [vmem:[%s7152_s9 + $0x178] sm:$0xff] }
 0x1ff   : > { %v5398_v40 = vcombine.low %v1310_v27, %v1314_v28 }
 0x201   : > { %4576 = vmatpush1.bf16.msra.mxu0 %v5810_v58  ;;  %4748 = vmatpush1.bf16.msra.mxu1 %v5812_v59  ;;  %v1283_v58 = vld [vmem:[%s7152_s9 + $0x38] sm:$0xff]  ;;  %v5866_v59 = vcombine.low %v1780_v45, %v1784_v47  ;;  %v1330_v45 = vld [vmem:[%s7152_s9 + $0x1b0] sm:$0xff] }
 0x202   : > { %4577 = vmatprep.subr.bf16.mxu0 %v5819_v60  ;;  %4749 = vmatprep.subr.bf16.mxu1 %v5821_v61  ;;  %v5868_v60 = vcombine.low %v1781_v50, %v1785_v51  ;;  %v5367_v61 = vcombine.high %v1278_v55, %v1282_v56  ;;  %v5369_v62 = vcombine.high %v1279_v57, %v1283_v58  ;;  %v1327_v47 = vld [vmem:[%s7152_s9 + $0x198] sm:$0xff] }
 0x203   : > { %v1331_v50 = vld [vmem:[%s7152_s9 + $0x1b8] sm:$0xff] }
 0x205   : > { %4578 = vmatpush1.bf16.msra.mxu0 %v5818_v4  ;;  %4750 = vmatpush1.bf16.msra.mxu1 %v5820_v5  ;;  %v1287_v4 = vld [vmem:[%s7152_s9 + $0x58] sm:$0xff] }
 0x206   : > { %4579 = vmatprep.subr.bf16.mxu0 %v5827_v6  ;;  %4751 = vmatprep.subr.bf16.mxu1 %v5829_v7  ;;  %v1291_v5 = vld [vmem:[%s7152_s9 + $0x78] sm:$0xff]  ;;  %v5366_v6 = vcombine.low %v1278_v55, %v1282_v56  ;;  %v5368_v7 = vcombine.low %v1279_v57, %v1283_v58  ;;  %v1338_v55 = vld [vmem:[%s7152_s9 + $0x1f0] sm:$0xff] }
 0x207   : > { %v5377_v9 = vcombine.high %v1287_v4, %v1291_v5  ;;  %v1335_v56 = vld [vmem:[%s7152_s9 + $0x1d8] sm:$0xff] }
 0x208   : > { %v1339_v57 = vld [vmem:[%s7152_s9 + $0x1f8] sm:$0xff] }
 0x209   : > { %4580 = vmatpush1.bf16.msra.mxu0 %v5826_v12  ;;  %4752 = vmatpush1.bf16.msra.mxu1 %v5828_v13  ;;  %v5374_v12 = vcombine.low %v1286_v63, %v1290_v0  ;;  %v5376_v13 = vcombine.low %v1287_v4, %v1291_v5  ;;  %v1346_v63 = vld [vmem:[%s7152_s9 + $0x230] sm:$0xff]  ;;  %v1343_v0 = vld [vmem:[%s7152_s9 + $0x218] sm:$0xff] }
 0x20a   : > { %4581 = vmatprep.subr.bf16.mxu0 %v5835_v14  ;;  %4753 = vmatprep.subr.bf16.mxu1 %v5837_v15  ;;  %v5383_v14 = vcombine.high %v1294_v10, %v1298_v11  ;;  %v5385_v15 = vcombine.high %v1295_v48, %v1299_v49  ;;  %v1347_v4 = vld [vmem:[%s7152_s9 + $0x238] sm:$0xff] }
 0x20d   : > { %4582 = vmatpush1.bf16.msra.mxu0 %v5834_v22  ;;  %4754 = vmatpush1.bf16.msra.mxu1 %v5836_v23  ;;  %v5382_v22 = vcombine.low %v1294_v10, %v1298_v11  ;;  %v5384_v23 = vcombine.low %v1295_v48, %v1299_v49  ;;  %v1354_v10 = vld [vmem:[%s7152_s9 + $0x270] sm:$0xff]  ;;  %v1351_v11 = vld [vmem:[%s7152_s9 + $0x258] sm:$0xff] }
 0x20e   : > { %4583 = vmatprep.subr.bf16.mxu0 %v5843_v24  ;;  %4755 = vmatprep.subr.bf16.mxu1 %v5845_v25  ;;  %v5391_v24 = vcombine.high %v1302_v16, %v1306_v17  ;;  %v5393_v25 = vcombine.high %v1303_v20, %v1307_v21  ;;  %v1355_v48 = vld [vmem:[%s7152_s9 + $0x278] sm:$0xff] }
 0x211   : > { %4584 = vmatpush1.bf16.msra.mxu0 %v5842_v34  ;;  %4756 = vmatpush1.bf16.msra.mxu1 %v5844_v35  ;;  %v5390_v34 = vcombine.low %v1302_v16, %v1306_v17  ;;  %v5399_v35 = vcombine.high %v1310_v27, %v1314_v28  ;;  %v1362_v16 = vld [vmem:[%s7152_s9 + $0x2b0] sm:$0xff]  ;;  %v1359_v17 = vld [vmem:[%s7152_s9 + $0x298] sm:$0xff] }
 0x212   : > { %4585 = vmatprep.subr.bf16.mxu0 %v5851_v18  ;;  %4757 = vmatprep.subr.bf16.mxu1 %v5853_v19  ;;  %v5401_v18 = vcombine.high %v1311_v29, %v1315_v31  ;;  %v1318_v19 = vld [vmem:[%s7152_s9 + $0x150] sm:$0xff]  ;;  %v1367_v28 = vld [vmem:[%s7152_s9 + $0x2d8] sm:$0xff] }
 0x213   : > { %v5406_v51 = vcombine.low %v1318_v19, %v1322_v36  ;;  %v1370_v27 = vld [vmem:[%s7152_s9 + $0x2f0] sm:$0xff] }
 0x215   : > { %4586 = vmatpush1.bf16.msra.mxu0 %v5850_v41  ;;  %4758 = vmatpush1.bf16.msra.mxu1 %v5852_v42  ;;  %v5400_v41 = vcombine.low %v1311_v29, %v1315_v31  ;;  %v5407_v42 = vcombine.high %v1318_v19, %v1322_v36  ;;  %v1371_v29 = vld [vmem:[%s7152_s9 + $0x2f8] sm:$0xff]  ;;  %v1378_v19 = vld [vmem:[%s7152_s9 + $0x330] sm:$0xff] }
 0x216   : > { %4587 = vmatprep.subr.bf16.mxu0 %v5859_v43  ;;  %4759 = vmatprep.subr.bf16.mxu1 %v5861_v44  ;;  %v5409_v43 = vcombine.high %v1319_v37, %v1323_v39  ;;  %v1326_v44 = vld [vmem:[%s7152_s9 + $0x190] sm:$0xff]  ;;  %v1375_v36 = vld [vmem:[%s7152_s9 + $0x318] sm:$0xff] }
 0x217   : > { %v5414_v58 = vcombine.low %v1326_v44, %v1330_v45 }
 0x219   : > { %4588 = vmatpush1.bf16.msra.mxu0 %v5858_v32  ;;  %4760 = vmatpush1.bf16.msra.mxu1 %v5860_v33  ;;  %v5408_v32 = vcombine.low %v1319_v37, %v1323_v39  ;;  %v5415_v33 = vcombine.high %v1326_v44, %v1330_v45  ;;  %v1379_v37 = vld [vmem:[%s7152_s9 + $0x338] sm:$0xff]  ;;  %v1386_v44 = vld [vmem:[%s7152_s9 + $0x370] sm:$0xff] }
 0x21a   : > { %4589 = vmatprep.subr.bf16.mxu0 %v5867_v52  ;;  %4761 = vmatprep.subr.bf16.mxu1 %v5869_v53  ;;  %v5417_v52 = vcombine.high %v1327_v47, %v1331_v50  ;;  %v1334_v53 = vld [vmem:[%s7152_s9 + $0x1d0] sm:$0xff]  ;;  %v1383_v45 = vld [vmem:[%s7152_s9 + $0x358] sm:$0xff] }
 0x21b   : > { %v5422_v5 = vcombine.low %v1334_v53, %v1338_v55 }
 0x21d   : > { %4590 = vmatpush1.bf16.msra.mxu0 %v5866_v59  ;;  %4762 = vmatpush1.bf16.msra.mxu1 %v5868_v60  ;;  %v5416_v59 = vcombine.low %v1327_v47, %v1331_v50  ;;  %v5423_v60 = vcombine.high %v1334_v53, %v1338_v55  ;;  %v1387_v47 = vld [vmem:[%s7152_s9 + $0x378] sm:$0xff]  ;;  %v1394_v53 = vld [vmem:[%s7152_s9 + $0x3b0] sm:$0xff] }
 0x21e   : > { %4774 = vmatprep.subr.bf16.mxu0 %v5367_v61  ;;  %4946 = vmatprep.subr.bf16.mxu1 %v5369_v62  ;;  %v5425_v61 = vcombine.high %v1335_v56, %v1339_v57  ;;  %v1342_v62 = vld [vmem:[%s7152_s9 + $0x210] sm:$0xff]  ;;  %v1391_v55 = vld [vmem:[%s7152_s9 + $0x398] sm:$0xff] }
 0x21f   : > { %v5430_v49 = vcombine.low %v1342_v62, %v1346_v63 }
 0x220   : > { %4592 = vmatmul.mubr.bf16.vlgmr.msra.gmra.mrb[0].mxu0 %v7482_v1  ;;  %4764 = vmatmul.mubr.bf16.vlgmr.msra.gmra.mrb[0].mxu1 %v7482_v1 }
 0x221   : > { %4775 = vmatpush1.bf16.msra.mxu0 %v5366_v6  ;;  %4947 = vmatpush1.bf16.msra.mxu1 %v5368_v7  ;;  %v5424_v6 = vcombine.low %v1335_v56, %v1339_v57  ;;  %v5431_v7 = vcombine.high %v1342_v62, %v1346_v63  ;;  %v1395_v56 = vld [vmem:[%s7152_s9 + $0x3b8] sm:$0xff]  ;;  %v1402_v62 = vld [vmem:[%s7152_s9 + $0x3f0] sm:$0xff] }
 0x222   : > { %4776 = vmatprep.subr.bf16.mxu0 %v5375_v8  ;;  %4948 = vmatprep.subr.bf16.mxu1 %v5377_v9  ;;  %v5433_v8 = vcombine.high %v1343_v0, %v1347_v4  ;;  %v1350_v9 = vld [vmem:[%s7152_s9 + $0x250] sm:$0xff]  ;;  %v1399_v63 = vld [vmem:[%s7152_s9 + $0x3d8] sm:$0xff] }
 0x223   : > { %4806 = vmatprep.mubr.bf16.mxu0 %v7148_v2  ;;  %4978 = vmatprep.mubr.bf16.mxu1 %v7148_v2  ;;  %v5392_v2 = vcombine.low %v1303_v20, %v1307_v21  ;;  %v1363_v20 = vld [vmem:[%s7152_s9 + $0x2b8] sm:$0xff]  ;;  %v5438_v21 = vcombine.low %v1350_v9, %v1354_v10 }
 0x225   : > { %4777 = vmatpush1.bf16.msra.mxu0 %v5374_v12  ;;  %4949 = vmatpush1.bf16.msra.mxu1 %v5376_v13  ;;  %v5432_v12 = vcombine.low %v1343_v0, %v1347_v4  ;;  %v5439_v13 = vcombine.high %v1350_v9, %v1354_v10  ;;  %v1403_v0 = vld [vmem:[%s7152_s9 + $0x3f8] sm:$0xff]  ;;  %v1410_v9 = vld [vmem:[%s7152_s9 + $0x430] sm:$0xff] }
 0x226   : > { %4778 = vmatprep.subr.bf16.mxu0 %v5383_v14  ;;  %4950 = vmatprep.subr.bf16.mxu1 %v5385_v15  ;;  %v5441_v14 = vcombine.high %v1351_v11, %v1355_v48  ;;  %v1358_v15 = vld [vmem:[%s7152_s9 + $0x290] sm:$0xff]  ;;  %v1407_v10 = vld [vmem:[%s7152_s9 + $0x418] sm:$0xff] }
 0x227   : > { %v5446_v31 = vcombine.low %v1358_v15, %v1362_v16 }
 0x229   : > { %4779 = vmatpush1.bf16.msra.mxu0 %v5382_v22  ;;  %4951 = vmatpush1.bf16.msra.mxu1 %v5384_v23  ;;  %v5440_v22 = vcombine.low %v1351_v11, %v1355_v48  ;;  %v5447_v23 = vcombine.high %v1358_v15, %v1362_v16  ;;  %v1411_v11 = vld [vmem:[%s7152_s9 + $0x438] sm:$0xff]  ;;  %v1418_v15 = vld [vmem:[%s7152_s9 + $0x470] sm:$0xff] }
 0x22a   : > { %4780 = vmatprep.subr.bf16.mxu0 %v5391_v24  ;;  %4952 = vmatprep.subr.bf16.mxu1 %v5393_v25  ;;  %v5449_v24 = vcombine.high %v1359_v17, %v1363_v20  ;;  %v1366_v25 = vld [vmem:[%s7152_s9 + $0x2d0] sm:$0xff]  ;;  %v1415_v16 = vld [vmem:[%s7152_s9 + $0x458] sm:$0xff] }
 0x22b   : > { %v5454_v39 = vcombine.low %v1366_v25, %v1370_v27 }
 0x22d   : > { %4781 = vmatpush1.bf16.msra.mxu0 %v5390_v34  ;;  %4953 = vmatpush1.bf16.msra.mxu1 %v5392_v2  ;;  %v5448_v34 = vcombine.low %v1359_v17, %v1363_v20  ;;  %v5455_v2 = vcombine.high %v1366_v25, %v1370_v27  ;;  %v1419_v17 = vld [vmem:[%s7152_s9 + $0x478] sm:$0xff]  ;;  %v1426_v25 = vld [vmem:[%s7152_s9 + $0x4b0] sm:$0xff] }
 0x22e   : > { %4782 = vmatprep.subr.bf16.mxu0 %v5399_v35  ;;  %4954 = vmatprep.subr.bf16.mxu1 %v5401_v18  ;;  %v5457_v35 = vcombine.high %v1367_v28, %v1371_v29  ;;  %v1374_v18 = vld [vmem:[%s7152_s9 + $0x310] sm:$0xff]  ;;  %v1423_v27 = vld [vmem:[%s7152_s9 + $0x498] sm:$0xff] }
 0x22f   : > { %v5462_v50 = vcombine.low %v1374_v18, %v1378_v19 }
 0x231   : > { %4783 = vmatpush1.bf16.msra.mxu0 %v5398_v40  ;;  %4955 = vmatpush1.bf16.msra.mxu1 %v5400_v41  ;;  %v5456_v40 = vcombine.low %v1367_v28, %v1371_v29  ;;  %v5463_v41 = vcombine.high %v1374_v18, %v1378_v19  ;;  %v1427_v28 = vld [vmem:[%s7152_s9 + $0x4b8] sm:$0xff]  ;;  %v1434_v18 = vld [vmem:[%s7152_s9 + $0x4f0] sm:$0xff] }
 0x232   : > { %4784 = vmatprep.subr.bf16.mxu0 %v5407_v42  ;;  %4956 = vmatprep.subr.bf16.mxu1 %v5409_v43  ;;  %v5465_v42 = vcombine.high %v1375_v36, %v1379_v37  ;;  %v1382_v43 = vld [vmem:[%s7152_s9 + $0x350] sm:$0xff]  ;;  %v1431_v19 = vld [vmem:[%s7152_s9 + $0x4d8] sm:$0xff] }
 0x233   : > { %v5470_v57 = vcombine.low %v1382_v43, %v1386_v44 }
 0x235   : > { %4785 = vmatpush1.bf16.msra.mxu0 %v5406_v51  ;;  %4957 = vmatpush1.bf16.msra.mxu1 %v5408_v32  ;;  %v5464_v51 = vcombine.low %v1375_v36, %v1379_v37  ;;  %v5471_v32 = vcombine.high %v1382_v43, %v1386_v44  ;;  %v1435_v36 = vld [vmem:[%s7152_s9 + $0x4f8] sm:$0xff]  ;;  %v5512_v37 = vcombine.low %v1423_v27, %v1427_v28 }
 0x236   : > { %4786 = vmatprep.subr.bf16.mxu0 %v5415_v33  ;;  %4958 = vmatprep.subr.bf16.mxu1 %v5417_v52  ;;  %v5473_v33 = vcombine.high %v1383_v45, %v1387_v47  ;;  %v1390_v52 = vld [vmem:[%s7152_s9 + $0x390] sm:$0xff]  ;;  %v1439_v43 = vld [vmem:[%s7152_s9 + $0x518] sm:$0xff] }
 0x237   : > { %v5478_v4 = vcombine.low %v1390_v52, %v1394_v53  ;;  %v1443_v44 = vld [vmem:[%s7152_s9 + $0x538] sm:$0xff] }
 0x239   : > { %4787 = vmatpush1.bf16.msra.mxu0 %v5414_v58  ;;  %4959 = vmatpush1.bf16.msra.mxu1 %v5416_v59  ;;  %v5472_v58 = vcombine.low %v1383_v45, %v1387_v47  ;;  %v5479_v59 = vcombine.high %v1390_v52, %v1394_v53  ;;  %v1451_v52 = vld [vmem:[%s7152_s9 + $0x578] sm:$0xff] }
 0x23a   : > { %4788 = vmatprep.subr.bf16.mxu0 %v5423_v60  ;;  %4960 = vmatprep.subr.bf16.mxu1 %v5425_v61  ;;  %v5481_v60 = vcombine.high %v1391_v55, %v1395_v56  ;;  %v1398_v61 = vld [vmem:[%s7152_s9 + $0x3d0] sm:$0xff] }
 0x23b   : > { %v5486_v48 = vcombine.low %v1398_v61, %v1402_v62 }
 0x23d   : > { %4789 = vmatpush1.bf16.msra.mxu0 %v5422_v5  ;;  %4961 = vmatpush1.bf16.msra.mxu1 %v5424_v6  ;;  %v5480_v5 = vcombine.low %v1391_v55, %v1395_v56  ;;  %v5487_v6 = vcombine.high %v1398_v61, %v1402_v62  ;;  %v5528_v55 = vcombine.low %v1439_v43, %v1443_v44  ;;  %v1459_v61 = vld [vmem:[%s7152_s9 + $0x5b8] sm:$0xff] }
 0x23e   : > { %4790 = vmatprep.subr.bf16.mxu0 %v5431_v7  ;;  %4962 = vmatprep.subr.bf16.mxu1 %v5433_v8  ;;  %v5489_v7 = vcombine.high %v1399_v63, %v1403_v0  ;;  %v1406_v8 = vld [vmem:[%s7152_s9 + $0x410] sm:$0xff] }
 0x23f   : > { %v5494_v20 = vcombine.low %v1406_v8, %v1410_v9 }
 0x241   : > { %4791 = vmatpush1.bf16.msra.mxu0 %v5430_v49  ;;  %4963 = vmatpush1.bf16.msra.mxu1 %v5432_v12  ;;  %v5488_v49 = vcombine.low %v1399_v63, %v1403_v0  ;;  %v5495_v12 = vcombine.high %v1406_v8, %v1410_v9  ;;  %v1467_v8 = vld [vmem:[%s7152_s9 + $0x5f8] sm:$0xff] }
 0x242   : > { %4792 = vmatprep.subr.bf16.mxu0 %v5439_v13  ;;  %4964 = vmatprep.subr.bf16.mxu1 %v5441_v14  ;;  %v5497_v13 = vcombine.high %v1407_v10, %v1411_v11  ;;  %v1414_v14 = vld [vmem:[%s7152_s9 + $0x450] sm:$0xff] }
 0x243   : > { %v5502_v29 = vcombine.low %v1414_v14, %v1418_v15 }
 0x245   : > { %4793 = vmatpush1.bf16.msra.mxu0 %v5438_v21  ;;  %4965 = vmatpush1.bf16.msra.mxu1 %v5440_v22  ;;  %v5496_v21 = vcombine.low %v1407_v10, %v1411_v11  ;;  %v5503_v22 = vcombine.high %v1414_v14, %v1418_v15  ;;  %v1475_v14 = vld [vmem:[%s7152_s9 + $0x638] sm:$0xff] }
 0x246   : > { %4794 = vmatprep.subr.bf16.mxu0 %v5447_v23  ;;  %4966 = vmatprep.subr.bf16.mxu1 %v5449_v24  ;;  %v5505_v23 = vcombine.high %v1415_v16, %v1419_v17  ;;  %v1422_v24 = vld [vmem:[%s7152_s9 + $0x490] sm:$0xff] }
 0x249   : > { %4795 = vmatpush1.bf16.msra.mxu0 %v5446_v31  ;;  %4967 = vmatpush1.bf16.msra.mxu1 %v5448_v34  ;;  %v5504_v31 = vcombine.low %v1415_v16, %v1419_v17  ;;  %v5511_v34 = vcombine.high %v1422_v24, %v1426_v25 }
 0x24a   : > { %4796 = vmatprep.subr.bf16.mxu0 %v5455_v2  ;;  %4968 = vmatprep.subr.bf16.mxu1 %v5457_v35  ;;  %v5513_v2 = vcombine.high %v1423_v27, %v1427_v28  ;;  %v1430_v35 = vld [vmem:[%s7152_s9 + $0x4d0] sm:$0xff] }
 0x24b   : > { %v5518_v45 = vcombine.low %v1430_v35, %v1434_v18 }
 0x24d   : > { %4797 = vmatpush1.bf16.msra.mxu0 %v5454_v39  ;;  %4969 = vmatpush1.bf16.msra.mxu1 %v5456_v40  ;;  %v5519_v39 = vcombine.high %v1430_v35, %v1434_v18  ;;  %v5521_v40 = vcombine.high %v1431_v19, %v1435_v36  ;;  %v1491_v35 = vld [vmem:[%s7152_s9 + $0x6b8] sm:$0xff] }
 0x24e   : > { %4798 = vmatprep.subr.bf16.mxu0 %v5463_v41  ;;  %4970 = vmatprep.subr.bf16.mxu1 %v5465_v42  ;;  %v1438_v41 = vld [vmem:[%s7152_s9 + $0x510] sm:$0xff] }
 0x24f   : > { %v1442_v42 = vld [vmem:[%s7152_s9 + $0x530] sm:$0xff] }
 0x250   : > { %v5527_v47 = vcombine.high %v1438_v41, %v1442_v42  ;;  %v5526_v53 = vcombine.low %v1438_v41, %v1442_v42  ;;  %v1499_v41 = vld [vmem:[%s7152_s9 + $0x6f8] sm:$0xff] }
 0x251   : > { %4799 = vmatpush1.bf16.msra.mxu0 %v5462_v50  ;;  %4971 = vmatpush1.bf16.msra.mxu1 %v5464_v51  ;;  %v5529_v50 = vcombine.high %v1439_v43, %v1443_v44  ;;  %v1446_v51 = vld [vmem:[%s7152_s9 + $0x550] sm:$0xff] }
 0x252   : > { %4800 = vmatprep.subr.bf16.mxu0 %v5471_v32  ;;  %4972 = vmatprep.subr.bf16.mxu1 %v5473_v33  ;;  %v1450_v32 = vld [vmem:[%s7152_s9 + $0x570] sm:$0xff]  ;;  %v1447_v33 = vld [vmem:[%s7152_s9 + $0x558] sm:$0xff] }
 0x253   : > { %v5535_v56 = vcombine.high %v1446_v51, %v1450_v32  ;;  %v5534_v62 = vcombine.low %v1446_v51, %v1450_v32  ;;  %v5536_v63 = vcombine.low %v1447_v33, %v1451_v52  ;;  %v1507_v51 = vld [vmem:[%s7152_s9 + $0x738] sm:$0xff] }
 0x255   : > { %4801 = vmatpush1.bf16.msra.mxu0 %v5470_v57  ;;  %4973 = vmatpush1.bf16.msra.mxu1 %v5472_v58  ;;  %v5537_v57 = vcombine.high %v1447_v33, %v1451_v52  ;;  %v1454_v58 = vld [vmem:[%s7152_s9 + $0x590] sm:$0xff] }
 0x256   : > { %4802 = vmatprep.subr.bf16.mxu0 %v5479_v59  ;;  %4974 = vmatprep.subr.bf16.mxu1 %v5481_v60  ;;  %v1458_v59 = vld [vmem:[%s7152_s9 + $0x5b0] sm:$0xff]  ;;  %v1455_v60 = vld [vmem:[%s7152_s9 + $0x598] sm:$0xff] }
 0x257   : > { %v5543_v0 = vcombine.high %v1454_v58, %v1458_v59  ;;  %v5542_v9 = vcombine.low %v1454_v58, %v1458_v59  ;;  %v5544_v10 = vcombine.low %v1455_v60, %v1459_v61  ;;  %v1515_v58 = vld [vmem:[%s7152_s9 + $0x778] sm:$0xff] }
 0x259   : > { %4803 = vmatpush1.bf16.msra.mxu0 %v5478_v4  ;;  %4975 = vmatpush1.bf16.msra.mxu1 %v5480_v5  ;;  %v5545_v4 = vcombine.high %v1455_v60, %v1459_v61  ;;  %v1462_v5 = vld [vmem:[%s7152_s9 + $0x5d0] sm:$0xff] }
 0x25a   : > { %4804 = vmatprep.subr.bf16.mxu0 %v5487_v6  ;;  %4976 = vmatprep.subr.bf16.mxu1 %v5489_v7  ;;  %v1466_v6 = vld [vmem:[%s7152_s9 + $0x5f0] sm:$0xff]  ;;  %v1463_v7 = vld [vmem:[%s7152_s9 + $0x5d8] sm:$0xff] }
 0x25b   : > { %v5551_v11 = vcombine.high %v1462_v5, %v1466_v6  ;;  %v5550_v15 = vcombine.low %v1462_v5, %v1466_v6  ;;  %v5552_v16 = vcombine.low %v1463_v7, %v1467_v8  ;;  %v1523_v5 = vld [vmem:[%s7152_s9 + $0x7b8] sm:$0xff] }
 0x25d   : > { %4805 = vmatpush1.bf16.msra.mxu0 %v5486_v48  ;;  %4977 = vmatpush1.bf16.msra.mxu1 %v5488_v49  ;;  %v5553_v48 = vcombine.high %v1463_v7, %v1467_v8  ;;  %v1470_v49 = vld [vmem:[%s7152_s9 + $0x610] sm:$0xff] }
 0x25e   : > { %4817 = vmatprep.subr.bf16.mxu0 %v5495_v12  ;;  %4989 = vmatprep.subr.bf16.mxu1 %v5497_v13  ;;  %v1474_v12 = vld [vmem:[%s7152_s9 + $0x630] sm:$0xff]  ;;  %v1471_v13 = vld [vmem:[%s7152_s9 + $0x618] sm:$0xff] }
 0x25f   : > { %v5559_v17 = vcombine.high %v1470_v49, %v1474_v12  ;;  %v5560_v27 = vcombine.low %v1471_v13, %v1475_v14 }
 0x260   : > { %4807 = vmatmul.mubr.bf16.vlgmr.msra.gmra.mrb[4].mxu0 %v7150_v3  ;;  %4979 = vmatmul.mubr.bf16.vlgmr.msra.gmra.mrb[4].mxu1 %v7150_v3  ;;  %v5510_v3 = vcombine.low %v1422_v24, %v1426_v25  ;;  %v1483_v24 = vld [vmem:[%s7152_s9 + $0x678] sm:$0xff]  ;;  %v5558_v25 = vcombine.low %v1470_v49, %v1474_v12 }
 0x261   : > { %4818 = vmatpush1.bf16.msra.mxu0 %v5494_v20  ;;  %4990 = vmatpush1.bf16.msra.mxu1 %v5496_v21  ;;  %v5561_v20 = vcombine.high %v1471_v13, %v1475_v14  ;;  %v1478_v21 = vld [vmem:[%s7152_s9 + $0x650] sm:$0xff]  ;;  %v1531_v49 = vld [vmem:[%s7152_s9 + $0x7f8] sm:$0xff] }
 0x262   : > { %4819 = vmatprep.subr.bf16.mxu0 %v5503_v22  ;;  %4991 = vmatprep.subr.bf16.mxu1 %v5505_v23  ;;  %v1482_v22 = vld [vmem:[%s7152_s9 + $0x670] sm:$0xff]  ;;  %v1479_v23 = vld [vmem:[%s7152_s9 + $0x658] sm:$0xff] }
 0x263   : > { %4849 = vmatprep.mubr.bf16.mxu0 %v7242_v26  ;;  %5021 = vmatprep.mubr.bf16.mxu1 %v7242_v26  ;;  %v5520_v26 = vcombine.low %v1431_v19, %v1435_v36  ;;  %v5567_v28 = vcombine.high %v1478_v21, %v1482_v22  ;;  %v5566_v18 = vcombine.low %v1478_v21, %v1482_v22  ;;  %v1539_v21 = vld [vmem:[%s7152_s9 + $0x838] sm:$0xff] }
 0x264   : > { %v5568_v19 = vcombine.low %v1479_v23, %v1483_v24 }
 0x265   : > { %4820 = vmatpush1.bf16.msra.mxu0 %v5502_v29  ;;  %4992 = vmatpush1.bf16.msra.mxu1 %v5504_v31  ;;  %v5569_v29 = vcombine.high %v1479_v23, %v1483_v24  ;;  %v1486_v31 = vld [vmem:[%s7152_s9 + $0x690] sm:$0xff] }
 0x266   : > { %4821 = vmatprep.subr.bf16.mxu0 %v5511_v34  ;;  %4993 = vmatprep.subr.bf16.mxu1 %v5513_v2  ;;  %v1490_v34 = vld [vmem:[%s7152_s9 + $0x6b0] sm:$0xff]  ;;  %v1487_v2 = vld [vmem:[%s7152_s9 + $0x698] sm:$0xff] }
 0x267   : > { %v5575_v36 = vcombine.high %v1486_v31, %v1490_v34  ;;  %v5574_v42 = vcombine.low %v1486_v31, %v1490_v34  ;;  %v5576_v43 = vcombine.low %v1487_v2, %v1491_v35  ;;  %v1547_v31 = vld [vmem:[%s7152_s9 + $0x878] sm:$0xff] }
 0x269   : > { %4822 = vmatpush1.bf16.msra.mxu0 %v5510_v3  ;;  %4994 = vmatpush1.bf16.msra.mxu1 %v5512_v37  ;;  %v5577_v3 = vcombine.high %v1487_v2, %v1491_v35  ;;  %v1494_v37 = vld [vmem:[%s7152_s9 + $0x6d0] sm:$0xff] }
 0x26a   : > { %4823 = vmatprep.subr.bf16.mxu0 %v5519_v39  ;;  %4995 = vmatprep.subr.bf16.mxu1 %v5521_v40  ;;  %v1498_v39 = vld [vmem:[%s7152_s9 + $0x6f0] sm:$0xff]  ;;  %v1495_v40 = vld [vmem:[%s7152_s9 + $0x6d8] sm:$0xff] }
 0x26b   : > { %v5583_v44 = vcombine.high %v1494_v37, %v1498_v39  ;;  %v5582_v32 = vcombine.low %v1494_v37, %v1498_v39  ;;  %v5584_v33 = vcombine.low %v1495_v40, %v1499_v41  ;;  %v1555_v37 = vld [vmem:[%s7152_s9 + $0x8b8] sm:$0xff] }
 0x26d   : > { %4824 = vmatpush1.bf16.msra.mxu0 %v5518_v45  ;;  %4996 = vmatpush1.bf16.msra.mxu1 %v5520_v26  ;;  %v5585_v45 = vcombine.high %v1495_v40, %v1499_v41  ;;  %v1502_v26 = vld [vmem:[%s7152_s9 + $0x710] sm:$0xff] }
 0x26e   : > { %4825 = vmatprep.subr.bf16.mxu0 %v5527_v47  ;;  %4997 = vmatprep.subr.bf16.mxu1 %v5529_v50  ;;  %v1506_v47 = vld [vmem:[%s7152_s9 + $0x730] sm:$0xff]  ;;  %v1503_v50 = vld [vmem:[%s7152_s9 + $0x718] sm:$0xff] }
 0x26f   : > { %v5591_v52 = vcombine.high %v1502_v26, %v1506_v47  ;;  %v5590_v59 = vcombine.low %v1502_v26, %v1506_v47  ;;  %v5592_v60 = vcombine.low %v1503_v50, %v1507_v51  ;;  %v1563_v26 = vld [vmem:[%s7152_s9 + $0x8f8] sm:$0xff] }
 0x271   : > { %4826 = vmatpush1.bf16.msra.mxu0 %v5526_v53  ;;  %4998 = vmatpush1.bf16.msra.mxu1 %v5528_v55  ;;  %v5593_v53 = vcombine.high %v1503_v50, %v1507_v51  ;;  %v1510_v55 = vld [vmem:[%s7152_s9 + $0x750] sm:$0xff] }
 0x272   : > { %4827 = vmatprep.subr.bf16.mxu0 %v5535_v56  ;;  %4999 = vmatprep.subr.bf16.mxu1 %v5537_v57  ;;  %v1514_v56 = vld [vmem:[%s7152_s9 + $0x770] sm:$0xff]  ;;  %v1511_v57 = vld [vmem:[%s7152_s9 + $0x758] sm:$0xff] }
 0x273   : > { %v5599_v61 = vcombine.high %v1510_v55, %v1514_v56  ;;  %v5598_v6 = vcombine.low %v1510_v55, %v1514_v56  ;;  %v5600_v7 = vcombine.low %v1511_v57, %v1515_v58 }
 0x275   : > { %4828 = vmatpush1.bf16.msra.mxu0 %v5534_v62  ;;  %5000 = vmatpush1.bf16.msra.mxu1 %v5536_v63  ;;  %v5601_v62 = vcombine.high %v1511_v57, %v1515_v58  ;;  %v1518_v63 = vld [vmem:[%s7152_s9 + $0x790] sm:$0xff] }
 0x276   : > { %4829 = vmatprep.subr.bf16.mxu0 %v5543_v0  ;;  %5001 = vmatprep.subr.bf16.mxu1 %v5545_v4  ;;  %v1522_v0 = vld [vmem:[%s7152_s9 + $0x7b0] sm:$0xff]  ;;  %v1519_v4 = vld [vmem:[%s7152_s9 + $0x798] sm:$0xff] }
 0x277   : > { %v5607_v8 = vcombine.high %v1518_v63, %v1522_v0  ;;  %v5606_v12 = vcombine.low %v1518_v63, %v1522_v0  ;;  %v5608_v13 = vcombine.low %v1519_v4, %v1523_v5  ;;  %v1574_v58 = vld [vmem:[%s7152_s9 + $0x950] sm:$0xff] }
 0x279   : > { %4830 = vmatpush1.bf16.msra.mxu0 %v5542_v9  ;;  %5002 = vmatpush1.bf16.msra.mxu1 %v5544_v10  ;;  %v5609_v9 = vcombine.high %v1519_v4, %v1523_v5  ;;  %v1526_v10 = vld [vmem:[%s7152_s9 + $0x7d0] sm:$0xff] }
 0x27a   : > { %4831 = vmatprep.subr.bf16.mxu0 %v5551_v11  ;;  %5003 = vmatprep.subr.bf16.mxu1 %v5553_v48  ;;  %v1530_v11 = vld [vmem:[%s7152_s9 + $0x7f0] sm:$0xff]  ;;  %v1527_v48 = vld [vmem:[%s7152_s9 + $0x7d8] sm:$0xff] }
 0x27b   : > { %v5615_v14 = vcombine.high %v1526_v10, %v1530_v11  ;;  %v5614_v22 = vcombine.low %v1526_v10, %v1530_v11  ;;  %v5616_v23 = vcombine.low %v1527_v48, %v1531_v49  ;;  %v1582_v5 = vld [vmem:[%s7152_s9 + $0x990] sm:$0xff] }
 0x27d   : > { %4832 = vmatpush1.bf16.msra.mxu0 %v5550_v15  ;;  %5004 = vmatpush1.bf16.msra.mxu1 %v5552_v16  ;;  %v5617_v15 = vcombine.high %v1527_v48, %v1531_v49  ;;  %v1534_v16 = vld [vmem:[%s7152_s9 + $0x810] sm:$0xff] }
 0x27e   : > { %4833 = vmatprep.subr.bf16.mxu0 %v5559_v17  ;;  %5005 = vmatprep.subr.bf16.mxu1 %v5561_v20  ;;  %v1538_v17 = vld [vmem:[%s7152_s9 + $0x830] sm:$0xff]  ;;  %v1535_v20 = vld [vmem:[%s7152_s9 + $0x818] sm:$0xff] }
 0x27f   : > { %v5623_v24 = vcombine.high %v1534_v16, %v1538_v17  ;;  %v5622_v34 = vcombine.low %v1534_v16, %v1538_v17  ;;  %v5624_v2 = vcombine.low %v1535_v20, %v1539_v21  ;;  %v1590_v49 = vld [vmem:[%s7152_s9 + $0x9d0] sm:$0xff] }
 0x281   : > { %4834 = vmatpush1.bf16.msra.mxu0 %v5558_v25  ;;  %5006 = vmatpush1.bf16.msra.mxu1 %v5560_v27  ;;  %v5625_v25 = vcombine.high %v1535_v20, %v1539_v21  ;;  %v1542_v27 = vld [vmem:[%s7152_s9 + $0x850] sm:$0xff] }
 0x282   : > { %4835 = vmatprep.subr.bf16.mxu0 %v5567_v28  ;;  %5007 = vmatprep.subr.bf16.mxu1 %v5569_v29  ;;  %v1546_v28 = vld [vmem:[%s7152_s9 + $0x870] sm:$0xff]  ;;  %v1543_v29 = vld [vmem:[%s7152_s9 + $0x858] sm:$0xff] }
 0x283   : > { %v5631_v35 = vcombine.high %v1542_v27, %v1546_v28  ;;  %v5630_v39 = vcombine.low %v1542_v27, %v1546_v28  ;;  %v5632_v40 = vcombine.low %v1543_v29, %v1547_v31  ;;  %v1598_v21 = vld [vmem:[%s7152_s9 + $0xa10] sm:$0xff] }
 0x285   : > { %4836 = vmatpush1.bf16.msra.mxu0 %v5566_v18  ;;  %5008 = vmatpush1.bf16.msra.mxu1 %v5568_v19  ;;  %v5633_v18 = vcombine.high %v1543_v29, %v1547_v31  ;;  %v1550_v19 = vld [vmem:[%s7152_s9 + $0x890] sm:$0xff] }
 0x286   : > { %4837 = vmatprep.subr.bf16.mxu0 %v5575_v36  ;;  %5009 = vmatprep.subr.bf16.mxu1 %v5577_v3  ;;  %v1554_v36 = vld [vmem:[%s7152_s9 + $0x8b0] sm:$0xff]  ;;  %v1551_v3 = vld [vmem:[%s7152_s9 + $0x898] sm:$0xff] }
 0x287   : > { %v5639_v41 = vcombine.high %v1550_v19, %v1554_v36  ;;  %v5640_v47 = vcombine.low %v1551_v3, %v1555_v37  ;;  %v1606_v31 = vld [vmem:[%s7152_s9 + $0xa50] sm:$0xff] }
 0x289   : > { %4838 = vmatpush1.bf16.msra.mxu0 %v5574_v42  ;;  %5010 = vmatpush1.bf16.msra.mxu1 %v5576_v43  ;;  %v5641_v42 = vcombine.high %v1551_v3, %v1555_v37  ;;  %v1558_v43 = vld [vmem:[%s7152_s9 + $0x8d0] sm:$0xff] }
 0x28a   : > { %4839 = vmatprep.subr.bf16.mxu0 %v5583_v44  ;;  %5011 = vmatprep.subr.bf16.mxu1 %v5585_v45  ;;  %v1562_v44 = vld [vmem:[%s7152_s9 + $0x8f0] sm:$0xff]  ;;  %v1559_v45 = vld [vmem:[%s7152_s9 + $0x8d8] sm:$0xff] }
 0x28b   : > { %v5647_v50 = vcombine.high %v1558_v43, %v1562_v44  ;;  %v5649_v51 = vcombine.high %v1559_v45, %v1563_v26  ;;  %v5646_v55 = vcombine.low %v1558_v43, %v1562_v44  ;;  %v1614_v37 = vld [vmem:[%s7152_s9 + $0xa90] sm:$0xff] }
 0x28d   : > { %4840 = vmatpush1.bf16.msra.mxu0 %v5582_v32  ;;  %5012 = vmatpush1.bf16.msra.mxu1 %v5584_v33  ;;  %v1566_v32 = vld [vmem:[%s7152_s9 + $0x910] sm:$0xff] }
 0x28e   : > { %4841 = vmatprep.subr.bf16.mxu0 %v5591_v52  ;;  %5013 = vmatprep.subr.bf16.mxu1 %v5593_v53  ;;  %v1570_v33 = vld [vmem:[%s7152_s9 + $0x930] sm:$0xff]  ;;  %v1567_v52 = vld [vmem:[%s7152_s9 + $0x918] sm:$0xff] }
 0x28f   : > { %v1571_v53 = vld [vmem:[%s7152_s9 + $0x938] sm:$0xff]  ;;  %v5655_v56 = vcombine.high %v1566_v32, %v1570_v33 }
 0x290   : > { %v5657_v57 = vcombine.high %v1567_v52, %v1571_v53  ;;  %v5656_v63 = vcombine.low %v1567_v52, %v1571_v53  ;;  %v1630_v53 = vld [vmem:[%s7152_s9 + $0xb10] sm:$0xff] }
 0x291   : > { %4842 = vmatpush1.bf16.msra.mxu0 %v5590_v59  ;;  %5014 = vmatpush1.bf16.msra.mxu1 %v5592_v60  ;;  %v1578_v59 = vld [vmem:[%s7152_s9 + $0x970] sm:$0xff]  ;;  %v1575_v60 = vld [vmem:[%s7152_s9 + $0x958] sm:$0xff] }
 0x292   : > { %4843 = vmatprep.subr.bf16.mxu0 %v5599_v61  ;;  %5015 = vmatprep.subr.bf16.mxu1 %v5601_v62  ;;  %v1579_v61 = vld [vmem:[%s7152_s9 + $0x978] sm:$0xff]  ;;  %v5654_v62 = vcombine.low %v1566_v32, %v1570_v33  ;;  %v5663_v0 = vcombine.high %v1574_v58, %v1578_v59 }
 0x293   : > { %v5665_v4 = vcombine.high %v1575_v60, %v1579_v61  ;;  %v5664_v10 = vcombine.low %v1575_v60, %v1579_v61  ;;  %v1638_v61 = vld [vmem:[%s7152_s9 + $0xb50] sm:$0xff] }
 0x295   : > { %4844 = vmatpush1.bf16.msra.mxu0 %v5598_v6  ;;  %5016 = vmatpush1.bf16.msra.mxu1 %v5600_v7  ;;  %v1586_v6 = vld [vmem:[%s7152_s9 + $0x9b0] sm:$0xff]  ;;  %v1583_v7 = vld [vmem:[%s7152_s9 + $0x998] sm:$0xff] }
 0x296   : > { %4845 = vmatprep.subr.bf16.mxu0 %v5607_v8  ;;  %5017 = vmatprep.subr.bf16.mxu1 %v5609_v9  ;;  %v1587_v8 = vld [vmem:[%s7152_s9 + $0x9b8] sm:$0xff]  ;;  %v5662_v9 = vcombine.low %v1574_v58, %v1578_v59  ;;  %v5671_v11 = vcombine.high %v1582_v5, %v1586_v6 }
 0x297   : > { %v5673_v48 = vcombine.high %v1583_v7, %v1587_v8  ;;  %v5672_v16 = vcombine.low %v1583_v7, %v1587_v8  ;;  %v1646_v8 = vld [vmem:[%s7152_s9 + $0xb90] sm:$0xff] }
 0x299   : > { %4846 = vmatpush1.bf16.msra.mxu0 %v5606_v12  ;;  %5018 = vmatpush1.bf16.msra.mxu1 %v5608_v13  ;;  %v1594_v12 = vld [vmem:[%s7152_s9 + $0x9f0] sm:$0xff]  ;;  %v1591_v13 = vld [vmem:[%s7152_s9 + $0x9d8] sm:$0xff] }
 0x29a   : > { %4847 = vmatprep.subr.bf16.mxu0 %v5615_v14  ;;  %5019 = vmatprep.subr.bf16.mxu1 %v5617_v15  ;;  %v1595_v14 = vld [vmem:[%s7152_s9 + $0x9f8] sm:$0xff]  ;;  %v5670_v15 = vcombine.low %v1582_v5, %v1586_v6  ;;  %v5679_v17 = vcombine.high %v1590_v49, %v1594_v12 }
 0x29b   : > { %v5681_v20 = vcombine.high %v1591_v13, %v1595_v14  ;;  %v5680_v27 = vcombine.low %v1591_v13, %v1595_v14  ;;  %v1654_v14 = vld [vmem:[%s7152_s9 + $0xbd0] sm:$0xff] }
 0x29d   : > { %4848 = vmatpush1.bf16.msra.mxu0 %v5614_v22  ;;  %5020 = vmatpush1.bf16.msra.mxu1 %v5616_v23  ;;  %v1602_v22 = vld [vmem:[%s7152_s9 + $0xa30] sm:$0xff]  ;;  %v1599_v23 = vld [vmem:[%s7152_s9 + $0xa18] sm:$0xff] }
 0x29e   : > { %4860 = vmatprep.subr.bf16.mxu0 %v5623_v24  ;;  %5032 = vmatprep.subr.bf16.mxu1 %v5625_v25  ;;  %v1603_v24 = vld [vmem:[%s7152_s9 + $0xa38] sm:$0xff]  ;;  %v5678_v25 = vcombine.low %v1590_v49, %v1594_v12  ;;  %v5687_v28 = vcombine.high %v1598_v21, %v1602_v22 }
 0x29f   : > { %v5689_v29 = vcombine.high %v1599_v23, %v1603_v24 }
 0x2a0   : > { %4850 = vmatmul.mubr.bf16.vlgmr.msra.gmra.mrb[4].mxu0 %v7311_v30  ;;  %5022 = vmatmul.mubr.bf16.vlgmr.msra.gmra.mrb[4].mxu1 %v7311_v30  ;;  %v5638_v30 = vcombine.low %v1550_v19, %v1554_v36  ;;  %v5688_v19 = vcombine.low %v1599_v23, %v1603_v24  ;;  %v1662_v24 = vld [vmem:[%s7152_s9 + $0xc10] sm:$0xff] }
 0x2a1   : > { %4861 = vmatpush1.bf16.msra.mxu0 %v5622_v34  ;;  %5033 = vmatpush1.bf16.msra.mxu1 %v5624_v2  ;;  %v1610_v34 = vld [vmem:[%s7152_s9 + $0xa70] sm:$0xff]  ;;  %v1607_v2 = vld [vmem:[%s7152_s9 + $0xa58] sm:$0xff] }
 0x2a2   : > { %4862 = vmatprep.subr.bf16.mxu0 %v5631_v35  ;;  %5034 = vmatprep.subr.bf16.mxu1 %v5633_v18  ;;  %v1611_v35 = vld [vmem:[%s7152_s9 + $0xa78] sm:$0xff]  ;;  %v5686_v18 = vcombine.low %v1598_v21, %v1602_v22  ;;  %v5695_v36 = vcombine.high %v1606_v31, %v1610_v34 }
 0x2a3   : > { %4892 = vmatprep.mubr.bf16.mxu0 %v7328_v38  ;;  %5064 = vmatprep.mubr.bf16.mxu1 %v7328_v38  ;;  %v5648_v38 = vcombine.low %v1559_v45, %v1563_v26  ;;  %v5697_v3 = vcombine.high %v1607_v2, %v1611_v35  ;;  %v5696_v43 = vcombine.low %v1607_v2, %v1611_v35  ;;  %v1622_v26 = vld [vmem:[%s7152_s9 + $0xad0] sm:$0xff] }
 0x2a4   : > { %v1670_v35 = vld [vmem:[%s7152_s9 + $0xc50] sm:$0xff] }
 0x2a5   : > { %4863 = vmatpush1.bf16.msra.mxu0 %v5630_v39  ;;  %5035 = vmatpush1.bf16.msra.mxu1 %v5632_v40  ;;  %v1618_v39 = vld [vmem:[%s7152_s9 + $0xab0] sm:$0xff]  ;;  %v1615_v40 = vld [vmem:[%s7152_s9 + $0xa98] sm:$0xff] }
 0x2a6   : > { %4864 = vmatprep.subr.bf16.mxu0 %v5639_v41  ;;  %5036 = vmatprep.subr.bf16.mxu1 %v5641_v42  ;;  %v1619_v41 = vld [vmem:[%s7152_s9 + $0xab8] sm:$0xff]  ;;  %v5694_v42 = vcombine.low %v1606_v31, %v1610_v34  ;;  %v5703_v44 = vcombine.high %v1614_v37, %v1618_v39 }
 0x2a7   : > { %v5705_v45 = vcombine.high %v1615_v40, %v1619_v41  ;;  %v5704_v32 = vcombine.low %v1615_v40, %v1619_v41  ;;  %v1678_v41 = vld [vmem:[%s7152_s9 + $0xc90] sm:$0xff] }
 0x2a9   : > { %4865 = vmatpush1.bf16.msra.mxu0 %v5638_v30  ;;  %5037 = vmatpush1.bf16.msra.mxu1 %v5640_v47  ;;  %v1626_v30 = vld [vmem:[%s7152_s9 + $0xaf0] sm:$0xff]  ;;  %v1623_v47 = vld [vmem:[%s7152_s9 + $0xad8] sm:$0xff] }
 0x2aa   : > { %4866 = vmatprep.subr.bf16.mxu0 %v5647_v50  ;;  %5038 = vmatprep.subr.bf16.mxu1 %v5649_v51  ;;  %v1627_v50 = vld [vmem:[%s7152_s9 + $0xaf8] sm:$0xff]  ;;  %v5702_v51 = vcombine.low %v1614_v37, %v1618_v39  ;;  %v5711_v33 = vcombine.high %v1622_v26, %v1626_v30 }
 0x2ab   : > { %v5713_v52 = vcombine.high %v1623_v47, %v1627_v50  ;;  %v5712_v58 = vcombine.low %v1623_v47, %v1627_v50  ;;  %v1686_v50 = vld [vmem:[%s7152_s9 + $0xcd0] sm:$0xff] }
 0x2ad   : > { %4867 = vmatpush1.bf16.msra.mxu0 %v5646_v55  ;;  %5039 = vmatpush1.bf16.msra.mxu1 %v5648_v38  ;;  %v1634_v55 = vld [vmem:[%s7152_s9 + $0xb30] sm:$0xff]  ;;  %v1631_v38 = vld [vmem:[%s7152_s9 + $0xb18] sm:$0xff] }
 0x2ae   : > { %4868 = vmatprep.subr.bf16.mxu0 %v5655_v56  ;;  %5040 = vmatprep.subr.bf16.mxu1 %v5657_v57  ;;  %v1635_v56 = vld [vmem:[%s7152_s9 + $0xb38] sm:$0xff]  ;;  %v5710_v57 = vcombine.low %v1622_v26, %v1626_v30  ;;  %v5719_v59 = vcombine.high %v1630_v53, %v1634_v55 }
 0x2af   : > { %v5721_v60 = vcombine.high %v1631_v38, %v1635_v56  ;;  %v5720_v5 = vcombine.low %v1631_v38, %v1635_v56  ;;  %v1694_v56 = vld [vmem:[%s7152_s9 + $0xd10] sm:$0xff] }
 0x2b1   : > { %4869 = vmatpush1.bf16.msra.mxu0 %v5654_v62  ;;  %5041 = vmatpush1.bf16.msra.mxu1 %v5656_v63  ;;  %v1642_v62 = vld [vmem:[%s7152_s9 + $0xb70] sm:$0xff]  ;;  %v1639_v63 = vld [vmem:[%s7152_s9 + $0xb58] sm:$0xff] }
 0x2b2   : > { %4870 = vmatprep.subr.bf16.mxu0 %v5663_v0  ;;  %5042 = vmatprep.subr.bf16.mxu1 %v5665_v4  ;;  %v1643_v0 = vld [vmem:[%s7152_s9 + $0xb78] sm:$0xff]  ;;  %v5718_v4 = vcombine.low %v1630_v53, %v1634_v55  ;;  %v5727_v6 = vcombine.high %v1638_v61, %v1642_v62 }
 0x2b3   : > { %v5729_v7 = vcombine.high %v1639_v63, %v1643_v0  ;;  %v5728_v49 = vcombine.low %v1639_v63, %v1643_v0  ;;  %v1702_v0 = vld [vmem:[%s7152_s9 + $0xd50] sm:$0xff] }
 0x2b5   : > { %4871 = vmatpush1.bf16.msra.mxu0 %v5662_v9  ;;  %5043 = vmatpush1.bf16.msra.mxu1 %v5664_v10  ;;  %v1650_v9 = vld [vmem:[%s7152_s9 + $0xbb0] sm:$0xff]  ;;  %v1647_v10 = vld [vmem:[%s7152_s9 + $0xb98] sm:$0xff] }
 0x2b6   : > { %4872 = vmatprep.subr.bf16.mxu0 %v5671_v11  ;;  %5044 = vmatprep.subr.bf16.mxu1 %v5673_v48  ;;  %v1651_v11 = vld [vmem:[%s7152_s9 + $0xbb8] sm:$0xff]  ;;  %v5726_v48 = vcombine.low %v1638_v61, %v1642_v62  ;;  %v5735_v12 = vcombine.high %v1646_v8, %v1650_v9 }
 0x2b7   : > { %v5737_v13 = vcombine.high %v1647_v10, %v1651_v11  ;;  %v5736_v21 = vcombine.low %v1647_v10, %v1651_v11 }
 0x2b9   : > { %4873 = vmatpush1.bf16.msra.mxu0 %v5670_v15  ;;  %5045 = vmatpush1.bf16.msra.mxu1 %v5672_v16  ;;  %v1658_v15 = vld [vmem:[%s7152_s9 + $0xbf0] sm:$0xff]  ;;  %v1655_v16 = vld [vmem:[%s7152_s9 + $0xbd8] sm:$0xff] }
 0x2ba   : > { %4874 = vmatprep.subr.bf16.mxu0 %v5679_v17  ;;  %5046 = vmatprep.subr.bf16.mxu1 %v5681_v20  ;;  %v1659_v17 = vld [vmem:[%s7152_s9 + $0xbf8] sm:$0xff]  ;;  %v5734_v20 = vcombine.low %v1646_v8, %v1650_v9  ;;  %v5743_v22 = vcombine.high %v1654_v14, %v1658_v15  ;;  %v7723_v9 = vld [vmem:[%s1264_s8] sm:$0xff] }
 0x2bb   : > { %v5745_v23 = vcombine.high %v1655_v16, %v1659_v17  ;;  %v5744_v31 = vcombine.low %v1655_v16, %v1659_v17  ;;  %v1711_v17 = vld [vmem:[%s7152_s9 + $0xd98] sm:$0xff] }
 0x2bd   : > { %4875 = vmatpush1.bf16.msra.mxu0 %v5678_v25  ;;  %5047 = vmatpush1.bf16.msra.mxu1 %v5680_v27  ;;  %v1666_v25 = vld [vmem:[%s7152_s9 + $0xc30] sm:$0xff]  ;;  %v1663_v27 = vld [vmem:[%s7152_s9 + $0xc18] sm:$0xff] }
 0x2be   : > { %4876 = vmatprep.subr.bf16.mxu0 %v5687_v28  ;;  %5048 = vmatprep.subr.bf16.mxu1 %v5689_v29  ;;  %v1667_v28 = vld [vmem:[%s7152_s9 + $0xc38] sm:$0xff]  ;;  %v5742_v29 = vcombine.low %v1654_v14, %v1658_v15  ;;  %v5751_v34 = vcombine.high %v1662_v24, %v1666_v25  ;;  %v1710_v14 = vld [vmem:[%s7152_s9 + $0xd90] sm:$0xff] }
 0x2bf   : > { %v5753_v2 = vcombine.high %v1663_v27, %v1667_v28  ;;  %v5752_v37 = vcombine.low %v1663_v27, %v1667_v28  ;;  %v1714_v15 = vld [vmem:[%s7152_s9 + $0xdb0] sm:$0xff] }
 0x2c1   : > { %4877 = vmatpush1.bf16.msra.mxu0 %v5686_v18  ;;  %5049 = vmatpush1.bf16.msra.mxu1 %v5688_v19  ;;  %v1674_v18 = vld [vmem:[%s7152_s9 + $0xc70] sm:$0xff]  ;;  %v1671_v19 = vld [vmem:[%s7152_s9 + $0xc58] sm:$0xff] }
 0x2c2   : > { %4878 = vmatprep.subr.bf16.mxu0 %v5695_v36  ;;  %5050 = vmatprep.subr.bf16.mxu1 %v5697_v3  ;;  %v1675_v36 = vld [vmem:[%s7152_s9 + $0xc78] sm:$0xff]  ;;  %v5750_v3 = vcombine.low %v1662_v24, %v1666_v25  ;;  %v5759_v39 = vcombine.high %v1670_v35, %v1674_v18  ;;  %v7736_v24 = vld [vmem:[%s7152_s9 + $0xdd0] sm:$0xff] }
 0x2c3   : > { %v5761_v40 = vcombine.high %v1671_v19, %v1675_v36  ;;  %v5760_v26 = vcombine.low %v1671_v19, %v1675_v36  ;;  %v7739_v25 = vld [vmem:[%s7152_s9 + $0xdf0] sm:$0xff] }
 0x2c5   : > { %4879 = vmatpush1.bf16.msra.mxu0 %v5694_v42  ;;  %5051 = vmatpush1.bf16.msra.mxu1 %v5696_v43  ;;  %v1682_v42 = vld [vmem:[%s7152_s9 + $0xcb0] sm:$0xff]  ;;  %v1679_v43 = vld [vmem:[%s7152_s9 + $0xc98] sm:$0xff] }
 0x2c6   : > { %4880 = vmatprep.subr.bf16.mxu0 %v5703_v44  ;;  %5052 = vmatprep.subr.bf16.mxu1 %v5705_v45  ;;  %v1683_v44 = vld [vmem:[%s7152_s9 + $0xcb8] sm:$0xff]  ;;  %v5758_v45 = vcombine.low %v1670_v35, %v1674_v18  ;;  %v5767_v30 = vcombine.high %v1678_v41, %v1682_v42 }
 0x2c7   : > { %v5769_v47 = vcombine.high %v1679_v43, %v1683_v44  ;;  %v5768_v53 = vcombine.low %v1679_v43, %v1683_v44  ;;  %v5806_v44 = vcombine.low %v7736_v24, %v7739_v25 }
 0x2c9   : > { %4881 = vmatpush1.bf16.msra.mxu0 %v5702_v51  ;;  %5053 = vmatpush1.bf16.msra.mxu1 %v5704_v32  ;;  %v1690_v51 = vld [vmem:[%s7152_s9 + $0xcf0] sm:$0xff]  ;;  %v1691_v32 = vld [vmem:[%s7152_s9 + $0xcf8] sm:$0xff] }
 0x2ca   : > { %4882 = vmatprep.subr.bf16.mxu0 %v5711_v33  ;;  %5054 = vmatprep.subr.bf16.mxu1 %v5713_v52  ;;  %v1790_v33 = vlaneseq  ;;  %v5766_v52 = vcombine.low %v1678_v41, %v1682_v42  ;;  %v5775_v55 = vcombine.high %v1686_v50, %v1690_v51 }
 0x2cd   : > { %4883 = vmatpush1.bf16.msra.mxu0 %v5710_v57  ;;  %5055 = vmatpush1.bf16.msra.mxu1 %v5712_v58  ;;  %v1698_v57 = vld [vmem:[%s7152_s9 + $0xd30] sm:$0xff]  ;;  %v1695_v58 = vld [vmem:[%s7152_s9 + $0xd18] sm:$0xff] }
 0x2ce   : > { %4884 = vmatprep.subr.bf16.mxu0 %v5719_v59  ;;  %5056 = vmatprep.subr.bf16.mxu1 %v5721_v60  ;;  %v1699_v59 = vld [vmem:[%s7152_s9 + $0xd38] sm:$0xff]  ;;  %v7713_v60 = vshrl.u32 %v1790_v33, 7  ;;  %v5783_v62 = vcombine.high %v1694_v56, %v1698_v57  ;;  %v5782_v8 = vcombine.low %v1694_v56, %v1698_v57  ;;  %v1730_v56 = vld [vmem:[%s7152_s9 + $0xe30] sm:$0xff] }
 0x2cf   : > { %v5785_v63 = vcombine.high %v1695_v58, %v1699_v59 }
 0x2d0   : > { %v1800_v10 = vsub.s32 2, %v7713_v60  ;;  %v1796_v11 = vsub.s32 1, %v7713_v60 }
 0x2d1   : > { %4885 = vmatpush1.bf16.msra.mxu0 %v5718_v4  ;;  %5057 = vmatpush1.bf16.msra.mxu1 %v5720_v5  ;;  %v1706_v4 = vld [vmem:[%s7152_s9 + $0xd70] sm:$0xff]  ;;  %v1792_v5 = vsub.s32 0, %v7713_v60 }
 0x2d2   : > { %4886 = vmatprep.subr.bf16.mxu0 %v5727_v6  ;;  %5058 = vmatprep.subr.bf16.mxu1 %v5729_v7  ;;  %v1703_v6 = vld [vmem:[%s7152_s9 + $0xd58] sm:$0xff] }
 0x2d3   : > { %v1707_v7 = vld [vmem:[%s7152_s9 + $0xd78] sm:$0xff]  ;;  %v1793_v16 = vrot.slane %v7723_v9, %v1792_v5 }
 0x2d4   : > { %v5792_v28 = vcombine.low %v1703_v6, %v1707_v7 }
 0x2d5   : > { %4887 = vmatpush1.bf16.msra.mxu0 %v5726_v48  ;;  %5059 = vmatpush1.bf16.msra.mxu1 %v5728_v49  ;;  %v5784_v48 = vcombine.low %v1695_v58, %v1699_v59  ;;  %v1804_v49 = vsub.s32 3, %v7713_v60 }
 0x2d6   : > { %4888 = vmatprep.subr.bf16.mxu0 %v5735_v12  ;;  %5060 = vmatprep.subr.bf16.mxu1 %v5737_v13  ;;  %v5791_v12 = vcombine.high %v1702_v0, %v1706_v4  ;;  %v5793_v13 = vcombine.high %v1703_v6, %v1707_v7 }
 0x2d7   : > { %v1805_v27 = vrot.slane %v7723_v9, %v1804_v49 }
 0x2d9   : > { %4889 = vmatpush1.bf16.msra.mxu0 %v5734_v20  ;;  %5061 = vmatpush1.bf16.msra.mxu1 %v5736_v21  ;;  %v1715_v20 = vld [vmem:[%s7152_s9 + $0xdb8] sm:$0xff]  ;;  %v1801_v21 = vrot.slane %v7723_v9, %v1800_v10 }
 0x2da   : > { %4890 = vmatprep.subr.bf16.mxu0 %v5743_v22  ;;  %5062 = vmatprep.subr.bf16.mxu1 %v5745_v23  ;;  %v1797_v22 = vrot.slane %v7723_v9, %v1796_v11  ;;  %v5790_v23 = vcombine.low %v1702_v0, %v1706_v4  ;;  %v5801_v35 = vcombine.high %v1711_v17, %v1715_v20 }
 0x2dd   : > { %4891 = vmatpush1.bf16.msra.mxu0 %v5742_v29  ;;  %5063 = vmatpush1.bf16.msra.mxu1 %v5744_v31  ;;  %v5799_v29 = vcombine.high %v1710_v14, %v1714_v15  ;;  %v7743_v31 = vld [vmem:[%s7152_s9 + $0xdd8] sm:$0xff] }
 0x2de   : > { %4903 = vmatprep.subr.bf16.mxu0 %v5751_v34  ;;  %5075 = vmatprep.subr.bf16.mxu1 %v5753_v2  ;;  %v7746_v34 = vld [vmem:[%s7152_s9 + $0xdf8] sm:$0xff] }
 0x2e0   : > { %4893 = vmatmul.mubr.bf16.vlgmr.msra.gmra.mrb[4].mxu0 %v7397_v46  ;;  %5065 = vmatmul.mubr.bf16.vlgmr.msra.gmra.mrb[4].mxu1 %v7397_v46  ;;  %v1687_v46 = vld [vmem:[%s7152_s9 + $0xcd8] sm:$0xff] }
 0x2e1   : > { %4904 = vmatpush1.bf16.msra.mxu0 %v5750_v3  ;;  %5076 = vmatpush1.bf16.msra.mxu1 %v5752_v37  ;;  %v5777_v38 = vcombine.high %v1687_v46, %v1691_v32  ;;  %v5776_v61 = vcombine.low %v1687_v46, %v1691_v32  ;;  %v5798_v3 = vcombine.low %v1710_v14, %v1714_v15  ;;  %v1726_v32 = vld [vmem:[%s7152_s9 + $0xe10] sm:$0xff] }
 0x2e2   : > { %4905 = vmatprep.subr.bf16.mxu0 %v5759_v39  ;;  %5077 = vmatprep.subr.bf16.mxu1 %v5761_v40  ;;  %v5800_v37 = vcombine.low %v1711_v17, %v1715_v20  ;;  %v5807_v39 = vcombine.high %v7736_v24, %v7739_v25  ;;  %v5809_v46 = vcombine.high %v7743_v31, %v7746_v34  ;;  %v1738_v14 = vld [vmem:[%s7152_s9 + $0xe70] sm:$0xff]  ;;  %v1735_v17 = vld [vmem:[%s7152_s9 + $0xe58] sm:$0xff] }
 0x2e3   : > { %4935 = vmatprep.mubr.bf16.mxu0 %v7414_v54  ;;  %5107 = vmatprep.mubr.bf16.mxu1 %v7414_v54  ;;  %v5774_v54 = vcombine.low %v1686_v50, %v1690_v51  ;;  %v5815_v10 = vcombine.high %v1726_v32, %v1730_v56  ;;  %v1739_v20 = vld [vmem:[%s7152_s9 + $0xe78] sm:$0xff] }
 0x2e5   : > { %4906 = vmatpush1.bf16.msra.mxu0 %v5758_v45  ;;  %5078 = vmatpush1.bf16.msra.mxu1 %v5760_v26  ;;  %v5808_v45 = vcombine.low %v7743_v31, %v7746_v34  ;;  %v1743_v31 = vld [vmem:[%s7152_s9 + $0xe98] sm:$0xff] }
 0x2e6   : > { %4907 = vmatprep.subr.bf16.mxu0 %v5767_v30  ;;  %5079 = vmatprep.subr.bf16.mxu1 %v5769_v47  ;;  %v1747_v34 = vld [vmem:[%s7152_s9 + $0xeb8] sm:$0xff] }
 0x2e9   : > { %4908 = vmatpush1.bf16.msra.mxu0 %v5766_v52  ;;  %5080 = vmatpush1.bf16.msra.mxu1 %v5768_v53 }
 0x2ea   : > { %4909 = vmatprep.subr.bf16.mxu0 %v5775_v55  ;;  %5081 = vmatprep.subr.bf16.mxu1 %v5777_v38 }
 0x2ed   : > { %4910 = vmatpush1.bf16.msra.mxu0 %v5774_v54  ;;  %5082 = vmatpush1.bf16.msra.mxu1 %v5776_v61  ;;  %v1727_v61 = vld [vmem:[%s7152_s9 + $0xe18] sm:$0xff] }
 0x2ee   : > { %4911 = vmatprep.subr.bf16.mxu0 %v5783_v62  ;;  %5083 = vmatprep.subr.bf16.mxu1 %v5785_v63  ;;  %v1731_v62 = vld [vmem:[%s7152_s9 + $0xe38] sm:$0xff] }
 0x2ef   : > { %v5816_v24 = vcombine.low %v1727_v61, %v1731_v62 }
 0x2f1   : > { %4912 = vmatpush1.bf16.msra.mxu0 %v5782_v8  ;;  %5084 = vmatpush1.bf16.msra.mxu1 %v5784_v48 }
 0x2f2   : > { %4913 = vmatprep.subr.bf16.mxu0 %v5791_v12  ;;  %5085 = vmatprep.subr.bf16.mxu1 %v5793_v13  ;;  %v5817_v12 = vcombine.high %v1727_v61, %v1731_v62  ;;  %v1734_v13 = vld [vmem:[%s7152_s9 + $0xe50] sm:$0xff]  ;;  %v1779_v61 = vld [vmem:[%s7152_s9 + $0xfb8] sm:$0xff] }
 0x2f3   : > { %v4593_v2 = vpop.f32.mrb[0].mxu0  ;;  %v4765_v19 = vpop.f32.mrb[0].mxu1  ;;  %v5823_v25 = vcombine.high %v1734_v13, %v1738_v14 }
 0x2f4   : > { %v5897_v18 = vadd.f32 %v4593_v2, %v1793_v16  ;;  %v4595_v36 = vpop.f32.mrb[1].mxu0  ;;  %v5901_v40 = vadd.f32 %v4765_v19, %v1801_v21  ;;  %v4767_v42 = vpop.f32.mrb[1].mxu1  ;;  %v5822_v2 = vcombine.low %v1734_v13, %v1738_v14  ;;  %v5833_v19 = vcombine.high %v1743_v31, %v1747_v34 }
 0x2f5   : > { %v5898_v41 = vadd.f32 %v4595_v36, %v1797_v22  ;;  %v4597_v43 = vpop.f32.mrb[2].mxu0  ;;  %4914 = vmatpush1.bf16.msra.mxu0 %v5790_v23  ;;  %v5902_v30 = vadd.f32 %v4767_v42, %v1805_v27  ;;  %v4769_v50 = vpop.f32.mrb[2].mxu1  ;;  %5086 = vmatpush1.bf16.msra.mxu1 %v5792_v28  ;;  %v1742_v28 = vld [vmem:[%s7152_s9 + $0xe90] sm:$0xff]  ;;  %v1808_v14 = vsub.s32 4, %v7713_v60 }
 0x2f6   : > { %v5118_v26 = vmul.f32 0.2, %v5897_v18  ;;  %v5899_v47 = vadd.f32 %v4597_v43, %v1793_v16  ;;  %v4599_v51 = vpop.f32.mrb[3].mxu0  ;;  %4915 = vmatprep.subr.bf16.mxu0 %v5799_v29  ;;  %v5120_v33 = vmul.f32 0.2, %v5901_v40  ;;  %v5903_v53 = vadd.f32 %v4769_v50, %v1801_v21  ;;  %v4771_v38 = vpop.f32.mrb[3].mxu1  ;;  %5087 = vmatprep.subr.bf16.mxu1 %v5801_v35 }
 0x2f7   : > { %v5119_v52 = vmul.f32 0.2, %v5898_v41  ;;  %v5900_v55 = vadd.f32 %v4599_v51, %v1797_v22  ;;  %v5121_v58 = vmul.f32 0.2, %v5902_v30  ;;  %v5904_v54 = vadd.f32 %v4771_v38, %v1805_v27  ;;  %v1746_v29 = vld [vmem:[%s7152_s9 + $0xeb0] sm:$0xff] }
 0x2f8   : > { %v5134_v57 = vmax.f32 %v5897_v18, %v5118_v26  ;;  %v5126_v59 = vmul.f32 0.2, %v5899_v47  ;;  %v5136_v63 = vmax.f32 %v5901_v40, %v5120_v33  ;;  %v5128_v4 = vmul.f32 0.2, %v5903_v53  ;;  %v1750_v36 = vld [vmem:[%s7152_s9 + $0xed0] sm:$0xff]  ;;  %v1759_v26 = vld [vmem:[%s7152_s9 + $0xf18] sm:$0xff] }
 0x2f9   : > { %v5135_v0 = vmax.f32 %v5898_v41, %v5119_v52  ;;  %v5127_v5 = vmul.f32 0.2, %v5900_v55  ;;  %4916 = vmatpush1.bf16.msra.mxu0 %v5798_v3  ;;  %v5137_v6 = vmax.f32 %v5902_v30, %v5121_v58  ;;  %v5129_v8 = vmul.f32 0.2, %v5904_v54  ;;  %5088 = vmatpush1.bf16.msra.mxu1 %v5800_v37  ;;  %v1754_v3 = vld [vmem:[%s7152_s9 + $0xef0] sm:$0xff]  ;;  %v1751_v37 = vld [vmem:[%s7152_s9 + $0xed8] sm:$0xff] }
 0x2fa   : > { %v5142_v7 = vmax.f32 %v5899_v47, %v5126_v59  ;;  %4917 = vmatprep.subr.bf16.mxu0 %v5807_v39  ;;  %v5144_v48 = vmax.f32 %v5903_v53, %v5128_v4  ;;  %5089 = vmatprep.subr.bf16.mxu1 %v5809_v46  ;;  %v5814_v22 = vcombine.low %v1726_v32, %v1730_v56  ;;  %v1755_v39 = vld [vmem:[%s7152_s9 + $0xef8] sm:$0xff]  ;;  %v1766_v32 = vld [vmem:[%s7152_s9 + $0xf50] sm:$0xff] }
 0x2fb   : > { %v5888_v11 = vpack.c.bf16 %v5135_v0, %v5134_v57  ;;  %v5143_v49 = vmax.f32 %v5900_v55, %v5127_v5  ;;  %v5889_v15 = vpack.c.bf16 %v5137_v6, %v5136_v63  ;;  %v5145_v16 = vmax.f32 %v5904_v54, %v5129_v8  ;;  %v1763_v30 = vld [vmem:[%s7152_s9 + $0xf38] sm:$0xff]  ;;  %v1770_v33 = vld [vmem:[%s7152_s9 + $0xf70] sm:$0xff] }
 0x2fc   : > { %v5825_v27 = vcombine.high %v1735_v17, %v1739_v20  ;;  %v5824_v35 = vcombine.low %v1735_v17, %v1739_v20  ;;  %v5831_v18 = vcombine.high %v1742_v28, %v1746_v29  ;;  %v5830_v40 = vcombine.low %v1742_v28, %v1746_v29  ;;  %v1767_v52 = vld [vmem:[%s7152_s9 + $0xf58] sm:$0xff]  ;;  %v1774_v58 = vld [vmem:[%s7152_s9 + $0xf90] sm:$0xff] }
 0x2fd   : > { %5198 = vst [vmem:[%s7769_s12] sm:$0xff] %v5888_v11  ;;  %v5892_v21 = vpack.c.bf16 %v5143_v49, %v5142_v7  ;;  %4918 = vmatpush1.bf16.msra.mxu0 %v5806_v44  ;;  %5199 = vst [vmem:[%s7769_s12 + $0x8] sm:$0xff] %v5889_v15  ;;  %v5893_v23 = vpack.c.bf16 %v5145_v16, %v5144_v48  ;;  %5090 = vmatpush1.bf16.msra.mxu1 %v5808_v45  ;;  %v1758_v44 = vld [vmem:[%s7152_s9 + $0xf10] sm:$0xff]  ;;  %v1771_v53 = vld [vmem:[%s7152_s9 + $0xf78] sm:$0xff]  ;;  %v1816_v15 = vsub.s32 6, %v7713_v60 }
 0x2fe   : > { %4919 = vmatprep.subr.bf16.mxu0 %v5815_v10  ;;  %5091 = vmatprep.subr.bf16.mxu1 %v5817_v12  ;;  %v5832_v41 = vcombine.low %v1743_v31, %v1747_v34  ;;  %v5839_v42 = vcombine.high %v1750_v36, %v1754_v3  ;;  %v5841_v43 = vcombine.high %v1751_v37, %v1755_v39  ;;  %v1762_v45 = vld [vmem:[%s7152_s9 + $0xf30] sm:$0xff]  ;;  %v1775_v54 = vld [vmem:[%s7152_s9 + $0xf98] sm:$0xff]  ;;  %v1812_v16 = vsub.s32 5, %v7713_v60 }
 0x2ff   : > { %5202 = vst [vmem:[%s7769_s12 + $0x20] sm:$0xff] %v5892_v21  ;;  %5203 = vst [vmem:[%s7769_s12 + $0x28] sm:$0xff] %v5893_v23  ;;  %v5838_v47 = vcombine.low %v1750_v36, %v1754_v3  ;;  %v5840_v50 = vcombine.low %v1751_v37, %v1755_v39  ;;  %v5847_v51 = vcombine.high %v1758_v44, %v1762_v45  ;;  %v1778_v59 = vld [vmem:[%s7152_s9 + $0xfb0] sm:$0xff]  ;;  %v1783_v7 = vld [vmem:[%s7152_s9 + $0xfd8] sm:$0xff]  ;;  %v1820_v17 = vsub.s32 7, %v7713_v60 }
 0x300   : > { %v5849_v46 = vcombine.high %v1759_v26, %v1763_v30  ;;  %v5846_v55 = vcombine.low %v1758_v44, %v1762_v45  ;;  %v5848_v38 = vcombine.low %v1759_v26, %v1763_v30  ;;  %v5855_v56 = vcombine.high %v1766_v32, %v1770_v33  ;;  %v1782_v5 = vld [vmem:[%s7152_s9 + $0xfd0] sm:$0xff]  ;;  %v1787_v8 = vld [vmem:[%s7152_s9 + $0xff8] sm:$0xff] }
 0x301   : > { %4920 = vmatpush1.bf16.msra.mxu0 %v5814_v22  ;;  %5092 = vmatpush1.bf16.msra.mxu1 %v5816_v24  ;;  %v5857_v57 = vcombine.high %v1767_v52, %v1771_v53  ;;  %v5854_v62 = vcombine.low %v1766_v32, %v1770_v33  ;;  %v5856_v63 = vcombine.low %v1767_v52, %v1771_v53  ;;  %v1786_v6 = vld [vmem:[%s7152_s9 + $0xff0] sm:$0xff] }
 0x302   : > { %4921 = vmatprep.subr.bf16.mxu0 %v5823_v25  ;;  %5093 = vmatprep.subr.bf16.mxu1 %v5825_v27  ;;  %v5863_v0 = vcombine.high %v1774_v58, %v1778_v59  ;;  %v5865_v4 = vcombine.high %v1775_v54, %v1779_v61  ;;  %v5862_v10 = vcombine.low %v1774_v58, %v1778_v59 }
 0x303   : > { %v5864_v11 = vcombine.low %v1775_v54, %v1779_v61  ;;  %v5871_v48 = vcombine.high %v1782_v5, %v1786_v6  ;;  %v5873_v49 = vcombine.high %v1783_v7, %v1787_v8  ;;  %v5870_v12 = vcombine.low %v1782_v5, %v1786_v6 }
 0x304   : > { %v5872_v13 = vcombine.low %v1783_v7, %v1787_v8  ;;  %v1809_v20 = vrot.slane %v7723_v9, %v1808_v14  ;;  %v1817_v21 = vrot.slane %v7723_v9, %v1816_v15  ;;  %v1813_v22 = vrot.slane %v7723_v9, %v1812_v16 }
 0x305   : > { %4922 = vmatpush1.bf16.msra.mxu0 %v5822_v2  ;;  %5094 = vmatpush1.bf16.msra.mxu1 %v5824_v35  ;;  %v1821_v23 = vrot.slane %v7723_v9, %v1820_v17 }
 0x306   : > { %4923 = vmatprep.subr.bf16.mxu0 %v5831_v18  ;;  %5095 = vmatprep.subr.bf16.mxu1 %v5833_v19  ;;  %v5239_v54 = vld [vmem:[%s7769_s12 + $0x20] sm:$0xff] (%p6096_p6)  ;;  %v5241_v61 = vld [vmem:[%s7769_s12 + $0x28] sm:$0xff] (%p6096_p6) }
 0x307   : > { %5240 = vst [vmem:[%s5218_s18 + $0x40] sm:$0xff] (%p6096_p6), %v5239_v54  ;;  %5242 = vst [vmem:[%s5218_s18 + $0x48] sm:$0xff] (%p6096_p6), %v5241_v61 }
 0x309   : > { %4924 = vmatpush1.bf16.msra.mxu0 %v5830_v40  ;;  %5096 = vmatpush1.bf16.msra.mxu1 %v5832_v41 }
 0x30a   : > { %4925 = vmatprep.subr.bf16.mxu0 %v5839_v42  ;;  %5097 = vmatprep.subr.bf16.mxu1 %v5841_v43 }
 0x30d   : > { %4926 = vmatpush1.bf16.msra.mxu0 %v5838_v47  ;;  %5098 = vmatpush1.bf16.msra.mxu1 %v5840_v50 }
 0x30e   : > { %4927 = vmatprep.subr.bf16.mxu0 %v5847_v51  ;;  %5099 = vmatprep.subr.bf16.mxu1 %v5849_v46 }
 0x311   : > { %4928 = vmatpush1.bf16.msra.mxu0 %v5846_v55  ;;  %5100 = vmatpush1.bf16.msra.mxu1 %v5848_v38 }
 0x312   : > { %4929 = vmatprep.subr.bf16.mxu0 %v5855_v56  ;;  %5101 = vmatprep.subr.bf16.mxu1 %v5857_v57  ;;  %v5231_v56 = vld [vmem:[%s7769_s12] sm:$0xff] (%p6096_p6)  ;;  %v5233_v57 = vld [vmem:[%s7769_s12 + $0x8] sm:$0xff] (%p6096_p6) }
 0x313   : > { %5232 = vst [vmem:[%s5218_s18] sm:$0xff] (%p6096_p6), %v5231_v56  ;;  %5234 = vst [vmem:[%s5218_s18 + $0x8] sm:$0xff] (%p6096_p6), %v5233_v57 }
 0x315   : > { %4930 = vmatpush1.bf16.msra.mxu0 %v5854_v62  ;;  %5102 = vmatpush1.bf16.msra.mxu1 %v5856_v63 }
 0x316   : > { %4931 = vmatprep.subr.bf16.mxu0 %v5863_v0  ;;  %5103 = vmatprep.subr.bf16.mxu1 %v5865_v4 }
 0x319   : > { %4932 = vmatpush1.bf16.msra.mxu0 %v5862_v10  ;;  %5104 = vmatpush1.bf16.msra.mxu1 %v5864_v11 }
 0x31a   : > { %4933 = vmatprep.subr.bf16.mxu0 %v5871_v48  ;;  %5105 = vmatprep.subr.bf16.mxu1 %v5873_v49 }
 0x31d   : > { %4934 = vmatpush1.bf16.msra.mxu0 %v5870_v12  ;;  %5106 = vmatpush1.bf16.msra.mxu1 %v5872_v13 }
 0x320   : > { %4936 = vmatmul.mubr.bf16.vlgmr.msra.gmra.mrb[4].mxu0 %v7482_v1  ;;  %5108 = vmatmul.mubr.bf16.vlgmr.msra.gmra.mrb[4].mxu1 %v7482_v1 }
 0x3f3   : > { %v4937_v24 = vpop.f32.mrb[4].mxu0  ;;  %v5109_v27 = vpop.f32.mrb[4].mxu1 }
 0x3f4   : > { %v5905_v25 = vadd.f32 %v4937_v24, %v1809_v20  ;;  %v4939_v1 = vpop.f32.mrb[5].mxu0  ;;  %v5909_v28 = vadd.f32 %v5109_v27, %v1817_v21  ;;  %v5111_v31 = vpop.f32.mrb[5].mxu1 }
 0x3f5   : > { %v5906_v29 = vadd.f32 %v4939_v1, %v1813_v22  ;;  %v4941_v34 = vpop.f32.mrb[6].mxu0  ;;  %v5910_v35 = vadd.f32 %v5111_v31, %v1821_v23  ;;  %v5113_v60 = vpop.f32.mrb[6].mxu1 }
 0x3f6   : > { %v5122_v2 = vmul.f32 0.2, %v5905_v25  ;;  %v5907_v18 = vadd.f32 %v4941_v34, %v1809_v20  ;;  %v4943_v19 = vpop.f32.mrb[7].mxu0  ;;  %v5124_v36 = vmul.f32 0.2, %v5909_v28  ;;  %v5911_v37 = vadd.f32 %v5113_v60, %v1817_v21  ;;  %v5115_v40 = vpop.f32.mrb[7].mxu1 }
 0x3f7   : > { %v5123_v3 = vmul.f32 0.2, %v5906_v29  ;;  %v5908_v39 = vadd.f32 %v4943_v19, %v1813_v22  ;;  %v5125_v9 = vmul.f32 0.2, %v5910_v35  ;;  %v5912_v43 = vadd.f32 %v5115_v40, %v1821_v23 }
 0x3f8   : > { %v5138_v41 = vmax.f32 %v5905_v25, %v5122_v2  ;;  %v5130_v42 = vmul.f32 0.2, %v5907_v18  ;;  %v5140_v44 = vmax.f32 %v5909_v28, %v5124_v36  ;;  %v5132_v26 = vmul.f32 0.2, %v5911_v37 }
 0x3f9   : > { %v5139_v45 = vmax.f32 %v5906_v29, %v5123_v3  ;;  %v5131_v30 = vmul.f32 0.2, %v5908_v39  ;;  %v5141_v47 = vmax.f32 %v5910_v35, %v5125_v9  ;;  %v5133_v51 = vmul.f32 0.2, %v5912_v43  ;;  %5212 = sbr.rel (!%p6096_p6) target bundleno = 1032 (0x408), region = 59 }
 0x3fa   : > { %v5146_v50 = vmax.f32 %v5907_v18, %v5130_v42  ;;  %v5148_v32 = vmax.f32 %v5911_v37, %v5132_v26 }
 0x3fb   : > { %v5890_v46 = vpack.c.bf16 %v5139_v45, %v5138_v41  ;;  %v5147_v33 = vmax.f32 %v5908_v39, %v5131_v30  ;;  %v5891_v52 = vpack.c.bf16 %v5141_v47, %v5140_v44  ;;  %v5149_v53 = vmax.f32 %v5912_v43, %v5133_v51 }
 0x3fd   : > { %5200 = vst [vmem:[%s7769_s12 + $0x10] sm:$0xff] %v5890_v46  ;;  %v5894_v55 = vpack.c.bf16 %v5147_v33, %v5146_v50  ;;  %5201 = vst [vmem:[%s7769_s12 + $0x18] sm:$0xff] %v5891_v52  ;;  %v5895_v38 = vpack.c.bf16 %v5149_v53, %v5148_v32 }
 0x3ff   : > { %5204 = vst [vmem:[%s7769_s12 + $0x30] sm:$0xff] %v5894_v55  ;;  %5205 = vst [vmem:[%s7769_s12 + $0x38] sm:$0xff] %v5895_v38 }
 0x404   : > { %v5235_v58 = vld [vmem:[%s7769_s12 + $0x10] sm:$0xff]  ;;  %v5237_v59 = vld [vmem:[%s7769_s12 + $0x18] sm:$0xff] }
 0x405   : > { %5236 = vst [vmem:[%s5218_s18 + $0x10] sm:$0xff] %v5235_v58  ;;  %5238 = vst [vmem:[%s5218_s18 + $0x18] sm:$0xff] %v5237_v59 }
 0x406   : > { %v5243_v62 = vld [vmem:[%s7769_s12 + $0x30] sm:$0xff]  ;;  %v5245_v63 = vld [vmem:[%s7769_s12 + $0x38] sm:$0xff] }
 0x407   : > { %5244 = vst [vmem:[%s5218_s18 + $0x50] sm:$0xff] %v5243_v62  ;;  %5246 = vst [vmem:[%s5218_s18 + $0x58] sm:$0xff] %v5245_v63 }
 0x408 PF: > { %s13_s16 = sadd.s32 1, %s6039_s16   ;;  %s7848_s12 = smov %s6027_s13 }
 0x409   : > { %p10_p12 = scmp.ge.s32.totalorder %s13_s16, 4   ;;  %s7849_s13 = smov %s6101_s22 }
 0x40a   : > { %s7850_s14 = smov %s6035_s15  ;;  %s7851_s15 = smov %s7853_s17 }
 0x40b   :  { %12 = sbr.rel (!%p10_p12) target bundleno = 3 (0x3), region = 119 }

// kernel: network_forward.16
= control target key start
LH: loop header
LB: loop body
LE: loop exit
PB: predicated region body
PF: predicated region fallthrough
CT: control target
= control target key end

     0   :  { %s10102_s1 = inlined_call_operand.vmem [shape: bf16[2048,512], index: 1, kind: input, shape index: {}]   ;;  %s10103_s0 = inlined_call_operand.vmem [shape: bf16[16,2048], index: 0, kind: input, shape index: {}]   ;;  %s10104_s3 = inlined_call_operand.vmem [shape: bf16[512,1024], index: 3, kind: input, shape index: {}]   ;;  %s10105_s2 = inlined_call_operand.vmem [shape: f32[1,512], index: 2, kind: input, shape index: {}]   ;;  %s10106_s4 = inlined_call_operand.vmem [shape: f32[1,1024], index: 4, kind: input, shape index: {}]   ;;  %s10107_s5 = inlined_call_operand.vmem [shape: bf16[16,1024], index: 5, kind: output, shape index: {}]  }
   0x1   :  { %v6804_v0 = vld [vmem:[%s10102_s1 + $0x4] ss:$16 sps:$4 sm:$0xff]   ;;  %v6806_v1 = vld [vmem:[%s10102_s1 + $0xc] ss:$16 sps:$4 sm:$0xff]   ;;  %v6808_v2 = vld [vmem:[%s10102_s1] ss:$16 sps:$4 sm:$0xff]  }
   0x2   :  { %3210 = vmatprep.subr.bf16.mxu0 %v6804_v0  ;;  %v6809_v3 = vld [vmem:[%s10102_s1 + $0x8] ss:$16 sps:$4 sm:$0xff]   ;;  %3554 = vmatprep.subr.bf16.mxu1 %v6806_v1  ;;  %v6810_v4 = vld [vmem:[%s10102_s1 + $0x24] ss:$16 sps:$4 sm:$0xff]   ;;  %v6812_v5 = vld [vmem:[%s10102_s1 + $0x2c] ss:$16 sps:$4 sm:$0xff]  }
   0x3   :  { %3211 = vmatpush1.bf16.msra.mxu0 %v6808_v2  ;;  %3555 = vmatpush1.bf16.msra.mxu1 %v6809_v3  ;;  %v6814_v6 = vld [vmem:[%s10102_s1 + $0x20] ss:$16 sps:$4 sm:$0xff]   ;;  %v6815_v7 = vld [vmem:[%s10102_s1 + $0x28] ss:$16 sps:$4 sm:$0xff]   ;;  %v6816_v8 = vld [vmem:[%s10102_s1 + $0x44] ss:$16 sps:$4 sm:$0xff]  }
   0x4   :  { %3212 = vmatprep.subr.bf16.mxu0 %v6810_v4  ;;  %3556 = vmatprep.subr.bf16.mxu1 %v6812_v5  ;;  %v6818_v9 = vld [vmem:[%s10102_s1 + $0x4c] ss:$16 sps:$4 sm:$0xff]   ;;  %v6820_v10 = vld [vmem:[%s10102_s1 + $0x40] ss:$16 sps:$4 sm:$0xff]   ;;  %v6821_v11 = vld [vmem:[%s10102_s1 + $0x48] ss:$16 sps:$4 sm:$0xff]  }
   0x5   :  { %v6822_v12 = vld [vmem:[%s10102_s1 + $0x64] ss:$16 sps:$4 sm:$0xff]   ;;  %v6824_v13 = vld [vmem:[%s10102_s1 + $0x6c] ss:$16 sps:$4 sm:$0xff]   ;;  %v6826_v14 = vld [vmem:[%s10102_s1 + $0x60] ss:$16 sps:$4 sm:$0xff]  }
   0x6   :  { %v6827_v15 = vld [vmem:[%s10102_s1 + $0x68] ss:$16 sps:$4 sm:$0xff]   ;;  %v6828_v16 = vld [vmem:[%s10102_s1 + $0x84] ss:$16 sps:$4 sm:$0xff]   ;;  %v6830_v17 = vld [vmem:[%s10102_s1 + $0x8c] ss:$16 sps:$4 sm:$0xff]  }
   0x7   :  { %3213 = vmatpush1.bf16.msra.mxu0 %v6814_v6  ;;  %3557 = vmatpush1.bf16.msra.mxu1 %v6815_v7  ;;  %v6832_v18 = vld [vmem:[%s10102_s1 + $0x80] ss:$16 sps:$4 sm:$0xff]   ;;  %v6833_v19 = vld [vmem:[%s10102_s1 + $0x88] ss:$16 sps:$4 sm:$0xff]   ;;  %v6834_v20 = vld [vmem:[%s10102_s1 + $0xa4] ss:$16 sps:$4 sm:$0xff]  }
   0x8   :  { %3214 = vmatprep.subr.bf16.mxu0 %v6816_v8  ;;  %3558 = vmatprep.subr.bf16.mxu1 %v6818_v9  ;;  %v6836_v21 = vld [vmem:[%s10102_s1 + $0xac] ss:$16 sps:$4 sm:$0xff]   ;;  %v6838_v22 = vld [vmem:[%s10102_s1 + $0xa0] ss:$16 sps:$4 sm:$0xff]   ;;  %v6839_v23 = vld [vmem:[%s10102_s1 + $0xa8] ss:$16 sps:$4 sm:$0xff]  }
   0x9   :  { %v6840_v24 = vld [vmem:[%s10102_s1 + $0xc4] ss:$16 sps:$4 sm:$0xff]   ;;  %v6842_v25 = vld [vmem:[%s10102_s1 + $0xcc] ss:$16 sps:$4 sm:$0xff]   ;;  %v6844_v26 = vld [vmem:[%s10102_s1 + $0xc0] ss:$16 sps:$4 sm:$0xff]  }
   0xa   :  { %v6845_v27 = vld [vmem:[%s10102_s1 + $0xc8] ss:$16 sps:$4 sm:$0xff]   ;;  %v6846_v28 = vld [vmem:[%s10102_s1 + $0xe4] ss:$16 sps:$4 sm:$0xff]   ;;  %v6848_v29 = vld [vmem:[%s10102_s1 + $0xec] ss:$16 sps:$4 sm:$0xff]  }
   0xb   :  { %3215 = vmatpush1.bf16.msra.mxu0 %v6820_v10  ;;  %3559 = vmatpush1.bf16.msra.mxu1 %v6821_v11  ;;  %v6850_v30 = vld [vmem:[%s10102_s1 + $0xe0] ss:$16 sps:$4 sm:$0xff]   ;;  %v6851_v31 = vld [vmem:[%s10102_s1 + $0xe8] ss:$16 sps:$4 sm:$0xff]   ;;  %v6852_v32 = vld [vmem:[%s10102_s1 + $0x104] ss:$16 sps:$4 sm:$0xff]  }
   0xc   :  { %3216 = vmatprep.subr.bf16.mxu0 %v6822_v12  ;;  %3560 = vmatprep.subr.bf16.mxu1 %v6824_v13  ;;  %v6854_v33 = vld [vmem:[%s10102_s1 + $0x10c] ss:$16 sps:$4 sm:$0xff]   ;;  %v6856_v34 = vld [vmem:[%s10102_s1 + $0x100] ss:$16 sps:$4 sm:$0xff]   ;;  %v6857_v35 = vld [vmem:[%s10102_s1 + $0x108] ss:$16 sps:$4 sm:$0xff]  }
   0xd   :  { %v6858_v36 = vld [vmem:[%s10102_s1 + $0x124] ss:$16 sps:$4 sm:$0xff]   ;;  %v6860_v37 = vld [vmem:[%s10102_s1 + $0x12c] ss:$16 sps:$4 sm:$0xff]   ;;  %v6862_v38 = vld [vmem:[%s10102_s1 + $0x120] ss:$16 sps:$4 sm:$0xff]  }
   0xe   :  { %v6863_v39 = vld [vmem:[%s10102_s1 + $0x128] ss:$16 sps:$4 sm:$0xff]   ;;  %v6864_v40 = vld [vmem:[%s10102_s1 + $0x144] ss:$16 sps:$4 sm:$0xff]   ;;  %v6866_v41 = vld [vmem:[%s10102_s1 + $0x14c] ss:$16 sps:$4 sm:$0xff]  }
   0xf   :  { %3217 = vmatpush1.bf16.msra.mxu0 %v6826_v14  ;;  %3561 = vmatpush1.bf16.msra.mxu1 %v6827_v15  ;;  %v6868_v42 = vld [vmem:[%s10102_s1 + $0x140] ss:$16 sps:$4 sm:$0xff]   ;;  %v6869_v43 = vld [vmem:[%s10102_s1 + $0x148] ss:$16 sps:$4 sm:$0xff]   ;;  %v6870_v44 = vld [vmem:[%s10102_s1 + $0x164] ss:$16 sps:$4 sm:$0xff]  }
  0x10   :  { %3218 = vmatprep.subr.bf16.mxu0 %v6828_v16  ;;  %3562 = vmatprep.subr.bf16.mxu1 %v6830_v17  ;;  %v6872_v45 = vld [vmem:[%s10102_s1 + $0x16c] ss:$16 sps:$4 sm:$0xff]   ;;  %v20_v46 = vld [vmem:[%s10103_s0] sm:$0xff]  ;;  %v6875_v49 = vld [vmem:[%s10102_s1 + $0x168] ss:$16 sps:$4 sm:$0xff]  }
  0x11   :  { %v28_v47 = vld [vmem:[%s10103_s0 + $0x40] sm:$0xff]  ;;  %v6878_v52 = vld [vmem:[%s10102_s1 + $0x18c] ss:$16 sps:$4 sm:$0xff]   ;;  %v6881_v54 = vld [vmem:[%s10102_s1 + $0x188] ss:$16 sps:$4 sm:$0xff]  }
  0x12   :  { %v6874_v48 = vld [vmem:[%s10102_s1 + $0x160] ss:$16 sps:$4 sm:$0xff]   ;;  %v5909_v50 = vcombine.high %v20_v46, %v28_v47  ;;  %v6876_v51 = vld [vmem:[%s10102_s1 + $0x184] ss:$16 sps:$4 sm:$0xff]   ;;  %v6884_v56 = vld [vmem:[%s10102_s1 + $0x1ac] ss:$16 sps:$4 sm:$0xff]   ;;  %v5908_v5 = vcombine.low %v20_v46, %v28_v47 }
  0x13   :  { %3219 = vmatpush1.bf16.msra.mxu0 %v6832_v18  ;;  %3563 = vmatpush1.bf16.msra.mxu1 %v6833_v19  ;;  %v6880_v53 = vld [vmem:[%s10102_s1 + $0x180] ss:$16 sps:$4 sm:$0xff]   ;;  %v6882_v55 = vld [vmem:[%s10102_s1 + $0x1a4] ss:$16 sps:$4 sm:$0xff]   ;;  %v6887_v58 = vld [vmem:[%s10102_s1 + $0x1a8] ss:$16 sps:$4 sm:$0xff]  }
  0x14   :  { %3220 = vmatprep.subr.bf16.mxu0 %v6834_v20  ;;  %3564 = vmatprep.subr.bf16.mxu1 %v6836_v21  ;;  %v6886_v57 = vld [vmem:[%s10102_s1 + $0x1a0] ss:$16 sps:$4 sm:$0xff]   ;;  %v6888_v59 = vld [vmem:[%s10102_s1 + $0x1c4] ss:$16 sps:$4 sm:$0xff]   ;;  %v6890_v60 = vld [vmem:[%s10102_s1 + $0x1cc] ss:$16 sps:$4 sm:$0xff]  }
  0x15   :  { %3242 = vmatprep.mubr.bf16.mxu0 %v5909_v50  ;;  %3586 = vmatprep.mubr.bf16.mxu1 %v5909_v50  ;;  %v6892_v61 = vld [vmem:[%s10102_s1 + $0x1c0] ss:$16 sps:$4 sm:$0xff]   ;;  %v6893_v62 = vld [vmem:[%s10102_s1 + $0x1c8] ss:$16 sps:$4 sm:$0xff]   ;;  %v6894_v63 = vld [vmem:[%s10102_s1 + $0x1e4] ss:$16 sps:$4 sm:$0xff]  }
  0x16   :  { %v6896_v0 = vld [vmem:[%s10102_s1 + $0x1ec] ss:$16 sps:$4 sm:$0xff]   ;;  %v6898_v1 = vld [vmem:[%s10102_s1 + $0x1e0] ss:$16 sps:$4 sm:$0xff]   ;;  %v6899_v2 = vld [vmem:[%s10102_s1 + $0x1e8] ss:$16 sps:$4 sm:$0xff]  }
  0x17   :  { %3221 = vmatpush1.bf16.msra.mxu0 %v6838_v22  ;;  %3565 = vmatpush1.bf16.msra.mxu1 %v6839_v23  ;;  %v6902_v3 = vld [vmem:[%s10102_s1 + $0x204] ss:$16 sps:$4 sm:$0xff]   ;;  %v6905_v4 = vld [vmem:[%s10102_s1 + $0x20c] ss:$16 sps:$4 sm:$0xff]   ;;  %v6900_v6 = vld [vmem:[%s10102_s1 + $0x200] ss:$16 sps:$4 sm:$0xff]  }
  0x18   :  { %3222 = vmatprep.subr.bf16.mxu0 %v6840_v24  ;;  %3566 = vmatprep.subr.bf16.mxu1 %v6842_v25  ;;  %v6903_v7 = vld [vmem:[%s10102_s1 + $0x208] ss:$16 sps:$4 sm:$0xff]   ;;  %v6908_v8 = vld [vmem:[%s10102_s1 + $0x224] ss:$16 sps:$4 sm:$0xff]   ;;  %v6911_v9 = vld [vmem:[%s10102_s1 + $0x22c] ss:$16 sps:$4 sm:$0xff]  }
  0x19   :  { %v6906_v10 = vld [vmem:[%s10102_s1 + $0x220] ss:$16 sps:$4 sm:$0xff]   ;;  %v6909_v11 = vld [vmem:[%s10102_s1 + $0x228] ss:$16 sps:$4 sm:$0xff]   ;;  %v6914_v12 = vld [vmem:[%s10102_s1 + $0x244] ss:$16 sps:$4 sm:$0xff]  }
  0x1a   :  { %v6917_v13 = vld [vmem:[%s10102_s1 + $0x24c] ss:$16 sps:$4 sm:$0xff]   ;;  %v6912_v14 = vld [vmem:[%s10102_s1 + $0x240] ss:$16 sps:$4 sm:$0xff]   ;;  %v6915_v15 = vld [vmem:[%s10102_s1 + $0x248] ss:$16 sps:$4 sm:$0xff]  }
  0x1b   :  { %3223 = vmatpush1.bf16.msra.mxu0 %v6844_v26  ;;  %3567 = vmatpush1.bf16.msra.mxu1 %v6845_v27  ;;  %v6920_v16 = vld [vmem:[%s10102_s1 + $0x264] ss:$16 sps:$4 sm:$0xff]   ;;  %v6923_v17 = vld [vmem:[%s10102_s1 + $0x26c] ss:$16 sps:$4 sm:$0xff]   ;;  %v6918_v18 = vld [vmem:[%s10102_s1 + $0x260] ss:$16 sps:$4 sm:$0xff]  }
  0x1c   :  { %3224 = vmatprep.subr.bf16.mxu0 %v6846_v28  ;;  %3568 = vmatprep.subr.bf16.mxu1 %v6848_v29  ;;  %v6921_v19 = vld [vmem:[%s10102_s1 + $0x268] ss:$16 sps:$4 sm:$0xff]   ;;  %v6926_v20 = vld [vmem:[%s10102_s1 + $0x284] ss:$16 sps:$4 sm:$0xff]   ;;  %v6929_v21 = vld [vmem:[%s10102_s1 + $0x28c] ss:$16 sps:$4 sm:$0xff]  }
  0x1d   :  { %v6924_v22 = vld [vmem:[%s10102_s1 + $0x280] ss:$16 sps:$4 sm:$0xff]   ;;  %v6927_v23 = vld [vmem:[%s10102_s1 + $0x288] ss:$16 sps:$4 sm:$0xff]   ;;  %v6932_v24 = vld [vmem:[%s10102_s1 + $0x2a4] ss:$16 sps:$4 sm:$0xff]  }
  0x1e   :  { %v6935_v25 = vld [vmem:[%s10102_s1 + $0x2ac] ss:$16 sps:$4 sm:$0xff]   ;;  %v6930_v26 = vld [vmem:[%s10102_s1 + $0x2a0] ss:$16 sps:$4 sm:$0xff]   ;;  %v6933_v27 = vld [vmem:[%s10102_s1 + $0x2a8] ss:$16 sps:$4 sm:$0xff]  }
  0x1f   :  { %3225 = vmatpush1.bf16.msra.mxu0 %v6850_v30  ;;  %3569 = vmatpush1.bf16.msra.mxu1 %v6851_v31  ;;  %v6938_v28 = vld [vmem:[%s10102_s1 + $0x2c4] ss:$16 sps:$4 sm:$0xff]   ;;  %v6941_v29 = vld [vmem:[%s10102_s1 + $0x2cc] ss:$16 sps:$4 sm:$0xff]   ;;  %v6957_v46 = vld [vmem:[%s10102_s1 + $0x328] ss:$16 sps:$4 sm:$0xff]  }
  0x20   :  { %3226 = vmatprep.subr.bf16.mxu0 %v6852_v32  ;;  %3570 = vmatprep.subr.bf16.mxu1 %v6854_v33  ;;  %v7881_v30 = vld [vmem:[%s10103_s0 + $0x8] sm:$0xff]  ;;  %v6936_v32 = vld [vmem:[%s10102_s1 + $0x2c0] ss:$16 sps:$4 sm:$0xff]   ;;  %v6962_v47 = vld [vmem:[%s10102_s1 + $0x344] ss:$16 sps:$4 sm:$0xff]  }
  0x21   :  { %v7886_v31 = vld [vmem:[%s10103_s0 + $0x48] sm:$0xff] }
  0x22   :  { %v6939_v33 = vld [vmem:[%s10102_s1 + $0x2c8] ss:$16 sps:$4 sm:$0xff]  }
  0x23   :  { %3227 = vmatpush1.bf16.msra.mxu0 %v6856_v34  ;;  %3571 = vmatpush1.bf16.msra.mxu1 %v6857_v35  ;;  %v5911_v34 = vcombine.high %v7881_v30, %v7886_v31  ;;  %v6944_v35 = vld [vmem:[%s10102_s1 + $0x2e4] ss:$16 sps:$4 sm:$0xff]   ;;  %v6963_v50 = vld [vmem:[%s10102_s1 + $0x348] ss:$16 sps:$4 sm:$0xff]  }
  0x24   :  { %3228 = vmatprep.subr.bf16.mxu0 %v6858_v36  ;;  %3572 = vmatprep.subr.bf16.mxu1 %v6860_v37  ;;  %v6947_v36 = vld [vmem:[%s10102_s1 + $0x2ec] ss:$16 sps:$4 sm:$0xff]   ;;  %v6942_v37 = vld [vmem:[%s10102_s1 + $0x2e0] ss:$16 sps:$4 sm:$0xff]  }
  0x27   :  { %3229 = vmatpush1.bf16.msra.mxu0 %v6862_v38  ;;  %3573 = vmatpush1.bf16.msra.mxu1 %v6863_v39  ;;  %v6945_v38 = vld [vmem:[%s10102_s1 + $0x2e8] ss:$16 sps:$4 sm:$0xff]   ;;  %v6950_v39 = vld [vmem:[%s10102_s1 + $0x304] ss:$16 sps:$4 sm:$0xff]  }
  0x28   :  { %3230 = vmatprep.subr.bf16.mxu0 %v6864_v40  ;;  %3574 = vmatprep.subr.bf16.mxu1 %v6866_v41  ;;  %v6953_v40 = vld [vmem:[%s10102_s1 + $0x30c] ss:$16 sps:$4 sm:$0xff]   ;;  %v6948_v41 = vld [vmem:[%s10102_s1 + $0x300] ss:$16 sps:$4 sm:$0xff]  }
  0x2b   :  { %3231 = vmatpush1.bf16.msra.mxu0 %v6868_v42  ;;  %3575 = vmatpush1.bf16.msra.mxu1 %v6869_v43  ;;  %v6951_v42 = vld [vmem:[%s10102_s1 + $0x308] ss:$16 sps:$4 sm:$0xff]   ;;  %v6956_v43 = vld [vmem:[%s10102_s1 + $0x324] ss:$16 sps:$4 sm:$0xff]  }
  0x2c   :  { %3232 = vmatprep.subr.bf16.mxu0 %v6870_v44  ;;  %3576 = vmatprep.subr.bf16.mxu1 %v6872_v45  ;;  %v6959_v44 = vld [vmem:[%s10102_s1 + $0x32c] ss:$16 sps:$4 sm:$0xff]   ;;  %v6954_v45 = vld [vmem:[%s10102_s1 + $0x320] ss:$16 sps:$4 sm:$0xff]  }
  0x2f   :  { %3233 = vmatpush1.bf16.msra.mxu0 %v6874_v48  ;;  %3577 = vmatpush1.bf16.msra.mxu1 %v6875_v49  ;;  %v6965_v48 = vld [vmem:[%s10102_s1 + $0x34c] ss:$16 sps:$4 sm:$0xff]   ;;  %v6960_v49 = vld [vmem:[%s10102_s1 + $0x340] ss:$16 sps:$4 sm:$0xff]  }
  0x30   :  { %3234 = vmatprep.subr.bf16.mxu0 %v6876_v51  ;;  %3578 = vmatprep.subr.bf16.mxu1 %v6878_v52  ;;  %v6968_v51 = vld [vmem:[%s10102_s1 + $0x364] ss:$16 sps:$4 sm:$0xff]   ;;  %v6971_v52 = vld [vmem:[%s10102_s1 + $0x36c] ss:$16 sps:$4 sm:$0xff]  }
  0x33   :  { %3235 = vmatpush1.bf16.msra.mxu0 %v6880_v53  ;;  %3579 = vmatpush1.bf16.msra.mxu1 %v6881_v54  ;;  %v6966_v53 = vld [vmem:[%s10102_s1 + $0x360] ss:$16 sps:$4 sm:$0xff]   ;;  %v6969_v54 = vld [vmem:[%s10102_s1 + $0x368] ss:$16 sps:$4 sm:$0xff]  }
  0x34   :  { %3236 = vmatprep.subr.bf16.mxu0 %v6882_v55  ;;  %3580 = vmatprep.subr.bf16.mxu1 %v6884_v56  ;;  %v6974_v55 = vld [vmem:[%s10102_s1 + $0x384] ss:$16 sps:$4 sm:$0xff]   ;;  %v6977_v56 = vld [vmem:[%s10102_s1 + $0x38c] ss:$16 sps:$4 sm:$0xff]  }
  0x37   :  { %3237 = vmatpush1.bf16.msra.mxu0 %v6886_v57  ;;  %3581 = vmatpush1.bf16.msra.mxu1 %v6887_v58  ;;  %v6972_v57 = vld [vmem:[%s10102_s1 + $0x380] ss:$16 sps:$4 sm:$0xff]   ;;  %v6975_v58 = vld [vmem:[%s10102_s1 + $0x388] ss:$16 sps:$4 sm:$0xff]  }
  0x38   :  { %3238 = vmatprep.subr.bf16.mxu0 %v6888_v59  ;;  %3582 = vmatprep.subr.bf16.mxu1 %v6890_v60  ;;  %v6980_v59 = vld [vmem:[%s10102_s1 + $0x3a4] ss:$16 sps:$4 sm:$0xff]   ;;  %v6983_v60 = vld [vmem:[%s10102_s1 + $0x3ac] ss:$16 sps:$4 sm:$0xff]  }
  0x3b   :  { %3239 = vmatpush1.bf16.msra.mxu0 %v6892_v61  ;;  %3583 = vmatpush1.bf16.msra.mxu1 %v6893_v62  ;;  %v6978_v61 = vld [vmem:[%s10102_s1 + $0x3a0] ss:$16 sps:$4 sm:$0xff]   ;;  %v6981_v62 = vld [vmem:[%s10102_s1 + $0x3a8] ss:$16 sps:$4 sm:$0xff]  }
  0x3c   :  { %3240 = vmatprep.subr.bf16.mxu0 %v6894_v63  ;;  %3584 = vmatprep.subr.bf16.mxu1 %v6896_v0  ;;  %v6986_v63 = vld [vmem:[%s10102_s1 + $0x3c4] ss:$16 sps:$4 sm:$0xff]   ;;  %v6989_v0 = vld [vmem:[%s10102_s1 + $0x3cc] ss:$16 sps:$4 sm:$0xff]  }
  0x3f   :  { %3241 = vmatpush1.bf16.msra.mxu0 %v6898_v1  ;;  %3585 = vmatpush1.bf16.msra.mxu1 %v6899_v2  ;;  %v6984_v1 = vld [vmem:[%s10102_s1 + $0x3c0] ss:$16 sps:$4 sm:$0xff]   ;;  %v6987_v2 = vld [vmem:[%s10102_s1 + $0x3c8] ss:$16 sps:$4 sm:$0xff]  }
  0x40   :  { %3253 = vmatprep.subr.bf16.mxu0 %v6902_v3  ;;  %3597 = vmatprep.subr.bf16.mxu1 %v6905_v4  ;;  %v6992_v3 = vld [vmem:[%s10102_s1 + $0x3e4] ss:$16 sps:$4 sm:$0xff]   ;;  %v6995_v4 = vld [vmem:[%s10102_s1 + $0x3ec] ss:$16 sps:$4 sm:$0xff]  }
  0x42   :  { %3243 = vmatmul.mubr.bf16.vlgmr.msra.gmra.mrb[0].mxu0 %v5908_v5  ;;  %3587 = vmatmul.mubr.bf16.vlgmr.msra.gmra.mrb[0].mxu1 %v5908_v5  ;;  %v6990_v5 = vld [vmem:[%s10102_s1 + $0x3e0] ss:$16 sps:$4 sm:$0xff]  }
  0x43   :  { %3254 = vmatpush1.bf16.msra.mxu0 %v6900_v6  ;;  %3598 = vmatpush1.bf16.msra.mxu1 %v6903_v7  ;;  %v6993_v6 = vld [vmem:[%s10102_s1 + $0x3e8] ss:$16 sps:$4 sm:$0xff]   ;;  %v6998_v7 = vld [vmem:[%s10102_s1 + $0x404] ss:$16 sps:$4 sm:$0xff]  }
  0x44   :  { %3255 = vmatprep.subr.bf16.mxu0 %v6908_v8  ;;  %3599 = vmatprep.subr.bf16.mxu1 %v6911_v9  ;;  %v7001_v8 = vld [vmem:[%s10102_s1 + $0x40c] ss:$16 sps:$4 sm:$0xff]   ;;  %v5910_v9 = vcombine.low %v7881_v30, %v7886_v31  ;;  %v7023_v30 = vld [vmem:[%s10102_s1 + $0x488] ss:$16 sps:$4 sm:$0xff]   ;;  %v7028_v31 = vld [vmem:[%s10102_s1 + $0x4a4] ss:$16 sps:$4 sm:$0xff]  }
  0x45   :  { %3285 = vmatprep.mubr.bf16.mxu0 %v5911_v34  ;;  %3629 = vmatprep.mubr.bf16.mxu1 %v5911_v34  ;;  %v7029_v34 = vld [vmem:[%s10102_s1 + $0x4a8] ss:$16 sps:$4 sm:$0xff]  }
  0x47   :  { %3256 = vmatpush1.bf16.msra.mxu0 %v6906_v10  ;;  %3600 = vmatpush1.bf16.msra.mxu1 %v6909_v11  ;;  %v6996_v10 = vld [vmem:[%s10102_s1 + $0x400] ss:$16 sps:$4 sm:$0xff]   ;;  %v6999_v11 = vld [vmem:[%s10102_s1 + $0x408] ss:$16 sps:$4 sm:$0xff]  }
  0x48   :  { %3257 = vmatprep.subr.bf16.mxu0 %v6914_v12  ;;  %3601 = vmatprep.subr.bf16.mxu1 %v6917_v13  ;;  %v7004_v12 = vld [vmem:[%s10102_s1 + $0x424] ss:$16 sps:$4 sm:$0xff]   ;;  %v7007_v13 = vld [vmem:[%s10102_s1 + $0x42c] ss:$16 sps:$4 sm:$0xff]  }
  0x4b   :  { %3258 = vmatpush1.bf16.msra.mxu0 %v6912_v14  ;;  %3602 = vmatpush1.bf16.msra.mxu1 %v6915_v15  ;;  %v8027_v14 = vld [vmem:[%s10103_s0 + $0x10] sm:$0xff] }
  0x4c   :  { %3259 = vmatprep.subr.bf16.mxu0 %v6920_v16  ;;  %3603 = vmatprep.subr.bf16.mxu1 %v6923_v17  ;;  %v8032_v15 = vld [vmem:[%s10103_s0 + $0x50] sm:$0xff] }
  0x4d   :  { %v5913_v16 = vcombine.high %v8027_v14, %v8032_v15  ;;  %v7002_v17 = vld [vmem:[%s10102_s1 + $0x420] ss:$16 sps:$4 sm:$0xff]  }
  0x4f   :  { %3260 = vmatpush1.bf16.msra.mxu0 %v6918_v18  ;;  %3604 = vmatpush1.bf16.msra.mxu1 %v6921_v19  ;;  %v7005_v18 = vld [vmem:[%s10102_s1 + $0x428] ss:$16 sps:$4 sm:$0xff]   ;;  %v7010_v19 = vld [vmem:[%s10102_s1 + $0x444] ss:$16 sps:$4 sm:$0xff]  }
  0x50   :  { %3261 = vmatprep.subr.bf16.mxu0 %v6926_v20  ;;  %3605 = vmatprep.subr.bf16.mxu1 %v6929_v21  ;;  %v7013_v20 = vld [vmem:[%s10102_s1 + $0x44c] ss:$16 sps:$4 sm:$0xff]   ;;  %v7008_v21 = vld [vmem:[%s10102_s1 + $0x440] ss:$16 sps:$4 sm:$0xff]  }
  0x53   :  { %3262 = vmatpush1.bf16.msra.mxu0 %v6924_v22  ;;  %3606 = vmatpush1.bf16.msra.mxu1 %v6927_v23  ;;  %v7011_v22 = vld [vmem:[%s10102_s1 + $0x448] ss:$16 sps:$4 sm:$0xff]   ;;  %v7016_v23 = vld [vmem:[%s10102_s1 + $0x464] ss:$16 sps:$4 sm:$0xff]  }
  0x54   :  { %3263 = vmatprep.subr.bf16.mxu0 %v6932_v24  ;;  %3607 = vmatprep.subr.bf16.mxu1 %v6935_v25  ;;  %v7019_v24 = vld [vmem:[%s10102_s1 + $0x46c] ss:$16 sps:$4 sm:$0xff]   ;;  %v7014_v25 = vld [vmem:[%s10102_s1 + $0x460] ss:$16 sps:$4 sm:$0xff]  }
  0x57   :  { %3264 = vmatpush1.bf16.msra.mxu0 %v6930_v26  ;;  %3608 = vmatpush1.bf16.msra.mxu1 %v6933_v27  ;;  %v7017_v26 = vld [vmem:[%s10102_s1 + $0x468] ss:$16 sps:$4 sm:$0xff]   ;;  %v7022_v27 = vld [vmem:[%s10102_s1 + $0x484] ss:$16 sps:$4 sm:$0xff]  }
  0x58   :  { %3265 = vmatprep.subr.bf16.mxu0 %v6938_v28  ;;  %3609 = vmatprep.subr.bf16.mxu1 %v6941_v29  ;;  %v7025_v28 = vld [vmem:[%s10102_s1 + $0x48c] ss:$16 sps:$4 sm:$0xff]   ;;  %v7020_v29 = vld [vmem:[%s10102_s1 + $0x480] ss:$16 sps:$4 sm:$0xff]  }
  0x5b   :  { %3266 = vmatpush1.bf16.msra.mxu0 %v6936_v32  ;;  %3610 = vmatpush1.bf16.msra.mxu1 %v6939_v33  ;;  %v7031_v32 = vld [vmem:[%s10102_s1 + $0x4ac] ss:$16 sps:$4 sm:$0xff]   ;;  %v7026_v33 = vld [vmem:[%s10102_s1 + $0x4a0] ss:$16 sps:$4 sm:$0xff]  }
  0x5c   :  { %3267 = vmatprep.subr.bf16.mxu0 %v6944_v35  ;;  %3611 = vmatprep.subr.bf16.mxu1 %v6947_v36  ;;  %v7034_v35 = vld [vmem:[%s10102_s1 + $0x4c4] ss:$16 sps:$4 sm:$0xff]   ;;  %v7037_v36 = vld [vmem:[%s10102_s1 + $0x4cc] ss:$16 sps:$4 sm:$0xff]  }
  0x5f   :  { %3268 = vmatpush1.bf16.msra.mxu0 %v6942_v37  ;;  %3612 = vmatpush1.bf16.msra.mxu1 %v6945_v38  ;;  %v7032_v37 = vld [vmem:[%s10102_s1 + $0x4c0] ss:$16 sps:$4 sm:$0xff]   ;;  %v7035_v38 = vld [vmem:[%s10102_s1 + $0x4c8] ss:$16 sps:$4 sm:$0xff]  }
  0x60   :  { %3269 = vmatprep.subr.bf16.mxu0 %v6950_v39  ;;  %3613 = vmatprep.subr.bf16.mxu1 %v6953_v40  ;;  %v7040_v39 = vld [vmem:[%s10102_s1 + $0x4e4] ss:$16 sps:$4 sm:$0xff]   ;;  %v7043_v40 = vld [vmem:[%s10102_s1 + $0x4ec] ss:$16 sps:$4 sm:$0xff]  }
  0x63   :  { %3270 = vmatpush1.bf16.msra.mxu0 %v6948_v41  ;;  %3614 = vmatpush1.bf16.msra.mxu1 %v6951_v42  ;;  %v7038_v41 = vld [vmem:[%s10102_s1 + $0x4e0] ss:$16 sps:$4 sm:$0xff]   ;;  %v7041_v42 = vld [vmem:[%s10102_s1 + $0x4e8] ss:$16 sps:$4 sm:$0xff]  }
  0x64   :  { %3271 = vmatprep.subr.bf16.mxu0 %v6956_v43  ;;  %3615 = vmatprep.subr.bf16.mxu1 %v6959_v44  ;;  %v7046_v43 = vld [vmem:[%s10102_s1 + $0x504] ss:$16 sps:$4 sm:$0xff]   ;;  %v7049_v44 = vld [vmem:[%s10102_s1 + $0x50c] ss:$16 sps:$4 sm:$0xff]  }
  0x67   :  { %3272 = vmatpush1.bf16.msra.mxu0 %v6954_v45  ;;  %3616 = vmatpush1.bf16.msra.mxu1 %v6957_v46  ;;  %v7044_v45 = vld [vmem:[%s10102_s1 + $0x500] ss:$16 sps:$4 sm:$0xff]   ;;  %v7047_v46 = vld [vmem:[%s10102_s1 + $0x508] ss:$16 sps:$4 sm:$0xff]  }
  0x68   :  { %3273 = vmatprep.subr.bf16.mxu0 %v6962_v47  ;;  %3617 = vmatprep.subr.bf16.mxu1 %v6965_v48  ;;  %v7052_v47 = vld [vmem:[%s10102_s1 + $0x524] ss:$16 sps:$4 sm:$0xff]   ;;  %v7055_v48 = vld [vmem:[%s10102_s1 + $0x52c] ss:$16 sps:$4 sm:$0xff]  }
  0x6b   :  { %3274 = vmatpush1.bf16.msra.mxu0 %v6960_v49  ;;  %3618 = vmatpush1.bf16.msra.mxu1 %v6963_v50  ;;  %v7050_v49 = vld [vmem:[%s10102_s1 + $0x520] ss:$16 sps:$4 sm:$0xff]   ;;  %v7053_v50 = vld [vmem:[%s10102_s1 + $0x528] ss:$16 sps:$4 sm:$0xff]  }
  0x6c   :  { %3275 = vmatprep.subr.bf16.mxu0 %v6968_v51  ;;  %3619 = vmatprep.subr.bf16.mxu1 %v6971_v52  ;;  %v7058_v51 = vld [vmem:[%s10102_s1 + $0x544] ss:$16 sps:$4 sm:$0xff]   ;;  %v7061_v52 = vld [vmem:[%s10102_s1 + $0x54c] ss:$16 sps:$4 sm:$0xff]  }
  0x6f   :  { %3276 = vmatpush1.bf16.msra.mxu0 %v6966_v53  ;;  %3620 = vmatpush1.bf16.msra.mxu1 %v6969_v54  ;;  %v7056_v53 = vld [vmem:[%s10102_s1 + $0x540] ss:$16 sps:$4 sm:$0xff]   ;;  %v7059_v54 = vld [vmem:[%s10102_s1 + $0x548] ss:$16 sps:$4 sm:$0xff]  }
  0x70   :  { %3277 = vmatprep.subr.bf16.mxu0 %v6974_v55  ;;  %3621 = vmatprep.subr.bf16.mxu1 %v6977_v56  ;;  %v7064_v55 = vld [vmem:[%s10102_s1 + $0x564] ss:$16 sps:$4 sm:$0xff]   ;;  %v7067_v56 = vld [vmem:[%s10102_s1 + $0x56c] ss:$16 sps:$4 sm:$0xff]  }
  0x73   :  { %3278 = vmatpush1.bf16.msra.mxu0 %v6972_v57  ;;  %3622 = vmatpush1.bf16.msra.mxu1 %v6975_v58  ;;  %v7062_v57 = vld [vmem:[%s10102_s1 + $0x560] ss:$16 sps:$4 sm:$0xff]   ;;  %v7065_v58 = vld [vmem:[%s10102_s1 + $0x568] ss:$16 sps:$4 sm:$0xff]  }
  0x74   :  { %3279 = vmatprep.subr.bf16.mxu0 %v6980_v59  ;;  %3623 = vmatprep.subr.bf16.mxu1 %v6983_v60  ;;  %v7070_v59 = vld [vmem:[%s10102_s1 + $0x584] ss:$16 sps:$4 sm:$0xff]   ;;  %v7073_v60 = vld [vmem:[%s10102_s1 + $0x58c] ss:$16 sps:$4 sm:$0xff]  }
  0x77   :  { %3280 = vmatpush1.bf16.msra.mxu0 %v6978_v61  ;;  %3624 = vmatpush1.bf16.msra.mxu1 %v6981_v62  ;;  %v7068_v61 = vld [vmem:[%s10102_s1 + $0x580] ss:$16 sps:$4 sm:$0xff]   ;;  %v7071_v62 = vld [vmem:[%s10102_s1 + $0x588] ss:$16 sps:$4 sm:$0xff]  }
  0x78   :  { %3281 = vmatprep.subr.bf16.mxu0 %v6986_v63  ;;  %3625 = vmatprep.subr.bf16.mxu1 %v6989_v0  ;;  %v7076_v63 = vld [vmem:[%s10102_s1 + $0x5a4] ss:$16 sps:$4 sm:$0xff]   ;;  %v7079_v0 = vld [vmem:[%s10102_s1 + $0x5ac] ss:$16 sps:$4 sm:$0xff]  }
  0x7b   :  { %3282 = vmatpush1.bf16.msra.mxu0 %v6984_v1  ;;  %3626 = vmatpush1.bf16.msra.mxu1 %v6987_v2  ;;  %v7074_v1 = vld [vmem:[%s10102_s1 + $0x5a0] ss:$16 sps:$4 sm:$0xff]   ;;  %v7077_v2 = vld [vmem:[%s10102_s1 + $0x5a8] ss:$16 sps:$4 sm:$0xff]  }
  0x7c   :  { %3283 = vmatprep.subr.bf16.mxu0 %v6992_v3  ;;  %3627 = vmatprep.subr.bf16.mxu1 %v6995_v4  ;;  %v7082_v3 = vld [vmem:[%s10102_s1 + $0x5c4] ss:$16 sps:$4 sm:$0xff]   ;;  %v7085_v4 = vld [vmem:[%s10102_s1 + $0x5cc] ss:$16 sps:$4 sm:$0xff]  }
  0x7f   :  { %3284 = vmatpush1.bf16.msra.mxu0 %v6990_v5  ;;  %3628 = vmatpush1.bf16.msra.mxu1 %v6993_v6  ;;  %v7080_v5 = vld [vmem:[%s10102_s1 + $0x5c0] ss:$16 sps:$4 sm:$0xff]   ;;  %v7083_v6 = vld [vmem:[%s10102_s1 + $0x5c8] ss:$16 sps:$4 sm:$0xff]  }
  0x80   :  { %3296 = vmatprep.subr.bf16.mxu0 %v6998_v7  ;;  %3640 = vmatprep.subr.bf16.mxu1 %v7001_v8  ;;  %v7088_v7 = vld [vmem:[%s10102_s1 + $0x5e4] ss:$16 sps:$4 sm:$0xff]   ;;  %v7091_v8 = vld [vmem:[%s10102_s1 + $0x5ec] ss:$16 sps:$4 sm:$0xff]  }
  0x82   :  { %3286 = vmatmul.mubr.bf16.vlgmr.msra.gmra.mrb[0].mxu0 %v5910_v9  ;;  %3630 = vmatmul.mubr.bf16.vlgmr.msra.gmra.mrb[0].mxu1 %v5910_v9  ;;  %v7086_v9 = vld [vmem:[%s10102_s1 + $0x5e0] ss:$16 sps:$4 sm:$0xff]  }
  0x83   :  { %3297 = vmatpush1.bf16.msra.mxu0 %v6996_v10  ;;  %3641 = vmatpush1.bf16.msra.mxu1 %v6999_v11  ;;  %v7089_v10 = vld [vmem:[%s10102_s1 + $0x5e8] ss:$16 sps:$4 sm:$0xff]   ;;  %v7094_v11 = vld [vmem:[%s10102_s1 + $0x604] ss:$16 sps:$4 sm:$0xff]  }
  0x84   :  { %3298 = vmatprep.subr.bf16.mxu0 %v7004_v12  ;;  %3642 = vmatprep.subr.bf16.mxu1 %v7007_v13  ;;  %v7097_v12 = vld [vmem:[%s10102_s1 + $0x60c] ss:$16 sps:$4 sm:$0xff]   ;;  %v7092_v13 = vld [vmem:[%s10102_s1 + $0x600] ss:$16 sps:$4 sm:$0xff]  }
  0x85   :  { %3328 = vmatprep.mubr.bf16.mxu0 %v5913_v16  ;;  %3672 = vmatprep.mubr.bf16.mxu1 %v5913_v16  ;;  %v7095_v16 = vld [vmem:[%s10102_s1 + $0x608] ss:$16 sps:$4 sm:$0xff]  }
  0x87   :  { %3299 = vmatpush1.bf16.msra.mxu0 %v7002_v17  ;;  %3643 = vmatpush1.bf16.msra.mxu1 %v7005_v18  ;;  %v5912_v17 = vcombine.low %v8027_v14, %v8032_v15  ;;  %v8227_v18 = vld [vmem:[%s10103_s0 + $0x18] sm:$0xff] }
  0x88   :  { %3300 = vmatprep.subr.bf16.mxu0 %v7010_v19  ;;  %3644 = vmatprep.subr.bf16.mxu1 %v7013_v20  ;;  %v8232_v19 = vld [vmem:[%s10103_s0 + $0x58] sm:$0xff]  ;;  %v7100_v20 = vld [vmem:[%s10102_s1 + $0x624] ss:$16 sps:$4 sm:$0xff]  }
  0x89   :  { %v7103_v14 = vld [vmem:[%s10102_s1 + $0x62c] ss:$16 sps:$4 sm:$0xff]   ;;  %v5915_v15 = vcombine.high %v8227_v18, %v8232_v19 }
  0x8b   :  { %3301 = vmatpush1.bf16.msra.mxu0 %v7008_v21  ;;  %3645 = vmatpush1.bf16.msra.mxu1 %v7011_v22  ;;  %v7098_v21 = vld [vmem:[%s10102_s1 + $0x620] ss:$16 sps:$4 sm:$0xff]   ;;  %v7101_v22 = vld [vmem:[%s10102_s1 + $0x628] ss:$16 sps:$4 sm:$0xff]  }
  0x8c   :  { %3302 = vmatprep.subr.bf16.mxu0 %v7016_v23  ;;  %3646 = vmatprep.subr.bf16.mxu1 %v7019_v24  ;;  %v7106_v23 = vld [vmem:[%s10102_s1 + $0x644] ss:$16 sps:$4 sm:$0xff]   ;;  %v7109_v24 = vld [vmem:[%s10102_s1 + $0x64c] ss:$16 sps:$4 sm:$0xff]  }
  0x8f   :  { %3303 = vmatpush1.bf16.msra.mxu0 %v7014_v25  ;;  %3647 = vmatpush1.bf16.msra.mxu1 %v7017_v26  ;;  %v7104_v25 = vld [vmem:[%s10102_s1 + $0x640] ss:$16 sps:$4 sm:$0xff]   ;;  %v7107_v26 = vld [vmem:[%s10102_s1 + $0x648] ss:$16 sps:$4 sm:$0xff]  }
  0x90   :  { %3304 = vmatprep.subr.bf16.mxu0 %v7022_v27  ;;  %3648 = vmatprep.subr.bf16.mxu1 %v7025_v28  ;;  %v7112_v27 = vld [vmem:[%s10102_s1 + $0x664] ss:$16 sps:$4 sm:$0xff]   ;;  %v7115_v28 = vld [vmem:[%s10102_s1 + $0x66c] ss:$16 sps:$4 sm:$0xff]  }
  0x93   :  { %3305 = vmatpush1.bf16.msra.mxu0 %v7020_v29  ;;  %3649 = vmatpush1.bf16.msra.mxu1 %v7023_v30  ;;  %v7110_v29 = vld [vmem:[%s10102_s1 + $0x660] ss:$16 sps:$4 sm:$0xff]   ;;  %v7113_v30 = vld [vmem:[%s10102_s1 + $0x668] ss:$16 sps:$4 sm:$0xff]  }
  0x94   :  { %3306 = vmatprep.subr.bf16.mxu0 %v7028_v31  ;;  %3650 = vmatprep.subr.bf16.mxu1 %v7031_v32  ;;  %v7118_v31 = vld [vmem:[%s10102_s1 + $0x684] ss:$16 sps:$4 sm:$0xff]   ;;  %v7121_v32 = vld [vmem:[%s10102_s1 + $0x68c] ss:$16 sps:$4 sm:$0xff]  }
  0x97   :  { %3307 = vmatpush1.bf16.msra.mxu0 %v7026_v33  ;;  %3651 = vmatpush1.bf16.msra.mxu1 %v7029_v34  ;;  %v7116_v33 = vld [vmem:[%s10102_s1 + $0x680] ss:$16 sps:$4 sm:$0xff]   ;;  %v7119_v34 = vld [vmem:[%s10102_s1 + $0x688] ss:$16 sps:$4 sm:$0xff]  }
  0x98   :  { %3308 = vmatprep.subr.bf16.mxu0 %v7034_v35  ;;  %3652 = vmatprep.subr.bf16.mxu1 %v7037_v36  ;;  %v7124_v35 = vld [vmem:[%s10102_s1 + $0x6a4] ss:$16 sps:$4 sm:$0xff]   ;;  %v7127_v36 = vld [vmem:[%s10102_s1 + $0x6ac] ss:$16 sps:$4 sm:$0xff]  }
  0x9b   :  { %3309 = vmatpush1.bf16.msra.mxu0 %v7032_v37  ;;  %3653 = vmatpush1.bf16.msra.mxu1 %v7035_v38  ;;  %v7122_v37 = vld [vmem:[%s10102_s1 + $0x6a0] ss:$16 sps:$4 sm:$0xff]   ;;  %v7125_v38 = vld [vmem:[%s10102_s1 + $0x6a8] ss:$16 sps:$4 sm:$0xff]  }
  0x9c   :  { %3310 = vmatprep.subr.bf16.mxu0 %v7040_v39  ;;  %3654 = vmatprep.subr.bf16.mxu1 %v7043_v40  ;;  %v7130_v39 = vld [vmem:[%s10102_s1 + $0x6c4] ss:$16 sps:$4 sm:$0xff]   ;;  %v7133_v40 = vld [vmem:[%s10102_s1 + $0x6cc] ss:$16 sps:$4 sm:$0xff]  }
  0x9f   :  { %3311 = vmatpush1.bf16.msra.mxu0 %v7038_v41  ;;  %3655 = vmatpush1.bf16.msra.mxu1 %v7041_v42  ;;  %v7128_v41 = vld [vmem:[%s10102_s1 + $0x6c0] ss:$16 sps:$4 sm:$0xff]   ;;  %v7131_v42 = vld [vmem:[%s10102_s1 + $0x6c8] ss:$16 sps:$4 sm:$0xff]  }
  0xa0   :  { %3312 = vmatprep.subr.bf16.mxu0 %v7046_v43  ;;  %3656 = vmatprep.subr.bf16.mxu1 %v7049_v44  ;;  %v7136_v43 = vld [vmem:[%s10102_s1 + $0x6e4] ss:$16 sps:$4 sm:$0xff]   ;;  %v7139_v44 = vld [vmem:[%s10102_s1 + $0x6ec] ss:$16 sps:$4 sm:$0xff]  }
  0xa3   :  { %3313 = vmatpush1.bf16.msra.mxu0 %v7044_v45  ;;  %3657 = vmatpush1.bf16.msra.mxu1 %v7047_v46  ;;  %v7134_v45 = vld [vmem:[%s10102_s1 + $0x6e0] ss:$16 sps:$4 sm:$0xff]   ;;  %v7137_v46 = vld [vmem:[%s10102_s1 + $0x6e8] ss:$16 sps:$4 sm:$0xff]  }
  0xa4   :  { %3314 = vmatprep.subr.bf16.mxu0 %v7052_v47  ;;  %3658 = vmatprep.subr.bf16.mxu1 %v7055_v48  ;;  %v7142_v47 = vld [vmem:[%s10102_s1 + $0x704] ss:$16 sps:$4 sm:$0xff]   ;;  %v7145_v48 = vld [vmem:[%s10102_s1 + $0x70c] ss:$16 sps:$4 sm:$0xff]  }
  0xa7   :  { %3315 = vmatpush1.bf16.msra.mxu0 %v7050_v49  ;;  %3659 = vmatpush1.bf16.msra.mxu1 %v7053_v50  ;;  %v7140_v49 = vld [vmem:[%s10102_s1 + $0x700] ss:$16 sps:$4 sm:$0xff]   ;;  %v7143_v50 = vld [vmem:[%s10102_s1 + $0x708] ss:$16 sps:$4 sm:$0xff]  }
  0xa8   :  { %3316 = vmatprep.subr.bf16.mxu0 %v7058_v51  ;;  %3660 = vmatprep.subr.bf16.mxu1 %v7061_v52  ;;  %v7148_v51 = vld [vmem:[%s10102_s1 + $0x724] ss:$16 sps:$4 sm:$0xff]   ;;  %v7151_v52 = vld [vmem:[%s10102_s1 + $0x72c] ss:$16 sps:$4 sm:$0xff]  }
  0xab   :  { %3317 = vmatpush1.bf16.msra.mxu0 %v7056_v53  ;;  %3661 = vmatpush1.bf16.msra.mxu1 %v7059_v54  ;;  %v7146_v53 = vld [vmem:[%s10102_s1 + $0x720] ss:$16 sps:$4 sm:$0xff]   ;;  %v7149_v54 = vld [vmem:[%s10102_s1 + $0x728] ss:$16 sps:$4 sm:$0xff]  }
  0xac   :  { %3318 = vmatprep.subr.bf16.mxu0 %v7064_v55  ;;  %3662 = vmatprep.subr.bf16.mxu1 %v7067_v56  ;;  %v7154_v55 = vld [vmem:[%s10102_s1 + $0x744] ss:$16 sps:$4 sm:$0xff]   ;;  %v7157_v56 = vld [vmem:[%s10102_s1 + $0x74c] ss:$16 sps:$4 sm:$0xff]  }
  0xaf   :  { %3319 = vmatpush1.bf16.msra.mxu0 %v7062_v57  ;;  %3663 = vmatpush1.bf16.msra.mxu1 %v7065_v58  ;;  %v7152_v57 = vld [vmem:[%s10102_s1 + $0x740] ss:$16 sps:$4 sm:$0xff]   ;;  %v7155_v58 = vld [vmem:[%s10102_s1 + $0x748] ss:$16 sps:$4 sm:$0xff]  }
  0xb0   :  { %3320 = vmatprep.subr.bf16.mxu0 %v7070_v59  ;;  %3664 = vmatprep.subr.bf16.mxu1 %v7073_v60  ;;  %v7160_v59 = vld [vmem:[%s10102_s1 + $0x764] ss:$16 sps:$4 sm:$0xff]   ;;  %v7163_v60 = vld [vmem:[%s10102_s1 + $0x76c] ss:$16 sps:$4 sm:$0xff]  }
  0xb3   :  { %3321 = vmatpush1.bf16.msra.mxu0 %v7068_v61  ;;  %3665 = vmatpush1.bf16.msra.mxu1 %v7071_v62  ;;  %v7158_v61 = vld [vmem:[%s10102_s1 + $0x760] ss:$16 sps:$4 sm:$0xff]   ;;  %v7161_v62 = vld [vmem:[%s10102_s1 + $0x768] ss:$16 sps:$4 sm:$0xff]  }
  0xb4   :  { %3322 = vmatprep.subr.bf16.mxu0 %v7076_v63  ;;  %3666 = vmatprep.subr.bf16.mxu1 %v7079_v0  ;;  %v7166_v63 = vld [vmem:[%s10102_s1 + $0x784] ss:$16 sps:$4 sm:$0xff]   ;;  %v7169_v0 = vld [vmem:[%s10102_s1 + $0x78c] ss:$16 sps:$4 sm:$0xff]  }
  0xb7   :  { %3323 = vmatpush1.bf16.msra.mxu0 %v7074_v1  ;;  %3667 = vmatpush1.bf16.msra.mxu1 %v7077_v2  ;;  %v7164_v1 = vld [vmem:[%s10102_s1 + $0x780] ss:$16 sps:$4 sm:$0xff]   ;;  %v7167_v2 = vld [vmem:[%s10102_s1 + $0x788] ss:$16 sps:$4 sm:$0xff]  }
  0xb8   :  { %3324 = vmatprep.subr.bf16.mxu0 %v7082_v3  ;;  %3668 = vmatprep.subr.bf16.mxu1 %v7085_v4  ;;  %v7172_v3 = vld [vmem:[%s10102_s1 + $0x7a4] ss:$16 sps:$4 sm:$0xff]   ;;  %v7175_v4 = vld [vmem:[%s10102_s1 + $0x7ac] ss:$16 sps:$4 sm:$0xff]  }
  0xbb   :  { %3325 = vmatpush1.bf16.msra.mxu0 %v7080_v5  ;;  %3669 = vmatpush1.bf16.msra.mxu1 %v7083_v6  ;;  %v7170_v5 = vld [vmem:[%s10102_s1 + $0x7a0] ss:$16 sps:$4 sm:$0xff]   ;;  %v7173_v6 = vld [vmem:[%s10102_s1 + $0x7a8] ss:$16 sps:$4 sm:$0xff]  }
  0xbc   :  { %3326 = vmatprep.subr.bf16.mxu0 %v7088_v7  ;;  %3670 = vmatprep.subr.bf16.mxu1 %v7091_v8  ;;  %v7178_v7 = vld [vmem:[%s10102_s1 + $0x7c4] ss:$16 sps:$4 sm:$0xff]   ;;  %v7181_v8 = vld [vmem:[%s10102_s1 + $0x7cc] ss:$16 sps:$4 sm:$0xff]  }
  0xbf   :  { %3327 = vmatpush1.bf16.msra.mxu0 %v7086_v9  ;;  %3671 = vmatpush1.bf16.msra.mxu1 %v7089_v10  ;;  %v7176_v9 = vld [vmem:[%s10102_s1 + $0x7c0] ss:$16 sps:$4 sm:$0xff]   ;;  %v7179_v10 = vld [vmem:[%s10102_s1 + $0x7c8] ss:$16 sps:$4 sm:$0xff]  }
  0xc0   :  { %3339 = vmatprep.subr.bf16.mxu0 %v7094_v11  ;;  %3683 = vmatprep.subr.bf16.mxu1 %v7097_v12  ;;  %v7184_v11 = vld [vmem:[%s10102_s1 + $0x7e4] ss:$16 sps:$4 sm:$0xff]   ;;  %v7187_v12 = vld [vmem:[%s10102_s1 + $0x7ec] ss:$16 sps:$4 sm:$0xff]  }
  0xc2   :  { %3329 = vmatmul.mubr.bf16.vlgmr.msra.gmra.mrb[0].mxu0 %v5912_v17  ;;  %3673 = vmatmul.mubr.bf16.vlgmr.msra.gmra.mrb[0].mxu1 %v5912_v17  ;;  %v7190_v17 = vld [vmem:[%s10102_s1 + $0x804] ss:$16 sps:$4 sm:$0xff]  }
  0xc3   :  { %3340 = vmatpush1.bf16.msra.mxu0 %v7092_v13  ;;  %3684 = vmatpush1.bf16.msra.mxu1 %v7095_v16  ;;  %v7182_v13 = vld [vmem:[%s10102_s1 + $0x7e0] ss:$16 sps:$4 sm:$0xff]   ;;  %v7185_v16 = vld [vmem:[%s10102_s1 + $0x7e8] ss:$16 sps:$4 sm:$0xff]  }
  0xc4   :  { %3341 = vmatprep.subr.bf16.mxu0 %v7100_v20  ;;  %3685 = vmatprep.subr.bf16.mxu1 %v7103_v14  ;;  %v7193_v20 = vld [vmem:[%s10102_s1 + $0x80c] ss:$16 sps:$4 sm:$0xff]   ;;  %v8425_v14 = vld [vmem:[%s10103_s0 + $0x20] sm:$0xff] }
  0xc5   :  { %3371 = vmatprep.mubr.bf16.mxu0 %v5915_v15  ;;  %3715 = vmatprep.mubr.bf16.mxu1 %v5915_v15  ;;  %v5914_v15 = vcombine.low %v8227_v18, %v8232_v19  ;;  %v7196_v18 = vld [vmem:[%s10102_s1 + $0x824] ss:$16 sps:$4 sm:$0xff]   ;;  %v7199_v19 = vld [vmem:[%s10102_s1 + $0x82c] ss:$16 sps:$4 sm:$0xff]  }
  0xc7   :  { %3342 = vmatpush1.bf16.msra.mxu0 %v7098_v21  ;;  %3686 = vmatpush1.bf16.msra.mxu1 %v7101_v22  ;;  %v8432_v21 = vld [vmem:[%s10103_s0 + $0x60] sm:$0xff] }
  0xc8   :  { %3343 = vmatprep.subr.bf16.mxu0 %v7106_v23  ;;  %3687 = vmatprep.subr.bf16.mxu1 %v7109_v24  ;;  %v7188_v22 = vld [vmem:[%s10102_s1 + $0x800] ss:$16 sps:$4 sm:$0xff]   ;;  %v7191_v23 = vld [vmem:[%s10102_s1 + $0x808] ss:$16 sps:$4 sm:$0xff]   ;;  %v5917_v24 = vcombine.high %v8425_v14, %v8432_v21 }
  0xcb   :  { %3344 = vmatpush1.bf16.msra.mxu0 %v7104_v25  ;;  %3688 = vmatpush1.bf16.msra.mxu1 %v7107_v26  ;;  %v7194_v25 = vld [vmem:[%s10102_s1 + $0x820] ss:$16 sps:$4 sm:$0xff]   ;;  %v7197_v26 = vld [vmem:[%s10102_s1 + $0x828] ss:$16 sps:$4 sm:$0xff]  }
  0xcc   :  { %3345 = vmatprep.subr.bf16.mxu0 %v7112_v27  ;;  %3689 = vmatprep.subr.bf16.mxu1 %v7115_v28  ;;  %v7202_v27 = vld [vmem:[%s10102_s1 + $0x844] ss:$16 sps:$4 sm:$0xff]   ;;  %v7205_v28 = vld [vmem:[%s10102_s1 + $0x84c] ss:$16 sps:$4 sm:$0xff]  }
  0xcf   :  { %3346 = vmatpush1.bf16.msra.mxu0 %v7110_v29  ;;  %3690 = vmatpush1.bf16.msra.mxu1 %v7113_v30  ;;  %v7200_v29 = vld [vmem:[%s10102_s1 + $0x840] ss:$16 sps:$4 sm:$0xff]   ;;  %v7203_v30 = vld [vmem:[%s10102_s1 + $0x848] ss:$16 sps:$4 sm:$0xff]  }
  0xd0   :  { %3347 = vmatprep.subr.bf16.mxu0 %v7118_v31  ;;  %3691 = vmatprep.subr.bf16.mxu1 %v7121_v32  ;;  %v7208_v31 = vld [vmem:[%s10102_s1 + $0x864] ss:$16 sps:$4 sm:$0xff]   ;;  %v7211_v32 = vld [vmem:[%s10102_s1 + $0x86c] ss:$16 sps:$4 sm:$0xff]  }
  0xd3   :  { %3348 = vmatpush1.bf16.msra.mxu0 %v7116_v33  ;;  %3692 = vmatpush1.bf16.msra.mxu1 %v7119_v34  ;;  %v7206_v33 = vld [vmem:[%s10102_s1 + $0x860] ss:$16 sps:$4 sm:$0xff]   ;;  %v7209_v34 = vld [vmem:[%s10102_s1 + $0x868] ss:$16 sps:$4 sm:$0xff]  }
  0xd4   :  { %3349 = vmatprep.subr.bf16.mxu0 %v7124_v35  ;;  %3693 = vmatprep.subr.bf16.mxu1 %v7127_v36  ;;  %v7214_v35 = vld [vmem:[%s10102_s1 + $0x884] ss:$16 sps:$4 sm:$0xff]   ;;  %v7217_v36 = vld [vmem:[%s10102_s1 + $0x88c] ss:$16 sps:$4 sm:$0xff]  }
  0xd7   :  { %3350 = vmatpush1.bf16.msra.mxu0 %v7122_v37  ;;  %3694 = vmatpush1.bf16.msra.mxu1 %v7125_v38  ;;  %v7212_v37 = vld [vmem:[%s10102_s1 + $0x880] ss:$16 sps:$4 sm:$0xff]   ;;  %v7215_v38 = vld [vmem:[%s10102_s1 + $0x888] ss:$16 sps:$4 sm:$0xff]  }
  0xd8   :  { %3351 = vmatprep.subr.bf16.mxu0 %v7130_v39  ;;  %3695 = vmatprep.subr.bf16.mxu1 %v7133_v40  ;;  %v7220_v39 = vld [vmem:[%s10102_s1 + $0x8a4] ss:$16 sps:$4 sm:$0xff]   ;;  %v7223_v40 = vld [vmem:[%s10102_s1 + $0x8ac] ss:$16 sps:$4 sm:$0xff]  }
  0xdb   :  { %3352 = vmatpush1.bf16.msra.mxu0 %v7128_v41  ;;  %3696 = vmatpush1.bf16.msra.mxu1 %v7131_v42  ;;  %v7218_v41 = vld [vmem:[%s10102_s1 + $0x8a0] ss:$16 sps:$4 sm:$0xff]   ;;  %v7221_v42 = vld [vmem:[%s10102_s1 + $0x8a8] ss:$16 sps:$4 sm:$0xff]  }
  0xdc   :  { %3353 = vmatprep.subr.bf16.mxu0 %v7136_v43  ;;  %3697 = vmatprep.subr.bf16.mxu1 %v7139_v44  ;;  %v7226_v43 = vld [vmem:[%s10102_s1 + $0x8c4] ss:$16 sps:$4 sm:$0xff]   ;;  %v7229_v44 = vld [vmem:[%s10102_s1 + $0x8cc] ss:$16 sps:$4 sm:$0xff]  }
  0xdf   :  { %3354 = vmatpush1.bf16.msra.mxu0 %v7134_v45  ;;  %3698 = vmatpush1.bf16.msra.mxu1 %v7137_v46  ;;  %v7224_v45 = vld [vmem:[%s10102_s1 + $0x8c0] ss:$16 sps:$4 sm:$0xff]   ;;  %v7227_v46 = vld [vmem:[%s10102_s1 + $0x8c8] ss:$16 sps:$4 sm:$0xff]  }
  0xe0   :  { %3355 = vmatprep.subr.bf16.mxu0 %v7142_v47  ;;  %3699 = vmatprep.subr.bf16.mxu1 %v7145_v48  ;;  %v7232_v47 = vld [vmem:[%s10102_s1 + $0x8e4] ss:$16 sps:$4 sm:$0xff]   ;;  %v7235_v48 = vld [vmem:[%s10102_s1 + $0x8ec] ss:$16 sps:$4 sm:$0xff]  }
  0xe3   :  { %3356 = vmatpush1.bf16.msra.mxu0 %v7140_v49  ;;  %3700 = vmatpush1.bf16.msra.mxu1 %v7143_v50  ;;  %v7230_v49 = vld [vmem:[%s10102_s1 + $0x8e0] ss:$16 sps:$4 sm:$0xff]   ;;  %v7233_v50 = vld [vmem:[%s10102_s1 + $0x8e8] ss:$16 sps:$4 sm:$0xff]  }
  0xe4   :  { %3357 = vmatprep.subr.bf16.mxu0 %v7148_v51  ;;  %3701 = vmatprep.subr.bf16.mxu1 %v7151_v52  ;;  %v7238_v51 = vld [vmem:[%s10102_s1 + $0x904] ss:$16 sps:$4 sm:$0xff]   ;;  %v7241_v52 = vld [vmem:[%s10102_s1 + $0x90c] ss:$16 sps:$4 sm:$0xff]  }
  0xe7   :  { %3358 = vmatpush1.bf16.msra.mxu0 %v7146_v53  ;;  %3702 = vmatpush1.bf16.msra.mxu1 %v7149_v54  ;;  %v7236_v53 = vld [vmem:[%s10102_s1 + $0x900] ss:$16 sps:$4 sm:$0xff]   ;;  %v7239_v54 = vld [vmem:[%s10102_s1 + $0x908] ss:$16 sps:$4 sm:$0xff]  }
  0xe8   :  { %3359 = vmatprep.subr.bf16.mxu0 %v7154_v55  ;;  %3703 = vmatprep.subr.bf16.mxu1 %v7157_v56  ;;  %v7244_v55 = vld [vmem:[%s10102_s1 + $0x924] ss:$16 sps:$4 sm:$0xff]   ;;  %v7247_v56 = vld [vmem:[%s10102_s1 + $0x92c] ss:$16 sps:$4 sm:$0xff]  }
  0xeb   :  { %3360 = vmatpush1.bf16.msra.mxu0 %v7152_v57  ;;  %3704 = vmatpush1.bf16.msra.mxu1 %v7155_v58  ;;  %v7242_v57 = vld [vmem:[%s10102_s1 + $0x920] ss:$16 sps:$4 sm:$0xff]   ;;  %v7245_v58 = vld [vmem:[%s10102_s1 + $0x928] ss:$16 sps:$4 sm:$0xff]  }
  0xec   :  { %3361 = vmatprep.subr.bf16.mxu0 %v7160_v59  ;;  %3705 = vmatprep.subr.bf16.mxu1 %v7163_v60  ;;  %v7250_v59 = vld [vmem:[%s10102_s1 + $0x944] ss:$16 sps:$4 sm:$0xff]   ;;  %v7253_v60 = vld [vmem:[%s10102_s1 + $0x94c] ss:$16 sps:$4 sm:$0xff]  }
  0xef   :  { %3362 = vmatpush1.bf16.msra.mxu0 %v7158_v61  ;;  %3706 = vmatpush1.bf16.msra.mxu1 %v7161_v62  ;;  %v7248_v61 = vld [vmem:[%s10102_s1 + $0x940] ss:$16 sps:$4 sm:$0xff]   ;;  %v7251_v62 = vld [vmem:[%s10102_s1 + $0x948] ss:$16 sps:$4 sm:$0xff]  }
  0xf0   :  { %3363 = vmatprep.subr.bf16.mxu0 %v7166_v63  ;;  %3707 = vmatprep.subr.bf16.mxu1 %v7169_v0  ;;  %v7256_v63 = vld [vmem:[%s10102_s1 + $0x964] ss:$16 sps:$4 sm:$0xff]   ;;  %v7259_v0 = vld [vmem:[%s10102_s1 + $0x96c] ss:$16 sps:$4 sm:$0xff]  }
  0xf3   :  { %3364 = vmatpush1.bf16.msra.mxu0 %v7164_v1  ;;  %3708 = vmatpush1.bf16.msra.mxu1 %v7167_v2  ;;  %v7254_v1 = vld [vmem:[%s10102_s1 + $0x960] ss:$16 sps:$4 sm:$0xff]   ;;  %v7257_v2 = vld [vmem:[%s10102_s1 + $0x968] ss:$16 sps:$4 sm:$0xff]  }
  0xf4   :  { %3365 = vmatprep.subr.bf16.mxu0 %v7172_v3  ;;  %3709 = vmatprep.subr.bf16.mxu1 %v7175_v4  ;;  %v7262_v3 = vld [vmem:[%s10102_s1 + $0x984] ss:$16 sps:$4 sm:$0xff]   ;;  %v7265_v4 = vld [vmem:[%s10102_s1 + $0x98c] ss:$16 sps:$4 sm:$0xff]  }
  0xf7   :  { %3366 = vmatpush1.bf16.msra.mxu0 %v7170_v5  ;;  %3710 = vmatpush1.bf16.msra.mxu1 %v7173_v6  ;;  %v7260_v5 = vld [vmem:[%s10102_s1 + $0x980] ss:$16 sps:$4 sm:$0xff]   ;;  %v7263_v6 = vld [vmem:[%s10102_s1 + $0x988] ss:$16 sps:$4 sm:$0xff]  }
  0xf8   :  { %3367 = vmatprep.subr.bf16.mxu0 %v7178_v7  ;;  %3711 = vmatprep.subr.bf16.mxu1 %v7181_v8  ;;  %v7268_v7 = vld [vmem:[%s10102_s1 + $0x9a4] ss:$16 sps:$4 sm:$0xff]   ;;  %v7271_v8 = vld [vmem:[%s10102_s1 + $0x9ac] ss:$16 sps:$4 sm:$0xff]  }
  0xfb   :  { %3368 = vmatpush1.bf16.msra.mxu0 %v7176_v9  ;;  %3712 = vmatpush1.bf16.msra.mxu1 %v7179_v10  ;;  %v7266_v9 = vld [vmem:[%s10102_s1 + $0x9a0] ss:$16 sps:$4 sm:$0xff]   ;;  %v7269_v10 = vld [vmem:[%s10102_s1 + $0x9a8] ss:$16 sps:$4 sm:$0xff]  }
  0xfc   :  { %3369 = vmatprep.subr.bf16.mxu0 %v7184_v11  ;;  %3713 = vmatprep.subr.bf16.mxu1 %v7187_v12  ;;  %v7274_v11 = vld [vmem:[%s10102_s1 + $0x9c4] ss:$16 sps:$4 sm:$0xff]   ;;  %v7277_v12 = vld [vmem:[%s10102_s1 + $0x9cc] ss:$16 sps:$4 sm:$0xff]  }
  0xff   :  { %3370 = vmatpush1.bf16.msra.mxu0 %v7182_v13  ;;  %3714 = vmatpush1.bf16.msra.mxu1 %v7185_v16  ;;  %v7272_v13 = vld [vmem:[%s10102_s1 + $0x9c0] ss:$16 sps:$4 sm:$0xff]   ;;  %v7275_v16 = vld [vmem:[%s10102_s1 + $0x9c8] ss:$16 sps:$4 sm:$0xff]  }
 0x100   :  { %3382 = vmatprep.subr.bf16.mxu0 %v7190_v17  ;;  %3726 = vmatprep.subr.bf16.mxu1 %v7193_v20  ;;  %v7280_v17 = vld [vmem:[%s10102_s1 + $0x9e4] ss:$16 sps:$4 sm:$0xff]   ;;  %v7283_v20 = vld [vmem:[%s10102_s1 + $0x9ec] ss:$16 sps:$4 sm:$0xff]  }
 0x102   :  { %3372 = vmatmul.mubr.bf16.vlgmr.msra.gmra.mrb[0].mxu0 %v5914_v15  ;;  %3716 = vmatmul.mubr.bf16.vlgmr.msra.gmra.mrb[0].mxu1 %v5914_v15  ;;  %v7278_v15 = vld [vmem:[%s10102_s1 + $0x9e0] ss:$16 sps:$4 sm:$0xff]  }
 0x103   :  { %3383 = vmatpush1.bf16.msra.mxu0 %v7188_v22  ;;  %3727 = vmatpush1.bf16.msra.mxu1 %v7191_v23  ;;  %v7281_v22 = vld [vmem:[%s10102_s1 + $0x9e8] ss:$16 sps:$4 sm:$0xff]   ;;  %v7286_v23 = vld [vmem:[%s10102_s1 + $0xa04] ss:$16 sps:$4 sm:$0xff]  }
 0x104   :  { %3384 = vmatprep.subr.bf16.mxu0 %v7196_v18  ;;  %3728 = vmatprep.subr.bf16.mxu1 %v7199_v19  ;;  %v7289_v18 = vld [vmem:[%s10102_s1 + $0xa0c] ss:$16 sps:$4 sm:$0xff]  }
 0x105   :  { %3414 = vmatprep.mubr.bf16.mxu0 %v5917_v24  ;;  %3758 = vmatprep.mubr.bf16.mxu1 %v5917_v24  ;;  %v8631_v19 = vld [vmem:[%s10103_s0 + $0x28] sm:$0xff] }
 0x106   :  { %v8636_v24 = vld [vmem:[%s10103_s0 + $0x68] sm:$0xff] }
 0x107   :  { %3385 = vmatpush1.bf16.msra.mxu0 %v7194_v25  ;;  %3729 = vmatpush1.bf16.msra.mxu1 %v7197_v26  ;;  %v5916_v25 = vcombine.low %v8425_v14, %v8432_v21  ;;  %v7284_v26 = vld [vmem:[%s10102_s1 + $0xa00] ss:$16 sps:$4 sm:$0xff]   ;;  %v7295_v14 = vld [vmem:[%s10102_s1 + $0xa2c] ss:$16 sps:$4 sm:$0xff]   ;;  %v5919_v21 = vcombine.high %v8631_v19, %v8636_v24 }
 0x108   :  { %3386 = vmatprep.subr.bf16.mxu0 %v7202_v27  ;;  %3730 = vmatprep.subr.bf16.mxu1 %v7205_v28  ;;  %v7287_v27 = vld [vmem:[%s10102_s1 + $0xa08] ss:$16 sps:$4 sm:$0xff]   ;;  %v7292_v28 = vld [vmem:[%s10102_s1 + $0xa24] ss:$16 sps:$4 sm:$0xff]  }
 0x10b   :  { %3387 = vmatpush1.bf16.msra.mxu0 %v7200_v29  ;;  %3731 = vmatpush1.bf16.msra.mxu1 %v7203_v30  ;;  %v7290_v29 = vld [vmem:[%s10102_s1 + $0xa20] ss:$16 sps:$4 sm:$0xff]   ;;  %v7293_v30 = vld [vmem:[%s10102_s1 + $0xa28] ss:$16 sps:$4 sm:$0xff]  }
 0x10c   :  { %3388 = vmatprep.subr.bf16.mxu0 %v7208_v31  ;;  %3732 = vmatprep.subr.bf16.mxu1 %v7211_v32  ;;  %v7298_v31 = vld [vmem:[%s10102_s1 + $0xa44] ss:$16 sps:$4 sm:$0xff]   ;;  %v7301_v32 = vld [vmem:[%s10102_s1 + $0xa4c] ss:$16 sps:$4 sm:$0xff]  }
 0x10f   :  { %3389 = vmatpush1.bf16.msra.mxu0 %v7206_v33  ;;  %3733 = vmatpush1.bf16.msra.mxu1 %v7209_v34  ;;  %v7296_v33 = vld [vmem:[%s10102_s1 + $0xa40] ss:$16 sps:$4 sm:$0xff]   ;;  %v7299_v34 = vld [vmem:[%s10102_s1 + $0xa48] ss:$16 sps:$4 sm:$0xff]  }
 0x110   :  { %3390 = vmatprep.subr.bf16.mxu0 %v7214_v35  ;;  %3734 = vmatprep.subr.bf16.mxu1 %v7217_v36  ;;  %v7304_v35 = vld [vmem:[%s10102_s1 + $0xa64] ss:$16 sps:$4 sm:$0xff]   ;;  %v7307_v36 = vld [vmem:[%s10102_s1 + $0xa6c] ss:$16 sps:$4 sm:$0xff]  }
 0x113   :  { %3391 = vmatpush1.bf16.msra.mxu0 %v7212_v37  ;;  %3735 = vmatpush1.bf16.msra.mxu1 %v7215_v38  ;;  %v7302_v37 = vld [vmem:[%s10102_s1 + $0xa60] ss:$16 sps:$4 sm:$0xff]   ;;  %v7305_v38 = vld [vmem:[%s10102_s1 + $0xa68] ss:$16 sps:$4 sm:$0xff]  }
 0x114   :  { %3392 = vmatprep.subr.bf16.mxu0 %v7220_v39  ;;  %3736 = vmatprep.subr.bf16.mxu1 %v7223_v40  ;;  %v7310_v39 = vld [vmem:[%s10102_s1 + $0xa84] ss:$16 sps:$4 sm:$0xff]   ;;  %v7313_v40 = vld [vmem:[%s10102_s1 + $0xa8c] ss:$16 sps:$4 sm:$0xff]  }
 0x117   :  { %3393 = vmatpush1.bf16.msra.mxu0 %v7218_v41  ;;  %3737 = vmatpush1.bf16.msra.mxu1 %v7221_v42  ;;  %v7308_v41 = vld [vmem:[%s10102_s1 + $0xa80] ss:$16 sps:$4 sm:$0xff]   ;;  %v7311_v42 = vld [vmem:[%s10102_s1 + $0xa88] ss:$16 sps:$4 sm:$0xff]  }
 0x118   :  { %3394 = vmatprep.subr.bf16.mxu0 %v7226_v43  ;;  %3738 = vmatprep.subr.bf16.mxu1 %v7229_v44  ;;  %v7316_v43 = vld [vmem:[%s10102_s1 + $0xaa4] ss:$16 sps:$4 sm:$0xff]   ;;  %v7319_v44 = vld [vmem:[%s10102_s1 + $0xaac] ss:$16 sps:$4 sm:$0xff]  }
 0x11b   :  { %3395 = vmatpush1.bf16.msra.mxu0 %v7224_v45  ;;  %3739 = vmatpush1.bf16.msra.mxu1 %v7227_v46  ;;  %v7314_v45 = vld [vmem:[%s10102_s1 + $0xaa0] ss:$16 sps:$4 sm:$0xff]   ;;  %v7317_v46 = vld [vmem:[%s10102_s1 + $0xaa8] ss:$16 sps:$4 sm:$0xff]  }
 0x11c   :  { %3396 = vmatprep.subr.bf16.mxu0 %v7232_v47  ;;  %3740 = vmatprep.subr.bf16.mxu1 %v7235_v48  ;;  %v7322_v47 = vld [vmem:[%s10102_s1 + $0xac4] ss:$16 sps:$4 sm:$0xff]   ;;  %v7325_v48 = vld [vmem:[%s10102_s1 + $0xacc] ss:$16 sps:$4 sm:$0xff]  }
 0x11f   :  { %3397 = vmatpush1.bf16.msra.mxu0 %v7230_v49  ;;  %3741 = vmatpush1.bf16.msra.mxu1 %v7233_v50  ;;  %v7320_v49 = vld [vmem:[%s10102_s1 + $0xac0] ss:$16 sps:$4 sm:$0xff]   ;;  %v7323_v50 = vld [vmem:[%s10102_s1 + $0xac8] ss:$16 sps:$4 sm:$0xff]  }
 0x120   :  { %3398 = vmatprep.subr.bf16.mxu0 %v7238_v51  ;;  %3742 = vmatprep.subr.bf16.mxu1 %v7241_v52  ;;  %v7328_v51 = vld [vmem:[%s10102_s1 + $0xae4] ss:$16 sps:$4 sm:$0xff]   ;;  %v7331_v52 = vld [vmem:[%s10102_s1 + $0xaec] ss:$16 sps:$4 sm:$0xff]  }
 0x123   :  { %3399 = vmatpush1.bf16.msra.mxu0 %v7236_v53  ;;  %3743 = vmatpush1.bf16.msra.mxu1 %v7239_v54  ;;  %v7326_v53 = vld [vmem:[%s10102_s1 + $0xae0] ss:$16 sps:$4 sm:$0xff]   ;;  %v7329_v54 = vld [vmem:[%s10102_s1 + $0xae8] ss:$16 sps:$4 sm:$0xff]  }
 0x124   :  { %3400 = vmatprep.subr.bf16.mxu0 %v7244_v55  ;;  %3744 = vmatprep.subr.bf16.mxu1 %v7247_v56  ;;  %v7334_v55 = vld [vmem:[%s10102_s1 + $0xb04] ss:$16 sps:$4 sm:$0xff]   ;;  %v7337_v56 = vld [vmem:[%s10102_s1 + $0xb0c] ss:$16 sps:$4 sm:$0xff]  }
 0x127   :  { %3401 = vmatpush1.bf16.msra.mxu0 %v7242_v57  ;;  %3745 = vmatpush1.bf16.msra.mxu1 %v7245_v58  ;;  %v7332_v57 = vld [vmem:[%s10102_s1 + $0xb00] ss:$16 sps:$4 sm:$0xff]   ;;  %v7335_v58 = vld [vmem:[%s10102_s1 + $0xb08] ss:$16 sps:$4 sm:$0xff]  }
 0x128   :  { %3402 = vmatprep.subr.bf16.mxu0 %v7250_v59  ;;  %3746 = vmatprep.subr.bf16.mxu1 %v7253_v60  ;;  %v7340_v59 = vld [vmem:[%s10102_s1 + $0xb24] ss:$16 sps:$4 sm:$0xff]   ;;  %v7343_v60 = vld [vmem:[%s10102_s1 + $0xb2c] ss:$16 sps:$4 sm:$0xff]  }
 0x12b   :  { %3403 = vmatpush1.bf16.msra.mxu0 %v7248_v61  ;;  %3747 = vmatpush1.bf16.msra.mxu1 %v7251_v62  ;;  %v7338_v61 = vld [vmem:[%s10102_s1 + $0xb20] ss:$16 sps:$4 sm:$0xff]   ;;  %v7341_v62 = vld [vmem:[%s10102_s1 + $0xb28] ss:$16 sps:$4 sm:$0xff]  }
 0x12c   :  { %3404 = vmatprep.subr.bf16.mxu0 %v7256_v63  ;;  %3748 = vmatprep.subr.bf16.mxu1 %v7259_v0  ;;  %v7346_v63 = vld [vmem:[%s10102_s1 + $0xb44] ss:$16 sps:$4 sm:$0xff]   ;;  %v7349_v0 = vld [vmem:[%s10102_s1 + $0xb4c] ss:$16 sps:$4 sm:$0xff]  }
 0x12f   :  { %3405 = vmatpush1.bf16.msra.mxu0 %v7254_v1  ;;  %3749 = vmatpush1.bf16.msra.mxu1 %v7257_v2  ;;  %v7344_v1 = vld [vmem:[%s10102_s1 + $0xb40] ss:$16 sps:$4 sm:$0xff]   ;;  %v7347_v2 = vld [vmem:[%s10102_s1 + $0xb48] ss:$16 sps:$4 sm:$0xff]  }
 0x130   :  { %3406 = vmatprep.subr.bf16.mxu0 %v7262_v3  ;;  %3750 = vmatprep.subr.bf16.mxu1 %v7265_v4  ;;  %v7352_v3 = vld [vmem:[%s10102_s1 + $0xb64] ss:$16 sps:$4 sm:$0xff]   ;;  %v7355_v4 = vld [vmem:[%s10102_s1 + $0xb6c] ss:$16 sps:$4 sm:$0xff]  }
 0x133   :  { %3407 = vmatpush1.bf16.msra.mxu0 %v7260_v5  ;;  %3751 = vmatpush1.bf16.msra.mxu1 %v7263_v6  ;;  %v7350_v5 = vld [vmem:[%s10102_s1 + $0xb60] ss:$16 sps:$4 sm:$0xff]   ;;  %v7353_v6 = vld [vmem:[%s10102_s1 + $0xb68] ss:$16 sps:$4 sm:$0xff]  }
 0x134   :  { %3408 = vmatprep.subr.bf16.mxu0 %v7268_v7  ;;  %3752 = vmatprep.subr.bf16.mxu1 %v7271_v8  ;;  %v7358_v7 = vld [vmem:[%s10102_s1 + $0xb84] ss:$16 sps:$4 sm:$0xff]   ;;  %v7361_v8 = vld [vmem:[%s10102_s1 + $0xb8c] ss:$16 sps:$4 sm:$0xff]  }
 0x137   :  { %3409 = vmatpush1.bf16.msra.mxu0 %v7266_v9  ;;  %3753 = vmatpush1.bf16.msra.mxu1 %v7269_v10  ;;  %v7356_v9 = vld [vmem:[%s10102_s1 + $0xb80] ss:$16 sps:$4 sm:$0xff]   ;;  %v7359_v10 = vld [vmem:[%s10102_s1 + $0xb88] ss:$16 sps:$4 sm:$0xff]  }
 0x138   :  { %3410 = vmatprep.subr.bf16.mxu0 %v7274_v11  ;;  %3754 = vmatprep.subr.bf16.mxu1 %v7277_v12  ;;  %v7364_v11 = vld [vmem:[%s10102_s1 + $0xba4] ss:$16 sps:$4 sm:$0xff]   ;;  %v7367_v12 = vld [vmem:[%s10102_s1 + $0xbac] ss:$16 sps:$4 sm:$0xff]  }
 0x13b   :  { %3411 = vmatpush1.bf16.msra.mxu0 %v7272_v13  ;;  %3755 = vmatpush1.bf16.msra.mxu1 %v7275_v16  ;;  %v7362_v13 = vld [vmem:[%s10102_s1 + $0xba0] ss:$16 sps:$4 sm:$0xff]   ;;  %v7365_v16 = vld [vmem:[%s10102_s1 + $0xba8] ss:$16 sps:$4 sm:$0xff]  }
 0x13c   :  { %3412 = vmatprep.subr.bf16.mxu0 %v7280_v17  ;;  %3756 = vmatprep.subr.bf16.mxu1 %v7283_v20  ;;  %v7370_v17 = vld [vmem:[%s10102_s1 + $0xbc4] ss:$16 sps:$4 sm:$0xff]   ;;  %v7373_v20 = vld [vmem:[%s10102_s1 + $0xbcc] ss:$16 sps:$4 sm:$0xff]  }
 0x13f   :  { %3413 = vmatpush1.bf16.msra.mxu0 %v7278_v15  ;;  %3757 = vmatpush1.bf16.msra.mxu1 %v7281_v22  ;;  %v7368_v15 = vld [vmem:[%s10102_s1 + $0xbc0] ss:$16 sps:$4 sm:$0xff]   ;;  %v7371_v22 = vld [vmem:[%s10102_s1 + $0xbc8] ss:$16 sps:$4 sm:$0xff]  }
 0x140   :  { %3425 = vmatprep.subr.bf16.mxu0 %v7286_v23  ;;  %3769 = vmatprep.subr.bf16.mxu1 %v7289_v18  ;;  %v7376_v23 = vld [vmem:[%s10102_s1 + $0xbe4] ss:$16 sps:$4 sm:$0xff]   ;;  %v7379_v18 = vld [vmem:[%s10102_s1 + $0xbec] ss:$16 sps:$4 sm:$0xff]  }
 0x142   :  { %3415 = vmatmul.mubr.bf16.vlgmr.msra.gmra.mrb[0].mxu0 %v5916_v25  ;;  %3759 = vmatmul.mubr.bf16.vlgmr.msra.gmra.mrb[0].mxu1 %v5916_v25  ;;  %v7374_v25 = vld [vmem:[%s10102_s1 + $0xbe0] ss:$16 sps:$4 sm:$0xff]  }
 0x143   :  { %3426 = vmatpush1.bf16.msra.mxu0 %v7284_v26  ;;  %3770 = vmatpush1.bf16.msra.mxu1 %v7287_v27  ;;  %v7377_v26 = vld [vmem:[%s10102_s1 + $0xbe8] ss:$16 sps:$4 sm:$0xff]   ;;  %v7382_v27 = vld [vmem:[%s10102_s1 + $0xc04] ss:$16 sps:$4 sm:$0xff]  }
 0x144   :  { %3427 = vmatprep.subr.bf16.mxu0 %v7292_v28  ;;  %3771 = vmatprep.subr.bf16.mxu1 %v7295_v14  ;;  %v7385_v28 = vld [vmem:[%s10102_s1 + $0xc0c] ss:$16 sps:$4 sm:$0xff]   ;;  %v5918_v14 = vcombine.low %v8631_v19, %v8636_v24  ;;  %v7383_v19 = vld [vmem:[%s10102_s1 + $0xc08] ss:$16 sps:$4 sm:$0xff]   ;;  %v7388_v24 = vld [vmem:[%s10102_s1 + $0xc24] ss:$16 sps:$4 sm:$0xff]  }
 0x145   :  { %3457 = vmatprep.mubr.bf16.mxu0 %v5919_v21  ;;  %3801 = vmatprep.mubr.bf16.mxu1 %v5919_v21  ;;  %v8839_v21 = vld [vmem:[%s10103_s0 + $0x30] sm:$0xff] }
 0x147   :  { %3428 = vmatpush1.bf16.msra.mxu0 %v7290_v29  ;;  %3772 = vmatpush1.bf16.msra.mxu1 %v7293_v30  ;;  %v8844_v29 = vld [vmem:[%s10103_s0 + $0x70] sm:$0xff] }
 0x148   :  { %3429 = vmatprep.subr.bf16.mxu0 %v7298_v31  ;;  %3773 = vmatprep.subr.bf16.mxu1 %v7301_v32  ;;  %v7380_v30 = vld [vmem:[%s10102_s1 + $0xc00] ss:$16 sps:$4 sm:$0xff]   ;;  %v7391_v31 = vld [vmem:[%s10102_s1 + $0xc2c] ss:$16 sps:$4 sm:$0xff]   ;;  %v5921_v32 = vcombine.high %v8839_v21, %v8844_v29 }
 0x14b   :  { %3430 = vmatpush1.bf16.msra.mxu0 %v7296_v33  ;;  %3774 = vmatpush1.bf16.msra.mxu1 %v7299_v34  ;;  %v7386_v33 = vld [vmem:[%s10102_s1 + $0xc20] ss:$16 sps:$4 sm:$0xff]   ;;  %v7389_v34 = vld [vmem:[%s10102_s1 + $0xc28] ss:$16 sps:$4 sm:$0xff]  }
 0x14c   :  { %3431 = vmatprep.subr.bf16.mxu0 %v7304_v35  ;;  %3775 = vmatprep.subr.bf16.mxu1 %v7307_v36  ;;  %v7394_v35 = vld [vmem:[%s10102_s1 + $0xc44] ss:$16 sps:$4 sm:$0xff]   ;;  %v7397_v36 = vld [vmem:[%s10102_s1 + $0xc4c] ss:$16 sps:$4 sm:$0xff]  }
 0x14f   :  { %3432 = vmatpush1.bf16.msra.mxu0 %v7302_v37  ;;  %3776 = vmatpush1.bf16.msra.mxu1 %v7305_v38  ;;  %v7392_v37 = vld [vmem:[%s10102_s1 + $0xc40] ss:$16 sps:$4 sm:$0xff]   ;;  %v7395_v38 = vld [vmem:[%s10102_s1 + $0xc48] ss:$16 sps:$4 sm:$0xff]  }
 0x150   :  { %3433 = vmatprep.subr.bf16.mxu0 %v7310_v39  ;;  %3777 = vmatprep.subr.bf16.mxu1 %v7313_v40  ;;  %v7400_v39 = vld [vmem:[%s10102_s1 + $0xc64] ss:$16 sps:$4 sm:$0xff]   ;;  %v7403_v40 = vld [vmem:[%s10102_s1 + $0xc6c] ss:$16 sps:$4 sm:$0xff]  }
 0x153   :  { %3434 = vmatpush1.bf16.msra.mxu0 %v7308_v41  ;;  %3778 = vmatpush1.bf16.msra.mxu1 %v7311_v42  ;;  %v7398_v41 = vld [vmem:[%s10102_s1 + $0xc60] ss:$16 sps:$4 sm:$0xff]   ;;  %v7401_v42 = vld [vmem:[%s10102_s1 + $0xc68] ss:$16 sps:$4 sm:$0xff]  }
 0x154   :  { %3435 = vmatprep.subr.bf16.mxu0 %v7316_v43  ;;  %3779 = vmatprep.subr.bf16.mxu1 %v7319_v44  ;;  %v7406_v43 = vld [vmem:[%s10102_s1 + $0xc84] ss:$16 sps:$4 sm:$0xff]   ;;  %v7409_v44 = vld [vmem:[%s10102_s1 + $0xc8c] ss:$16 sps:$4 sm:$0xff]  }
 0x157   :  { %3436 = vmatpush1.bf16.msra.mxu0 %v7314_v45  ;;  %3780 = vmatpush1.bf16.msra.mxu1 %v7317_v46  ;;  %v7404_v45 = vld [vmem:[%s10102_s1 + $0xc80] ss:$16 sps:$4 sm:$0xff]   ;;  %v7407_v46 = vld [vmem:[%s10102_s1 + $0xc88] ss:$16 sps:$4 sm:$0xff]  }
 0x158   :  { %3437 = vmatprep.subr.bf16.mxu0 %v7322_v47  ;;  %3781 = vmatprep.subr.bf16.mxu1 %v7325_v48  ;;  %v7412_v47 = vld [vmem:[%s10102_s1 + $0xca4] ss:$16 sps:$4 sm:$0xff]   ;;  %v7415_v48 = vld [vmem:[%s10102_s1 + $0xcac] ss:$16 sps:$4 sm:$0xff]  }
 0x15b   :  { %3438 = vmatpush1.bf16.msra.mxu0 %v7320_v49  ;;  %3782 = vmatpush1.bf16.msra.mxu1 %v7323_v50  ;;  %v7410_v49 = vld [vmem:[%s10102_s1 + $0xca0] ss:$16 sps:$4 sm:$0xff]   ;;  %v7413_v50 = vld [vmem:[%s10102_s1 + $0xca8] ss:$16 sps:$4 sm:$0xff]  }
 0x15c   :  { %3439 = vmatprep.subr.bf16.mxu0 %v7328_v51  ;;  %3783 = vmatprep.subr.bf16.mxu1 %v7331_v52  ;;  %v7418_v51 = vld [vmem:[%s10102_s1 + $0xcc4] ss:$16 sps:$4 sm:$0xff]   ;;  %v7421_v52 = vld [vmem:[%s10102_s1 + $0xccc] ss:$16 sps:$4 sm:$0xff]  }
 0x15f   :  { %3440 = vmatpush1.bf16.msra.mxu0 %v7326_v53  ;;  %3784 = vmatpush1.bf16.msra.mxu1 %v7329_v54  ;;  %v7416_v53 = vld [vmem:[%s10102_s1 + $0xcc0] ss:$16 sps:$4 sm:$0xff]   ;;  %v7419_v54 = vld [vmem:[%s10102_s1 + $0xcc8] ss:$16 sps:$4 sm:$0xff]  }
 0x160   :  { %3441 = vmatprep.subr.bf16.mxu0 %v7334_v55  ;;  %3785 = vmatprep.subr.bf16.mxu1 %v7337_v56  ;;  %v7424_v55 = vld [vmem:[%s10102_s1 + $0xce4] ss:$16 sps:$4 sm:$0xff]   ;;  %v7427_v56 = vld [vmem:[%s10102_s1 + $0xcec] ss:$16 sps:$4 sm:$0xff]  }
 0x163   :  { %3442 = vmatpush1.bf16.msra.mxu0 %v7332_v57  ;;  %3786 = vmatpush1.bf16.msra.mxu1 %v7335_v58  ;;  %v7422_v57 = vld [vmem:[%s10102_s1 + $0xce0] ss:$16 sps:$4 sm:$0xff]   ;;  %v7425_v58 = vld [vmem:[%s10102_s1 + $0xce8] ss:$16 sps:$4 sm:$0xff]  }
 0x164   :  { %3443 = vmatprep.subr.bf16.mxu0 %v7340_v59  ;;  %3787 = vmatprep.subr.bf16.mxu1 %v7343_v60  ;;  %v7430_v59 = vld [vmem:[%s10102_s1 + $0xd04] ss:$16 sps:$4 sm:$0xff]   ;;  %v7433_v60 = vld [vmem:[%s10102_s1 + $0xd0c] ss:$16 sps:$4 sm:$0xff]  }
 0x167   :  { %3444 = vmatpush1.bf16.msra.mxu0 %v7338_v61  ;;  %3788 = vmatpush1.bf16.msra.mxu1 %v7341_v62  ;;  %v7428_v61 = vld [vmem:[%s10102_s1 + $0xd00] ss:$16 sps:$4 sm:$0xff]   ;;  %v7431_v62 = vld [vmem:[%s10102_s1 + $0xd08] ss:$16 sps:$4 sm:$0xff]  }
 0x168   :  { %3445 = vmatprep.subr.bf16.mxu0 %v7346_v63  ;;  %3789 = vmatprep.subr.bf16.mxu1 %v7349_v0  ;;  %v7436_v63 = vld [vmem:[%s10102_s1 + $0xd24] ss:$16 sps:$4 sm:$0xff]   ;;  %v7439_v0 = vld [vmem:[%s10102_s1 + $0xd2c] ss:$16 sps:$4 sm:$0xff]  }
 0x16b   :  { %3446 = vmatpush1.bf16.msra.mxu0 %v7344_v1  ;;  %3790 = vmatpush1.bf16.msra.mxu1 %v7347_v2  ;;  %v7434_v1 = vld [vmem:[%s10102_s1 + $0xd20] ss:$16 sps:$4 sm:$0xff]   ;;  %v7437_v2 = vld [vmem:[%s10102_s1 + $0xd28] ss:$16 sps:$4 sm:$0xff]  }
 0x16c   :  { %3447 = vmatprep.subr.bf16.mxu0 %v7352_v3  ;;  %3791 = vmatprep.subr.bf16.mxu1 %v7355_v4  ;;  %v7442_v3 = vld [vmem:[%s10102_s1 + $0xd44] ss:$16 sps:$4 sm:$0xff]   ;;  %v7445_v4 = vld [vmem:[%s10102_s1 + $0xd4c] ss:$16 sps:$4 sm:$0xff]  }
 0x16f   :  { %3448 = vmatpush1.bf16.msra.mxu0 %v7350_v5  ;;  %3792 = vmatpush1.bf16.msra.mxu1 %v7353_v6  ;;  %v7440_v5 = vld [vmem:[%s10102_s1 + $0xd40] ss:$16 sps:$4 sm:$0xff]   ;;  %v7443_v6 = vld [vmem:[%s10102_s1 + $0xd48] ss:$16 sps:$4 sm:$0xff]  }
 0x170   :  { %3449 = vmatprep.subr.bf16.mxu0 %v7358_v7  ;;  %3793 = vmatprep.subr.bf16.mxu1 %v7361_v8  ;;  %v7448_v7 = vld [vmem:[%s10102_s1 + $0xd64] ss:$16 sps:$4 sm:$0xff]   ;;  %v7451_v8 = vld [vmem:[%s10102_s1 + $0xd6c] ss:$16 sps:$4 sm:$0xff]  }
 0x173   :  { %3450 = vmatpush1.bf16.msra.mxu0 %v7356_v9  ;;  %3794 = vmatpush1.bf16.msra.mxu1 %v7359_v10  ;;  %v7446_v9 = vld [vmem:[%s10102_s1 + $0xd60] ss:$16 sps:$4 sm:$0xff]   ;;  %v7449_v10 = vld [vmem:[%s10102_s1 + $0xd68] ss:$16 sps:$4 sm:$0xff]  }
 0x174   :  { %3451 = vmatprep.subr.bf16.mxu0 %v7364_v11  ;;  %3795 = vmatprep.subr.bf16.mxu1 %v7367_v12  ;;  %v7454_v11 = vld [vmem:[%s10102_s1 + $0xd84] ss:$16 sps:$4 sm:$0xff]   ;;  %v7457_v12 = vld [vmem:[%s10102_s1 + $0xd8c] ss:$16 sps:$4 sm:$0xff]  }
 0x177   :  { %3452 = vmatpush1.bf16.msra.mxu0 %v7362_v13  ;;  %3796 = vmatpush1.bf16.msra.mxu1 %v7365_v16  ;;  %v7452_v13 = vld [vmem:[%s10102_s1 + $0xd80] ss:$16 sps:$4 sm:$0xff]   ;;  %v7455_v16 = vld [vmem:[%s10102_s1 + $0xd88] ss:$16 sps:$4 sm:$0xff]  }
 0x178   :  { %3453 = vmatprep.subr.bf16.mxu0 %v7370_v17  ;;  %3797 = vmatprep.subr.bf16.mxu1 %v7373_v20  ;;  %v7460_v17 = vld [vmem:[%s10102_s1 + $0xda4] ss:$16 sps:$4 sm:$0xff]   ;;  %v7463_v20 = vld [vmem:[%s10102_s1 + $0xdac] ss:$16 sps:$4 sm:$0xff]  }
 0x17b   :  { %3454 = vmatpush1.bf16.msra.mxu0 %v7368_v15  ;;  %3798 = vmatpush1.bf16.msra.mxu1 %v7371_v22  ;;  %v7458_v15 = vld [vmem:[%s10102_s1 + $0xda0] ss:$16 sps:$4 sm:$0xff]   ;;  %v7461_v22 = vld [vmem:[%s10102_s1 + $0xda8] ss:$16 sps:$4 sm:$0xff]  }
 0x17c   :  { %3455 = vmatprep.subr.bf16.mxu0 %v7376_v23  ;;  %3799 = vmatprep.subr.bf16.mxu1 %v7379_v18  ;;  %v7466_v23 = vld [vmem:[%s10102_s1 + $0xdc4] ss:$16 sps:$4 sm:$0xff]   ;;  %v7469_v18 = vld [vmem:[%s10102_s1 + $0xdcc] ss:$16 sps:$4 sm:$0xff]  }
 0x17f   :  { %3456 = vmatpush1.bf16.msra.mxu0 %v7374_v25  ;;  %3800 = vmatpush1.bf16.msra.mxu1 %v7377_v26  ;;  %v7464_v25 = vld [vmem:[%s10102_s1 + $0xdc0] ss:$16 sps:$4 sm:$0xff]   ;;  %v7467_v26 = vld [vmem:[%s10102_s1 + $0xdc8] ss:$16 sps:$4 sm:$0xff]  }
 0x180   :  { %3468 = vmatprep.subr.bf16.mxu0 %v7382_v27  ;;  %3812 = vmatprep.subr.bf16.mxu1 %v7385_v28  ;;  %v7472_v27 = vld [vmem:[%s10102_s1 + $0xde4] ss:$16 sps:$4 sm:$0xff]   ;;  %v7475_v28 = vld [vmem:[%s10102_s1 + $0xdec] ss:$16 sps:$4 sm:$0xff]  }
 0x182   :  { %3458 = vmatmul.mubr.bf16.vlgmr.msra.gmra.mrb[0].mxu0 %v5918_v14  ;;  %3802 = vmatmul.mubr.bf16.vlgmr.msra.gmra.mrb[0].mxu1 %v5918_v14  ;;  %v7470_v14 = vld [vmem:[%s10102_s1 + $0xde0] ss:$16 sps:$4 sm:$0xff]  }
 0x183   :  { %3469 = vmatpush1.bf16.msra.mxu0 %v7380_v30  ;;  %3813 = vmatpush1.bf16.msra.mxu1 %v7383_v19  ;;  %v7473_v30 = vld [vmem:[%s10102_s1 + $0xde8] ss:$16 sps:$4 sm:$0xff]   ;;  %v7478_v19 = vld [vmem:[%s10102_s1 + $0xe04] ss:$16 sps:$4 sm:$0xff]  }
 0x184   :  { %3470 = vmatprep.subr.bf16.mxu0 %v7388_v24  ;;  %3814 = vmatprep.subr.bf16.mxu1 %v7391_v31  ;;  %v7481_v24 = vld [vmem:[%s10102_s1 + $0xe0c] ss:$16 sps:$4 sm:$0xff]   ;;  %v5920_v31 = vcombine.low %v8839_v21, %v8844_v29  ;;  %v7479_v21 = vld [vmem:[%s10102_s1 + $0xe08] ss:$16 sps:$4 sm:$0xff]   ;;  %v7484_v29 = vld [vmem:[%s10102_s1 + $0xe24] ss:$16 sps:$4 sm:$0xff]  }
 0x185   :  { %3500 = vmatprep.mubr.bf16.mxu0 %v5921_v32  ;;  %3844 = vmatprep.mubr.bf16.mxu1 %v5921_v32  ;;  %v9045_v32 = vld [vmem:[%s10103_s0 + $0x38] sm:$0xff] }
 0x187   :  { %3471 = vmatpush1.bf16.msra.mxu0 %v7386_v33  ;;  %3815 = vmatpush1.bf16.msra.mxu1 %v7389_v34  ;;  %v9050_v33 = vld [vmem:[%s10103_s0 + $0x78] sm:$0xff]  ;;  %v7476_v34 = vld [vmem:[%s10102_s1 + $0xe00] ss:$16 sps:$4 sm:$0xff]  }
 0x188   :  { %3472 = vmatprep.subr.bf16.mxu0 %v7394_v35  ;;  %3816 = vmatprep.subr.bf16.mxu1 %v7397_v36  ;;  %v7487_v35 = vld [vmem:[%s10102_s1 + $0xe2c] ss:$16 sps:$4 sm:$0xff]   ;;  %v5923_v36 = vcombine.high %v9045_v32, %v9050_v33 }
 0x18b   :  { %3473 = vmatpush1.bf16.msra.mxu0 %v7392_v37  ;;  %3817 = vmatpush1.bf16.msra.mxu1 %v7395_v38  ;;  %v7482_v37 = vld [vmem:[%s10102_s1 + $0xe20] ss:$16 sps:$4 sm:$0xff]   ;;  %v7485_v38 = vld [vmem:[%s10102_s1 + $0xe28] ss:$16 sps:$4 sm:$0xff]  }
 0x18c   :  { %3474 = vmatprep.subr.bf16.mxu0 %v7400_v39  ;;  %3818 = vmatprep.subr.bf16.mxu1 %v7403_v40  ;;  %v7490_v39 = vld [vmem:[%s10102_s1 + $0xe44] ss:$16 sps:$4 sm:$0xff]   ;;  %v7493_v40 = vld [vmem:[%s10102_s1 + $0xe4c] ss:$16 sps:$4 sm:$0xff]  }
 0x18f   :  { %3475 = vmatpush1.bf16.msra.mxu0 %v7398_v41  ;;  %3819 = vmatpush1.bf16.msra.mxu1 %v7401_v42  ;;  %v7488_v41 = vld [vmem:[%s10102_s1 + $0xe40] ss:$16 sps:$4 sm:$0xff]   ;;  %v7491_v42 = vld [vmem:[%s10102_s1 + $0xe48] ss:$16 sps:$4 sm:$0xff]  }
 0x190   :  { %3476 = vmatprep.subr.bf16.mxu0 %v7406_v43  ;;  %3820 = vmatprep.subr.bf16.mxu1 %v7409_v44  ;;  %v7496_v43 = vld [vmem:[%s10102_s1 + $0xe64] ss:$16 sps:$4 sm:$0xff]   ;;  %v7499_v44 = vld [vmem:[%s10102_s1 + $0xe6c] ss:$16 sps:$4 sm:$0xff]  }
 0x193   :  { %3477 = vmatpush1.bf16.msra.mxu0 %v7404_v45  ;;  %3821 = vmatpush1.bf16.msra.mxu1 %v7407_v46  ;;  %v7494_v45 = vld [vmem:[%s10102_s1 + $0xe60] ss:$16 sps:$4 sm:$0xff]   ;;  %v7497_v46 = vld [vmem:[%s10102_s1 + $0xe68] ss:$16 sps:$4 sm:$0xff]  }
 0x194   :  { %3478 = vmatprep.subr.bf16.mxu0 %v7412_v47  ;;  %3822 = vmatprep.subr.bf16.mxu1 %v7415_v48  ;;  %v7502_v47 = vld [vmem:[%s10102_s1 + $0xe84] ss:$16 sps:$4 sm:$0xff]   ;;  %v7505_v48 = vld [vmem:[%s10102_s1 + $0xe8c] ss:$16 sps:$4 sm:$0xff]  }
 0x197   :  { %3479 = vmatpush1.bf16.msra.mxu0 %v7410_v49  ;;  %3823 = vmatpush1.bf16.msra.mxu1 %v7413_v50  ;;  %v7500_v49 = vld [vmem:[%s10102_s1 + $0xe80] ss:$16 sps:$4 sm:$0xff]   ;;  %v7503_v50 = vld [vmem:[%s10102_s1 + $0xe88] ss:$16 sps:$4 sm:$0xff]  }
 0x198   :  { %3480 = vmatprep.subr.bf16.mxu0 %v7418_v51  ;;  %3824 = vmatprep.subr.bf16.mxu1 %v7421_v52  ;;  %v7508_v51 = vld [vmem:[%s10102_s1 + $0xea4] ss:$16 sps:$4 sm:$0xff]   ;;  %v7511_v52 = vld [vmem:[%s10102_s1 + $0xeac] ss:$16 sps:$4 sm:$0xff]  }
 0x19b   :  { %3481 = vmatpush1.bf16.msra.mxu0 %v7416_v53  ;;  %3825 = vmatpush1.bf16.msra.mxu1 %v7419_v54  ;;  %v7506_v53 = vld [vmem:[%s10102_s1 + $0xea0] ss:$16 sps:$4 sm:$0xff]   ;;  %v7509_v54 = vld [vmem:[%s10102_s1 + $0xea8] ss:$16 sps:$4 sm:$0xff]  }
 0x19c   :  { %3482 = vmatprep.subr.bf16.mxu0 %v7424_v55  ;;  %3826 = vmatprep.subr.bf16.mxu1 %v7427_v56  ;;  %v7514_v55 = vld [vmem:[%s10102_s1 + $0xec4] ss:$16 sps:$4 sm:$0xff]   ;;  %v7517_v56 = vld [vmem:[%s10102_s1 + $0xecc] ss:$16 sps:$4 sm:$0xff]  }
 0x19f   :  { %3483 = vmatpush1.bf16.msra.mxu0 %v7422_v57  ;;  %3827 = vmatpush1.bf16.msra.mxu1 %v7425_v58  ;;  %v7512_v57 = vld [vmem:[%s10102_s1 + $0xec0] ss:$16 sps:$4 sm:$0xff]   ;;  %v7515_v58 = vld [vmem:[%s10102_s1 + $0xec8] ss:$16 sps:$4 sm:$0xff]  }
 0x1a0   :  { %3484 = vmatprep.subr.bf16.mxu0 %v7430_v59  ;;  %3828 = vmatprep.subr.bf16.mxu1 %v7433_v60  ;;  %v7520_v59 = vld [vmem:[%s10102_s1 + $0xee4] ss:$16 sps:$4 sm:$0xff]   ;;  %v7523_v60 = vld [vmem:[%s10102_s1 + $0xeec] ss:$16 sps:$4 sm:$0xff]  }
 0x1a3   :  { %3485 = vmatpush1.bf16.msra.mxu0 %v7428_v61  ;;  %3829 = vmatpush1.bf16.msra.mxu1 %v7431_v62  ;;  %v7518_v61 = vld [vmem:[%s10102_s1 + $0xee0] ss:$16 sps:$4 sm:$0xff]   ;;  %v7521_v62 = vld [vmem:[%s10102_s1 + $0xee8] ss:$16 sps:$4 sm:$0xff]  }
 0x1a4   :  { %3486 = vmatprep.subr.bf16.mxu0 %v7436_v63  ;;  %3830 = vmatprep.subr.bf16.mxu1 %v7439_v0  ;;  %v7526_v63 = vld [vmem:[%s10102_s1 + $0xf04] ss:$16 sps:$4 sm:$0xff]   ;;  %v7529_v0 = vld [vmem:[%s10102_s1 + $0xf0c] ss:$16 sps:$4 sm:$0xff]  }
 0x1a7   :  { %3487 = vmatpush1.bf16.msra.mxu0 %v7434_v1  ;;  %3831 = vmatpush1.bf16.msra.mxu1 %v7437_v2  ;;  %v7524_v1 = vld [vmem:[%s10102_s1 + $0xf00] ss:$16 sps:$4 sm:$0xff]   ;;  %v7527_v2 = vld [vmem:[%s10102_s1 + $0xf08] ss:$16 sps:$4 sm:$0xff]  }
 0x1a8   :  { %3488 = vmatprep.subr.bf16.mxu0 %v7442_v3  ;;  %3832 = vmatprep.subr.bf16.mxu1 %v7445_v4  ;;  %v7532_v3 = vld [vmem:[%s10102_s1 + $0xf24] ss:$16 sps:$4 sm:$0xff]   ;;  %v7535_v4 = vld [vmem:[%s10102_s1 + $0xf2c] ss:$16 sps:$4 sm:$0xff]  }
 0x1ab   :  { %3489 = vmatpush1.bf16.msra.mxu0 %v7440_v5  ;;  %3833 = vmatpush1.bf16.msra.mxu1 %v7443_v6  ;;  %v7530_v5 = vld [vmem:[%s10102_s1 + $0xf20] ss:$16 sps:$4 sm:$0xff]   ;;  %v7533_v6 = vld [vmem:[%s10102_s1 + $0xf28] ss:$16 sps:$4 sm:$0xff]  }
 0x1ac   :  { %3490 = vmatprep.subr.bf16.mxu0 %v7448_v7  ;;  %3834 = vmatprep.subr.bf16.mxu1 %v7451_v8  ;;  %v7538_v7 = vld [vmem:[%s10102_s1 + $0xf44] ss:$16 sps:$4 sm:$0xff]   ;;  %v7541_v8 = vld [vmem:[%s10102_s1 + $0xf4c] ss:$16 sps:$4 sm:$0xff]  }
 0x1af   :  { %3491 = vmatpush1.bf16.msra.mxu0 %v7446_v9  ;;  %3835 = vmatpush1.bf16.msra.mxu1 %v7449_v10  ;;  %v7536_v9 = vld [vmem:[%s10102_s1 + $0xf40] ss:$16 sps:$4 sm:$0xff]   ;;  %v7539_v10 = vld [vmem:[%s10102_s1 + $0xf48] ss:$16 sps:$4 sm:$0xff]  }
 0x1b0   :  { %3492 = vmatprep.subr.bf16.mxu0 %v7454_v11  ;;  %3836 = vmatprep.subr.bf16.mxu1 %v7457_v12  ;;  %v7544_v11 = vld [vmem:[%s10102_s1 + $0xf64] ss:$16 sps:$4 sm:$0xff]   ;;  %v7547_v12 = vld [vmem:[%s10102_s1 + $0xf6c] ss:$16 sps:$4 sm:$0xff]  }
 0x1b3   :  { %3493 = vmatpush1.bf16.msra.mxu0 %v7452_v13  ;;  %3837 = vmatpush1.bf16.msra.mxu1 %v7455_v16  ;;  %v7542_v13 = vld [vmem:[%s10102_s1 + $0xf60] ss:$16 sps:$4 sm:$0xff]   ;;  %v7545_v16 = vld [vmem:[%s10102_s1 + $0xf68] ss:$16 sps:$4 sm:$0xff]  }
 0x1b4   :  { %3494 = vmatprep.subr.bf16.mxu0 %v7460_v17  ;;  %3838 = vmatprep.subr.bf16.mxu1 %v7463_v20  ;;  %v7550_v17 = vld [vmem:[%s10102_s1 + $0xf84] ss:$16 sps:$4 sm:$0xff]   ;;  %v7553_v20 = vld [vmem:[%s10102_s1 + $0xf8c] ss:$16 sps:$4 sm:$0xff]  }
 0x1b7   :  { %3495 = vmatpush1.bf16.msra.mxu0 %v7458_v15  ;;  %3839 = vmatpush1.bf16.msra.mxu1 %v7461_v22  ;;  %v7548_v15 = vld [vmem:[%s10102_s1 + $0xf80] ss:$16 sps:$4 sm:$0xff]   ;;  %v7551_v22 = vld [vmem:[%s10102_s1 + $0xf88] ss:$16 sps:$4 sm:$0xff]  }
 0x1b8   :  { %3496 = vmatprep.subr.bf16.mxu0 %v7466_v23  ;;  %3840 = vmatprep.subr.bf16.mxu1 %v7469_v18  ;;  %v7556_v23 = vld [vmem:[%s10102_s1 + $0xfa4] ss:$16 sps:$4 sm:$0xff]   ;;  %v7559_v18 = vld [vmem:[%s10102_s1 + $0xfac] ss:$16 sps:$4 sm:$0xff]  }
 0x1bb   :  { %3497 = vmatpush1.bf16.msra.mxu0 %v7464_v25  ;;  %3841 = vmatpush1.bf16.msra.mxu1 %v7467_v26  ;;  %v7554_v25 = vld [vmem:[%s10102_s1 + $0xfa0] ss:$16 sps:$4 sm:$0xff]   ;;  %v7557_v26 = vld [vmem:[%s10102_s1 + $0xfa8] ss:$16 sps:$4 sm:$0xff]  }
 0x1bc   :  { %3498 = vmatprep.subr.bf16.mxu0 %v7472_v27  ;;  %3842 = vmatprep.subr.bf16.mxu1 %v7475_v28  ;;  %v7562_v27 = vld [vmem:[%s10102_s1 + $0xfc4] ss:$16 sps:$4 sm:$0xff]   ;;  %v7565_v28 = vld [vmem:[%s10102_s1 + $0xfcc] ss:$16 sps:$4 sm:$0xff]  }
 0x1bf   :  { %3499 = vmatpush1.bf16.msra.mxu0 %v7470_v14  ;;  %3843 = vmatpush1.bf16.msra.mxu1 %v7473_v30  ;;  %v7560_v14 = vld [vmem:[%s10102_s1 + $0xfc0] ss:$16 sps:$4 sm:$0xff]   ;;  %v7563_v30 = vld [vmem:[%s10102_s1 + $0xfc8] ss:$16 sps:$4 sm:$0xff]  }
 0x1c0   :  { %3511 = vmatprep.subr.bf16.mxu0 %v7478_v19  ;;  %3855 = vmatprep.subr.bf16.mxu1 %v7481_v24  ;;  %v7568_v19 = vld [vmem:[%s10102_s1 + $0xfe4] ss:$16 sps:$4 sm:$0xff]   ;;  %v7571_v24 = vld [vmem:[%s10102_s1 + $0xfec] ss:$16 sps:$4 sm:$0xff]  }
 0x1c2   :  { %3501 = vmatmul.mubr.bf16.vlgmr.msra.gmra.mrb[0].mxu0 %v5920_v31  ;;  %3845 = vmatmul.mubr.bf16.vlgmr.msra.gmra.mrb[0].mxu1 %v5920_v31  ;;  %v3910_v31 = vld [vmem:[%s10104_s3] sm:$0xff] }
 0x1c3   :  { %3512 = vmatpush1.bf16.msra.mxu0 %v7476_v34  ;;  %3856 = vmatpush1.bf16.msra.mxu1 %v7479_v21  ;;  %v3914_v34 = vld [vmem:[%s10104_s3 + $0x20] sm:$0xff]  ;;  %v3911_v21 = vld [vmem:[%s10104_s3 + $0x8] sm:$0xff] }
 0x1c4   :  { %3513 = vmatprep.subr.bf16.mxu0 %v7484_v29  ;;  %3857 = vmatprep.subr.bf16.mxu1 %v7487_v35  ;;  %v3915_v29 = vld [vmem:[%s10104_s3 + $0x28] sm:$0xff]  ;;  %v7566_v35 = vld [vmem:[%s10102_s1 + $0xfe0] ss:$16 sps:$4 sm:$0xff]  }
 0x1c5   :  { %3543 = vmatprep.mubr.bf16.mxu0 %v5923_v36  ;;  %3887 = vmatprep.mubr.bf16.mxu1 %v5923_v36  ;;  %v7569_v36 = vld [vmem:[%s10102_s1 + $0xfe8] ss:$16 sps:$4 sm:$0xff]  }
 0x1c7   :  { %3514 = vmatpush1.bf16.msra.mxu0 %v7482_v37  ;;  %3858 = vmatpush1.bf16.msra.mxu1 %v7485_v38  ;;  %v6437_v37 = vcombine.high %v3910_v31, %v3914_v34  ;;  %v6439_v38 = vcombine.high %v3911_v21, %v3915_v29 }
 0x1c8   :  { %3515 = vmatprep.subr.bf16.mxu0 %v7490_v39  ;;  %3859 = vmatprep.subr.bf16.mxu1 %v7493_v40  ;;  %v3918_v39 = vld [vmem:[%s10104_s3 + $0x40] sm:$0xff] }
 0x1c9   :  { %v3922_v40 = vld [vmem:[%s10104_s3 + $0x60] sm:$0xff] }
 0x1cb   :  { %3516 = vmatpush1.bf16.msra.mxu0 %v7488_v41  ;;  %3860 = vmatpush1.bf16.msra.mxu1 %v7491_v42  ;;  %v3919_v41 = vld [vmem:[%s10104_s3 + $0x48] sm:$0xff] }
 0x1cc   :  { %3517 = vmatprep.subr.bf16.mxu0 %v7496_v43  ;;  %3861 = vmatprep.subr.bf16.mxu1 %v7499_v44  ;;  %v3923_v42 = vld [vmem:[%s10104_s3 + $0x68] sm:$0xff]  ;;  %v5922_v43 = vcombine.low %v9045_v32, %v9050_v33  ;;  %v6436_v44 = vcombine.low %v3910_v31, %v3914_v34  ;;  %v3974_v34 = vld [vmem:[%s10104_s3 + $0x200] sm:$0xff] }
 0x1cd   :  { %v3927_v32 = vld [vmem:[%s10104_s3 + $0x88] sm:$0xff] }
 0x1ce   :  { %v3931_v33 = vld [vmem:[%s10104_s3 + $0xa8] sm:$0xff] }
 0x1cf   :  { %3518 = vmatpush1.bf16.msra.mxu0 %v7494_v45  ;;  %3862 = vmatpush1.bf16.msra.mxu1 %v7497_v46  ;;  %v6438_v45 = vcombine.low %v3911_v21, %v3915_v29  ;;  %v6445_v46 = vcombine.high %v3918_v39, %v3922_v40  ;;  %v3978_v21 = vld [vmem:[%s10104_s3 + $0x220] sm:$0xff]  ;;  %v3975_v29 = vld [vmem:[%s10104_s3 + $0x208] sm:$0xff] }
 0x1d0   :  { %3519 = vmatprep.subr.bf16.mxu0 %v7502_v47  ;;  %3863 = vmatprep.subr.bf16.mxu1 %v7505_v48  ;;  %v6447_v47 = vcombine.high %v3919_v41, %v3923_v42  ;;  %v3926_v48 = vld [vmem:[%s10104_s3 + $0x80] sm:$0xff] }
 0x1d3   :  { %3520 = vmatpush1.bf16.msra.mxu0 %v7500_v49  ;;  %3864 = vmatpush1.bf16.msra.mxu1 %v7503_v50  ;;  %v3930_v49 = vld [vmem:[%s10104_s3 + $0xa0] sm:$0xff]  ;;  %v6444_v50 = vcombine.low %v3918_v39, %v3922_v40 }
 0x1d4   :  { %3521 = vmatprep.subr.bf16.mxu0 %v7508_v51  ;;  %3865 = vmatprep.subr.bf16.mxu1 %v7511_v52  ;;  %v6446_v51 = vcombine.low %v3919_v41, %v3923_v42  ;;  %v6453_v52 = vcombine.high %v3926_v48, %v3930_v49  ;;  %v3982_v40 = vld [vmem:[%s10104_s3 + $0x240] sm:$0xff]  ;;  %v3983_v42 = vld [vmem:[%s10104_s3 + $0x248] sm:$0xff] }
 0x1d5   :  { %v3986_v41 = vld [vmem:[%s10104_s3 + $0x260] sm:$0xff] }
 0x1d7   :  { %3522 = vmatpush1.bf16.msra.mxu0 %v7506_v53  ;;  %3866 = vmatpush1.bf16.msra.mxu1 %v7509_v54  ;;  %v6455_v53 = vcombine.high %v3927_v32, %v3931_v33  ;;  %v3934_v54 = vld [vmem:[%s10104_s3 + $0xc0] sm:$0xff] }
 0x1d8   :  { %3523 = vmatprep.subr.bf16.mxu0 %v7514_v55  ;;  %3867 = vmatprep.subr.bf16.mxu1 %v7517_v56  ;;  %v3938_v55 = vld [vmem:[%s10104_s3 + $0xe0] sm:$0xff]  ;;  %v3935_v56 = vld [vmem:[%s10104_s3 + $0xc8] sm:$0xff] }
 0x1db   :  { %3524 = vmatpush1.bf16.msra.mxu0 %v7512_v57  ;;  %3868 = vmatpush1.bf16.msra.mxu1 %v7515_v58  ;;  %v3939_v57 = vld [vmem:[%s10104_s3 + $0xe8] sm:$0xff]  ;;  %v6452_v58 = vcombine.low %v3926_v48, %v3930_v49  ;;  %v3990_v48 = vld [vmem:[%s10104_s3 + $0x280] sm:$0xff] }
 0x1dc   :  { %3525 = vmatprep.subr.bf16.mxu0 %v7520_v59  ;;  %3869 = vmatprep.subr.bf16.mxu1 %v7523_v60  ;;  %v6454_v59 = vcombine.low %v3927_v32, %v3931_v33  ;;  %v6461_v60 = vcombine.high %v3934_v54, %v3938_v55  ;;  %v3994_v49 = vld [vmem:[%s10104_s3 + $0x2a0] sm:$0xff]  ;;  %v3991_v32 = vld [vmem:[%s10104_s3 + $0x288] sm:$0xff] }
 0x1dd   :  { %v3995_v33 = vld [vmem:[%s10104_s3 + $0x2a8] sm:$0xff] }
 0x1df   :  { %3526 = vmatpush1.bf16.msra.mxu0 %v7518_v61  ;;  %3870 = vmatpush1.bf16.msra.mxu1 %v7521_v62  ;;  %v6463_v61 = vcombine.high %v3935_v56, %v3939_v57  ;;  %v3942_v62 = vld [vmem:[%s10104_s3 + $0x100] sm:$0xff] }
 0x1e0   :  { %3527 = vmatprep.subr.bf16.mxu0 %v7526_v63  ;;  %3871 = vmatprep.subr.bf16.mxu1 %v7529_v0  ;;  %v3946_v63 = vld [vmem:[%s10104_s3 + $0x120] sm:$0xff]  ;;  %v3943_v0 = vld [vmem:[%s10104_s3 + $0x108] sm:$0xff] }
 0x1e3   :  { %3528 = vmatpush1.bf16.msra.mxu0 %v7524_v1  ;;  %3872 = vmatpush1.bf16.msra.mxu1 %v7527_v2  ;;  %v3947_v1 = vld [vmem:[%s10104_s3 + $0x128] sm:$0xff]  ;;  %v6460_v2 = vcombine.low %v3934_v54, %v3938_v55  ;;  %v3998_v54 = vld [vmem:[%s10104_s3 + $0x2c0] sm:$0xff] }
 0x1e4   :  { %3529 = vmatprep.subr.bf16.mxu0 %v7532_v3  ;;  %3873 = vmatprep.subr.bf16.mxu1 %v7535_v4  ;;  %v6462_v3 = vcombine.low %v3935_v56, %v3939_v57  ;;  %v6469_v4 = vcombine.high %v3942_v62, %v3946_v63  ;;  %v4002_v55 = vld [vmem:[%s10104_s3 + $0x2e0] sm:$0xff]  ;;  %v3999_v56 = vld [vmem:[%s10104_s3 + $0x2c8] sm:$0xff] }
 0x1e5   :  { %v4003_v57 = vld [vmem:[%s10104_s3 + $0x2e8] sm:$0xff] }
 0x1e7   :  { %3530 = vmatpush1.bf16.msra.mxu0 %v7530_v5  ;;  %3874 = vmatpush1.bf16.msra.mxu1 %v7533_v6  ;;  %v6471_v5 = vcombine.high %v3943_v0, %v3947_v1  ;;  %v3950_v6 = vld [vmem:[%s10104_s3 + $0x140] sm:$0xff] }
 0x1e8   :  { %3531 = vmatprep.subr.bf16.mxu0 %v7538_v7  ;;  %3875 = vmatprep.subr.bf16.mxu1 %v7541_v8  ;;  %v3954_v7 = vld [vmem:[%s10104_s3 + $0x160] sm:$0xff]  ;;  %v3951_v8 = vld [vmem:[%s10104_s3 + $0x148] sm:$0xff] }
 0x1eb   :  { %3532 = vmatpush1.bf16.msra.mxu0 %v7536_v9  ;;  %3876 = vmatpush1.bf16.msra.mxu1 %v7539_v10  ;;  %v3955_v9 = vld [vmem:[%s10104_s3 + $0x168] sm:$0xff]  ;;  %v6468_v10 = vcombine.low %v3942_v62, %v3946_v63  ;;  %v4006_v62 = vld [vmem:[%s10104_s3 + $0x300] sm:$0xff] }
 0x1ec   :  { %3533 = vmatprep.subr.bf16.mxu0 %v7544_v11  ;;  %3877 = vmatprep.subr.bf16.mxu1 %v7547_v12  ;;  %v6470_v11 = vcombine.low %v3943_v0, %v3947_v1  ;;  %v6477_v12 = vcombine.high %v3950_v6, %v3954_v7  ;;  %v4010_v63 = vld [vmem:[%s10104_s3 + $0x320] sm:$0xff]  ;;  %v4007_v0 = vld [vmem:[%s10104_s3 + $0x308] sm:$0xff] }
 0x1ed   :  { %v4011_v1 = vld [vmem:[%s10104_s3 + $0x328] sm:$0xff] }
 0x1ef   :  { %3534 = vmatpush1.bf16.msra.mxu0 %v7542_v13  ;;  %3878 = vmatpush1.bf16.msra.mxu1 %v7545_v16  ;;  %v6479_v13 = vcombine.high %v3951_v8, %v3955_v9  ;;  %v3958_v16 = vld [vmem:[%s10104_s3 + $0x180] sm:$0xff] }
 0x1f0   :  { %3535 = vmatprep.subr.bf16.mxu0 %v7550_v17  ;;  %3879 = vmatprep.subr.bf16.mxu1 %v7553_v20  ;;  %v3962_v17 = vld [vmem:[%s10104_s3 + $0x1a0] sm:$0xff]  ;;  %v3959_v20 = vld [vmem:[%s10104_s3 + $0x188] sm:$0xff] }
 0x1f3   :  { %3536 = vmatpush1.bf16.msra.mxu0 %v7548_v15  ;;  %3880 = vmatpush1.bf16.msra.mxu1 %v7551_v22  ;;  %v3963_v15 = vld [vmem:[%s10104_s3 + $0x1a8] sm:$0xff]  ;;  %v6476_v22 = vcombine.low %v3950_v6, %v3954_v7  ;;  %v4014_v6 = vld [vmem:[%s10104_s3 + $0x340] sm:$0xff] }
 0x1f4   :  { %3537 = vmatprep.subr.bf16.mxu0 %v7556_v23  ;;  %3881 = vmatprep.subr.bf16.mxu1 %v7559_v18  ;;  %v6478_v23 = vcombine.low %v3951_v8, %v3955_v9  ;;  %v6485_v18 = vcombine.high %v3958_v16, %v3962_v17  ;;  %v4018_v7 = vld [vmem:[%s10104_s3 + $0x360] sm:$0xff]  ;;  %v4015_v8 = vld [vmem:[%s10104_s3 + $0x348] sm:$0xff] }
 0x1f5   :  { %v4019_v9 = vld [vmem:[%s10104_s3 + $0x368] sm:$0xff] }
 0x1f7   :  { %3538 = vmatpush1.bf16.msra.mxu0 %v7554_v25  ;;  %3882 = vmatpush1.bf16.msra.mxu1 %v7557_v26  ;;  %v6487_v25 = vcombine.high %v3959_v20, %v3963_v15  ;;  %v3966_v26 = vld [vmem:[%s10104_s3 + $0x1c0] sm:$0xff] }
 0x1f8   :  { %3539 = vmatprep.subr.bf16.mxu0 %v7562_v27  ;;  %3883 = vmatprep.subr.bf16.mxu1 %v7565_v28  ;;  %v3970_v27 = vld [vmem:[%s10104_s3 + $0x1e0] sm:$0xff]  ;;  %v3967_v28 = vld [vmem:[%s10104_s3 + $0x1c8] sm:$0xff] }
 0x1fb   :  { %3540 = vmatpush1.bf16.msra.mxu0 %v7560_v14  ;;  %3884 = vmatpush1.bf16.msra.mxu1 %v7563_v30  ;;  %v3971_v14 = vld [vmem:[%s10104_s3 + $0x1e8] sm:$0xff]  ;;  %v6484_v30 = vcombine.low %v3958_v16, %v3962_v17  ;;  %v6540_v16 = vcombine.low %v4014_v6, %v4018_v7  ;;  %v6542_v17 = vcombine.low %v4015_v8, %v4019_v9 }
 0x1fc   :  { %3541 = vmatprep.subr.bf16.mxu0 %v7568_v19  ;;  %3885 = vmatprep.subr.bf16.mxu1 %v7571_v24  ;;  %v6486_v19 = vcombine.low %v3959_v20, %v3963_v15  ;;  %v6493_v24 = vcombine.high %v3966_v26, %v3970_v27  ;;  %v6495_v31 = vcombine.high %v3967_v28, %v3971_v14  ;;  %v4022_v20 = vld [vmem:[%s10104_s3 + $0x380] sm:$0xff] }
 0x1fd   :  { %v4026_v15 = vld [vmem:[%s10104_s3 + $0x3a0] sm:$0xff] }
 0x1ff   :  { %3542 = vmatpush1.bf16.msra.mxu0 %v7566_v35  ;;  %3886 = vmatpush1.bf16.msra.mxu1 %v7569_v36  ;;  %v3979_v35 = vld [vmem:[%s10104_s3 + $0x228] sm:$0xff]  ;;  %v6492_v36 = vcombine.low %v3966_v26, %v3970_v27 }
 0x200   :  { %5488 = vmatprep.subr.bf16.mxu0 %v6437_v37  ;;  %5574 = vmatprep.subr.bf16.mxu1 %v6439_v38  ;;  %v6494_v37 = vcombine.low %v3967_v28, %v3971_v14  ;;  %v6501_v38 = vcombine.high %v3974_v34, %v3978_v21  ;;  %v6503_v39 = vcombine.high %v3975_v29, %v3979_v35  ;;  %v4030_v28 = vld [vmem:[%s10104_s3 + $0x3c0] sm:$0xff] }
 0x201   :  { %v4034_v14 = vld [vmem:[%s10104_s3 + $0x3e0] sm:$0xff] }
 0x202   :  { %3544 = vmatmul.mubr.bf16.vlgmr.msra.gmra.mrb[0].mxu0 %v5922_v43  ;;  %3888 = vmatmul.mubr.bf16.vlgmr.msra.gmra.mrb[0].mxu1 %v5922_v43  ;;  %v3987_v43 = vld [vmem:[%s10104_s3 + $0x268] sm:$0xff] }
 0x203   :  { %5489 = vmatpush1.bf16.msra.mxu0 %v6436_v44  ;;  %5575 = vmatpush1.bf16.msra.mxu1 %v6438_v45  ;;  %v6500_v44 = vcombine.low %v3974_v34, %v3978_v21  ;;  %v6502_v45 = vcombine.low %v3975_v29, %v3979_v35  ;;  %v9437_v29 = vld [vmem:[%s10104_s3 + $0x400] sm:$0xff] }
 0x204   :  { %5490 = vmatprep.subr.bf16.mxu0 %v6445_v46  ;;  %5576 = vmatprep.subr.bf16.mxu1 %v6447_v47  ;;  %v6509_v46 = vcombine.high %v3982_v40, %v3986_v41  ;;  %v6511_v47 = vcombine.high %v3983_v42, %v3987_v43  ;;  %v9442_v35 = vld [vmem:[%s10104_s3 + $0x420] sm:$0xff] }
 0x207   :  { %5491 = vmatpush1.bf16.msra.mxu0 %v6444_v50  ;;  %5577 = vmatpush1.bf16.msra.mxu1 %v6446_v51  ;;  %v6508_v50 = vcombine.low %v3982_v40, %v3986_v41  ;;  %v6510_v51 = vcombine.low %v3983_v42, %v3987_v43  ;;  %v550_v42 = vlaneseq }
 0x208   :  { %5492 = vmatprep.subr.bf16.mxu0 %v6453_v52  ;;  %5578 = vmatprep.subr.bf16.mxu1 %v6455_v53  ;;  %v6517_v52 = vcombine.high %v3990_v48, %v3994_v49  ;;  %v6519_v53 = vcombine.high %v3991_v32, %v3995_v33 }
 0x209   :  { %v9458_v43 = vshrl.u32 %v550_v42, 7  ;;  %v4075_v42 = vld [vmem:[%s10104_s3 + $0x528] sm:$0xff] }
 0x20b   :  { %5493 = vmatpush1.bf16.msra.mxu0 %v6452_v58  ;;  %5579 = vmatpush1.bf16.msra.mxu1 %v6454_v59  ;;  %v6516_v58 = vcombine.low %v3990_v48, %v3994_v49  ;;  %v6518_v59 = vcombine.low %v3991_v32, %v3995_v33  ;;  %v564_v48 = vsub.s32 3, %v9458_v43 }
 0x20c   :  { %5494 = vmatprep.subr.bf16.mxu0 %v6461_v60  ;;  %5580 = vmatprep.subr.bf16.mxu1 %v6463_v61  ;;  %v6525_v60 = vcombine.high %v3998_v54, %v4002_v55  ;;  %v6527_v61 = vcombine.high %v3999_v56, %v4003_v57 }
 0x20f   :  { %5495 = vmatpush1.bf16.msra.mxu0 %v6460_v2  ;;  %5581 = vmatpush1.bf16.msra.mxu1 %v6462_v3  ;;  %v6524_v2 = vcombine.low %v3998_v54, %v4002_v55  ;;  %v6526_v3 = vcombine.low %v3999_v56, %v4003_v57 }
 0x210   :  { %5496 = vmatprep.subr.bf16.mxu0 %v6469_v4  ;;  %5582 = vmatprep.subr.bf16.mxu1 %v6471_v5  ;;  %v6533_v4 = vcombine.high %v4006_v62, %v4010_v63  ;;  %v6535_v5 = vcombine.high %v4007_v0, %v4011_v1 }
 0x213   :  { %5497 = vmatpush1.bf16.msra.mxu0 %v6468_v10  ;;  %5583 = vmatpush1.bf16.msra.mxu1 %v6470_v11  ;;  %v6532_v10 = vcombine.low %v4006_v62, %v4010_v63  ;;  %v6534_v11 = vcombine.low %v4007_v0, %v4011_v1 }
 0x214   :  { %5498 = vmatprep.subr.bf16.mxu0 %v6477_v12  ;;  %5584 = vmatprep.subr.bf16.mxu1 %v6479_v13  ;;  %v6541_v12 = vcombine.high %v4014_v6, %v4018_v7  ;;  %v6543_v13 = vcombine.high %v4015_v8, %v4019_v9 }
 0x217   :  { %5499 = vmatpush1.bf16.msra.mxu0 %v6476_v22  ;;  %5585 = vmatpush1.bf16.msra.mxu1 %v6478_v23  ;;  %v4023_v22 = vld [vmem:[%s10104_s3 + $0x388] sm:$0xff]  ;;  %v6549_v23 = vcombine.high %v4022_v20, %v4026_v15 }
 0x218   :  { %5500 = vmatprep.subr.bf16.mxu0 %v6485_v18  ;;  %5586 = vmatprep.subr.bf16.mxu1 %v6487_v25  ;;  %v4027_v18 = vld [vmem:[%s10104_s3 + $0x3a8] sm:$0xff]  ;;  %v6548_v25 = vcombine.low %v4022_v20, %v4026_v15 }
 0x219   :  { %v6550_v26 = vcombine.low %v4023_v22, %v4027_v18  ;;  %v6551_v27 = vcombine.high %v4023_v22, %v4027_v18  ;;  %v4051_v20 = vld [vmem:[%s10104_s3 + $0x468] sm:$0xff] }
 0x21b   :  { %5501 = vmatpush1.bf16.msra.mxu0 %v6484_v30  ;;  %5587 = vmatpush1.bf16.msra.mxu1 %v6486_v19  ;;  %v4031_v30 = vld [vmem:[%s10104_s3 + $0x3c8] sm:$0xff]  ;;  %v6557_v19 = vcombine.high %v4030_v28, %v4034_v14 }
 0x21c   :  { %5502 = vmatprep.subr.bf16.mxu0 %v6493_v24  ;;  %5588 = vmatprep.subr.bf16.mxu1 %v6495_v31  ;;  %v4035_v24 = vld [vmem:[%s10104_s3 + $0x3e8] sm:$0xff]  ;;  %v6556_v31 = vcombine.low %v4030_v28, %v4034_v14 }
 0x21d   :  { %v6558_v34 = vcombine.low %v4031_v30, %v4035_v24  ;;  %v6559_v21 = vcombine.high %v4031_v30, %v4035_v24  ;;  %v4059_v28 = vld [vmem:[%s10104_s3 + $0x4a8] sm:$0xff] }
 0x21f   :  { %5503 = vmatpush1.bf16.msra.mxu0 %v6492_v36  ;;  %5589 = vmatpush1.bf16.msra.mxu1 %v6494_v37  ;;  %v9447_v36 = vld [vmem:[%s10104_s3 + $0x408] sm:$0xff]  ;;  %v6565_v37 = vcombine.high %v9437_v29, %v9442_v35 }
 0x220   :  { %5504 = vmatprep.subr.bf16.mxu0 %v6501_v38  ;;  %5590 = vmatprep.subr.bf16.mxu1 %v6503_v39  ;;  %v4043_v38 = vld [vmem:[%s10104_s3 + $0x428] sm:$0xff]  ;;  %v6564_v39 = vcombine.low %v9437_v29, %v9442_v35 }
 0x221   :  { %v6566_v40 = vcombine.low %v9447_v36, %v4043_v38  ;;  %v6567_v41 = vcombine.high %v9447_v36, %v4043_v38  ;;  %v4067_v29 = vld [vmem:[%s10104_s3 + $0x4e8] sm:$0xff] }
 0x223   :  { %5505 = vmatpush1.bf16.msra.mxu0 %v6500_v44  ;;  %5591 = vmatpush1.bf16.msra.mxu1 %v6502_v45  ;;  %v552_v44 = vsub.s32 0, %v9458_v43  ;;  %v560_v45 = vsub.s32 2, %v9458_v43 }
 0x224   :  { %5506 = vmatprep.subr.bf16.mxu0 %v6509_v46  ;;  %5592 = vmatprep.subr.bf16.mxu1 %v6511_v47  ;;  %v548_v46 = vld [vmem:[%s10105_s2] sm:$0xf]  ;;  %v556_v47 = vsub.s32 1, %v9458_v43 }
 0x225   :  { %v553_v49 = vrot.slane %v548_v46, %v552_v44  ;;  %v561_v32 = vrot.slane %v548_v46, %v560_v45 }
 0x226   :  { %v557_v33 = vrot.slane %v548_v46, %v556_v47 }
 0x227   :  { %5507 = vmatpush1.bf16.msra.mxu0 %v6508_v50  ;;  %5593 = vmatpush1.bf16.msra.mxu1 %v6510_v51  ;;  %v565_v50 = vrot.slane %v548_v46, %v564_v48 }
 0x228   :  { %5508 = vmatprep.subr.bf16.mxu0 %v6517_v52  ;;  %5594 = vmatprep.subr.bf16.mxu1 %v6519_v53 }
 0x22b   :  { %5509 = vmatpush1.bf16.msra.mxu0 %v6516_v58  ;;  %5595 = vmatpush1.bf16.msra.mxu1 %v6518_v59 }
 0x22c   :  { %5510 = vmatprep.subr.bf16.mxu0 %v6525_v60  ;;  %5596 = vmatprep.subr.bf16.mxu1 %v6527_v61 }
 0x22f   :  { %5511 = vmatpush1.bf16.msra.mxu0 %v6524_v2  ;;  %5597 = vmatpush1.bf16.msra.mxu1 %v6526_v3 }
 0x230   :  { %5512 = vmatprep.subr.bf16.mxu0 %v6533_v4  ;;  %5598 = vmatprep.subr.bf16.mxu1 %v6535_v5 }
 0x233   :  { %5513 = vmatpush1.bf16.msra.mxu0 %v6532_v10  ;;  %5599 = vmatpush1.bf16.msra.mxu1 %v6534_v11  ;;  %v4046_v11 = vld [vmem:[%s10104_s3 + $0x440] sm:$0xff] }
 0x234   :  { %5514 = vmatprep.subr.bf16.mxu0 %v6541_v12  ;;  %5600 = vmatprep.subr.bf16.mxu1 %v6543_v13 }
 0x237   :  { %5515 = vmatpush1.bf16.msra.mxu0 %v6540_v16  ;;  %5601 = vmatpush1.bf16.msra.mxu1 %v6542_v17  ;;  %v4050_v16 = vld [vmem:[%s10104_s3 + $0x460] sm:$0xff]  ;;  %v4047_v17 = vld [vmem:[%s10104_s3 + $0x448] sm:$0xff] }
 0x238   :  { %5516 = vmatprep.subr.bf16.mxu0 %v6549_v23  ;;  %5602 = vmatprep.subr.bf16.mxu1 %v6551_v27  ;;  %v4054_v23 = vld [vmem:[%s10104_s3 + $0x480] sm:$0xff]  ;;  %v6573_v18 = vcombine.high %v4046_v11, %v4050_v16  ;;  %v4055_v27 = vld [vmem:[%s10104_s3 + $0x488] sm:$0xff]  ;;  %v6572_v14 = vcombine.low %v4046_v11, %v4050_v16  ;;  %v6574_v30 = vcombine.low %v4047_v17, %v4051_v20 }
 0x239   :  { %v6583_v24 = vcombine.high %v4055_v27, %v4059_v28  ;;  %v6582_v36 = vcombine.low %v4055_v27, %v4059_v28  ;;  %v4106_v11 = vld [vmem:[%s10104_s3 + $0x620] sm:$0xff]  ;;  %v4103_v16 = vld [vmem:[%s10104_s3 + $0x608] sm:$0xff] }
 0x23a   :  { %v4114_v27 = vld [vmem:[%s10104_s3 + $0x660] sm:$0xff]  ;;  %v4111_v28 = vld [vmem:[%s10104_s3 + $0x648] sm:$0xff] }
 0x23b   :  { %5517 = vmatpush1.bf16.msra.mxu0 %v6548_v25  ;;  %5603 = vmatpush1.bf16.msra.mxu1 %v6550_v26  ;;  %v6575_v25 = vcombine.high %v4047_v17, %v4051_v20  ;;  %v4058_v26 = vld [vmem:[%s10104_s3 + $0x4a0] sm:$0xff]  ;;  %v4107_v17 = vld [vmem:[%s10104_s3 + $0x628] sm:$0xff] }
 0x23c   :  { %5518 = vmatprep.subr.bf16.mxu0 %v6557_v19  ;;  %5604 = vmatprep.subr.bf16.mxu1 %v6559_v21  ;;  %v6581_v19 = vcombine.high %v4054_v23, %v4058_v26  ;;  %v4063_v21 = vld [vmem:[%s10104_s3 + $0x4c8] sm:$0xff]  ;;  %v6580_v35 = vcombine.low %v4054_v23, %v4058_v26  ;;  %v4110_v26 = vld [vmem:[%s10104_s3 + $0x640] sm:$0xff] }
 0x23d   :  { %v6591_v38 = vcombine.high %v4063_v21, %v4067_v29 }
 0x23f   :  { %5519 = vmatpush1.bf16.msra.mxu0 %v6556_v31  ;;  %5605 = vmatpush1.bf16.msra.mxu1 %v6558_v34  ;;  %v4062_v31 = vld [vmem:[%s10104_s3 + $0x4c0] sm:$0xff] }
 0x240   :  { %5531 = vmatprep.subr.bf16.mxu0 %v6565_v37  ;;  %5617 = vmatprep.subr.bf16.mxu1 %v6567_v41  ;;  %v4066_v34 = vld [vmem:[%s10104_s3 + $0x4e0] sm:$0xff]  ;;  %v4071_v41 = vld [vmem:[%s10104_s3 + $0x508] sm:$0xff] }
 0x241   :  { %v6589_v37 = vcombine.high %v4062_v31, %v4066_v34  ;;  %v6588_v46 = vcombine.low %v4062_v31, %v4066_v34  ;;  %v4118_v34 = vld [vmem:[%s10104_s3 + $0x680] sm:$0xff] }
 0x2d5   :  { %v3545_v51 = vpop.f32.mrb[0].mxu0  ;;  %v3889_v52 = vpop.f32.mrb[0].mxu1 }
 0x2d6   :  { %v6708_v53 = vadd.f32 %v3545_v51, %v553_v49  ;;  %v6712_v54 = vadd.f32 %v3889_v52, %v561_v32  ;;  %v3547_v55 = vpop.f32.mrb[1].mxu0  ;;  %v3891_v56 = vpop.f32.mrb[1].mxu1  ;;  %v4082_v51 = vld [vmem:[%s10104_s3 + $0x560] sm:$0xff]  ;;  %v4079_v52 = vld [vmem:[%s10104_s3 + $0x548] sm:$0xff] }
 0x2d7   :  { %v6709_v57 = vadd.f32 %v3547_v55, %v557_v33  ;;  %v6713_v58 = vadd.f32 %v3891_v56, %v565_v50  ;;  %v3549_v59 = vpop.f32.mrb[2].mxu0  ;;  %v3893_v60 = vpop.f32.mrb[2].mxu1  ;;  %v6598_v55 = vcombine.low %v4071_v41, %v4075_v42 }
 0x2d8   :  { %v6710_v61 = vadd.f32 %v3549_v59, %v553_v49  ;;  %v6714_v62 = vadd.f32 %v3893_v60, %v561_v32  ;;  %v3551_v63 = vpop.f32.mrb[3].mxu0  ;;  %v3895_v0 = vpop.f32.mrb[3].mxu1  ;;  %v3898_v3 = vmax.f32 %v6708_v53, 0.0  ;;  %v3900_v4 = vmax.f32 %v6712_v54, 0.0  ;;  %v4083_v53 = vld [vmem:[%s10104_s3 + $0x568] sm:$0xff]  ;;  %v4090_v59 = vld [vmem:[%s10104_s3 + $0x5a0] sm:$0xff] }
 0x2d9   :  { %v6711_v1 = vadd.f32 %v3551_v63, %v557_v33  ;;  %v6715_v2 = vadd.f32 %v3895_v0, %v565_v50  ;;  %v3899_v7 = vmax.f32 %v6709_v57, 0.0  ;;  %v3901_v8 = vmax.f32 %v6713_v58, 0.0  ;;  %v4078_v50 = vld [vmem:[%s10104_s3 + $0x540] sm:$0xff]  ;;  %v4087_v60 = vld [vmem:[%s10104_s3 + $0x588] sm:$0xff] }
 0x2da   :  { %v3902_v5 = vmax.f32 %v6710_v61, 0.0  ;;  %v3904_v6 = vmax.f32 %v6714_v62, 0.0  ;;  %v6590_v49 = vcombine.low %v4063_v21, %v4067_v29  ;;  %v6599_v33 = vcombine.high %v4071_v41, %v4075_v42  ;;  %v4086_v58 = vld [vmem:[%s10104_s3 + $0x580] sm:$0xff]  ;;  %v4091_v61 = vld [vmem:[%s10104_s3 + $0x5a8] sm:$0xff] }
 0x2db   :  { %v3903_v9 = vmax.f32 %v6711_v1, 0.0  ;;  %v3905_v10 = vmax.f32 %v6715_v2, 0.0  ;;  %v6605_v56 = vcombine.high %v4078_v50, %v4082_v51  ;;  %v6607_v57 = vcombine.high %v4079_v52, %v4083_v53  ;;  %v4094_v2 = vld [vmem:[%s10104_s3 + $0x5c0] sm:$0xff]  ;;  %v4119_v29 = vld [vmem:[%s10104_s3 + $0x688] sm:$0xff] }
 0x2dc   :  { %v9478_v12 = vpack.c.bf16 %v3902_v5, %v3898_v3  ;;  %v9480_v13 = vpack.c.bf16 %v3904_v6, %v3900_v4  ;;  %v6604_v62 = vcombine.low %v4078_v50, %v4082_v51  ;;  %v6606_v63 = vcombine.low %v4079_v52, %v4083_v53  ;;  %v4098_v3 = vld [vmem:[%s10104_s3 + $0x5e0] sm:$0xff]  ;;  %v4095_v4 = vld [vmem:[%s10104_s3 + $0x5c8] sm:$0xff] }
 0x2dd   :  { %v9491_v15 = vpack.c.bf16 %v3903_v9, %v3899_v7  ;;  %v9493_v22 = vpack.c.bf16 %v3905_v10, %v3901_v8  ;;  %v6613_v0 = vcombine.high %v4086_v58, %v4090_v59  ;;  %v6615_v1 = vcombine.high %v4087_v60, %v4091_v61  ;;  %v4099_v5 = vld [vmem:[%s10104_s3 + $0x5e8] sm:$0xff]  ;;  %v4102_v10 = vld [vmem:[%s10104_s3 + $0x600] sm:$0xff] }
 0x2de   :  { %v6612_v6 = vcombine.low %v4086_v58, %v4090_v59  ;;  %v6614_v7 = vcombine.low %v4087_v60, %v4091_v61  ;;  %v6621_v8 = vcombine.high %v4094_v2, %v4098_v3  ;;  %v6623_v9 = vcombine.high %v4095_v4, %v4099_v5  ;;  %v4122_v21 = vld [vmem:[%s10104_s3 + $0x6a0] sm:$0xff]  ;;  %v4127_v42 = vld [vmem:[%s10104_s3 + $0x6c8] sm:$0xff] }
 0x2df   :  { %5520 = vmatprep.mubr.bf16.mxu0 %v9491_v15  ;;  %5606 = vmatprep.mubr.bf16.mxu1 %v9491_v15  ;;  %v6620_v20 = vcombine.low %v4094_v2, %v4098_v3  ;;  %v6622_v23 = vcombine.low %v4095_v4, %v4099_v5  ;;  %v4130_v41 = vld [vmem:[%s10104_s3 + $0x6e0] sm:$0xff]  ;;  %v4135_v53 = vld [vmem:[%s10104_s3 + $0x708] sm:$0xff] }
 0x2e0   :  { %5521 = vmatmul.mubr.bf16.vlgmr.msra.gmra.mrb[4].mxu0 %v9478_v12  ;;  %5607 = vmatmul.mubr.bf16.vlgmr.msra.gmra.mrb[4].mxu1 %v9478_v12  ;;  %v4134_v51 = vld [vmem:[%s10104_s3 + $0x700] sm:$0xff]  ;;  %v4143_v61 = vld [vmem:[%s10104_s3 + $0x748] sm:$0xff] }
 0x2e1   :  { %5532 = vmatpush1.bf16.msra.mxu0 %v6564_v39  ;;  %5618 = vmatpush1.bf16.msra.mxu1 %v6566_v40  ;;  %v4070_v39 = vld [vmem:[%s10104_s3 + $0x500] sm:$0xff]  ;;  %v4151_v5 = vld [vmem:[%s10104_s3 + $0x788] sm:$0xff] }
 0x2e2   :  { %5563 = vmatprep.mubr.bf16.mxu0 %v9493_v22  ;;  %5649 = vmatprep.mubr.bf16.mxu1 %v9493_v22  ;;  %v4074_v40 = vld [vmem:[%s10104_s3 + $0x520] sm:$0xff] }
 0x2e3   :  { %5533 = vmatprep.subr.bf16.mxu0 %v6573_v18  ;;  %5619 = vmatprep.subr.bf16.mxu1 %v6575_v25  ;;  %v6597_v32 = vcombine.high %v4070_v39, %v4074_v40  ;;  %v6596_v54 = vcombine.low %v4070_v39, %v4074_v40  ;;  %v6629_v18 = vcombine.high %v4102_v10, %v4106_v11  ;;  %v4126_v40 = vld [vmem:[%s10104_s3 + $0x6c0] sm:$0xff] }
 0x2e4   :  { %v6631_v25 = vcombine.high %v4103_v16, %v4107_v17  ;;  %v4138_v52 = vld [vmem:[%s10104_s3 + $0x720] sm:$0xff] }
 0x2e5   :  { %5534 = vmatpush1.bf16.msra.mxu0 %v6572_v14  ;;  %5620 = vmatpush1.bf16.msra.mxu1 %v6574_v30  ;;  %v4115_v14 = vld [vmem:[%s10104_s3 + $0x668] sm:$0xff]  ;;  %v6628_v30 = vcombine.low %v4102_v10, %v4106_v11  ;;  %v4142_v59 = vld [vmem:[%s10104_s3 + $0x740] sm:$0xff] }
 0x2e6   :  { %5535 = vmatprep.subr.bf16.mxu0 %v6581_v19  ;;  %5621 = vmatprep.subr.bf16.mxu1 %v6583_v24  ;;  %v6630_v19 = vcombine.low %v4103_v16, %v4107_v17  ;;  %v6637_v24 = vcombine.high %v4110_v26, %v4114_v27  ;;  %v6639_v31 = vcombine.high %v4111_v28, %v4115_v14  ;;  %v4146_v60 = vld [vmem:[%s10104_s3 + $0x760] sm:$0xff]  ;;  %v4159_v17 = vld [vmem:[%s10104_s3 + $0x7c8] sm:$0xff] }
 0x2e7   :  { %v4150_v3 = vld [vmem:[%s10104_s3 + $0x780] sm:$0xff] }
 0x2e8   :  { %v4154_v4 = vld [vmem:[%s10104_s3 + $0x7a0] sm:$0xff] }
 0x2e9   :  { %5536 = vmatpush1.bf16.msra.mxu0 %v6580_v35  ;;  %5622 = vmatpush1.bf16.msra.mxu1 %v6582_v36  ;;  %v4123_v35 = vld [vmem:[%s10104_s3 + $0x6a8] sm:$0xff]  ;;  %v6636_v36 = vcombine.low %v4110_v26, %v4114_v27  ;;  %v4158_v11 = vld [vmem:[%s10104_s3 + $0x7c0] sm:$0xff]  ;;  %v3912_v27 = vld [vmem:[%s10104_s3 + $0x10] sm:$0xff] }
 0x2ea   :  { %5537 = vmatprep.subr.bf16.mxu0 %v6589_v37  ;;  %5623 = vmatprep.subr.bf16.mxu1 %v6591_v38  ;;  %v6638_v37 = vcombine.low %v4111_v28, %v4115_v14  ;;  %v6645_v38 = vcombine.high %v4118_v34, %v4122_v21  ;;  %v6647_v39 = vcombine.high %v4119_v29, %v4123_v35  ;;  %v4162_v16 = vld [vmem:[%s10104_s3 + $0x7e0] sm:$0xff]  ;;  %v3916_v28 = vld [vmem:[%s10104_s3 + $0x30] sm:$0xff]  ;;  %v3913_v14 = vld [vmem:[%s10104_s3 + $0x18] sm:$0xff] }
 0x2ed   :  { %5538 = vmatpush1.bf16.msra.mxu0 %v6588_v46  ;;  %5624 = vmatpush1.bf16.msra.mxu1 %v6590_v49  ;;  %v4131_v46 = vld [vmem:[%s10104_s3 + $0x6e8] sm:$0xff]  ;;  %v6644_v49 = vcombine.low %v4118_v34, %v4122_v21  ;;  %v3920_v21 = vld [vmem:[%s10104_s3 + $0x50] sm:$0xff] }
 0x2ee   :  { %5539 = vmatprep.subr.bf16.mxu0 %v6597_v32  ;;  %5625 = vmatprep.subr.bf16.mxu1 %v6599_v33  ;;  %v6646_v32 = vcombine.low %v4119_v29, %v4123_v35  ;;  %v6653_v33 = vcombine.high %v4126_v40, %v4130_v41  ;;  %v6655_v50 = vcombine.high %v4127_v42, %v4131_v46  ;;  %v3924_v29 = vld [vmem:[%s10104_s3 + $0x70] sm:$0xff]  ;;  %v3921_v35 = vld [vmem:[%s10104_s3 + $0x58] sm:$0xff] }
 0x2f1   :  { %5540 = vmatpush1.bf16.msra.mxu0 %v6596_v54  ;;  %5626 = vmatpush1.bf16.msra.mxu1 %v6598_v55  ;;  %v4139_v54 = vld [vmem:[%s10104_s3 + $0x728] sm:$0xff]  ;;  %v6652_v55 = vcombine.low %v4126_v40, %v4130_v41  ;;  %v3928_v41 = vld [vmem:[%s10104_s3 + $0x90] sm:$0xff] }
 0x2f2   :  { %5541 = vmatprep.subr.bf16.mxu0 %v6605_v56  ;;  %5627 = vmatprep.subr.bf16.mxu1 %v6607_v57  ;;  %v6654_v56 = vcombine.low %v4127_v42, %v4131_v46  ;;  %v6661_v57 = vcombine.high %v4134_v51, %v4138_v52  ;;  %v6663_v58 = vcombine.high %v4135_v53, %v4139_v54  ;;  %v3932_v42 = vld [vmem:[%s10104_s3 + $0xb0] sm:$0xff]  ;;  %v3929_v46 = vld [vmem:[%s10104_s3 + $0x98] sm:$0xff] }
 0x2f5   :  { %5542 = vmatpush1.bf16.msra.mxu0 %v6604_v62  ;;  %5628 = vmatpush1.bf16.msra.mxu1 %v6606_v63  ;;  %v4147_v62 = vld [vmem:[%s10104_s3 + $0x768] sm:$0xff]  ;;  %v6660_v63 = vcombine.low %v4134_v51, %v4138_v52  ;;  %v3936_v52 = vld [vmem:[%s10104_s3 + $0xd0] sm:$0xff] }
 0x2f6   :  { %5543 = vmatprep.subr.bf16.mxu0 %v6613_v0  ;;  %5629 = vmatprep.subr.bf16.mxu1 %v6615_v1  ;;  %v6662_v0 = vcombine.low %v4135_v53, %v4139_v54  ;;  %v6669_v1 = vcombine.high %v4142_v59, %v4146_v60  ;;  %v6671_v2 = vcombine.high %v4143_v61, %v4147_v62  ;;  %v3940_v53 = vld [vmem:[%s10104_s3 + $0xf0] sm:$0xff]  ;;  %v3937_v54 = vld [vmem:[%s10104_s3 + $0xd8] sm:$0xff] }
 0x2f9   :  { %5544 = vmatpush1.bf16.msra.mxu0 %v6612_v6  ;;  %5630 = vmatpush1.bf16.msra.mxu1 %v6614_v7  ;;  %v4155_v6 = vld [vmem:[%s10104_s3 + $0x7a8] sm:$0xff]  ;;  %v6668_v7 = vcombine.low %v4142_v59, %v4146_v60  ;;  %v3944_v59 = vld [vmem:[%s10104_s3 + $0x110] sm:$0xff] }
 0x2fa   :  { %5545 = vmatprep.subr.bf16.mxu0 %v6621_v8  ;;  %5631 = vmatprep.subr.bf16.mxu1 %v6623_v9  ;;  %v6670_v8 = vcombine.low %v4143_v61, %v4147_v62  ;;  %v6677_v9 = vcombine.high %v4150_v3, %v4154_v4  ;;  %v6679_v10 = vcombine.high %v4151_v5, %v4155_v6  ;;  %v3948_v60 = vld [vmem:[%s10104_s3 + $0x130] sm:$0xff]  ;;  %v3945_v61 = vld [vmem:[%s10104_s3 + $0x118] sm:$0xff] }
 0x2fb   :  { %v3949_v62 = vld [vmem:[%s10104_s3 + $0x138] sm:$0xff] }
 0x2fd   :  { %5546 = vmatpush1.bf16.msra.mxu0 %v6620_v20  ;;  %5632 = vmatpush1.bf16.msra.mxu1 %v6622_v23  ;;  %v4163_v20 = vld [vmem:[%s10104_s3 + $0x7e8] sm:$0xff]  ;;  %v6676_v23 = vcombine.low %v4150_v3, %v4154_v4  ;;  %v3952_v3 = vld [vmem:[%s10104_s3 + $0x150] sm:$0xff] }
 0x2fe   :  { %5547 = vmatprep.subr.bf16.mxu0 %v6629_v18  ;;  %5633 = vmatprep.subr.bf16.mxu1 %v6631_v25  ;;  %v6678_v18 = vcombine.low %v4151_v5, %v4155_v6  ;;  %v6685_v25 = vcombine.high %v4158_v11, %v4162_v16  ;;  %v6687_v26 = vcombine.high %v4159_v17, %v4163_v20  ;;  %v3956_v4 = vld [vmem:[%s10104_s3 + $0x170] sm:$0xff]  ;;  %v3953_v5 = vld [vmem:[%s10104_s3 + $0x158] sm:$0xff] }
 0x2ff   :  { %v3957_v6 = vld [vmem:[%s10104_s3 + $0x178] sm:$0xff] }
 0x301   :  { %5548 = vmatpush1.bf16.msra.mxu0 %v6628_v30  ;;  %5634 = vmatpush1.bf16.msra.mxu1 %v6630_v19  ;;  %v3917_v30 = vld [vmem:[%s10104_s3 + $0x38] sm:$0xff]  ;;  %v6684_v19 = vcombine.low %v4158_v11, %v4162_v16  ;;  %v3960_v11 = vld [vmem:[%s10104_s3 + $0x190] sm:$0xff] }
 0x302   :  { %5549 = vmatprep.subr.bf16.mxu0 %v6637_v24  ;;  %5635 = vmatprep.subr.bf16.mxu1 %v6639_v31  ;;  %v6686_v24 = vcombine.low %v4159_v17, %v4163_v20  ;;  %v6441_v31 = vcombine.high %v3912_v27, %v3916_v28  ;;  %v6443_v34 = vcombine.high %v3913_v14, %v3917_v30  ;;  %v3964_v16 = vld [vmem:[%s10104_s3 + $0x1b0] sm:$0xff]  ;;  %v3961_v17 = vld [vmem:[%s10104_s3 + $0x198] sm:$0xff] }
 0x303   :  { %v3965_v20 = vld [vmem:[%s10104_s3 + $0x1b8] sm:$0xff] }
 0x305   :  { %5550 = vmatpush1.bf16.msra.mxu0 %v6636_v36  ;;  %5636 = vmatpush1.bf16.msra.mxu1 %v6638_v37  ;;  %v3925_v36 = vld [vmem:[%s10104_s3 + $0x78] sm:$0xff]  ;;  %v6440_v37 = vcombine.low %v3912_v27, %v3916_v28  ;;  %v3968_v27 = vld [vmem:[%s10104_s3 + $0x1d0] sm:$0xff] }
 0x306   :  { %5551 = vmatprep.subr.bf16.mxu0 %v6645_v38  ;;  %5637 = vmatprep.subr.bf16.mxu1 %v6647_v39  ;;  %v6442_v38 = vcombine.low %v3913_v14, %v3917_v30  ;;  %v6449_v39 = vcombine.high %v3920_v21, %v3924_v29  ;;  %v6451_v40 = vcombine.high %v3921_v35, %v3925_v36  ;;  %v3972_v28 = vld [vmem:[%s10104_s3 + $0x1f0] sm:$0xff]  ;;  %v3969_v14 = vld [vmem:[%s10104_s3 + $0x1d8] sm:$0xff] }
 0x307   :  { %v3973_v30 = vld [vmem:[%s10104_s3 + $0x1f8] sm:$0xff] }
 0x309   :  { %5552 = vmatpush1.bf16.msra.mxu0 %v6644_v49  ;;  %5638 = vmatpush1.bf16.msra.mxu1 %v6646_v32  ;;  %v3933_v49 = vld [vmem:[%s10104_s3 + $0xb8] sm:$0xff]  ;;  %v6448_v32 = vcombine.low %v3920_v21, %v3924_v29  ;;  %v3976_v21 = vld [vmem:[%s10104_s3 + $0x210] sm:$0xff] }
 0x30a   :  { %5553 = vmatprep.subr.bf16.mxu0 %v6653_v33  ;;  %5639 = vmatprep.subr.bf16.mxu1 %v6655_v50  ;;  %v6450_v33 = vcombine.low %v3921_v35, %v3925_v36  ;;  %v6457_v50 = vcombine.high %v3928_v41, %v3932_v42  ;;  %v6459_v51 = vcombine.high %v3929_v46, %v3933_v49  ;;  %v3980_v29 = vld [vmem:[%s10104_s3 + $0x230] sm:$0xff]  ;;  %v3977_v35 = vld [vmem:[%s10104_s3 + $0x218] sm:$0xff] }
 0x30b   :  { %v3981_v36 = vld [vmem:[%s10104_s3 + $0x238] sm:$0xff] }
 0x30d   :  { %5554 = vmatpush1.bf16.msra.mxu0 %v6652_v55  ;;  %5640 = vmatpush1.bf16.msra.mxu1 %v6654_v56  ;;  %v6456_v55 = vcombine.low %v3928_v41, %v3932_v42  ;;  %v6458_v56 = vcombine.low %v3929_v46, %v3933_v49  ;;  %v3984_v41 = vld [vmem:[%s10104_s3 + $0x250] sm:$0xff]  ;;  %v3985_v46 = vld [vmem:[%s10104_s3 + $0x258] sm:$0xff] }
 0x30e   :  { %5555 = vmatprep.subr.bf16.mxu0 %v6661_v57  ;;  %5641 = vmatprep.subr.bf16.mxu1 %v6663_v58  ;;  %v6465_v57 = vcombine.high %v3936_v52, %v3940_v53  ;;  %v3988_v42 = vld [vmem:[%s10104_s3 + $0x270] sm:$0xff]  ;;  %v3989_v49 = vld [vmem:[%s10104_s3 + $0x278] sm:$0xff] }
 0x311   :  { %5556 = vmatpush1.bf16.msra.mxu0 %v6660_v63  ;;  %5642 = vmatpush1.bf16.msra.mxu1 %v6662_v0  ;;  %v6464_v63 = vcombine.low %v3936_v52, %v3940_v53  ;;  %v3992_v52 = vld [vmem:[%s10104_s3 + $0x290] sm:$0xff] }
 0x312   :  { %5557 = vmatprep.subr.bf16.mxu0 %v6669_v1  ;;  %5643 = vmatprep.subr.bf16.mxu1 %v6671_v2  ;;  %v6473_v1 = vcombine.high %v3944_v59, %v3948_v60  ;;  %v6475_v2 = vcombine.high %v3945_v61, %v3949_v62  ;;  %v3996_v53 = vld [vmem:[%s10104_s3 + $0x2b0] sm:$0xff] }
 0x315   :  { %5558 = vmatpush1.bf16.msra.mxu0 %v6668_v7  ;;  %5644 = vmatpush1.bf16.msra.mxu1 %v6670_v8  ;;  %v6472_v7 = vcombine.low %v3944_v59, %v3948_v60  ;;  %v6474_v8 = vcombine.low %v3945_v61, %v3949_v62  ;;  %v4000_v59 = vld [vmem:[%s10104_s3 + $0x2d0] sm:$0xff]  ;;  %v4001_v61 = vld [vmem:[%s10104_s3 + $0x2d8] sm:$0xff] }
 0x316   :  { %5559 = vmatprep.subr.bf16.mxu0 %v6677_v9  ;;  %5645 = vmatprep.subr.bf16.mxu1 %v6679_v10  ;;  %v6481_v9 = vcombine.high %v3952_v3, %v3956_v4  ;;  %v6483_v10 = vcombine.high %v3953_v5, %v3957_v6  ;;  %v4004_v60 = vld [vmem:[%s10104_s3 + $0x2f0] sm:$0xff]  ;;  %v4005_v62 = vld [vmem:[%s10104_s3 + $0x2f8] sm:$0xff] }
 0x319   :  { %5560 = vmatpush1.bf16.msra.mxu0 %v6676_v23  ;;  %5646 = vmatpush1.bf16.msra.mxu1 %v6678_v18  ;;  %v6480_v23 = vcombine.low %v3952_v3, %v3956_v4  ;;  %v6482_v18 = vcombine.low %v3953_v5, %v3957_v6  ;;  %v4008_v3 = vld [vmem:[%s10104_s3 + $0x310] sm:$0xff]  ;;  %v4009_v5 = vld [vmem:[%s10104_s3 + $0x318] sm:$0xff] }
 0x31a   :  { %5561 = vmatprep.subr.bf16.mxu0 %v6685_v25  ;;  %5647 = vmatprep.subr.bf16.mxu1 %v6687_v26  ;;  %v6489_v25 = vcombine.high %v3960_v11, %v3964_v16  ;;  %v6491_v26 = vcombine.high %v3961_v17, %v3965_v20  ;;  %v4012_v4 = vld [vmem:[%s10104_s3 + $0x330] sm:$0xff]  ;;  %v4013_v6 = vld [vmem:[%s10104_s3 + $0x338] sm:$0xff] }
 0x31d   :  { %5562 = vmatpush1.bf16.msra.mxu0 %v6684_v19  ;;  %5648 = vmatpush1.bf16.msra.mxu1 %v6686_v24  ;;  %v6488_v19 = vcombine.low %v3960_v11, %v3964_v16  ;;  %v6490_v24 = vcombine.low %v3961_v17, %v3965_v20  ;;  %v4016_v11 = vld [vmem:[%s10104_s3 + $0x350] sm:$0xff]  ;;  %v4017_v17 = vld [vmem:[%s10104_s3 + $0x358] sm:$0xff] }
 0x31e   :  { %5660 = vmatprep.subr.bf16.mxu0 %v6441_v31  ;;  %5746 = vmatprep.subr.bf16.mxu1 %v6443_v34  ;;  %v6497_v31 = vcombine.high %v3968_v27, %v3972_v28  ;;  %v6499_v34 = vcombine.high %v3969_v14, %v3973_v30  ;;  %v4020_v16 = vld [vmem:[%s10104_s3 + $0x370] sm:$0xff]  ;;  %v4021_v20 = vld [vmem:[%s10104_s3 + $0x378] sm:$0xff] }
 0x320   :  { %5564 = vmatmul.mubr.bf16.vlgmr.msra.gmra.mrb[4].mxu0 %v9480_v13  ;;  %5650 = vmatmul.mubr.bf16.vlgmr.msra.gmra.mrb[4].mxu1 %v9480_v13 }
 0x321   :  { %5661 = vmatpush1.bf16.msra.mxu0 %v6440_v37  ;;  %5692 = vmatprep.mubr.bf16.mxu0 %v9491_v15  ;;  %v6496_v37 = vcombine.low %v3968_v27, %v3972_v28  ;;  %v4024_v27 = vld [vmem:[%s10104_s3 + $0x390] sm:$0xff] }
 0x322   :  { %5747 = vmatpush1.bf16.msra.mxu1 %v6442_v38  ;;  %5778 = vmatprep.mubr.bf16.mxu1 %v9491_v15  ;;  %v3941_v15 = vld [vmem:[%s10104_s3 + $0xf8] sm:$0xff]  ;;  %v6498_v38 = vcombine.low %v3969_v14, %v3973_v30  ;;  %v4028_v28 = vld [vmem:[%s10104_s3 + $0x3b0] sm:$0xff] }
 0x323   :  { %5662 = vmatprep.subr.bf16.mxu0 %v6449_v39  ;;  %5748 = vmatprep.subr.bf16.mxu1 %v6451_v40  ;;  %v6467_v58 = vcombine.high %v3937_v54, %v3941_v15  ;;  %v6466_v0 = vcombine.low %v3937_v54, %v3941_v15  ;;  %v6505_v39 = vcombine.high %v3976_v21, %v3980_v29  ;;  %v3993_v54 = vld [vmem:[%s10104_s3 + $0x298] sm:$0xff] }
 0x324   :  { %v6507_v40 = vcombine.high %v3977_v35, %v3981_v36  ;;  %v3997_v15 = vld [vmem:[%s10104_s3 + $0x2b8] sm:$0xff] }
 0x325   :  { %5663 = vmatpush1.bf16.msra.mxu0 %v6448_v32  ;;  %v6504_v32 = vcombine.low %v3976_v21, %v3980_v29  ;;  %v4025_v14 = vld [vmem:[%s10104_s3 + $0x398] sm:$0xff]  ;;  %v4032_v21 = vld [vmem:[%s10104_s3 + $0x3d0] sm:$0xff] }
 0x326   :  { %5749 = vmatpush1.bf16.msra.mxu1 %v6450_v33  ;;  %5664 = vmatprep.subr.bf16.mxu0 %v6457_v50  ;;  %v6506_v33 = vcombine.low %v3977_v35, %v3981_v36  ;;  %v6513_v50 = vcombine.high %v3984_v41, %v3988_v42  ;;  %v4029_v30 = vld [vmem:[%s10104_s3 + $0x3b8] sm:$0xff]  ;;  %v4036_v29 = vld [vmem:[%s10104_s3 + $0x3f0] sm:$0xff] }
 0x327   :  { %5750 = vmatprep.subr.bf16.mxu1 %v6459_v51  ;;  %v6515_v51 = vcombine.high %v3985_v46, %v3989_v49  ;;  %v4033_v35 = vld [vmem:[%s10104_s3 + $0x3d8] sm:$0xff] }
 0x328   :  { %v4037_v36 = vld [vmem:[%s10104_s3 + $0x3f8] sm:$0xff] }
 0x329   :  { %5665 = vmatpush1.bf16.msra.mxu0 %v6456_v55  ;;  %v6512_v55 = vcombine.low %v3984_v41, %v3988_v42  ;;  %v4040_v41 = vld [vmem:[%s10104_s3 + $0x410] sm:$0xff] }
 0x32a   :  { %5751 = vmatpush1.bf16.msra.mxu1 %v6458_v56  ;;  %5666 = vmatprep.subr.bf16.mxu0 %v6465_v57  ;;  %v6514_v56 = vcombine.low %v3985_v46, %v3989_v49  ;;  %v6521_v57 = vcombine.high %v3992_v52, %v3996_v53  ;;  %v4044_v42 = vld [vmem:[%s10104_s3 + $0x430] sm:$0xff]  ;;  %v4041_v46 = vld [vmem:[%s10104_s3 + $0x418] sm:$0xff] }
 0x32b   :  { %5752 = vmatprep.subr.bf16.mxu1 %v6467_v58  ;;  %v6523_v58 = vcombine.high %v3993_v54, %v3997_v15  ;;  %v4045_v49 = vld [vmem:[%s10104_s3 + $0x438] sm:$0xff] }
 0x32d   :  { %5667 = vmatpush1.bf16.msra.mxu0 %v6464_v63  ;;  %v6520_v63 = vcombine.low %v3992_v52, %v3996_v53  ;;  %v4048_v52 = vld [vmem:[%s10104_s3 + $0x450] sm:$0xff] }
 0x32e   :  { %5753 = vmatpush1.bf16.msra.mxu1 %v6466_v0  ;;  %5668 = vmatprep.subr.bf16.mxu0 %v6473_v1  ;;  %v6522_v0 = vcombine.low %v3993_v54, %v3997_v15  ;;  %v6529_v1 = vcombine.high %v4000_v59, %v4004_v60  ;;  %v4052_v53 = vld [vmem:[%s10104_s3 + $0x470] sm:$0xff]  ;;  %v6568_v54 = vcombine.low %v4040_v41, %v4044_v42  ;;  %v4049_v15 = vld [vmem:[%s10104_s3 + $0x458] sm:$0xff] }
 0x32f   :  { %5754 = vmatprep.subr.bf16.mxu1 %v6475_v2  ;;  %v6531_v2 = vcombine.high %v4001_v61, %v4005_v62 }
 0x331   :  { %5669 = vmatpush1.bf16.msra.mxu0 %v6472_v7  ;;  %v6528_v7 = vcombine.low %v4000_v59, %v4004_v60  ;;  %v4060_v59 = vld [vmem:[%s10104_s3 + $0x4b0] sm:$0xff] }
 0x332   :  { %5755 = vmatpush1.bf16.msra.mxu1 %v6474_v8  ;;  %5670 = vmatprep.subr.bf16.mxu0 %v6481_v9  ;;  %v6530_v8 = vcombine.low %v4001_v61, %v4005_v62  ;;  %v6537_v9 = vcombine.high %v4008_v3, %v4012_v4  ;;  %v4057_v61 = vld [vmem:[%s10104_s3 + $0x498] sm:$0xff] }
 0x333   :  { %5756 = vmatprep.subr.bf16.mxu1 %v6483_v10  ;;  %v6539_v10 = vcombine.high %v4009_v5, %v4013_v6  ;;  %v4061_v62 = vld [vmem:[%s10104_s3 + $0x4b8] sm:$0xff] }
 0x335   :  { %5671 = vmatpush1.bf16.msra.mxu0 %v6480_v23  ;;  %v6536_v23 = vcombine.low %v4008_v3, %v4012_v4  ;;  %v4064_v3 = vld [vmem:[%s10104_s3 + $0x4d0] sm:$0xff] }
 0x336   :  { %5757 = vmatpush1.bf16.msra.mxu1 %v6482_v18  ;;  %5672 = vmatprep.subr.bf16.mxu0 %v6489_v25  ;;  %v6538_v18 = vcombine.low %v4009_v5, %v4013_v6  ;;  %v6545_v25 = vcombine.high %v4016_v11, %v4020_v16  ;;  %v4068_v4 = vld [vmem:[%s10104_s3 + $0x4f0] sm:$0xff]  ;;  %v4069_v5 = vld [vmem:[%s10104_s3 + $0x4f8] sm:$0xff]  ;;  %v6586_v6 = vcombine.low %v4057_v61, %v4061_v62 }
 0x337   :  { %5758 = vmatprep.subr.bf16.mxu1 %v6491_v26  ;;  %v6547_v26 = vcombine.high %v4017_v17, %v4021_v20 }
 0x339   :  { %5673 = vmatpush1.bf16.msra.mxu0 %v6488_v19  ;;  %v6544_v19 = vcombine.low %v4016_v11, %v4020_v16  ;;  %v4073_v11 = vld [vmem:[%s10104_s3 + $0x518] sm:$0xff] }
 0x33a   :  { %5759 = vmatpush1.bf16.msra.mxu1 %v6490_v24  ;;  %5674 = vmatprep.subr.bf16.mxu0 %v6497_v31  ;;  %v6546_v24 = vcombine.low %v4017_v17, %v4021_v20  ;;  %v6553_v31 = vcombine.high %v4024_v27, %v4028_v28  ;;  %v4077_v16 = vld [vmem:[%s10104_s3 + $0x538] sm:$0xff]  ;;  %v6592_v17 = vcombine.low %v4064_v3, %v4068_v4 }
 0x33b   :  { %5760 = vmatprep.subr.bf16.mxu1 %v6499_v34  ;;  %v6555_v34 = vcombine.high %v4025_v14, %v4029_v30 }
 0x33d   :  { %5675 = vmatpush1.bf16.msra.mxu0 %v6496_v37  ;;  %v6552_v37 = vcombine.low %v4024_v27, %v4028_v28  ;;  %v4081_v27 = vld [vmem:[%s10104_s3 + $0x558] sm:$0xff] }
 0x33e   :  { %5761 = vmatpush1.bf16.msra.mxu1 %v6498_v38  ;;  %5676 = vmatprep.subr.bf16.mxu0 %v6505_v39  ;;  %v6554_v38 = vcombine.low %v4025_v14, %v4029_v30  ;;  %v6561_v39 = vcombine.high %v4032_v21, %v4036_v29  ;;  %v4085_v28 = vld [vmem:[%s10104_s3 + $0x578] sm:$0xff]  ;;  %v6602_v30 = vcombine.low %v4073_v11, %v4077_v16 }
 0x33f   :  { %5762 = vmatprep.subr.bf16.mxu1 %v6507_v40  ;;  %v6563_v40 = vcombine.high %v4033_v35, %v4037_v36 }
 0x341   :  { %5677 = vmatpush1.bf16.msra.mxu0 %v6504_v32  ;;  %v6560_v32 = vcombine.low %v4032_v21, %v4036_v29  ;;  %v4089_v21 = vld [vmem:[%s10104_s3 + $0x598] sm:$0xff] }
 0x342   :  { %5763 = vmatpush1.bf16.msra.mxu1 %v6506_v33  ;;  %5678 = vmatprep.subr.bf16.mxu0 %v6513_v50  ;;  %v6562_v33 = vcombine.low %v4033_v35, %v4037_v36  ;;  %v6569_v50 = vcombine.high %v4040_v41, %v4044_v42  ;;  %v4093_v29 = vld [vmem:[%s10104_s3 + $0x5b8] sm:$0xff]  ;;  %v6610_v36 = vcombine.low %v4081_v27, %v4085_v28 }
 0x343   :  { %5764 = vmatprep.subr.bf16.mxu1 %v6515_v51  ;;  %v6571_v51 = vcombine.high %v4041_v46, %v4045_v49  ;;  %v4097_v41 = vld [vmem:[%s10104_s3 + $0x5d8] sm:$0xff] }
 0x344   :  { %v4101_v42 = vld [vmem:[%s10104_s3 + $0x5f8] sm:$0xff] }
 0x345   :  { %5679 = vmatpush1.bf16.msra.mxu0 %v6512_v55  ;;  %v4053_v55 = vld [vmem:[%s10104_s3 + $0x478] sm:$0xff] }
 0x346   :  { %5765 = vmatpush1.bf16.msra.mxu1 %v6514_v56  ;;  %5680 = vmatprep.subr.bf16.mxu0 %v6521_v57  ;;  %v6570_v56 = vcombine.low %v4041_v46, %v4045_v49  ;;  %v6577_v57 = vcombine.high %v4048_v52, %v4052_v53  ;;  %v6579_v60 = vcombine.high %v4049_v15, %v4053_v55 }
 0x347   :  { %5766 = vmatprep.subr.bf16.mxu1 %v6523_v58  ;;  %v4056_v58 = vld [vmem:[%s10104_s3 + $0x490] sm:$0xff]  ;;  %v6618_v49 = vcombine.low %v4089_v21, %v4093_v29 }
 0x349   :  { %5681 = vmatpush1.bf16.msra.mxu0 %v6520_v63  ;;  %v6576_v63 = vcombine.low %v4048_v52, %v4052_v53  ;;  %v4105_v52 = vld [vmem:[%s10104_s3 + $0x618] sm:$0xff] }
 0x34a   :  { %5767 = vmatpush1.bf16.msra.mxu1 %v6522_v0  ;;  %5682 = vmatprep.subr.bf16.mxu0 %v6529_v1  ;;  %v6578_v0 = vcombine.low %v4049_v15, %v4053_v55  ;;  %v6585_v1 = vcombine.high %v4056_v58, %v4060_v59  ;;  %v4109_v53 = vld [vmem:[%s10104_s3 + $0x638] sm:$0xff]  ;;  %v6626_v15 = vcombine.low %v4097_v41, %v4101_v42 }
 0x34b   :  { %5768 = vmatprep.subr.bf16.mxu1 %v6531_v2  ;;  %v6587_v2 = vcombine.high %v4057_v61, %v4061_v62  ;;  %v6634_v62 = vcombine.low %v4105_v52, %v4109_v53 }
 0x34d   :  { %5683 = vmatpush1.bf16.msra.mxu0 %v6528_v7  ;;  %v6593_v7 = vcombine.high %v4064_v3, %v4068_v4  ;;  %v4121_v3 = vld [vmem:[%s10104_s3 + $0x698] sm:$0xff] }
 0x34e   :  { %5769 = vmatpush1.bf16.msra.mxu1 %v6530_v8  ;;  %5684 = vmatprep.subr.bf16.mxu0 %v6537_v9  ;;  %v4072_v9 = vld [vmem:[%s10104_s3 + $0x510] sm:$0xff]  ;;  %v4125_v4 = vld [vmem:[%s10104_s3 + $0x6b8] sm:$0xff] }
 0x34f   :  { %5770 = vmatprep.subr.bf16.mxu1 %v6539_v10  ;;  %v4076_v10 = vld [vmem:[%s10104_s3 + $0x530] sm:$0xff] }
 0x350   :  { %v6600_v14 = vcombine.low %v4072_v9, %v4076_v10 }
 0x351   :  { %5685 = vmatpush1.bf16.msra.mxu0 %v6536_v23  ;;  %v6601_v23 = vcombine.high %v4072_v9, %v4076_v10  ;;  %v4129_v9 = vld [vmem:[%s10104_s3 + $0x6d8] sm:$0xff] }
 0x352   :  { %5771 = vmatpush1.bf16.msra.mxu1 %v6538_v18  ;;  %5686 = vmatprep.subr.bf16.mxu0 %v6545_v25  ;;  %v6603_v18 = vcombine.high %v4073_v11, %v4077_v16  ;;  %v4080_v25 = vld [vmem:[%s10104_s3 + $0x550] sm:$0xff]  ;;  %v4133_v10 = vld [vmem:[%s10104_s3 + $0x6f8] sm:$0xff]  ;;  %v6650_v16 = vcombine.low %v4121_v3, %v4125_v4 }
 0x353   :  { %5772 = vmatprep.subr.bf16.mxu1 %v6547_v26  ;;  %v4084_v26 = vld [vmem:[%s10104_s3 + $0x570] sm:$0xff] }
 0x354   :  { %v6608_v35 = vcombine.low %v4080_v25, %v4084_v26 }
 0x355   :  { %5687 = vmatpush1.bf16.msra.mxu0 %v6544_v19  ;;  %v6609_v19 = vcombine.high %v4080_v25, %v4084_v26  ;;  %v4137_v25 = vld [vmem:[%s10104_s3 + $0x718] sm:$0xff] }
 0x356   :  { %5773 = vmatpush1.bf16.msra.mxu1 %v6546_v24  ;;  %5688 = vmatprep.subr.bf16.mxu0 %v6553_v31  ;;  %v6611_v24 = vcombine.high %v4081_v27, %v4085_v28  ;;  %v4088_v31 = vld [vmem:[%s10104_s3 + $0x590] sm:$0xff]  ;;  %v4141_v26 = vld [vmem:[%s10104_s3 + $0x738] sm:$0xff]  ;;  %v6658_v28 = vcombine.low %v4129_v9, %v4133_v10 }
 0x357   :  { %5774 = vmatprep.subr.bf16.mxu1 %v6555_v34  ;;  %v4092_v34 = vld [vmem:[%s10104_s3 + $0x5b0] sm:$0xff] }
 0x358   :  { %v6616_v46 = vcombine.low %v4088_v31, %v4092_v34 }
 0x359   :  { %5689 = vmatpush1.bf16.msra.mxu0 %v6552_v37  ;;  %v6617_v37 = vcombine.high %v4088_v31, %v4092_v34  ;;  %v4145_v31 = vld [vmem:[%s10104_s3 + $0x758] sm:$0xff] }
 0x35a   :  { %5775 = vmatpush1.bf16.msra.mxu1 %v6554_v38  ;;  %5690 = vmatprep.subr.bf16.mxu0 %v6561_v39  ;;  %v6619_v38 = vcombine.high %v4089_v21, %v4093_v29  ;;  %v4096_v39 = vld [vmem:[%s10104_s3 + $0x5d0] sm:$0xff]  ;;  %v4149_v34 = vld [vmem:[%s10104_s3 + $0x778] sm:$0xff]  ;;  %v6666_v29 = vcombine.low %v4137_v25, %v4141_v26 }
 0x35b   :  { %5776 = vmatprep.subr.bf16.mxu1 %v6563_v40  ;;  %v4100_v40 = vld [vmem:[%s10104_s3 + $0x5f0] sm:$0xff] }
 0x35d   :  { %5691 = vmatpush1.bf16.msra.mxu0 %v6560_v32  ;;  %v6625_v32 = vcombine.high %v4096_v39, %v4100_v40 }
 0x35e   :  { %5777 = vmatpush1.bf16.msra.mxu1 %v6562_v33  ;;  %5703 = vmatprep.subr.bf16.mxu0 %v6569_v50  ;;  %v6627_v33 = vcombine.high %v4097_v41, %v4101_v42  ;;  %v4104_v50 = vld [vmem:[%s10104_s3 + $0x610] sm:$0xff]  ;;  %v6674_v42 = vcombine.low %v4145_v31, %v4149_v34 }
 0x35f   :  { %5789 = vmatprep.subr.bf16.mxu1 %v6571_v51  ;;  %v4108_v51 = vld [vmem:[%s10104_s3 + $0x630] sm:$0xff] }
 0x360   :  { %5693 = vmatmul.mubr.bf16.vlgmr.msra.gmra.mrb[8].mxu0 %v9478_v12  ;;  %v6633_v55 = vcombine.high %v4104_v50, %v4108_v51  ;;  %v6632_v61 = vcombine.low %v4104_v50, %v4108_v51  ;;  %v4161_v50 = vld [vmem:[%s10104_s3 + $0x7d8] sm:$0xff] }
 0x361   :  { %5779 = vmatmul.mubr.bf16.vlgmr.msra.gmra.mrb[8].mxu1 %v9478_v12  ;;  %5704 = vmatpush1.bf16.msra.mxu0 %v6568_v54  ;;  %v4065_v12 = vld [vmem:[%s10104_s3 + $0x4d8] sm:$0xff]  ;;  %v6624_v54 = vcombine.low %v4096_v39, %v4100_v40 }
 0x362   :  { %5735 = vmatprep.mubr.bf16.mxu0 %v9493_v22  ;;  %5790 = vmatpush1.bf16.msra.mxu1 %v6570_v56  ;;  %v6595_v8 = vcombine.high %v4065_v12, %v4069_v5  ;;  %v6594_v20 = vcombine.low %v4065_v12, %v4069_v5  ;;  %v6635_v56 = vcombine.high %v4105_v52, %v4109_v53  ;;  %v4153_v39 = vld [vmem:[%s10104_s3 + $0x798] sm:$0xff] }
 0x363   :  { %5821 = vmatprep.mubr.bf16.mxu1 %v9493_v22  ;;  %5705 = vmatprep.subr.bf16.mxu0 %v6577_v57  ;;  %v6584_v22 = vcombine.low %v4056_v58, %v4060_v59  ;;  %v4112_v57 = vld [vmem:[%s10104_s3 + $0x650] sm:$0xff]  ;;  %v4113_v59 = vld [vmem:[%s10104_s3 + $0x658] sm:$0xff] }
 0x364   :  { %5791 = vmatprep.subr.bf16.mxu1 %v6579_v60  ;;  %v4116_v58 = vld [vmem:[%s10104_s3 + $0x670] sm:$0xff]  ;;  %v4117_v60 = vld [vmem:[%s10104_s3 + $0x678] sm:$0xff] }
 0x365   :  { %5706 = vmatpush1.bf16.msra.mxu0 %v6576_v63  ;;  %v6641_v63 = vcombine.high %v4112_v57, %v4116_v58  ;;  %v6640_v12 = vcombine.low %v4112_v57, %v4116_v58  ;;  %v6642_v5 = vcombine.low %v4113_v59, %v4117_v60  ;;  %v4157_v40 = vld [vmem:[%s10104_s3 + $0x7b8] sm:$0xff]  ;;  %v4166_v57 = vld [vmem:[%s10106_s4] sm:$0xff] }
 0x366   :  { %5792 = vmatpush1.bf16.msra.mxu1 %v6578_v0  ;;  %5707 = vmatprep.subr.bf16.mxu0 %v6585_v1  ;;  %v6643_v0 = vcombine.high %v4113_v59, %v4117_v60  ;;  %v4120_v1 = vld [vmem:[%s10104_s3 + $0x690] sm:$0xff]  ;;  %v4165_v51 = vld [vmem:[%s10104_s3 + $0x7f8] sm:$0xff]  ;;  %v6682_v53 = vcombine.low %v4153_v39, %v4157_v40  ;;  %v4171_v58 = vrot.slane %v4166_v57, %v552_v44 }
 0x367   :  { %5793 = vmatprep.subr.bf16.mxu1 %v6587_v2  ;;  %v4124_v2 = vld [vmem:[%s10104_s3 + $0x6b0] sm:$0xff]  ;;  %v4179_v59 = vrot.slane %v4166_v57, %v560_v45  ;;  %v4175_v60 = vrot.slane %v4166_v57, %v556_v47 }
 0x368   :  { %v6648_v11 = vcombine.low %v4120_v1, %v4124_v2 }
 0x369   :  { %5708 = vmatpush1.bf16.msra.mxu0 %v6584_v22  ;;  %v6649_v22 = vcombine.high %v4120_v1, %v4124_v2 }
 0x36a   :  { %5794 = vmatpush1.bf16.msra.mxu1 %v6586_v6  ;;  %5709 = vmatprep.subr.bf16.mxu0 %v6593_v7  ;;  %v6651_v6 = vcombine.high %v4121_v3, %v4125_v4  ;;  %v4128_v7 = vld [vmem:[%s10104_s3 + $0x6d0] sm:$0xff] }
 0x36b   :  { %5795 = vmatprep.subr.bf16.mxu1 %v6595_v8  ;;  %v4132_v8 = vld [vmem:[%s10104_s3 + $0x6f0] sm:$0xff] }
 0x36c   :  { %v6656_v27 = vcombine.low %v4128_v7, %v4132_v8 }
 0x36d   :  { %5710 = vmatpush1.bf16.msra.mxu0 %v6592_v17  ;;  %v6657_v17 = vcombine.high %v4128_v7, %v4132_v8 }
 0x36e   :  { %5796 = vmatpush1.bf16.msra.mxu1 %v6594_v20  ;;  %5711 = vmatprep.subr.bf16.mxu0 %v6601_v23  ;;  %v6659_v20 = vcombine.high %v4129_v9, %v4133_v10  ;;  %v4136_v23 = vld [vmem:[%s10104_s3 + $0x710] sm:$0xff] }
 0x36f   :  { %5797 = vmatprep.subr.bf16.mxu1 %v6603_v18  ;;  %v4140_v18 = vld [vmem:[%s10104_s3 + $0x730] sm:$0xff] }
 0x370   :  { %v6664_v21 = vcombine.low %v4136_v23, %v4140_v18 }
 0x371   :  { %5712 = vmatpush1.bf16.msra.mxu0 %v6600_v14  ;;  %v6665_v14 = vcombine.high %v4136_v23, %v4140_v18 }
 0x372   :  { %5798 = vmatpush1.bf16.msra.mxu1 %v6602_v30  ;;  %5713 = vmatprep.subr.bf16.mxu0 %v6609_v19  ;;  %v6667_v30 = vcombine.high %v4137_v25, %v4141_v26  ;;  %v4144_v19 = vld [vmem:[%s10104_s3 + $0x750] sm:$0xff] }
 0x373   :  { %5799 = vmatprep.subr.bf16.mxu1 %v6611_v24  ;;  %v4148_v24 = vld [vmem:[%s10104_s3 + $0x770] sm:$0xff] }
 0x374   :  { %v6672_v41 = vcombine.low %v4144_v19, %v4148_v24 }
 0x375   :  { %5714 = vmatpush1.bf16.msra.mxu0 %v6608_v35  ;;  %v6673_v35 = vcombine.high %v4144_v19, %v4148_v24 }
 0x376   :  { %5800 = vmatpush1.bf16.msra.mxu1 %v6610_v36  ;;  %5715 = vmatprep.subr.bf16.mxu0 %v6617_v37  ;;  %v6675_v36 = vcombine.high %v4145_v31, %v4149_v34  ;;  %v4152_v37 = vld [vmem:[%s10104_s3 + $0x790] sm:$0xff] }
 0x377   :  { %5801 = vmatprep.subr.bf16.mxu1 %v6619_v38  ;;  %v4156_v38 = vld [vmem:[%s10104_s3 + $0x7b0] sm:$0xff] }
 0x378   :  { %v6680_v52 = vcombine.low %v4152_v37, %v4156_v38 }
 0x379   :  { %5716 = vmatpush1.bf16.msra.mxu0 %v6616_v46  ;;  %v6681_v46 = vcombine.high %v4152_v37, %v4156_v38 }
 0x37a   :  { %5802 = vmatpush1.bf16.msra.mxu1 %v6618_v49  ;;  %5717 = vmatprep.subr.bf16.mxu0 %v6625_v32  ;;  %v6683_v49 = vcombine.high %v4153_v39, %v4157_v40  ;;  %v4160_v32 = vld [vmem:[%s10104_s3 + $0x7d0] sm:$0xff] }
 0x37b   :  { %5803 = vmatprep.subr.bf16.mxu1 %v6627_v33  ;;  %v4164_v33 = vld [vmem:[%s10104_s3 + $0x7f0] sm:$0xff] }
 0x37d   :  { %5718 = vmatpush1.bf16.msra.mxu0 %v6624_v54  ;;  %v6689_v54 = vcombine.high %v4160_v32, %v4164_v33 }
 0x37e   :  { %5804 = vmatpush1.bf16.msra.mxu1 %v6626_v15  ;;  %5719 = vmatprep.subr.bf16.mxu0 %v6633_v55  ;;  %v6691_v15 = vcombine.high %v4161_v50, %v4165_v51  ;;  %v6688_v55 = vcombine.low %v4160_v32, %v4164_v33 }
 0x37f   :  { %5805 = vmatprep.subr.bf16.mxu1 %v6635_v56  ;;  %v6690_v56 = vcombine.low %v4161_v50, %v4165_v51 }
 0x381   :  { %5720 = vmatpush1.bf16.msra.mxu0 %v6632_v61  ;;  %v4183_v61 = vrot.slane %v4166_v57, %v564_v48 }
 0x382   :  { %5806 = vmatpush1.bf16.msra.mxu1 %v6634_v62  ;;  %5721 = vmatprep.subr.bf16.mxu0 %v6641_v63 }
 0x383   :  { %5807 = vmatprep.subr.bf16.mxu1 %v6643_v0 }
 0x385   :  { %5722 = vmatpush1.bf16.msra.mxu0 %v6640_v12 }
 0x386   :  { %5808 = vmatpush1.bf16.msra.mxu1 %v6642_v5  ;;  %5723 = vmatprep.subr.bf16.mxu0 %v6649_v22 }
 0x387   :  { %5809 = vmatprep.subr.bf16.mxu1 %v6651_v6 }
 0x389   :  { %5724 = vmatpush1.bf16.msra.mxu0 %v6648_v11 }
 0x38a   :  { %5810 = vmatpush1.bf16.msra.mxu1 %v6650_v16  ;;  %5725 = vmatprep.subr.bf16.mxu0 %v6657_v17 }
 0x38b   :  { %5811 = vmatprep.subr.bf16.mxu1 %v6659_v20 }
 0x38d   :  { %5726 = vmatpush1.bf16.msra.mxu0 %v6656_v27  ;;  %v4186_v27 = vsub.s32 4, %v9458_v43 }
 0x38e   :  { %5812 = vmatpush1.bf16.msra.mxu1 %v6658_v28  ;;  %5727 = vmatprep.subr.bf16.mxu0 %v6665_v14  ;;  %v4194_v28 = vsub.s32 6, %v9458_v43  ;;  %v4190_v14 = vsub.s32 5, %v9458_v43 }
 0x38f   :  { %5813 = vmatprep.subr.bf16.mxu1 %v6667_v30  ;;  %v4198_v30 = vsub.s32 7, %v9458_v43  ;;  %v4187_v19 = vrot.slane %v4166_v57, %v4186_v27 }
 0x390   :  { %v4195_v24 = vrot.slane %v4166_v57, %v4194_v28  ;;  %v4191_v31 = vrot.slane %v4166_v57, %v4190_v14 }
 0x391   :  { %5728 = vmatpush1.bf16.msra.mxu0 %v6664_v21  ;;  %v4199_v34 = vrot.slane %v4166_v57, %v4198_v30 }
 0x392   :  { %5814 = vmatpush1.bf16.msra.mxu1 %v6666_v29  ;;  %5729 = vmatprep.subr.bf16.mxu0 %v6673_v35 }
 0x393   :  { %5815 = vmatprep.subr.bf16.mxu1 %v6675_v36 }
 0x395   :  { %5730 = vmatpush1.bf16.msra.mxu0 %v6672_v41 }
 0x396   :  { %5816 = vmatpush1.bf16.msra.mxu1 %v6674_v42  ;;  %5731 = vmatprep.subr.bf16.mxu0 %v6681_v46 }
 0x397   :  { %5817 = vmatprep.subr.bf16.mxu1 %v6683_v49 }
 0x399   :  { %5732 = vmatpush1.bf16.msra.mxu0 %v6680_v52 }
 0x39a   :  { %5818 = vmatpush1.bf16.msra.mxu1 %v6682_v53  ;;  %5733 = vmatprep.subr.bf16.mxu0 %v6689_v54 }
 0x39b   :  { %5819 = vmatprep.subr.bf16.mxu1 %v6691_v15 }
 0x39d   :  { %5734 = vmatpush1.bf16.msra.mxu0 %v6688_v55 }
 0x39e   :  { %5820 = vmatpush1.bf16.msra.mxu1 %v6690_v56 }
 0x3a0   :  { %5736 = vmatmul.mubr.bf16.vlgmr.msra.gmra.mrb[8].mxu0 %v9480_v13 }
 0x3a1   :  { %5822 = vmatmul.mubr.bf16.vlgmr.msra.gmra.mrb[8].mxu1 %v9480_v13 }
 0x3f3   :  { %v5565_v62 = vpop.f32.mrb[4].mxu0  ;;  %v5651_v63 = vpop.f32.mrb[4].mxu1 }
 0x3f4   :  { %v6716_v0 = vadd.f32 %v5565_v62, %v4171_v58  ;;  %v6720_v13 = vadd.f32 %v5651_v63, %v4179_v59  ;;  %v5567_v1 = vpop.f32.mrb[5].mxu0  ;;  %v5653_v2 = vpop.f32.mrb[5].mxu1 }
 0x3f5   :  { %v6717_v3 = vadd.f32 %v5567_v1, %v4175_v60  ;;  %v6721_v4 = vadd.f32 %v5653_v2, %v4183_v61  ;;  %v5569_v12 = vpop.f32.mrb[6].mxu0  ;;  %v5655_v5 = vpop.f32.mrb[6].mxu1 }
 0x3f6   :  { %v5832_v44 = vmax.f32 %v6716_v0, 0.0  ;;  %v5834_v22 = vmax.f32 %v6720_v13, 0.0  ;;  %v6718_v6 = vadd.f32 %v5569_v12, %v4171_v58  ;;  %v6722_v45 = vadd.f32 %v5655_v5, %v4179_v59  ;;  %v5571_v7 = vpop.f32.mrb[7].mxu0  ;;  %v5657_v8 = vpop.f32.mrb[7].mxu1 }
 0x3f7   :  { %v5833_v47 = vmax.f32 %v6717_v3, 0.0  ;;  %v5835_v9 = vmax.f32 %v6721_v4, 0.0  ;;  %v6719_v10 = vadd.f32 %v5571_v7, %v4175_v60  ;;  %v6723_v48 = vadd.f32 %v5657_v8, %v4183_v61 }
 0x3f8   :  { %v5840_v11 = vmax.f32 %v6718_v6, 0.0  ;;  %v5842_v16 = vmax.f32 %v6722_v45, 0.0 }
 0x3f9   :  { %v6700_v17 = vpack.c.bf16 %v5833_v47, %v5832_v44  ;;  %v6701_v20 = vpack.c.bf16 %v5835_v9, %v5834_v22  ;;  %v5841_v23 = vmax.f32 %v6719_v10, 0.0  ;;  %v5843_v18 = vmax.f32 %v6723_v48, 0.0 }
 0x3fb   :  { %5896 = vst [vmem:[%s10107_s5] sm:$0xff] %v6700_v17  ;;  %5897 = vst [vmem:[%s10107_s5 + $0x8] sm:$0xff] %v6701_v20  ;;  %v6704_v25 = vpack.c.bf16 %v5841_v23, %v5840_v11  ;;  %v6705_v26 = vpack.c.bf16 %v5843_v18, %v5842_v16 }
 0x3fd   :  { %5900 = vst [vmem:[%s10107_s5 + $0x20] sm:$0xff] %v6704_v25  ;;  %5901 = vst [vmem:[%s10107_s5 + $0x28] sm:$0xff] %v6705_v26 }
 0x473   :  { %v5737_v21 = vpop.f32.mrb[8].mxu0 }
 0x474   :  { %v6724_v29 = vadd.f32 %v5737_v21, %v4187_v19  ;;  %v5823_v35 = vpop.f32.mrb[8].mxu1  ;;  %v5739_v36 = vpop.f32.mrb[9].mxu0 }
 0x475   :  { %v6728_v37 = vadd.f32 %v5823_v35, %v4195_v24  ;;  %v6725_v38 = vadd.f32 %v5739_v36, %v4191_v31  ;;  %v5825_v39 = vpop.f32.mrb[9].mxu1  ;;  %v5741_v40 = vpop.f32.mrb[10].mxu0 }
 0x476   :  { %v5836_v41 = vmax.f32 %v6724_v29, 0.0  ;;  %v6729_v42 = vadd.f32 %v5825_v39, %v4199_v34  ;;  %v6726_v46 = vadd.f32 %v5741_v40, %v4187_v19  ;;  %v5827_v49 = vpop.f32.mrb[10].mxu1  ;;  %v5743_v32 = vpop.f32.mrb[11].mxu0 }
 0x477   :  { %v5838_v33 = vmax.f32 %v6728_v37, 0.0  ;;  %v5837_v50 = vmax.f32 %v6725_v38, 0.0  ;;  %v6730_v43 = vadd.f32 %v5827_v49, %v4195_v24  ;;  %v6727_v51 = vadd.f32 %v5743_v32, %v4191_v31  ;;  %v5829_v52 = vpop.f32.mrb[11].mxu1 }
 0x478   :  { %v5839_v53 = vmax.f32 %v6729_v42, 0.0  ;;  %v5844_v54 = vmax.f32 %v6726_v46, 0.0  ;;  %v6731_v15 = vadd.f32 %v5829_v52, %v4199_v34 }
 0x479   :  { %v6702_v55 = vpack.c.bf16 %v5837_v50, %v5836_v41  ;;  %v5846_v56 = vmax.f32 %v6730_v43, 0.0  ;;  %v5845_v57 = vmax.f32 %v6727_v51, 0.0 }
 0x47a   :  { %v6703_v58 = vpack.c.bf16 %v5839_v53, %v5838_v33  ;;  %v5847_v59 = vmax.f32 %v6731_v15, 0.0 }
 0x47b   :  { %5898 = vst [vmem:[%s10107_s5 + $0x10] sm:$0xff] %v6702_v55  ;;  %v6706_v60 = vpack.c.bf16 %v5845_v57, %v5844_v54 }
 0x47c   :  { %5899 = vst [vmem:[%s10107_s5 + $0x18] sm:$0xff] %v6703_v58  ;;  %v6707_v61 = vpack.c.bf16 %v5847_v59, %v5846_v56 }
 0x47d   :  { %5902 = vst [vmem:[%s10107_s5 + $0x30] sm:$0xff] %v6706_v60 }
 0x47e   :  { %5903 = vst [vmem:[%s10107_s5 + $0x38] sm:$0xff] %v6707_v61 }

// kernel: network_forward.18
= control target key start
LH: loop header
LB: loop body
LE: loop exit
PB: predicated region body
PF: predicated region fallthrough
CT: control target
= control target key end

     0   :  { %v850_v1 = vmov 0.0   ;;  %vm851_vm0 = vmmov 0   ;;  %vm299_vm1 = vcmask 261120   ;;  %s1052_s1 = inlined_call_operand.vmem [shape: bf16[288,128], index: 1, kind: input, shape index: {}]   ;;  %s1053_s0 = inlined_call_operand.vmem [shape: bf16[112,288], index: 0, kind: input, shape index: {}]   ;;  %s1054_s2 = inlined_call_operand.vmem [shape: f32[1,128], index: 2, kind: input, shape index: {}]   ;;  %s1055_s3 = inlined_call_operand.vmem [shape: bf16[112,128], index: 3, kind: output, shape index: {}]  }
   0x1   :  { %v804_v0 = vld [vmem:[%s1052_s1 + $0x40] sm:$0xff]   ;;  %770 = vmatprep.subr.bf16.mxu1 %v850_v1  ;;  %774 = vmatprep.mubr.msk.bf16.mxu1 %vm851_vm0, %v850_v1  ;;  %v806_v3 = vld [vmem:[%s1052_s1 + $0x48] sm:$0xff]   ;;  %v808_v5 = vld [vmem:[%s1052_s1 + $0x50] sm:$0xff]  }
   0x2   :  { %v805_v2 = vld [vmem:[%s1052_s1] sm:$0xff]   ;;  %703 = vmatprep.subr.bf16.mxu0 %v804_v0  ;;  %v807_v4 = vld [vmem:[%s1052_s1 + $0x8] sm:$0xff]   ;;  %v809_v6 = vld [vmem:[%s1052_s1 + $0x10] sm:$0xff]  }
   0x3   :  { %704 = vmatpush3.bf16.msra.mxu0 %v805_v2  ;;  %v810_v7 = vld [vmem:[%s1052_s1 + $0x58] sm:$0xff]   ;;  %v812_v9 = vld [vmem:[%s1052_s1 + $0x60] sm:$0xff]   ;;  %v814_v12 = vld [vmem:[%s1052_s1 + $0x68] sm:$0xff]  }
   0x4   :  { %705 = vmatprep.subr.bf16.mxu0 %v806_v3  ;;  %v811_v8 = vld [vmem:[%s1052_s1 + $0x18] sm:$0xff]   ;;  %v818_v10 = vld [vmem:[%s1052_s1 + $0x80] sm:$0xff]   ;;  %v815_v13 = vld [vmem:[%s1052_s1 + $0x28] sm:$0xff]  }
   0x5   :  { %v813_v11 = vld [vmem:[%s1052_s1 + $0x20] sm:$0xff]   ;;  %771 = vmatpush3.bf16.msra.mxu1 %v818_v10  ;;  %v816_v14 = vld [vmem:[%s1052_s1 + $0x70] sm:$0xff]   ;;  %v824_v16 = vld [vmem:[%s1052_s1 + $0x88] sm:$0xff]  }
   0x6   :  { %772 = vmatprep.subr.bf16.mxu1 %v850_v1  ;;  %v823_v15 = vld [vmem:[%s1053_s0 + $0x4] ss:$12 sps:$4 sm:$0xff]   ;;  %v825_v17 = vld [vmem:[%s1053_s0 + $0x8] ss:$12 sps:$4 sm:$0xff]   ;;  %v819_v19 = vld [vmem:[%s1052_s1 + $0x78] sm:$0xff]  }
   0x7   :  { %706 = vmatpush3.bf16.msra.mxu0 %v807_v4  ;;  %353 = vmatprep.mubr.bf16.mxu0 %v823_v15  ;;  %v817_v18 = vld [vmem:[%s1052_s1 + $0x30] sm:$0xff]   ;;  %v820_v20 = vld [vmem:[%s1052_s1 + $0x38] sm:$0xff]   ;;  %v829_v21 = vld [vmem:[%s1053_s0 + $0x20] ss:$12 sps:$4 sm:$0xff]  }
   0x8   :  { %707 = vmatprep.subr.bf16.mxu0 %v808_v5  ;;  %v821_v22 = vld [vmem:[%s1053_s0] ss:$12 sps:$4 sm:$0xff]   ;;  %v826_v23 = vld [vmem:[%s1053_s0 + $0x1c] ss:$12 sps:$4 sm:$0xff]   ;;  %v833_v24 = vld [vmem:[%s1053_s0 + $0x38] ss:$12 sps:$4 sm:$0xff]  }
   0x9   :  { %773 = vmatpush3.bf16.msra.mxu1 %v824_v16  ;;  %v828_v25 = vld [vmem:[%s1053_s0 + $0x18] ss:$12 sps:$4 sm:$0xff]   ;;  %v830_v26 = vld [vmem:[%s1053_s0 + $0x34] ss:$12 sps:$4 sm:$0xff]   ;;  %v837_v27 = vld [vmem:[%s1053_s0 + $0x50] ss:$12 sps:$4 sm:$0xff]  }
   0xa   :  { %v832_v28 = vld [vmem:[%s1053_s0 + $0x30] ss:$12 sps:$4 sm:$0xff]   ;;  %v834_v29 = vld [vmem:[%s1053_s0 + $0x4c] ss:$12 sps:$4 sm:$0xff]   ;;  %v841_v30 = vld [vmem:[%s1053_s0 + $0x68] ss:$12 sps:$4 sm:$0xff]  }
   0xb   :  { %708 = vmatpush3.bf16.msra.mxu0 %v809_v6  ;;  %v836_v31 = vld [vmem:[%s1053_s0 + $0x48] ss:$12 sps:$4 sm:$0xff]   ;;  %v838_v32 = vld [vmem:[%s1053_s0 + $0x64] ss:$12 sps:$4 sm:$0xff]   ;;  %v845_v33 = vld [vmem:[%s1053_s0 + $0x80] ss:$12 sps:$4 sm:$0xff]  }
   0xc   :  { %709 = vmatprep.subr.bf16.mxu0 %v810_v7  ;;  %775 = vmatmul.mubr.msk.bf16.vlgmr.msra.gmra.mrb[0].mxu1 %vm299_vm1, %v825_v17  ;;  %v840_v34 = vld [vmem:[%s1053_s0 + $0x60] ss:$12 sps:$4 sm:$0xff]   ;;  %v842_v35 = vld [vmem:[%s1053_s0 + $0x7c] ss:$12 sps:$4 sm:$0xff]   ;;  %v849_v36 = vld [vmem:[%s1053_s0 + $0x98] ss:$12 sps:$4 sm:$0xff]  }
   0xd   :  { %778 = vmatprep.mubr.msk.bf16.mxu1 %vm851_vm0, %v850_v1  ;;  %v844_v37 = vld [vmem:[%s1053_s0 + $0x78] ss:$12 sps:$4 sm:$0xff]   ;;  %v846_v38 = vld [vmem:[%s1053_s0 + $0x94] ss:$12 sps:$4 sm:$0xff]   ;;  %v848_v39 = vld [vmem:[%s1053_s0 + $0x90] ss:$12 sps:$4 sm:$0xff]  }
   0xe   :  { %v1015_v49 = vld [vmem:[%s1054_s2] ss:$0 sm:$0xff] }
   0xf   :  { %710 = vmatpush3.bf16.msra.mxu0 %v811_v8 }
  0x10   :  { %711 = vmatprep.subr.bf16.mxu0 %v812_v9 }
  0x13   :  { %712 = vmatpush3.bf16.msra.mxu0 %v813_v11 }
  0x14   :  { %713 = vmatprep.subr.bf16.mxu0 %v814_v12  ;;  %779 = vmatmul.mubr.msk.bf16.gmra.mrb[4].mxu1 %vm299_vm1, %v829_v21 }
  0x15   :  { %782 = vmatprep.mubr.msk.bf16.mxu1 %vm851_vm0, %v850_v1 }
  0x17   :  { %714 = vmatpush3.bf16.msra.mxu0 %v815_v13 }
  0x18   :  { %715 = vmatprep.subr.bf16.mxu0 %v816_v14 }
  0x1b   :  { %716 = vmatpush3.bf16.msra.mxu0 %v817_v18 }
  0x1c   :  { %717 = vmatprep.subr.bf16.mxu0 %v819_v19  ;;  %783 = vmatmul.mubr.msk.bf16.gmra.mrb[8].mxu1 %vm299_vm1, %v833_v24 }
  0x1d   :  { %786 = vmatprep.mubr.msk.bf16.mxu1 %vm851_vm0, %v850_v1 }
  0x1f   :  { %718 = vmatpush3.bf16.msra.mxu0 %v820_v20 }
  0x22   :  { %354 = vmatmul.mubr.bf16.vlgmr.msra.gmra.mrb[0].mxu0 %v821_v22 }
  0x23   :  { %361 = vmatprep.mubr.bf16.mxu0 %v826_v23 }
  0x24   :  { %787 = vmatmul.mubr.msk.bf16.gmra.mrb[12].mxu1 %vm299_vm1, %v837_v27 }
  0x25   :  { %790 = vmatprep.mubr.msk.bf16.mxu1 %vm851_vm0, %v850_v1 }
  0x2a   :  { %362 = vmatmul.mubr.bf16.gmra.mrb[4].mxu0 %v828_v25 }
  0x2b   :  { %369 = vmatprep.mubr.bf16.mxu0 %v830_v26 }
  0x2c   :  { %791 = vmatmul.mubr.msk.bf16.gmra.mrb[16].mxu1 %vm299_vm1, %v841_v30 }
  0x2d   :  { %794 = vmatprep.mubr.msk.bf16.mxu1 %vm851_vm0, %v850_v1 }
  0x32   :  { %370 = vmatmul.mubr.bf16.gmra.mrb[8].mxu0 %v832_v28 }
  0x33   :  { %377 = vmatprep.mubr.bf16.mxu0 %v834_v29 }
  0x34   :  { %795 = vmatmul.mubr.msk.bf16.gmra.mrb[20].mxu1 %vm299_vm1, %v845_v33 }
  0x35   :  { %798 = vmatprep.mubr.msk.bf16.mxu1 %vm851_vm0, %v850_v1 }
  0x3a   :  { %378 = vmatmul.mubr.bf16.gmra.mrb[12].mxu0 %v836_v31 }
  0x3b   :  { %385 = vmatprep.mubr.bf16.mxu0 %v838_v32 }
  0x3c   :  { %799 = vmatmul.mubr.msk.bf16.gmra.mrb[24].mxu1 %vm299_vm1, %v849_v36 }
  0x42   :  { %386 = vmatmul.mubr.bf16.gmra.mrb[16].mxu0 %v840_v34 }
  0x43   :  { %393 = vmatprep.mubr.bf16.mxu0 %v842_v35 }
  0x4a   :  { %394 = vmatmul.mubr.bf16.gmra.mrb[20].mxu0 %v844_v37 }
  0x4b   :  { %401 = vmatprep.mubr.bf16.mxu0 %v846_v38 }
  0x52   :  { %402 = vmatmul.mubr.bf16.gmra.mrb[24].mxu0 %v848_v39 }
  0xdf   :  { %v444_v40 = vpop.f32.mrb[0].mxu1 }
  0xe0   :  { %v776_v41 = vpop.f32.mrb[1].mxu1 }
  0xe1   :  { %v447_v42 = vpop.f32.mrb[2].mxu1 }
  0xe2   :  { %v777_v43 = vpop.f32.mrb[3].mxu1 }
  0xe7   :  { %v452_v44 = vpop.f32.mrb[4].mxu1 }
  0xe8   :  { %v780_v45 = vpop.f32.mrb[5].mxu1 }
  0xe9   :  { %v455_v47 = vpop.f32.mrb[6].mxu1 }
  0xea   :  { %v781_v50 = vpop.f32.mrb[7].mxu1 }
  0xef   :  { %v460_v58 = vpop.f32.mrb[8].mxu1 }
  0xf0   :  { %v784_v59 = vpop.f32.mrb[9].mxu1 }
  0xf1   :  { %v463_v62 = vpop.f32.mrb[10].mxu1 }
  0xf2   :  { %v785_v0 = vpop.f32.mrb[11].mxu1 }
  0xf5   :  { %v719_v46 = vpop.f32.mrb[0].mxu0 }
  0xf6   :  { %v720_v48 = vpop.f32.mrb[1].mxu0 }
  0xf7   :  { %v721_v51 = vadd.f32 %v720_v48, %v719_v46  ;;  %v722_v52 = vpop.f32.mrb[2].mxu0  ;;  %v468_v11 = vpop.f32.mrb[12].mxu1 }
  0xf8   :  { %v723_v53 = vpop.f32.mrb[3].mxu0  ;;  %v788_v12 = vpop.f32.mrb[13].mxu1 }
  0xf9   :  { %v356_v54 = vadd.f32 %v721_v51, %v1015_v49  ;;  %v724_v55 = vadd.f32 %v723_v53, %v722_v52  ;;  %v471_v15 = vpop.f32.mrb[14].mxu1 }
  0xfa   :  { %v789_v17 = vpop.f32.mrb[15].mxu1 }
  0xfb   :  { %v445_v56 = vadd.f32 %v444_v40, %v356_v54  ;;  %v359_v57 = vadd.f32 %v724_v55, %v1015_v49 }
  0xfd   :  { %v448_v60 = vadd.f32 %v447_v42, %v359_v57  ;;  %v725_v61 = vpop.f32.mrb[4].mxu0  ;;  %v499_v1 = vmax.f32 %v445_v56, 0.0 }
  0xfe   :  { %v726_v63 = vpop.f32.mrb[5].mxu0 }
  0xff   :  { %v500_v2 = vmax.f32 %v448_v60, 0.0  ;;  %v727_v3 = vadd.f32 %v726_v63, %v725_v61  ;;  %v728_v4 = vpop.f32.mrb[6].mxu0  ;;  %v476_v28 = vpop.f32.mrb[16].mxu1 }
 0x100   :  { %v729_v5 = vpop.f32.mrb[7].mxu0  ;;  %v792_v29 = vpop.f32.mrb[17].mxu1 }
 0x101   :  { %v665_v6 = vpack.c.bf16 %v500_v2, %v499_v1  ;;  %v364_v7 = vadd.f32 %v727_v3, %v1015_v49  ;;  %v730_v8 = vadd.f32 %v729_v5, %v728_v4  ;;  %v479_v32 = vpop.f32.mrb[18].mxu1 }
 0x102   :  { %v793_v34 = vpop.f32.mrb[19].mxu1 }
 0x103   :  { %666 = vst [vmem:[%s1055_s3] sm:$0xff] %v665_v6   ;;  %v453_v9 = vadd.f32 %v452_v44, %v364_v7  ;;  %v367_v10 = vadd.f32 %v730_v8, %v1015_v49 }
 0x105   :  { %v456_v13 = vadd.f32 %v455_v47, %v367_v10  ;;  %v731_v14 = vpop.f32.mrb[8].mxu0  ;;  %v501_v18 = vmax.f32 %v453_v9, 0.0 }
 0x106   :  { %v732_v16 = vpop.f32.mrb[9].mxu0 }
 0x107   :  { %v502_v19 = vmax.f32 %v456_v13, 0.0  ;;  %v733_v20 = vadd.f32 %v732_v16, %v731_v14  ;;  %v734_v21 = vpop.f32.mrb[10].mxu0  ;;  %v484_v45 = vpop.f32.mrb[20].mxu1 }
 0x108   :  { %v735_v22 = vpop.f32.mrb[11].mxu0  ;;  %v796_v46 = vpop.f32.mrb[21].mxu1 }
 0x109   :  { %v670_v23 = vpack.c.bf16 %v502_v19, %v501_v18  ;;  %v372_v24 = vadd.f32 %v733_v20, %v1015_v49  ;;  %v736_v25 = vadd.f32 %v735_v22, %v734_v21  ;;  %v487_v50 = vpop.f32.mrb[22].mxu1 }
 0x10a   :  { %v797_v52 = vpop.f32.mrb[23].mxu1 }
 0x10b   :  { %697 = vst [vmem:[%s1055_s3 + $0x8] sm:$0xff] %v670_v23   ;;  %v461_v26 = vadd.f32 %v460_v58, %v372_v24  ;;  %v375_v27 = vadd.f32 %v736_v25, %v1015_v49 }
 0x10d   :  { %v464_v30 = vadd.f32 %v463_v62, %v375_v27  ;;  %v737_v31 = vpop.f32.mrb[12].mxu0  ;;  %v503_v35 = vmax.f32 %v461_v26, 0.0 }
 0x10e   :  { %v738_v33 = vpop.f32.mrb[13].mxu0 }
 0x10f   :  { %v504_v36 = vmax.f32 %v464_v30, 0.0  ;;  %v739_v37 = vadd.f32 %v738_v33, %v737_v31  ;;  %v740_v38 = vpop.f32.mrb[14].mxu0  ;;  %v492_v63 = vpop.f32.mrb[24].mxu1 }
 0x110   :  { %v741_v39 = vpop.f32.mrb[15].mxu0  ;;  %v800_v0 = vpop.f32.mrb[25].mxu1 }
 0x111   :  { %v675_v40 = vpack.c.bf16 %v504_v36, %v503_v35  ;;  %v380_v41 = vadd.f32 %v739_v37, %v1015_v49  ;;  %v742_v42 = vadd.f32 %v741_v39, %v740_v38  ;;  %v495_v3 = vpop.f32.mrb[26].mxu1 }
 0x112   :  { %v801_v5 = vpop.f32.mrb[27].mxu1 }
 0x113   :  { %698 = vst [vmem:[%s1055_s3 + $0x10] sm:$0xff] %v675_v40   ;;  %v469_v43 = vadd.f32 %v468_v11, %v380_v41  ;;  %v383_v44 = vadd.f32 %v742_v42, %v1015_v49 }
 0x115   :  { %v472_v47 = vadd.f32 %v471_v15, %v383_v44  ;;  %v743_v48 = vpop.f32.mrb[16].mxu0  ;;  %v505_v53 = vmax.f32 %v469_v43, 0.0 }
 0x116   :  { %v744_v51 = vpop.f32.mrb[17].mxu0 }
 0x117   :  { %v506_v54 = vmax.f32 %v472_v47, 0.0  ;;  %v745_v55 = vadd.f32 %v744_v51, %v743_v48  ;;  %v746_v56 = vpop.f32.mrb[18].mxu0 }
 0x118   :  { %v747_v57 = vpop.f32.mrb[19].mxu0 }
 0x119   :  { %v680_v58 = vpack.c.bf16 %v506_v54, %v505_v53  ;;  %v388_v59 = vadd.f32 %v745_v55, %v1015_v49  ;;  %v748_v60 = vadd.f32 %v747_v57, %v746_v56 }
 0x11b   :  { %699 = vst [vmem:[%s1055_s3 + $0x18] sm:$0xff] %v680_v58   ;;  %v477_v61 = vadd.f32 %v476_v28, %v388_v59  ;;  %v391_v62 = vadd.f32 %v748_v60, %v1015_v49 }
 0x11d   :  { %v480_v1 = vadd.f32 %v479_v32, %v391_v62  ;;  %v749_v2 = vpop.f32.mrb[20].mxu0  ;;  %v507_v6 = vmax.f32 %v477_v61, 0.0 }
 0x11e   :  { %v750_v4 = vpop.f32.mrb[21].mxu0 }
 0x11f   :  { %v508_v7 = vmax.f32 %v480_v1, 0.0  ;;  %v751_v8 = vadd.f32 %v750_v4, %v749_v2  ;;  %v752_v9 = vpop.f32.mrb[22].mxu0 }
 0x120   :  { %v753_v10 = vpop.f32.mrb[23].mxu0 }
 0x121   :  { %v685_v11 = vpack.c.bf16 %v508_v7, %v507_v6  ;;  %v396_v12 = vadd.f32 %v751_v8, %v1015_v49  ;;  %v754_v13 = vadd.f32 %v753_v10, %v752_v9 }
 0x123   :  { %700 = vst [vmem:[%s1055_s3 + $0x20] sm:$0xff] %v685_v11   ;;  %v485_v14 = vadd.f32 %v484_v45, %v396_v12  ;;  %v399_v15 = vadd.f32 %v754_v13, %v1015_v49 }
 0x125   :  { %v488_v16 = vadd.f32 %v487_v50, %v399_v15  ;;  %v755_v17 = vpop.f32.mrb[24].mxu0  ;;  %v509_v19 = vmax.f32 %v485_v14, 0.0 }
 0x126   :  { %v756_v18 = vpop.f32.mrb[25].mxu0 }
 0x127   :  { %v510_v20 = vmax.f32 %v488_v16, 0.0  ;;  %v757_v21 = vadd.f32 %v756_v18, %v755_v17  ;;  %v758_v22 = vpop.f32.mrb[26].mxu0 }
 0x128   :  { %v759_v23 = vpop.f32.mrb[27].mxu0 }
 0x129   :  { %v690_v24 = vpack.c.bf16 %v510_v20, %v509_v19  ;;  %v404_v25 = vadd.f32 %v757_v21, %v1015_v49  ;;  %v760_v26 = vadd.f32 %v759_v23, %v758_v22 }
 0x12b   :  { %701 = vst [vmem:[%s1055_s3 + $0x28] sm:$0xff] %v690_v24   ;;  %v493_v27 = vadd.f32 %v492_v63, %v404_v25  ;;  %v407_v28 = vadd.f32 %v760_v26, %v1015_v49 }
 0x12d   :  { %v496_v29 = vadd.f32 %v495_v3, %v407_v28  ;;  %v511_v30 = vmax.f32 %v493_v27, 0.0 }
 0x12f   :  { %v512_v31 = vmax.f32 %v496_v29, 0.0 }
 0x131   :  { %v695_v32 = vpack.c.bf16 %v512_v31, %v511_v30 }
 0x133   :  { %702 = vst [vmem:[%s1055_s3 + $0x30] sm:$0xff] %v695_v32  }

// kernel: network_forward.19
= control target key start
LH: loop header
LB: loop body
LE: loop exit
PB: predicated region body
PF: predicated region fallthrough
CT: control target
= control target key end

     0   :  { %s1214_s12 = smov 0   ;;  %s1216_s13 = smov 0   ;;  %s1381_s0 = inlined_call_operand.vmem [shape: bf16[416,144], index: 0, kind: input, shape index: {}]   ;;  %s1382_s1 = inlined_call_operand.vmem [shape: bf16[144,128], index: 1, kind: input, shape index: {}]   ;;  %s1383_s2 = inlined_call_operand.vmem [shape: f32[1,128], index: 2, kind: input, shape index: {}]   ;;  %s1384_s3 = inlined_call_operand.vmem [shape: f32[416,128], index: 3, kind: output, shape index: {}]  }
   0x1   :  { %s1218_s14 = smov 0  }
   0x2 LB: > { %s25_s15 = sadd.s32 1, %s1187_s13  ;;  %p918_p0 = scmp.ge.s32.totalorder %s1191_s14, 1  ;;  %s1191_s14 = sphi %s1218_s14, %s13_s14   ;;  %s1187_s13 = sphi %s1216_s13, %s1386_s13   ;;  %s1183_s12 = sphi %s1214_s12, %s1385_s12  }
   0x3   : > { %p27_p1 = scmp.ge.s32.totalorder %s25_s15, 2  ;;  %p170_p2 = scmp.lt.s32.totalorder %s1191_s14, 3 }
   0x5   : > { %s1388_s15 = smov (%p27_p1, %s25_s15), 0  ;;  %p171_p3 = pnand %p918_p0, %p170_p2 }
   0x6   : > { %v1017_v0 = vld [vmem:[%s1382_s1] sm:$0xff] (!%p171_p3)   ;;  %v1193_v1 = vmov (!%p171_p3), 0   ;;  %s205_s18 = smul.u32 (!%p171_p3), 26, %s1183_s12  ;;  %v1018_v2 = vld [vmem:[%s1382_s1 + $0x8] sm:$0xff] (!%p171_p3)   ;;  %v1019_v3 = vld [vmem:[%s1382_s1 + $0x10] sm:$0xff] (!%p171_p3)   ;;  %vm451_vm0 = vcmask (!%p171_p3), 130048  }
   0x7   : > { %174 = sbr.rel (%p171_p3) target bundleno = 340 (0x154), region = 32  ;;  %491 = vmatprep.subr.bf16.mxu0 (!%p171_p3), %v1193_v1  ;;  %974 = vmatprep.subr.bf16.mxu1 (!%p171_p3), %v1193_v1  ;;  %v1020_v4 = vld [vmem:[%s1382_s1 + $0x18] sm:$0xff] (!%p171_p3)   ;;  %v1021_v7 = vld [vmem:[%s1382_s1 + $0x20] sm:$0xff] (!%p171_p3)   ;;  %v1022_v8 = vld [vmem:[%s1382_s1 + $0x28] sm:$0xff] (!%p171_p3)  }
   0x8   : > { %492 = vmatpush1.bf16.msra.mxu0 (!%p171_p3), %v1017_v0  ;;  %983 = vmatpush1.bf16.msra.mxu1 (!%p171_p3), %v1017_v0  ;;  %p206_p4 = scmp.lt.s32.totalorder (!%p171_p3), %s205_s18, 51  ;;  %v1023_v9 = vld [vmem:[%s1382_s1 + $0x30] sm:$0xff] (!%p171_p3)   ;;  %v1024_v10 = vld [vmem:[%s1382_s1 + $0x38] sm:$0xff] (!%p171_p3)   ;;  %v1025_v11 = vld [vmem:[%s1382_s1 + $0x40] sm:$0xff] (!%p171_p3)  }
   0x9   : > { %493 = vmatprep.subr.bf16.mxu0 (!%p171_p3), %v1193_v1  ;;  %975 = vmatprep.subr.bf16.mxu1 (!%p171_p3), %v1193_v1  ;;  %v1311_v36 = vld [vmem:[%s1383_s2] ss:$0 sm:$0xff] (!%p171_p3) }
   0xc   : > { %494 = vmatpush1.bf16.msra.mxu0 (!%p171_p3), %v1018_v2  ;;  %984 = vmatpush1.bf16.msra.mxu1 (!%p171_p3), %v1018_v2 }
   0xd   : > { %495 = vmatprep.subr.bf16.mxu0 (!%p171_p3), %v1193_v1  ;;  %976 = vmatprep.subr.bf16.mxu1 (!%p171_p3), %v1193_v1 }
   0xe   : > { %s1390_s18 = smov (!%p206_p4, %s205_s18), 51 }
   0xf   : > { %s973_s23 = sshll.u32 %s1390_s18, 3 }
  0x10   : > { %s1249_s26 = scalar_lea.vmem %s1381_s0, %s973_s23  ;;  %496 = vmatpush1.bf16.msra.mxu0 %v1019_v3  ;;  %985 = vmatpush1.bf16.msra.mxu1 %v1019_v3  ;;  %s1333_s20 = scalar_lea.vmem %s1384_s3, %s973_s23 }
  0x11   : > { %v1028_v5 = vld [vmem:[%s1249_s26 + $0x4] ss:$8 sps:$4 sm:$0xff]   ;;  %497 = vmatprep.subr.bf16.mxu0 %v1193_v1  ;;  %977 = vmatprep.subr.bf16.mxu1 %v1193_v1  ;;  %v1031_v6 = vld [vmem:[%s1249_s26 + $0x74] ss:$8 sps:$4 sm:$0xff]   ;;  %v1026_v12 = vld [vmem:[%s1249_s26] ss:$8 sps:$4 sm:$0xff]  }
  0x12   : > { %958 = vmatprep.mubr.msk.bf16.mxu0 %vm451_vm0, %v1028_v5  ;;  %965 = vmatprep.mubr.msk.bf16.mxu1 %vm451_vm0, %v1031_v6  ;;  %v1029_v13 = vld [vmem:[%s1249_s26 + $0x70] ss:$8 sps:$4 sm:$0xff]   ;;  %v1032_v14 = vld [vmem:[%s1249_s26 + $0x14] ss:$8 sps:$4 sm:$0xff]   ;;  %v1035_v15 = vld [vmem:[%s1249_s26 + $0x84] ss:$8 sps:$4 sm:$0xff]  }
  0x13   : > { %v1034_v16 = vld [vmem:[%s1249_s26 + $0x10] ss:$8 sps:$4 sm:$0xff]   ;;  %v1037_v17 = vld [vmem:[%s1249_s26 + $0x80] ss:$8 sps:$4 sm:$0xff]   ;;  %v1038_v18 = vld [vmem:[%s1249_s26 + $0x24] ss:$8 sps:$4 sm:$0xff]  }
  0x14   : > { %498 = vmatpush1.bf16.msra.mxu0 %v1020_v4  ;;  %986 = vmatpush1.bf16.msra.mxu1 %v1020_v4  ;;  %v1041_v19 = vld [vmem:[%s1249_s26 + $0x94] ss:$8 sps:$4 sm:$0xff]   ;;  %v1040_v20 = vld [vmem:[%s1249_s26 + $0x20] ss:$8 sps:$4 sm:$0xff]   ;;  %v1043_v21 = vld [vmem:[%s1249_s26 + $0x90] ss:$8 sps:$4 sm:$0xff]  }
  0x15   : > { %499 = vmatprep.subr.bf16.mxu0 %v1193_v1  ;;  %978 = vmatprep.subr.bf16.mxu1 %v1193_v1  ;;  %v1044_v22 = vld [vmem:[%s1249_s26 + $0x34] ss:$8 sps:$4 sm:$0xff]   ;;  %v1047_v23 = vld [vmem:[%s1249_s26 + $0xa4] ss:$8 sps:$4 sm:$0xff]   ;;  %v1046_v24 = vld [vmem:[%s1249_s26 + $0x30] ss:$8 sps:$4 sm:$0xff]  }
  0x16   : > { %v1049_v25 = vld [vmem:[%s1249_s26 + $0xa0] ss:$8 sps:$4 sm:$0xff]   ;;  %v1050_v26 = vld [vmem:[%s1249_s26 + $0x44] ss:$8 sps:$4 sm:$0xff]   ;;  %v1053_v27 = vld [vmem:[%s1249_s26 + $0xb4] ss:$8 sps:$4 sm:$0xff]  }
  0x17   : > { %v1052_v28 = vld [vmem:[%s1249_s26 + $0x40] ss:$8 sps:$4 sm:$0xff]   ;;  %v1055_v29 = vld [vmem:[%s1249_s26 + $0xb0] ss:$8 sps:$4 sm:$0xff]   ;;  %v1056_v30 = vld [vmem:[%s1249_s26 + $0x54] ss:$8 sps:$4 sm:$0xff]  }
  0x18   : > { %500 = vmatpush1.bf16.msra.mxu0 %v1021_v7  ;;  %987 = vmatpush1.bf16.msra.mxu1 %v1021_v7  ;;  %v1059_v31 = vld [vmem:[%s1249_s26 + $0xc4] ss:$8 sps:$4 sm:$0xff]   ;;  %v1058_v32 = vld [vmem:[%s1249_s26 + $0x50] ss:$8 sps:$4 sm:$0xff]   ;;  %v1061_v33 = vld [vmem:[%s1249_s26 + $0xc0] ss:$8 sps:$4 sm:$0xff]  }
  0x19   : > { %501 = vmatprep.subr.bf16.mxu0 %v1193_v1  ;;  %979 = vmatprep.subr.bf16.mxu1 %v1193_v1  ;;  %v1062_v34 = vld [vmem:[%s1249_s26 + $0x64] ss:$8 sps:$4 sm:$0xff]   ;;  %v1064_v35 = vld [vmem:[%s1249_s26 + $0x60] ss:$8 sps:$4 sm:$0xff]  }
  0x1c   : > { %502 = vmatpush1.bf16.msra.mxu0 %v1022_v8  ;;  %988 = vmatpush1.bf16.msra.mxu1 %v1022_v8 }
  0x1d   : > { %503 = vmatprep.subr.bf16.mxu0 %v1193_v1  ;;  %980 = vmatprep.subr.bf16.mxu1 %v1193_v1 }
  0x20   : > { %504 = vmatpush1.bf16.msra.mxu0 %v1023_v9  ;;  %989 = vmatpush1.bf16.msra.mxu1 %v1023_v9 }
  0x21   : > { %505 = vmatprep.subr.bf16.mxu0 %v1193_v1  ;;  %981 = vmatprep.subr.bf16.mxu1 %v1193_v1 }
  0x24   : > { %506 = vmatpush1.bf16.msra.mxu0 %v1024_v10  ;;  %990 = vmatpush1.bf16.msra.mxu1 %v1024_v10 }
  0x25   : > { %507 = vmatprep.subr.bf16.mxu0 %v1193_v1  ;;  %982 = vmatprep.subr.bf16.mxu1 %v1193_v1 }
  0x28   : > { %508 = vmatpush1.bf16.msra.mxu0 %v1025_v11  ;;  %991 = vmatpush1.bf16.msra.mxu1 %v1025_v11 }
  0x2b   : > { %524 = vmatmul.mubr.bf16.vlgmr.msra.gmra.mrb[0].mxu0 %v1026_v12  ;;  %580 = vmatmul.mubr.bf16.vlgmr.msra.gmra.mrb[0].mxu1 %v1029_v13 }
  0x2c   : > { %959 = vmatprep.mubr.msk.bf16.mxu0 %vm451_vm0, %v1032_v14  ;;  %966 = vmatprep.mubr.msk.bf16.mxu1 %vm451_vm0, %v1035_v15 }
  0x33   : > { %532 = vmatmul.mubr.bf16.gmra.mrb[4].mxu0 %v1034_v16  ;;  %588 = vmatmul.mubr.bf16.gmra.mrb[4].mxu1 %v1037_v17 }
  0x34   : > { %960 = vmatprep.mubr.msk.bf16.mxu0 %vm451_vm0, %v1038_v18  ;;  %967 = vmatprep.mubr.msk.bf16.mxu1 %vm451_vm0, %v1041_v19 }
  0x3b   : > { %540 = vmatmul.mubr.bf16.gmra.mrb[8].mxu0 %v1040_v20  ;;  %596 = vmatmul.mubr.bf16.gmra.mrb[8].mxu1 %v1043_v21 }
  0x3c   : > { %961 = vmatprep.mubr.msk.bf16.mxu0 %vm451_vm0, %v1044_v22  ;;  %968 = vmatprep.mubr.msk.bf16.mxu1 %vm451_vm0, %v1047_v23 }
  0x43   : > { %548 = vmatmul.mubr.bf16.gmra.mrb[12].mxu0 %v1046_v24  ;;  %604 = vmatmul.mubr.bf16.gmra.mrb[12].mxu1 %v1049_v25 }
  0x44   : > { %962 = vmatprep.mubr.msk.bf16.mxu0 %vm451_vm0, %v1050_v26  ;;  %969 = vmatprep.mubr.msk.bf16.mxu1 %vm451_vm0, %v1053_v27 }
  0x4b   : > { %556 = vmatmul.mubr.bf16.gmra.mrb[16].mxu0 %v1052_v28  ;;  %612 = vmatmul.mubr.bf16.gmra.mrb[16].mxu1 %v1055_v29 }
  0x4c   : > { %963 = vmatprep.mubr.msk.bf16.mxu0 %vm451_vm0, %v1056_v30  ;;  %970 = vmatprep.mubr.msk.bf16.mxu1 %vm451_vm0, %v1059_v31 }
  0x53   : > { %564 = vmatmul.mubr.bf16.gmra.mrb[20].mxu0 %v1058_v32  ;;  %620 = vmatmul.mubr.bf16.gmra.mrb[20].mxu1 %v1061_v33 }
  0x54   : > { %964 = vmatprep.mubr.msk.bf16.mxu0 %vm451_vm0, %v1062_v34 }
  0x5b   : > { %572 = vmatmul.mubr.bf16.gmra.mrb[24].mxu0 %v1064_v35 }
  0xfe   : > { %v525_v37 = vpop.f32.mrb[0].mxu0  ;;  %v581_v38 = vpop.f32.mrb[0].mxu1 }
  0xff   : > { %v526_v39 = vadd.f32 %v1311_v36, %v525_v37  ;;  %v527_v40 = vpop.f32.mrb[1].mxu0  ;;  %v582_v41 = vadd.f32 %v1311_v36, %v581_v38  ;;  %v583_v42 = vpop.f32.mrb[1].mxu1 }
 0x100   : > { %v528_v43 = vpop.f32.mrb[2].mxu0  ;;  %v584_v44 = vpop.f32.mrb[2].mxu1 }
 0x101   : > { %v628_v45 = vsub.f32 0.0, %v526_v39  ;;  %v529_v46 = vadd.f32 %v1311_v36, %v528_v43  ;;  %v530_v47 = vpop.f32.mrb[3].mxu0  ;;  %v642_v48 = vsub.f32 0.0, %v582_v41  ;;  %v585_v49 = vadd.f32 %v1311_v36, %v584_v44  ;;  %v586_v50 = vpop.f32.mrb[3].mxu1 }
 0x103   : > { %v654_v51 = vmul.f32 1.442695, %v628_v45  ;;  %v629_v52 = vsub.f32 0.0, %v529_v46  ;;  %v682_v53 = vmul.f32 1.442695, %v642_v48  ;;  %v643_v54 = vsub.f32 0.0, %v585_v49 }
 0x105   : > { %1065 = vpow2.f32 %v654_v51  ;;  %v656_v55 = vmul.f32 1.442695, %v629_v52  ;;  %v684_v56 = vmul.f32 1.442695, %v643_v54 }
 0x106   : > { %1067 = vpow2.f32 %v682_v53  ;;  %v533_v57 = vpop.f32.mrb[4].mxu0  ;;  %v589_v58 = vpop.f32.mrb[4].mxu1 }
 0x107   : > { %1069 = vpow2.f32 %v656_v55  ;;  %v534_v59 = vadd.f32 %v1311_v36, %v533_v57  ;;  %v535_v60 = vpop.f32.mrb[5].mxu0  ;;  %v590_v61 = vadd.f32 %v1311_v36, %v589_v58  ;;  %v591_v62 = vpop.f32.mrb[5].mxu1 }
 0x108   : > { %1071 = vpow2.f32 %v684_v56  ;;  %v536_v63 = vpop.f32.mrb[6].mxu0  ;;  %v592_v0 = vpop.f32.mrb[6].mxu1 }
 0x109   : > { %v630_v1 = vsub.f32 0.0, %v534_v59  ;;  %v537_v2 = vadd.f32 %v1311_v36, %v536_v63  ;;  %v538_v3 = vpop.f32.mrb[7].mxu0  ;;  %v644_v4 = vsub.f32 0.0, %v590_v61  ;;  %v593_v5 = vadd.f32 %v1311_v36, %v592_v0  ;;  %v594_v6 = vpop.f32.mrb[7].mxu1 }
 0x10b   : > { %v658_v7 = vmul.f32 1.442695, %v630_v1  ;;  %v631_v8 = vsub.f32 0.0, %v537_v2  ;;  %v686_v9 = vmul.f32 1.442695, %v644_v4  ;;  %v645_v10 = vsub.f32 0.0, %v593_v5 }
 0x10d   : > { %1073 = vpow2.f32 %v658_v7  ;;  %v660_v11 = vmul.f32 1.442695, %v631_v8  ;;  %v688_v12 = vmul.f32 1.442695, %v645_v10 }
 0x10e   : > { %1075 = vpow2.f32 %v686_v9  ;;  %v541_v13 = vpop.f32.mrb[8].mxu0  ;;  %v597_v14 = vpop.f32.mrb[8].mxu1 }
 0x10f   : > { %v1066_v15 = vpop.eup %1065  ;;  %1077 = vpow2.f32 %v660_v11  ;;  %v542_v16 = vadd.f32 %v1311_v36, %v541_v13  ;;  %v543_v17 = vpop.f32.mrb[9].mxu0  ;;  %v598_v18 = vadd.f32 %v1311_v36, %v597_v14 }
 0x110   : > { %v599_v19 = vpop.f32.mrb[9].mxu1  ;;  %v1068_v20 = vpop.eup %1067  ;;  %v706_v21 = vadd.f32 1.0, %v1066_v15  ;;  %1079 = vpow2.f32 %v688_v12 }
 0x111   : > { %v544_v22 = vpop.f32.mrb[10].mxu0  ;;  %v600_v23 = vpop.f32.mrb[10].mxu1  ;;  %v720_v25 = vadd.f32 1.0, %v1068_v20  ;;  %v632_v26 = vsub.f32 0.0, %v542_v16  ;;  %v646_v29 = vsub.f32 0.0, %v598_v18 }
 0x112   : > { %v1070_v24 = vpop.eup %1069  ;;  %v545_v27 = vadd.f32 %v1311_v36, %v544_v22  ;;  %v546_v28 = vpop.f32.mrb[11].mxu0  ;;  %1081 = vrcp.f32 %v706_v21  ;;  %v601_v33 = vadd.f32 %v1311_v36, %v600_v23 }
 0x113   : > { %v602_v30 = vpop.f32.mrb[11].mxu1  ;;  %v1072_v31 = vpop.eup %1071  ;;  %v707_v32 = vadd.f32 1.0, %v1070_v24  ;;  %1083 = vrcp.f32 %v720_v25  ;;  %v662_v35 = vmul.f32 1.442695, %v632_v26  ;;  %v690_v38 = vmul.f32 1.442695, %v646_v29 }
 0x114   : > { %v721_v34 = vadd.f32 1.0, %v1072_v31  ;;  %v633_v37 = vsub.f32 0.0, %v545_v27  ;;  %v647_v39 = vsub.f32 0.0, %v601_v33 }
 0x115   : > { %1085 = vrcp.f32 %v707_v32 }
 0x116   : > { %1087 = vrcp.f32 %v721_v34  ;;  %v664_v40 = vmul.f32 1.442695, %v633_v37  ;;  %v692_v41 = vmul.f32 1.442695, %v647_v39  ;;  %v549_v42 = vpop.f32.mrb[12].mxu0  ;;  %v605_v43 = vpop.f32.mrb[12].mxu1 }
 0x117   : > { %1089 = vpow2.f32 %v662_v35  ;;  %v1074_v44 = vpop.eup %1073  ;;  %v550_v45 = vadd.f32 %v1311_v36, %v549_v42  ;;  %v551_v46 = vpop.f32.mrb[13].mxu0  ;;  %v606_v47 = vadd.f32 %v1311_v36, %v605_v43 }
 0x118   : > { %1091 = vpow2.f32 %v664_v40  ;;  %v607_v48 = vpop.f32.mrb[13].mxu1  ;;  %v1076_v49 = vpop.eup %1075  ;;  %v708_v50 = vadd.f32 1.0, %v1074_v44 }
 0x119   : > { %1093 = vpow2.f32 %v690_v38  ;;  %v552_v51 = vpop.f32.mrb[14].mxu0  ;;  %v608_v52 = vpop.f32.mrb[14].mxu1  ;;  %v722_v54 = vadd.f32 1.0, %v1076_v49  ;;  %v634_v55 = vsub.f32 0.0, %v550_v45  ;;  %v648_v61 = vsub.f32 0.0, %v606_v47 }
 0x11a   : > { %v1078_v53 = vpop.eup %1077  ;;  %1095 = vpow2.f32 %v692_v41  ;;  %v553_v56 = vadd.f32 %v1311_v36, %v552_v51  ;;  %v554_v57 = vpop.f32.mrb[15].mxu0  ;;  %v609_v62 = vadd.f32 %v1311_v36, %v608_v52 }
 0x11b   : > { %v610_v58 = vpop.f32.mrb[15].mxu1  ;;  %v1080_v59 = vpop.eup %1079  ;;  %1097 = vrcp.f32 %v708_v50  ;;  %v709_v60 = vadd.f32 1.0, %v1078_v53  ;;  %v666_v0 = vmul.f32 1.442695, %v634_v55  ;;  %v694_v3 = vmul.f32 1.442695, %v648_v61 }
 0x11c   : > { %1099 = vrcp.f32 %v722_v54  ;;  %v723_v63 = vadd.f32 1.0, %v1080_v59  ;;  %v635_v1 = vsub.f32 0.0, %v553_v56  ;;  %v1082_v2 = vpop.eup %1081  ;;  %v649_v4 = vsub.f32 0.0, %v609_v62 }
 0x11d   : > { %1101 = vrcp.f32 %v709_v60  ;;  %v1084_v5 = vpop.eup %1083  ;;  %784 = vst [vmem:[%s1333_s20] sm:$0xff] %v1082_v2 }
 0x11e   : > { %1103 = vrcp.f32 %v723_v63  ;;  %v668_v6 = vmul.f32 1.442695, %v635_v1  ;;  %798 = vst [vmem:[%s1333_s20 + $0x70] sm:$0xff] %v1084_v5  ;;  %v696_v8 = vmul.f32 1.442695, %v649_v4  ;;  %v557_v9 = vpop.f32.mrb[16].mxu0 }
 0x11f   : > { %v1086_v7 = vpop.eup %1085  ;;  %1105 = vpow2.f32 %v666_v0  ;;  %v613_v10 = vpop.f32.mrb[16].mxu1  ;;  %v558_v12 = vadd.f32 %v1311_v36, %v557_v9 }
 0x120   : > { %v1088_v11 = vpop.eup %1087  ;;  %785 = vst [vmem:[%s1333_s20 + $0x8] sm:$0xff] %v1086_v7  ;;  %1107 = vpow2.f32 %v668_v6  ;;  %v559_v13 = vpop.f32.mrb[17].mxu0  ;;  %v614_v14 = vadd.f32 %v1311_v36, %v613_v10 }
 0x121   : > { %v615_v15 = vpop.f32.mrb[17].mxu1  ;;  %v1090_v16 = vpop.eup %1089  ;;  %799 = vst [vmem:[%s1333_s20 + $0x78] sm:$0xff] %v1088_v11  ;;  %1109 = vpow2.f32 %v694_v3  ;;  %v636_v21 = vsub.f32 0.0, %v558_v12 }
 0x122   : > { %v560_v17 = vpop.f32.mrb[18].mxu0  ;;  %v616_v18 = vpop.f32.mrb[18].mxu1  ;;  %v710_v20 = vadd.f32 1.0, %v1090_v16  ;;  %1111 = vpow2.f32 %v696_v8  ;;  %v650_v27 = vsub.f32 0.0, %v614_v14 }
 0x123   : > { %v1092_v19 = vpop.eup %1091  ;;  %v561_v22 = vadd.f32 %v1311_v36, %v560_v17  ;;  %v562_v23 = vpop.f32.mrb[19].mxu0  ;;  %v617_v28 = vadd.f32 %v1311_v36, %v616_v18  ;;  %v670_v31 = vmul.f32 1.442695, %v636_v21 }
 0x124   : > { %v618_v24 = vpop.f32.mrb[19].mxu1  ;;  %v1094_v25 = vpop.eup %1093  ;;  %v711_v26 = vadd.f32 1.0, %v1092_v19  ;;  %1113 = vrcp.f32 %v710_v20  ;;  %v698_v39 = vmul.f32 1.442695, %v650_v27 }
 0x125   : > { %v1096_v29 = vpop.eup %1095  ;;  %v724_v30 = vadd.f32 1.0, %v1094_v25  ;;  %v637_v32 = vsub.f32 0.0, %v561_v22  ;;  %v651_v35 = vsub.f32 0.0, %v617_v28 }
 0x126   : > { %v1098_v33 = vpop.eup %1097  ;;  %1115 = vrcp.f32 %v711_v26  ;;  %v725_v34 = vadd.f32 1.0, %v1096_v29  ;;  %v565_v42 = vpop.f32.mrb[20].mxu0 }
 0x127   : > { %v1100_v37 = vpop.eup %1099  ;;  %786 = vst [vmem:[%s1333_s20 + $0x10] sm:$0xff] %v1098_v33  ;;  %1117 = vrcp.f32 %v724_v30  ;;  %v672_v38 = vmul.f32 1.442695, %v637_v32  ;;  %v700_v41 = vmul.f32 1.442695, %v651_v35  ;;  %v621_v43 = vpop.f32.mrb[20].mxu1  ;;  %v566_v45 = vadd.f32 %v1311_v36, %v565_v42 }
 0x128   : > { %v1102_v40 = vpop.eup %1101  ;;  %800 = vst [vmem:[%s1333_s20 + $0x80] sm:$0xff] %v1100_v37  ;;  %1119 = vrcp.f32 %v725_v34  ;;  %v567_v46 = vpop.f32.mrb[21].mxu0  ;;  %v622_v47 = vadd.f32 %v1311_v36, %v621_v43 }
 0x129   : > { %v1104_v44 = vpop.eup %1103  ;;  %787 = vst [vmem:[%s1333_s20 + $0x18] sm:$0xff] %v1102_v40  ;;  %1121 = vpow2.f32 %v670_v31  ;;  %v623_v48 = vpop.f32.mrb[21].mxu1  ;;  %v638_v54 = vsub.f32 0.0, %v566_v45 }
 0x12a   : > { %v1106_v49 = vpop.eup %1105  ;;  %801 = vst [vmem:[%s1333_s20 + $0x88] sm:$0xff] %v1104_v44  ;;  %1123 = vpow2.f32 %v672_v38  ;;  %v568_v50 = vpop.f32.mrb[22].mxu0  ;;  %v652_v60 = vsub.f32 0.0, %v622_v47 }
 0x12b   : > { %v624_v51 = vpop.f32.mrb[22].mxu1  ;;  %v1108_v52 = vpop.eup %1107  ;;  %v712_v53 = vadd.f32 1.0, %v1106_v49  ;;  %1125 = vpow2.f32 %v698_v39  ;;  %v569_v55 = vadd.f32 %v1311_v36, %v568_v50  ;;  %v674_v0 = vmul.f32 1.442695, %v638_v54 }
 0x12c   : > { %v570_v56 = vpop.f32.mrb[23].mxu0  ;;  %v626_v57 = vpop.f32.mrb[23].mxu1  ;;  %v713_v59 = vadd.f32 1.0, %v1108_v52  ;;  %1127 = vpow2.f32 %v700_v41  ;;  %v625_v61 = vadd.f32 %v1311_v36, %v624_v51  ;;  %v702_v6 = vmul.f32 1.442695, %v652_v60 }
 0x12d   : > { %v1110_v58 = vpop.eup %1109  ;;  %1129 = vrcp.f32 %v712_v53  ;;  %v639_v1 = vsub.f32 0.0, %v569_v55 }
 0x12e   : > { %v1112_v62 = vpop.eup %1111  ;;  %v726_v63 = vadd.f32 1.0, %v1110_v58  ;;  %1131 = vrcp.f32 %v713_v59  ;;  %v653_v3 = vsub.f32 0.0, %v625_v61  ;;  %v573_v9 = vpop.f32.mrb[24].mxu0 }
 0x12f   : > { %v727_v2 = vadd.f32 1.0, %v1112_v62  ;;  %v1114_v4 = vpop.eup %1113  ;;  %v676_v5 = vmul.f32 1.442695, %v639_v1  ;;  %v574_v11 = vadd.f32 %v1311_v36, %v573_v9  ;;  %v575_v12 = vpop.f32.mrb[25].mxu0 }
 0x130   : > { %1133 = vrcp.f32 %v726_v63  ;;  %v1116_v7 = vpop.eup %1115  ;;  %788 = vst [vmem:[%s1333_s20 + $0x20] sm:$0xff] %v1114_v4  ;;  %v704_v8 = vmul.f32 1.442695, %v653_v3  ;;  %v576_v14 = vpop.f32.mrb[26].mxu0 }
 0x131   : > { %1135 = vrcp.f32 %v727_v2  ;;  %v1118_v10 = vpop.eup %1117  ;;  %789 = vst [vmem:[%s1333_s20 + $0x28] sm:$0xff] %v1116_v7  ;;  %v640_v16 = vsub.f32 0.0, %v574_v11  ;;  %v577_v17 = vadd.f32 %v1311_v36, %v576_v14  ;;  %v578_v18 = vpop.f32.mrb[27].mxu0 }
 0x132   : > { %1137 = vpow2.f32 %v674_v0  ;;  %v1120_v13 = vpop.eup %1119  ;;  %802 = vst [vmem:[%s1333_s20 + $0x90] sm:$0xff] %v1118_v10 }
 0x133   : > { %1139 = vpow2.f32 %v676_v5  ;;  %v1122_v15 = vpop.eup %1121  ;;  %803 = vst [vmem:[%s1333_s20 + $0x98] sm:$0xff] %v1120_v13  ;;  %v641_v23 = vsub.f32 0.0, %v577_v17  ;;  %v678_v26 = vmul.f32 1.442695, %v640_v16 }
 0x134   : > { %1141 = vpow2.f32 %v702_v6  ;;  %v1124_v19 = vpop.eup %1123  ;;  %v714_v20 = vadd.f32 1.0, %v1122_v15 }
 0x135   : > { %1143 = vpow2.f32 %v704_v8  ;;  %v1126_v21 = vpop.eup %1125  ;;  %v715_v22 = vadd.f32 1.0, %v1124_v19  ;;  %v680_v29 = vmul.f32 1.442695, %v641_v23 }
 0x136   : > { %v1128_v24 = vpop.eup %1127  ;;  %1145 = vrcp.f32 %v714_v20  ;;  %v728_v25 = vadd.f32 1.0, %v1126_v21 }
 0x137   : > { %v1130_v27 = vpop.eup %1129  ;;  %1147 = vrcp.f32 %v715_v22  ;;  %v729_v28 = vadd.f32 1.0, %v1128_v24 }
 0x138   : > { %v1132_v36 = vpop.eup %1131  ;;  %790 = vst [vmem:[%s1333_s20 + $0x30] sm:$0xff] %v1130_v27  ;;  %1149 = vrcp.f32 %v728_v25 }
 0x139   : > { %791 = vst [vmem:[%s1333_s20 + $0x38] sm:$0xff] %v1132_v36  ;;  %1151 = vrcp.f32 %v729_v28 }
 0x13a   : > { %v1134_v30 = vpop.eup %1133  ;;  %1153 = vpow2.f32 %v678_v26 }
 0x13b   : > { %v1136_v31 = vpop.eup %1135  ;;  %804 = vst [vmem:[%s1333_s20 + $0xa0] sm:$0xff] %v1134_v30  ;;  %1155 = vpow2.f32 %v680_v29 }
 0x13c   : > { %v1138_v32 = vpop.eup %1137  ;;  %805 = vst [vmem:[%s1333_s20 + $0xa8] sm:$0xff] %v1136_v31 }
 0x13d   : > { %v1140_v33 = vpop.eup %1139  ;;  %v716_v34 = vadd.f32 1.0, %v1138_v32 }
 0x13e   : > { %v1142_v35 = vpop.eup %1141  ;;  %v717_v37 = vadd.f32 1.0, %v1140_v33 }
 0x13f   : > { %v1144_v38 = vpop.eup %1143  ;;  %1157 = vrcp.f32 %v716_v34  ;;  %v730_v39 = vadd.f32 1.0, %v1142_v35 }
 0x140   : > { %1159 = vrcp.f32 %v717_v37  ;;  %v731_v40 = vadd.f32 1.0, %v1144_v38  ;;  %v1146_v41 = vpop.eup %1145 }
 0x141   : > { %1161 = vrcp.f32 %v730_v39  ;;  %v1148_v42 = vpop.eup %1147  ;;  %792 = vst [vmem:[%s1333_s20 + $0x40] sm:$0xff] %v1146_v41 }
 0x142   : > { %1163 = vrcp.f32 %v731_v40  ;;  %v1150_v43 = vpop.eup %1149  ;;  %793 = vst [vmem:[%s1333_s20 + $0x48] sm:$0xff] %v1148_v42 }
 0x143   : > { %v1152_v44 = vpop.eup %1151  ;;  %806 = vst [vmem:[%s1333_s20 + $0xb0] sm:$0xff] %v1150_v43 }
 0x144   : > { %v1154_v45 = vpop.eup %1153  ;;  %807 = vst [vmem:[%s1333_s20 + $0xb8] sm:$0xff] %v1152_v44 }
 0x145   : > { %v1156_v46 = vpop.eup %1155  ;;  %v718_v47 = vadd.f32 1.0, %v1154_v45 }
 0x146   : > { %v719_v48 = vadd.f32 1.0, %v1156_v46 }
 0x147   : > { %1165 = vrcp.f32 %v718_v47 }
 0x148   : > { %1167 = vrcp.f32 %v719_v48 }
 0x149   : > { %v1158_v49 = vpop.eup %1157 }
 0x14a   : > { %v1160_v50 = vpop.eup %1159  ;;  %794 = vst [vmem:[%s1333_s20 + $0x50] sm:$0xff] %v1158_v49 }
 0x14b   : > { %v1162_v51 = vpop.eup %1161  ;;  %795 = vst [vmem:[%s1333_s20 + $0x58] sm:$0xff] %v1160_v50 }
 0x14c   : > { %v1164_v52 = vpop.eup %1163  ;;  %808 = vst [vmem:[%s1333_s20 + $0xc0] sm:$0xff] %v1162_v51 }
 0x14d   : > { %809 = vst [vmem:[%s1333_s20 + $0xc8] sm:$0xff] %v1164_v52 }
 0x151   : > { %v1166_v53 = vpop.eup %1165 }
 0x152   : > { %v1168_v54 = vpop.eup %1167  ;;  %796 = vst [vmem:[%s1333_s20 + $0x60] sm:$0xff] %v1166_v53 }
 0x153   : > { %797 = vst [vmem:[%s1333_s20 + $0x68] sm:$0xff] %v1168_v54 }
 0x154 PF: > { %s13_s14 = sadd.s32 1, %s1191_s14   ;;  %s1385_s12 = smov %s1187_s13 }
 0x155   : > { %p10_p5 = scmp.ge.s32.totalorder %s13_s14, 4   ;;  %s1386_s13 = smov %s1388_s15 }
 0x157   :  { %12 = sbr.rel (!%p10_p5) target bundleno = 2 (0x2), region = 68 }

</bundles_post_ra>
